<compile_context>
chip_gen: v6e
topology: v6e:2x2x1
jax: 0.10.0
libtpu: 0.0.40
codegen_flags: <defaults>
</compile_context>

<pallas_src>
import math
from functools import partial

import numpy as np
import jax
import jax.numpy as jnp
from jax import lax
from jax.experimental import pallas as pl
from jax.experimental.pallas import tpu as pltpu

SQRT2 = math.sqrt(2.0)
INV_SQRT2 = 1.0 / SQRT2
NEG_SLOPE = 0.2

LANE = 128                     # channel dims padded to a multiple of this (lane dense)
TK = 128                       # input-channel (reduction) tile
TN = 128                       # output-channel tile
VMEM_LIMIT = 48 * 1024 * 1024  # safe on v5e/v6e/v7x


def _round_up(x, m):
    return (x + m - 1) // m * m


def _compiler_params(sem):
    return pltpu.CompilerParams(dimension_semantics=sem,
                                vmem_limit_bytes=VMEM_LIMIT)


def _lrelu_bias(acc, b):
    # FusedLeakyReLU: leaky_relu(acc + bias, 0.2) * sqrt(2)   (f32 in, f32 out)
    a = acc + b
    return jnp.where(a >= 0.0, a, a * NEG_SLOPE) * SQRT2


# ----------------------------- Pallas kernel bodies -----------------------------

def _conv3x3_s1_kernel(x_ref, w_ref, b_ref, o_ref, acc_ref, *, H, W):
    """3x3 stride-1 conv + FusedLeakyReLU as 9 shifted MXU matmuls.

    x_ref: (1, H+2, W+2, tk) bf16   w_ref: (9, tk, tn) bf16   b_ref: (1, tn) f32
    o_ref: (1, H*W, tn) bf16        acc_ref: (H*W, tn) f32 scratch
    grid = (N, Co_tiles, Ci_tiles); reduction (Ci) axis is last / "arbitrary".
    """
    k = pl.program_id(2)

    @pl.when(k == 0)
    def _init():
        acc_ref[...] = jnp.zeros_like(acc_ref)

    tk = x_ref.shape[-1]
    acc = acc_ref[...]
    for kh in range(3):
        for kw in range(3):
            win = x_ref[0, kh:kh + H, kw:kw + W, :].reshape(H * W, tk)
            acc = acc + jnp.dot(win, w_ref[kh * 3 + kw],
                                preferred_element_type=jnp.float32)
    acc_ref[...] = acc

    @pl.when(k == pl.num_programs(2) - 1)
    def _finalize():
        o_ref[0] = _lrelu_bias(acc, b_ref[...]).astype(o_ref.dtype)


def _conv3x3_s2_kernel(ye_lo, ye_hi, yo_lo, yo_hi, w_ref, b_ref, o_ref, acc_ref,
                       *, Ho, Wo):
    """3x3 stride-2 conv + FusedLeakyReLU on a row-split / column-folded blurred input.

    ye_*/yo_*: (1, Ho+1, Wo+1, tk) bf16 -- blurred tensor split by row parity (even/odd)
    and by column parity (lo/hi lane half of the folded array).  Stride-2 taps become
    unit-offset windows, so each tap is a full (Ho*Wo, tk)@(tk, tn) MXU matmul.
    """
    k = pl.program_id(2)

    @pl.when(k == 0)
    def _init():
        acc_ref[...] = jnp.zeros_like(acc_ref)

    tk = ye_lo.shape[-1]
    srcs = {(0, 0): ye_lo, (0, 1): ye_hi, (1, 0): yo_lo, (1, 1): yo_hi}
    acc = acc_ref[...]
    for kh in range(3):
        rpar, dr = kh & 1, kh >> 1          # row parity / extra row offset
        for kw in range(3):
            cpar, dc = kw & 1, kw >> 1      # col parity / extra folded-col offset
            src = srcs[(rpar, cpar)]
            win = src[0, dr:dr + Ho, dc:dc + Wo, :].reshape(Ho * Wo, tk)
            acc = acc + jnp.dot(win, w_ref[kh * 3 + kw],
                                preferred_element_type=jnp.float32)
    acc_ref[...] = acc

    @pl.when(k == pl.num_programs(2) - 1)
    def _finalize():
        o_ref[0] = _lrelu_bias(acc, b_ref[...]).astype(o_ref.dtype)


def _blur_rowsplit_kernel(y_ref, oe_ref, oo_ref, *, H, W, kv):
    """Separable [1,3,3,1] blur (pad=(2,2)), output split by row parity.

    y_ref: (1, H+5, W+5, tk) bf16 (pre-padded).  Outputs: (1, Ho+1, W+2, tk) bf16 each.
    Two 1-D passes (8 taps) instead of 16; all slices are unit-offset; the row-parity
    split is an outer-dim reshape (no data movement)."""
    x = y_ref[0].astype(jnp.float32)                       # (H+5, W+5, tk)
    h = kv[0] * x[:, 0:W + 2, :]                           # horizontal pass
    for b in range(1, 4):
        h = h + kv[b] * x[:, b:b + W + 2, :]
    v = kv[0] * h[0:H + 2]                                 # vertical pass
    for a in range(1, 4):
        v = v + kv[a] * h[a:a + H + 2]
    v = v.reshape((H + 2) // 2, 2, W + 2, v.shape[-1])     # split row parity (free)
    oe_ref[0] = v[:, 0].astype(oe_ref.dtype)
    oo_ref[0] = v[:, 1].astype(oo_ref.dtype)


def _blur_down2_kernel(xlo_ref, xhi_ref, o_ref, *, H, Wo, kv):
    """Separable [1,3,3,1] blur (pad=(1,1)) fused with the stride-2 decimation.

    xlo/xhi: (1, H+2, Wo+1, tk) bf16 -- even / odd input columns (lane halves of the
    column-folded input).  Only the needed quarter of blur outputs is computed."""
    Ho = H // 2
    lo = xlo_ref[0].astype(jnp.float32)
    hi = xhi_ref[0].astype(jnp.float32)
    # horizontal pass, already column-decimated
    hh = (kv[0] * lo[:, 0:Wo, :] + kv[1] * hi[:, 0:Wo, :]
          + kv[2] * lo[:, 1:Wo + 1, :] + kv[3] * hi[:, 1:Wo + 1, :])
    # split row parity (free outer-dim reshape) then decimated vertical pass
    hh = hh.reshape((H + 2) // 2, 2, Wo, hh.shape[-1])
    he, ho = hh[:, 0], hh[:, 1]
    vd = (kv[0] * he[0:Ho] + kv[1] * ho[0:Ho]
          + kv[2] * he[1:Ho + 1] + kv[3] * ho[1:Ho + 1])
    o_ref[0] = vd.astype(o_ref.dtype)


def _skip_residual_kernel(x_ref, w_ref, z_ref, o_ref, acc_ref):
    """skip 1x1 conv GEMM fused with the residual combine: (x@w + z) / sqrt(2)."""
    k = pl.program_id(2)

    @pl.when(k == 0)
    def _init():
        acc_ref[...] = jnp.zeros_like(acc_ref)

    acc_ref[...] += jnp.dot(x_ref[...], w_ref[...],
                            preferred_element_type=jnp.float32)

    @pl.when(k == pl.num_programs(2) - 1)
    def _finalize():
        o_ref[...] = ((acc_ref[...] + z_ref[...].astype(jnp.float32))
                      * INV_SQRT2).astype(o_ref.dtype)


# ----------------------------- pallas_call wrappers -----------------------------

def conv3x3_s1_lrelu(x_pad, w9, bias, H, W):
    N, _, _, Cp = x_pad.shape
    Cop = w9.shape[-1]
    tk, tn = min(TK, Cp), min(TN, Cop)
    n_k, n_j = Cp // tk, Cop // tn
    return pl.pallas_call(
        partial(_conv3x3_s1_kernel, H=H, W=W),
        grid=(N, n_j, n_k),
        in_specs=[
            pl.BlockSpec((1, H + 2, W + 2, tk), lambda n, j, k: (n, 0, 0, k)),
            pl.BlockSpec((9, tk, tn), lambda n, j, k: (0, k, j)),
            pl.BlockSpec((1, tn), lambda n, j, k: (0, j)),
        ],
        out_specs=pl.BlockSpec((1, H * W, tn), lambda n, j, k: (n, 0, j)),
        out_shape=jax.ShapeDtypeStruct((N, H * W, Cop), jnp.bfloat16),
        scratch_shapes=[pltpu.VMEM((H * W, tn), jnp.float32)],
        compiler_params=_compiler_params(("parallel", "parallel", "arbitrary")),
    )(x_pad, w9, bias)


def conv3x3_s2_lrelu(ye_f, yo_f, w9, bias, Ho, Wo, Cp):
    N = ye_f.shape[0]
    Cop = w9.shape[-1]
    tk, tn = min(TK, Cp), min(TN, Cop)
    n_k, n_j = Cp // tk, Cop // tn
    lo = pl.BlockSpec((1, Ho + 1, Wo + 1, tk), lambda n, j, k: (n, 0, 0, k))
    hi = pl.BlockSpec((1, Ho + 1, Wo + 1, tk),
                      lambda n, j, k, _o=n_k: (n, 0, 0, _o + k))
    return pl.pallas_call(
        partial(_conv3x3_s2_kernel, Ho=Ho, Wo=Wo),
        grid=(N, n_j, n_k),
        in_specs=[lo, hi, lo, hi,
                  pl.BlockSpec((9, tk, tn), lambda n, j, k: (0, k, j)),
                  pl.BlockSpec((1, tn), lambda n, j, k: (0, j))],
        out_specs=pl.BlockSpec((1, Ho * Wo, tn), lambda n, j, k: (n, 0, j)),
        out_shape=jax.ShapeDtypeStruct((N, Ho * Wo, Cop), jnp.bfloat16),
        scratch_shapes=[pltpu.VMEM((Ho * Wo, tn), jnp.float32)],
        compiler_params=_compiler_params(("parallel", "parallel", "arbitrary")),
    )(ye_f, ye_f, yo_f, yo_f, w9, bias)


def blur_rowsplit(y_pad, kv, H, W):
    N, _, _, Cp = y_pad.shape
    tk = min(TK, Cp)
    n_c = Cp // tk
    Hh = H // 2 + 1
    sd = jax.ShapeDtypeStruct((N, Hh, W + 2, Cp), jnp.bfloat16)
    return pl.pallas_call(
        partial(_blur_rowsplit_kernel, H=H, W=W, kv=kv),
        grid=(N, n_c),
        in_specs=[pl.BlockSpec((1, H + 5, W + 5, tk), lambda n, c: (n, 0, 0, c))],
        out_specs=(pl.BlockSpec((1, Hh, W + 2, tk), lambda n, c: (n, 0, 0, c)),
                   pl.BlockSpec((1, Hh, W + 2, tk), lambda n, c: (n, 0, 0, c))),
        out_shape=(sd, sd),
        compiler_params=_compiler_params(("parallel", "parallel")),
    )(y_pad)


def blur_down2(x_fold, kv, H, Wo, Cp):
    # x_fold: (N, H+2, Wo+1, 2*Cp); passed twice so each channel tile can read
    # both column-parity lane halves (no extra HBM copy).
    N = x_fold.shape[0]
    Ho = H // 2
    tk = min(TK, Cp)
    n_c = Cp // tk
    lo = pl.BlockSpec((1, H + 2, Wo + 1, tk), lambda n, c: (n, 0, 0, c))
    hi = pl.BlockSpec((1, H + 2, Wo + 1, tk),
                      lambda n, c, _o=n_c: (n, 0, 0, _o + c))
    return pl.pallas_call(
        partial(_blur_down2_kernel, H=H, Wo=Wo, kv=kv),
        grid=(N, n_c),
        in_specs=[lo, hi],
        out_specs=pl.BlockSpec((1, Ho, Wo, tk), lambda n, c: (n, 0, 0, c)),
        out_shape=jax.ShapeDtypeStruct((N, Ho, Wo, Cp), jnp.bfloat16),
        compiler_params=_compiler_params(("parallel", "parallel")),
    )(x_fold, x_fold)


def skip_residual_gemm(x2d, w, z2d):
    M, Cp = x2d.shape
    Cop = w.shape[-1]
    tm = 256 if (M % 256 == 0) else 128
    tk, tn = min(TK, Cp), min(TN, Cop)
    n_m, n_j, n_k = M // tm, Cop // tn, Cp // tk
    return pl.pallas_call(
        _skip_residual_kernel,
        grid=(n_m, n_j, n_k),
        in_specs=[pl.BlockSpec((tm, tk), lambda m, j, k: (m, k)),
                  pl.BlockSpec((tk, tn), lambda m, j, k: (k, j)),
                  pl.BlockSpec((tm, tn), lambda m, j, k: (m, j))],
        out_specs=pl.BlockSpec((tm, tn), lambda m, j, k: (m, j)),
        out_shape=jax.ShapeDtypeStruct((M, Cop), jnp.bfloat16),
        scratch_shapes=[pltpu.VMEM((tm, tn), jnp.float32)],
        input_output_aliases={2: 0},      # reuse the residual (z) buffer for the output
        compiler_params=_compiler_params(("parallel", "parallel", "arbitrary")),
    )(x2d, w, z2d)


# ----------------------------- weight packing (JAX glue) -----------------------------

def _pack_conv_weight(w_oihw, scale, Cp, Cop):
    # torch (Co, Ci, K, K) -> (K*K, Cp, Cop) bf16, tap-major, EqualConv scale folded in.
    Co, Ci, KH, KW = w_oihw.shape
    w = jnp.transpose(w_oihw, (2, 3, 1, 0)).reshape(KH * KW, Ci, Co) * scale
    w = jnp.pad(w, ((0, 0), (0, Cp - Ci), (0, Cop - Co)))
    return w.astype(jnp.bfloat16)


def _pack_bias(b, Cp):
    return jnp.pad(b, (0, Cp - b.shape[0])).reshape(1, Cp).astype(jnp.float32)


# ----------------------------- forward pass -----------------------------

def resblock_forward(x_nchw, params, blur_k_1d=(1, 3, 3, 1)):
    N, Ci, H, W = x_nchw.shape
    Co = params['w2'].shape[0]
    assert H % 2 == 0 and W % 2 == 0, "ResBlock downsamples by 2"
    Ho, Wo = H // 2, W // 2
    # TODO(synk): generalize the in-kernel spatial flatten to widths that are not
    # multiples of 8 (pad the compute width and slice).
    assert W % 8 == 0 and Wo % 8 == 0

    Cp = _round_up(Ci, LANE)
    Cop = _round_up(Co, LANE)

    # normalized separable 1-D blur taps (2-D kernel = outer product, sums to 1)
    k1 = np.asarray(blur_k_1d, np.float32)
    k1 = k1 / k1.sum()
    kv = tuple(float(v) for v in k1)

    scale_c = 1.0 / math.sqrt(Ci * 9)
    scale_s = 1.0 / math.sqrt(Ci)
    w1 = _pack_conv_weight(params['w1'], scale_c, Cp, Cp)
    b1 = _pack_bias(params['b1'], Cp)
    w2 = _pack_conv_weight(params['w2'], scale_c, Cp, Cop)
    b2 = _pack_bias(params['b2'], Cop)
    ws = _pack_conv_weight(params['ws'], scale_s, Cp, Cop)[0]          # (Cp, Cop)

    # NCHW -> NHWC (channels last = lane dim), zero-pad channels, cast bf16.
    x = jnp.transpose(x_nchw, (0, 2, 3, 1)).astype(jnp.float32)
    x = jnp.pad(x, ((0, 0), (0, 0), (0, 0), (0, Cp - Ci))).astype(jnp.bfloat16)

    # ---- conv1 : 3x3 / stride 1 / pad 1 + FusedLeakyReLU ------------------
    x1p = jnp.pad(x, ((0, 0), (1, 1), (1, 1), (0, 0)))
    y = conv3x3_s1_lrelu(x1p, w1, b1, H, W).reshape(N, H, W, Cp)

    # ---- conv2 : Blur(pad=(2,2)) -> 3x3 / stride 2 + FusedLeakyReLU -------
    yp = jnp.pad(y, ((0, 0), (2, 3), (2, 3), (0, 0)))          # extra zero row/col
    yb_even, yb_odd = blur_rowsplit(yp, kv, H, W)              # (N, Ho+1, W+2, Cp)
    ye_f = yb_even.reshape(N, Ho + 1, Wo + 1, 2 * Cp)          # free column-parity fold
    yo_f = yb_odd.reshape(N, Ho + 1, Wo + 1, 2 * Cp)
    z = conv3x3_s2_lrelu(ye_f, yo_f, w2, b2, Ho, Wo, Cp)       # (N, Ho*Wo, Cop)

    # ---- skip : Blur(pad=(1,1)) fused with stride-2 decimation, then 1x1 GEMM
    xpb = jnp.pad(x, ((0, 0), (1, 1), (1, 1), (0, 0)))
    xpf = xpb.reshape(N, H + 2, Wo + 1, 2 * Cp)                # free column-parity fold
    xs = blur_down2(xpf, kv, H, Wo, Cp)                        # (N, Ho, Wo, Cp)

    M = N * Ho * Wo
    Mp = _round_up(M, 128)
    xs2d = xs.reshape(M, Cp)
    z2d = z.reshape(M, Cop)
    if Mp != M:
        xs2d = jnp.pad(xs2d, ((0, Mp - M), (0, 0)))
        z2d = jnp.pad(z2d, ((0, Mp - M), (0, 0)))
    out2d = skip_residual_gemm(xs2d, ws, z2d)[:M]

    out = out2d.reshape(N, Ho, Wo, Cop)[..., :Co]
    return jnp.transpose(out, (0, 3, 1, 2)).astype(jnp.float32)


# ----------------------------- precision-matched plain-JAX reference -----------------------------

def resblock_reference(x_nchw, params, blur_k_1d=(1, 3, 3, 1)):
    Ci = x_nchw.shape[1]
    k1 = jnp.asarray(blur_k_1d, jnp.float32)
    k1 = k1 / k1.sum()
    k2d = k1[:, None] * k1[None, :]
    dn = ('NHWC', 'HWIO', 'NHWC')

    def conv(v, w_oihw, scale, stride, pad):
        w = (w_oihw * scale).astype(jnp.bfloat16)
        w = jnp.transpose(w, (2, 3, 1, 0))
        return lax.conv_general_dilated(
            v, w, (stride, stride), [(pad, pad), (pad, pad)],
            dimension_numbers=dn, preferred_element_type=jnp.float32)

    def blur(v, pad):
        C = v.shape[-1]
        kb = jnp.tile(k2d[:, :, None, None], (1, 1, 1, C))
        return lax.conv_general_dilated(
            v.astype(jnp.float32), kb, (1, 1), [(pad, pad), (pad, pad)],
            dimension_numbers=dn, feature_group_count=C,
            precision=lax.Precision.HIGHEST).astype(jnp.bfloat16)

    def fused_lrelu(v, b):
        v = v + b[None, None, None, :]
        return (jnp.where(v >= 0.0, v, v * NEG_SLOPE) * SQRT2).astype(jnp.bfloat16)

    s_c = 1.0 / math.sqrt(Ci * 9)
    s_s = 1.0 / math.sqrt(Ci)
    x = jnp.transpose(x_nchw, (0, 2, 3, 1)).astype(jnp.bfloat16)
    y = fused_lrelu(conv(x, params['w1'], s_c, 1, 1), params['b1'])
    z = fused_lrelu(conv(blur(y, 2), params['w2'], s_c, 2, 0), params['b2'])
    sk = conv(blur(x, 1), params['ws'], s_s, 2, 0)
    out = ((z.astype(jnp.float32) + sk) * INV_SQRT2).astype(jnp.bfloat16)
    return jnp.transpose(out, (0, 3, 1, 2)).astype(jnp.float32)


def init_params(key, in_channel, out_channel):
    k1, k2, k3, k4, k5 = jax.random.split(key, 5)
    return dict(
        w1=jax.random.normal(k1, (in_channel, in_channel, 3, 3), jnp.float32),
        b1=0.1 * jax.random.normal(k2, (in_channel,), jnp.float32),   # FusedLeakyReLU bias
        w2=jax.random.normal(k3, (out_channel, in_channel, 3, 3), jnp.float32),
        b2=0.1 * jax.random.normal(k4, (out_channel,), jnp.float32),  # FusedLeakyReLU bias
        ws=jax.random.normal(k5, (out_channel, in_channel, 1, 1), jnp.float32),
    )


if __name__ == "__main__":
    key = jax.random.PRNGKey(0)
    kx, kp = jax.random.split(key)
    in_channel, out_channel = 4, 8
    N, H, W = 2, 16, 16
    x = jax.random.normal(kx, (N, in_channel, H, W), jnp.float32)
    params = init_params(kp, in_channel, out_channel)

    fwd = jax.jit(resblock_forward)
    out = jax.block_until_ready(fwd(x, params))
    ref = jax.block_until_ready(resblock_reference(x, params))

    assert out.shape == (N, out_channel, H // 2, W // 2), out.shape
    np.testing.assert_allclose(np.asarray(out), np.asarray(ref), rtol=2e-2, atol=2e-2)
    print("KERNEL_OK")
</pallas_src>

<mosaic_0001>
module attributes {stable_mosaic.version = 11 : i64} {
  func.func @_blur_down2_kernel(%arg0: i32, %arg1: i32, %arg2: memref<1x18x9x128xbf16, #tpu.memory_space<vmem>>, %arg3: memref<1x18x9x128xbf16, #tpu.memory_space<vmem>>, %arg4: memref<1x8x8x128xbf16, #tpu.memory_space<vmem>>) attributes {dimension_semantics = [#tpu.dimension_semantics<parallel>, #tpu.dimension_semantics<parallel>], iteration_bounds = array<i64: 2, 1>, scalar_prefetch = 0 : i64, scratch_operands = 0 : i64, tpu.core_type = #tpu.core_type<tc>, window_params = [{transform_indices = @transform_0, window_bounds = array<i64: 1, 18, 9, 128>}, {transform_indices = @transform_1, window_bounds = array<i64: 1, 18, 9, 128>}, {transform_indices = @transform_2, window_bounds = array<i64: 1, 8, 8, 128>}]} {
    %c0 = arith.constant 0 : index
    %c0_0 = arith.constant 0 : index
    %c0_1 = arith.constant 0 : index
    %c0_2 = arith.constant 0 : index
    %0 = vector.load %arg2[%c0, %c0_0, %c0_1, %c0_2] : memref<1x18x9x128xbf16, #tpu.memory_space<vmem>>, vector<1x18x9x128xbf16>
    %1 = vector.shape_cast %0 : vector<1x18x9x128xbf16> to vector<18x9x128xbf16>
    %2 = arith.extf %1 : vector<18x9x128xbf16> to vector<18x9x128xf32>
    %c0_3 = arith.constant 0 : index
    %c0_4 = arith.constant 0 : index
    %c0_5 = arith.constant 0 : index
    %c0_6 = arith.constant 0 : index
    %3 = vector.load %arg3[%c0_3, %c0_4, %c0_5, %c0_6] : memref<1x18x9x128xbf16, #tpu.memory_space<vmem>>, vector<1x18x9x128xbf16>
    %4 = vector.shape_cast %3 : vector<1x18x9x128xbf16> to vector<18x9x128xbf16>
    %5 = arith.extf %4 : vector<18x9x128xbf16> to vector<18x9x128xf32>
    %6 = vector.extract_strided_slice %2 {offsets = [0, 0, 0], sizes = [18, 8, 128], strides = [1, 1, 1]} : vector<18x9x128xf32> to vector<18x8x128xf32>
    %cst = arith.constant 1.250000e-01 : f32
    %7 = vector.broadcast %cst : f32 to vector<18x8x128xf32>
    %8 = arith.mulf %7, %6 : vector<18x8x128xf32>
    %9 = vector.extract_strided_slice %5 {offsets = [0, 0, 0], sizes = [18, 8, 128], strides = [1, 1, 1]} : vector<18x9x128xf32> to vector<18x8x128xf32>
    %cst_7 = arith.constant 3.750000e-01 : f32
    %10 = vector.broadcast %cst_7 : f32 to vector<18x8x128xf32>
    %11 = arith.mulf %10, %9 : vector<18x8x128xf32>
    %12 = arith.addf %8, %11 : vector<18x8x128xf32>
    %13 = vector.extract_strided_slice %2 {offsets = [0, 1, 0], sizes = [18, 8, 128], strides = [1, 1, 1]} : vector<18x9x128xf32> to vector<18x8x128xf32>
    %cst_8 = arith.constant 3.750000e-01 : f32
    %14 = vector.broadcast %cst_8 : f32 to vector<18x8x128xf32>
    %15 = arith.mulf %14, %13 : vector<18x8x128xf32>
    %16 = arith.addf %12, %15 : vector<18x8x128xf32>
    %17 = vector.extract_strided_slice %5 {offsets = [0, 1, 0], sizes = [18, 8, 128], strides = [1, 1, 1]} : vector<18x9x128xf32> to vector<18x8x128xf32>
    %cst_9 = arith.constant 1.250000e-01 : f32
    %18 = vector.broadcast %cst_9 : f32 to vector<18x8x128xf32>
    %19 = arith.mulf %18, %17 : vector<18x8x128xf32>
    %20 = arith.addf %16, %19 : vector<18x8x128xf32>
    %21 = vector.shape_cast %20 : vector<18x8x128xf32> to vector<9x2x8x128xf32>
    %22 = vector.extract_strided_slice %21 {offsets = [0, 0, 0, 0], sizes = [9, 1, 8, 128], strides = [1, 1, 1, 1]} : vector<9x2x8x128xf32> to vector<9x1x8x128xf32>
    %23 = vector.shape_cast %22 : vector<9x1x8x128xf32> to vector<9x8x128xf32>
    %24 = vector.extract_strided_slice %21 {offsets = [0, 1, 0, 0], sizes = [9, 1, 8, 128], strides = [1, 1, 1, 1]} : vector<9x2x8x128xf32> to vector<9x1x8x128xf32>
    %25 = vector.shape_cast %24 : vector<9x1x8x128xf32> to vector<9x8x128xf32>
    %26 = vector.extract_strided_slice %23 {offsets = [0, 0, 0], sizes = [8, 8, 128], strides = [1, 1, 1]} : vector<9x8x128xf32> to vector<8x8x128xf32>
    %cst_10 = arith.constant 1.250000e-01 : f32
    %27 = vector.broadcast %cst_10 : f32 to vector<8x8x128xf32>
    %28 = arith.mulf %27, %26 : vector<8x8x128xf32>
    %29 = vector.extract_strided_slice %25 {offsets = [0, 0, 0], sizes = [8, 8, 128], strides = [1, 1, 1]} : vector<9x8x128xf32> to vector<8x8x128xf32>
    %cst_11 = arith.constant 3.750000e-01 : f32
    %30 = vector.broadcast %cst_11 : f32 to vector<8x8x128xf32>
    %31 = arith.mulf %30, %29 : vector<8x8x128xf32>
    %32 = arith.addf %28, %31 : vector<8x8x128xf32>
    %33 = vector.extract_strided_slice %23 {offsets = [1, 0, 0], sizes = [8, 8, 128], strides = [1, 1, 1]} : vector<9x8x128xf32> to vector<8x8x128xf32>
    %cst_12 = arith.constant 3.750000e-01 : f32
    %34 = vector.broadcast %cst_12 : f32 to vector<8x8x128xf32>
    %35 = arith.mulf %34, %33 : vector<8x8x128xf32>
    %36 = arith.addf %32, %35 : vector<8x8x128xf32>
    %37 = vector.extract_strided_slice %25 {offsets = [1, 0, 0], sizes = [8, 8, 128], strides = [1, 1, 1]} : vector<9x8x128xf32> to vector<8x8x128xf32>
    %cst_13 = arith.constant 1.250000e-01 : f32
    %38 = vector.broadcast %cst_13 : f32 to vector<8x8x128xf32>
    %39 = arith.mulf %38, %37 : vector<8x8x128xf32>
    %40 = arith.addf %36, %39 : vector<8x8x128xf32>
    %41 = arith.truncf %40 : vector<8x8x128xf32> to vector<8x8x128xbf16>
    %c0_14 = arith.constant 0 : index
    %c0_15 = arith.constant 0 : index
    %c0_16 = arith.constant 0 : index
    %c0_17 = arith.constant 0 : index
    %42 = vector.load %arg4[%c0_14, %c0_15, %c0_16, %c0_17] : memref<1x8x8x128xbf16, #tpu.memory_space<vmem>>, vector<1x8x8x128xbf16>
    %43 = vector.shape_cast %42 : vector<1x8x8x128xbf16> to vector<8x8x128xbf16>
    %44 = vector.shape_cast %41 : vector<8x8x128xbf16> to vector<1x8x8x128xbf16>
    tpu.vector_store %arg4[%c0_14, %c0_15, %c0_16, %c0_17], %44 {strides = array<i32>} : memref<1x8x8x128xbf16, #tpu.memory_space<vmem>>, vector<1x8x8x128xbf16>,
    return
  }
  func.func @transform_0(%arg0: i32, %arg1: i32) -> (i32, i32, i32, i32) {
    %c0_i32 = arith.constant 0 : i32
    %c0_i32_0 = arith.constant 0 : i32
    %c0_i32_1 = arith.constant 0 : i32
    return %arg0, %c0_i32, %c0_i32_0, %arg1 : i32, i32, i32, i32
  }
  func.func @transform_1(%arg0: i32, %arg1: i32) -> (i32, i32, i32, i32) {
    %c1_i32 = arith.constant 1 : i32
    %0 = arith.addi %c1_i32, %arg1 : i32
    %c0_i32 = arith.constant 0 : i32
    %c0_i32_0 = arith.constant 0 : i32
    %c0_i32_1 = arith.constant 0 : i32
    return %arg0, %c0_i32, %c0_i32_0, %0 : i32, i32, i32, i32
  }
  func.func @transform_2(%arg0: i32, %arg1: i32) -> (i32, i32, i32, i32) {
    %c0_i32 = arith.constant 0 : i32
    %c0_i32_0 = arith.constant 0 : i32
    %c0_i32_1 = arith.constant 0 : i32
    return %arg0, %c0_i32, %c0_i32_0, %arg1 : i32, i32, i32, i32
  }
}

module attributes {stable_mosaic.version = 11 : i64} {
  func.func @_conv3x3_s1_kernel(%arg0: i32, %arg1: i32, %arg2: i32, %arg3: memref<1x18x18x128xbf16, #tpu.memory_space<vmem>>, %arg4: memref<9x128x128xbf16, #tpu.memory_space<vmem>>, %arg5: memref<1x128xf32, #tpu.memory_space<vmem>>, %arg6: memref<1x256x128xbf16, #tpu.memory_space<vmem>>, %arg7: memref<256x128xf32, #tpu.memory_space<vmem>>) attributes {dimension_semantics = [#tpu.dimension_semantics<parallel>, #tpu.dimension_semantics<parallel>, #tpu.dimension_semantics<arbitrary>], iteration_bounds = array<i64: 2, 1, 1>, scalar_prefetch = 0 : i64, scratch_operands = 1 : i64, tpu.core_type = #tpu.core_type<tc>, window_params = [{transform_indices = @transform_0, window_bounds = array<i64: 1, 18, 18, 128>}, {transform_indices = @transform_1, window_bounds = array<i64: 9, 128, 128>}, {transform_indices = @transform_2, window_bounds = array<i64: 1, 128>}, {transform_indices = @transform_3, window_bounds = array<i64: 1, 256, 128>}]} {
    %c0_i32 = arith.constant 0 : i32
    %0 = arith.cmpi eq, %arg2, %c0_i32 : i32
    %1 = arith.extui %0 : i1 to i32
    %c0_i32_0 = arith.constant 0 : i32
    %2 = arith.cmpi ne, %1, %c0_i32_0 : i32
    scf.if %2 {
      %cst_69 = arith.constant 0.000000e+00 : f32
      %71 = vector.broadcast %cst_69 : f32 to vector<256x128xf32>
      %c0_70 = arith.constant 0 : index
      %c0_71 = arith.constant 0 : index
      %72 = vector.load %arg7[%c0_70, %c0_71] : memref<256x128xf32, #tpu.memory_space<vmem>>, vector<256x128xf32>
      tpu.vector_store %arg7[%c0_70, %c0_71], %71 {strides = array<i32>} : memref<256x128xf32, #tpu.memory_space<vmem>>, vector<256x128xf32>,
    } else {
    }
    %c0 = arith.constant 0 : index
    %c0_1 = arith.constant 0 : index
    %3 = vector.load %arg7[%c0, %c0_1] : memref<256x128xf32, #tpu.memory_space<vmem>>, vector<256x128xf32>
    %c0_2 = arith.constant 0 : index
    %c0_3 = arith.constant 0 : index
    %c0_4 = arith.constant 0 : index
    %c0_5 = arith.constant 0 : index
    %4 = vector.load %arg3[%c0_2, %c0_3, %c0_4, %c0_5] : memref<1x18x18x128xbf16, #tpu.memory_space<vmem>>, vector<1x16x16x128xbf16>
    %5 = vector.shape_cast %4 : vector<1x16x16x128xbf16> to vector<16x16x128xbf16>
    %6 = vector.shape_cast %5 : vector<16x16x128xbf16> to vector<256x128xbf16>
    %c0_6 = arith.constant 0 : index
    %c0_7 = arith.constant 0 : index
    %c0_8 = arith.constant 0 : index
    %7 = vector.load %arg4[%c0_6, %c0_7, %c0_8] : memref<9x128x128xbf16, #tpu.memory_space<vmem>>, vector<1x128x128xbf16>
    %8 = vector.shape_cast %7 : vector<1x128x128xbf16> to vector<128x128xbf16>
    %cst = arith.constant dense<0.000000e+00> : vector<256x128xf32>
    %9 = tpu.matmul %6, %8, %cst {dimension_numbers = #tpu.dot_dimension_numbers<[1], [0], [0], [1], [0, 0, 1, 1], [], []>} : vector<256x128xbf16>, vector<128x128xbf16>, vector<256x128xf32> -> vector<256x128xf32>
    %10 = arith.addf %3, %9 : vector<256x128xf32>
    %c0_9 = arith.constant 0 : index
    %c0_10 = arith.constant 0 : index
    %c1 = arith.constant 1 : index
    %c0_11 = arith.constant 0 : index
    %11 = vector.load %arg3[%c0_9, %c0_10, %c1, %c0_11] : memref<1x18x18x128xbf16, #tpu.memory_space<vmem>>, vector<1x16x16x128xbf16>
    %12 = vector.shape_cast %11 : vector<1x16x16x128xbf16> to vector<16x16x128xbf16>
    %13 = vector.shape_cast %12 : vector<16x16x128xbf16> to vector<256x128xbf16>
    %c1_12 = arith.constant 1 : index
    %c0_13 = arith.constant 0 : index
    %c0_14 = arith.constant 0 : index
    %14 = vector.load %arg4[%c1_12, %c0_13, %c0_14] : memref<9x128x128xbf16, #tpu.memory_space<vmem>>, vector<1x128x128xbf16>
    %15 = vector.shape_cast %14 : vector<1x128x128xbf16> to vector<128x128xbf16>
    %cst_15 = arith.constant dense<0.000000e+00> : vector<256x128xf32>
    %16 = tpu.matmul %13, %15, %cst_15 {dimension_numbers = #tpu.dot_dimension_numbers<[1], [0], [0], [1], [0, 0, 1, 1], [], []>} : vector<256x128xbf16>, vector<128x128xbf16>, vector<256x128xf32> -> vector<256x128xf32>
    %17 = arith.addf %10, %16 : vector<256x128xf32>
    %c0_16 = arith.constant 0 : index
    %c0_17 = arith.constant 0 : index
    %c2 = arith.constant 2 : index
    %c0_18 = arith.constant 0 : index
    %18 = vector.load %arg3[%c0_16, %c0_17, %c2, %c0_18] : memref<1x18x18x128xbf16, #tpu.memory_space<vmem>>, vector<1x16x16x128xbf16>
    %19 = vector.shape_cast %18 : vector<1x16x16x128xbf16> to vector<16x16x128xbf16>
    %20 = vector.shape_cast %19 : vector<16x16x128xbf16> to vector<256x128xbf16>
    %c2_19 = arith.constant 2 : index
    %c0_20 = arith.constant 0 : index
    %c0_21 = arith.constant 0 : index
    %21 = vector.load %arg4[%c2_19, %c0_20, %c0_21] : memref<9x128x128xbf16, #tpu.memory_space<vmem>>, vector<1x128x128xbf16>
    %22 = vector.shape_cast %21 : vector<1x128x128xbf16> to vector<128x128xbf16>
    %cst_22 = arith.constant dense<0.000000e+00> : vector<256x128xf32>
    %23 = tpu.matmul %20, %22, %cst_22 {dimension_numbers = #tpu.dot_dimension_numbers<[1], [0], [0], [1], [0, 0, 1, 1], [], []>} : vector<256x128xbf16>, vector<128x128xbf16>, vector<256x128xf32> -> vector<256x128xf32>
    %24 = arith.addf %17, %23 : vector<256x128xf32>
    %c0_23 = arith.constant 0 : index
    %c1_24 = arith.constant 1 : index
    %c0_25 = arith.constant 0 : index
    %c0_26 = arith.constant 0 : index
    %25 = vector.load %arg3[%c0_23, %c1_24, %c0_25, %c0_26] : memref<1x18x18x128xbf16, #tpu.memory_space<vmem>>, vector<1x16x16x128xbf16>
    %26 = vector.shape_cast %25 : vector<1x16x16x128xbf16> to vector<16x16x128xbf16>
    %27 = vector.shape_cast %26 : vector<16x16x128xbf16> to vector<256x128xbf16>
    %c3 = arith.constant 3 : index
    %c0_27 = arith.constant 0 : index
    %c0_28 = arith.constant 0 : index
    %28 = vector.load %arg4[%c3, %c0_27, %c0_28] : memref<9x128x128xbf16, #tpu.memory_space<vmem>>, vector<1x128x128xbf16>
    %29 = vector.shape_cast %28 : vector<1x128x128xbf16> to vector<128x128xbf16>
    %cst_29 = arith.constant dense<0.000000e+00> : vector<256x128xf32>
    %30 = tpu.matmul %27, %29, %cst_29 {dimension_numbers = #tpu.dot_dimension_numbers<[1], [0], [0], [1], [0, 0, 1, 1], [], []>} : vector<256x128xbf16>, vector<128x128xbf16>, vector<256x128xf32> -> vector<256x128xf32>
    %31 = arith.addf %24, %30 : vector<256x128xf32>
    %c0_30 = arith.constant 0 : index
    %c1_31 = arith.constant 1 : index
    %c1_32 = arith.constant 1 : index
    %c0_33 = arith.constant 0 : index
    %32 = vector.load %arg3[%c0_30, %c1_31, %c1_32, %c0_33] : memref<1x18x18x128xbf16, #tpu.memory_space<vmem>>, vector<1x16x16x128xbf16>
    %33 = vector.shape_cast %32 : vector<1x16x16x128xbf16> to vector<16x16x128xbf16>
    %34 = vector.shape_cast %33 : vector<16x16x128xbf16> to vector<256x128xbf16>
    %c4 = arith.constant 4 : index
    %c0_34 = arith.constant 0 : index
    %c0_35 = arith.constant 0 : index
    %35 = vector.load %arg4[%c4, %c0_34, %c0_35] : memref<9x128x128xbf16, #tpu.memory_space<vmem>>, vector<1x128x128xbf16>
    %36 = vector.shape_cast %35 : vector<1x128x128xbf16> to vector<128x128xbf16>
    %cst_36 = arith.constant dense<0.000000e+00> : vector<256x128xf32>
    %37 = tpu.matmul %34, %36, %cst_36 {dimension_numbers = #tpu.dot_dimension_numbers<[1], [0], [0], [1], [0, 0, 1, 1], [], []>} : vector<256x128xbf16>, vector<128x128xbf16>, vector<256x128xf32> -> vector<256x128xf32>
    %38 = arith.addf %31, %37 : vector<256x128xf32>
    %c0_37 = arith.constant 0 : index
    %c1_38 = arith.constant 1 : index
    %c2_39 = arith.constant 2 : index
    %c0_40 = arith.constant 0 : index
    %39 = vector.load %arg3[%c0_37, %c1_38, %c2_39, %c0_40] : memref<1x18x18x128xbf16, #tpu.memory_space<vmem>>, vector<1x16x16x128xbf16>
    %40 = vector.shape_cast %39 : vector<1x16x16x128xbf16> to vector<16x16x128xbf16>
    %41 = vector.shape_cast %40 : vector<16x16x128xbf16> to vector<256x128xbf16>
    %c5 = arith.constant 5 : index
    %c0_41 = arith.constant 0 : index
    %c0_42 = arith.constant 0 : index
    %42 = vector.load %arg4[%c5, %c0_41, %c0_42] : memref<9x128x128xbf16, #tpu.memory_space<vmem>>, vector<1x128x128xbf16>
    %43 = vector.shape_cast %42 : vector<1x128x128xbf16> to vector<128x128xbf16>
    %cst_43 = arith.constant dense<0.000000e+00> : vector<256x128xf32>
    %44 = tpu.matmul %41, %43, %cst_43 {dimension_numbers = #tpu.dot_dimension_numbers<[1], [0], [0], [1], [0, 0, 1, 1], [], []>} : vector<256x128xbf16>, vector<128x128xbf16>, vector<256x128xf32> -> vector<256x128xf32>
    %45 = arith.addf %38, %44 : vector<256x128xf32>
    %c0_44 = arith.constant 0 : index
    %c2_45 = arith.constant 2 : index
    %c0_46 = arith.constant 0 : index
    %c0_47 = arith.constant 0 : index
    %46 = vector.load %arg3[%c0_44, %c2_45, %c0_46, %c0_47] : memref<1x18x18x128xbf16, #tpu.memory_space<vmem>>, vector<1x16x16x128xbf16>
    %47 = vector.shape_cast %46 : vector<1x16x16x128xbf16> to vector<16x16x128xbf16>
    %48 = vector.shape_cast %47 : vector<16x16x128xbf16> to vector<256x128xbf16>
    %c6 = arith.constant 6 : index
    %c0_48 = arith.constant 0 : index
    %c0_49 = arith.constant 0 : index
    %49 = vector.load %arg4[%c6, %c0_48, %c0_49] : memref<9x128x128xbf16, #tpu.memory_space<vmem>>, vector<1x128x128xbf16>
    %50 = vector.shape_cast %49 : vector<1x128x128xbf16> to vector<128x128xbf16>
    %cst_50 = arith.constant dense<0.000000e+00> : vector<256x128xf32>
    %51 = tpu.matmul %48, %50, %cst_50 {dimension_numbers = #tpu.dot_dimension_numbers<[1], [0], [0], [1], [0, 0, 1, 1], [], []>} : vector<256x128xbf16>, vector<128x128xbf16>, vector<256x128xf32> -> vector<256x128xf32>
    %52 = arith.addf %45, %51 : vector<256x128xf32>
    %c0_51 = arith.constant 0 : index
    %c2_52 = arith.constant 2 : index
    %c1_53 = arith.constant 1 : index
    %c0_54 = arith.constant 0 : index
    %53 = vector.load %arg3[%c0_51, %c2_52, %c1_53, %c0_54] : memref<1x18x18x128xbf16, #tpu.memory_space<vmem>>, vector<1x16x16x128xbf16>
    %54 = vector.shape_cast %53 : vector<1x16x16x128xbf16> to vector<16x16x128xbf16>
    %55 = vector.shape_cast %54 : vector<16x16x128xbf16> to vector<256x128xbf16>
    %c7 = arith.constant 7 : index
    %c0_55 = arith.constant 0 : index
    %c0_56 = arith.constant 0 : index
    %56 = vector.load %arg4[%c7, %c0_55, %c0_56] : memref<9x128x128xbf16, #tpu.memory_space<vmem>>, vector<1x128x128xbf16>
    %57 = vector.shape_cast %56 : vector<1x128x128xbf16> to vector<128x128xbf16>
    %cst_57 = arith.constant dense<0.000000e+00> : vector<256x128xf32>
    %58 = tpu.matmul %55, %57, %cst_57 {dimension_numbers = #tpu.dot_dimension_numbers<[1], [0], [0], [1], [0, 0, 1, 1], [], []>} : vector<256x128xbf16>, vector<128x128xbf16>, vector<256x128xf32> -> vector<256x128xf32>
    %59 = arith.addf %52, %58 : vector<256x128xf32>
    %c0_58 = arith.constant 0 : index
    %c2_59 = arith.constant 2 : index
    %c2_60 = arith.constant 2 : index
    %c0_61 = arith.constant 0 : index
    %60 = vector.load %arg3[%c0_58, %c2_59, %c2_60, %c0_61] : memref<1x18x18x128xbf16, #tpu.memory_space<vmem>>, vector<1x16x16x128xbf16>
    %61 = vector.shape_cast %60 : vector<1x16x16x128xbf16> to vector<16x16x128xbf16>
    %62 = vector.shape_cast %61 : vector<16x16x128xbf16> to vector<256x128xbf16>
    %c8 = arith.constant 8 : index
    %c0_62 = arith.constant 0 : index
    %c0_63 = arith.constant 0 : index
    %63 = vector.load %arg4[%c8, %c0_62, %c0_63] : memref<9x128x128xbf16, #tpu.memory_space<vmem>>, vector<1x128x128xbf16>
    %64 = vector.shape_cast %63 : vector<1x128x128xbf16> to vector<128x128xbf16>
    %cst_64 = arith.constant dense<0.000000e+00> : vector<256x128xf32>
    %65 = tpu.matmul %62, %64, %cst_64 {dimension_numbers = #tpu.dot_dimension_numbers<[1], [0], [0], [1], [0, 0, 1, 1], [], []>} : vector<256x128xbf16>, vector<128x128xbf16>, vector<256x128xf32> -> vector<256x128xf32>
    %66 = arith.addf %59, %65 : vector<256x128xf32>
    %c0_65 = arith.constant 0 : index
    %c0_66 = arith.constant 0 : index
    %67 = vector.load %arg7[%c0_65, %c0_66] : memref<256x128xf32, #tpu.memory_space<vmem>>, vector<256x128xf32>
    tpu.vector_store %arg7[%c0_65, %c0_66], %66 {strides = array<i32>} : memref<256x128xf32, #tpu.memory_space<vmem>>, vector<256x128xf32>,
    %c0_i32_67 = arith.constant 0 : i32
    %68 = arith.cmpi eq, %arg2, %c0_i32_67 : i32
    %69 = arith.extui %68 : i1 to i32
    %c0_i32_68 = arith.constant 0 : i32
    %70 = arith.cmpi ne, %69, %c0_i32_68 : i32
    scf.if %70 {
      %c0_69 = arith.constant 0 : index
      %c0_70 = arith.constant 0 : index
      %71 = vector.load %arg5[%c0_69, %c0_70] : memref<1x128xf32, #tpu.memory_space<vmem>>, vector<1x128xf32>
      %72 = vector.broadcast %71 : vector<1x128xf32> to vector<256x128xf32>
      %73 = arith.addf %66, %72 : vector<256x128xf32>
      %cst_71 = arith.constant 0.000000e+00 : f32
      %74 = vector.broadcast %cst_71 : f32 to vector<256x128xf32>
      %75 = arith.cmpf oge, %73, %74 : vector<256x128xf32>
      %cst_72 = arith.constant 2.000000e-01 : f32
      %76 = vector.broadcast %cst_72 : f32 to vector<256x128xf32>
      %77 = arith.mulf %73, %76 : vector<256x128xf32>
      %78 = arith.select %75, %73, %77 : vector<256x128xi1>, vector<256x128xf32>
      %cst_73 = arith.constant 1.41421354 : f32
      %79 = vector.broadcast %cst_73 : f32 to vector<256x128xf32>
      %80 = arith.mulf %78, %79 : vector<256x128xf32>
      %81 = arith.truncf %80 : vector<256x128xf32> to vector<256x128xbf16>
      %c0_74 = arith.constant 0 : index
      %c0_75 = arith.constant 0 : index
      %c0_76 = arith.constant 0 : index
      %82 = vector.load %arg6[%c0_74, %c0_75, %c0_76] : memref<1x256x128xbf16, #tpu.memory_space<vmem>>, vector<1x256x128xbf16>
      %83 = vector.shape_cast %82 : vector<1x256x128xbf16> to vector<256x128xbf16>
      %84 = vector.shape_cast %81 : vector<256x128xbf16> to vector<1x256x128xbf16>
      tpu.vector_store %arg6[%c0_74, %c0_75, %c0_76], %84 {strides = array<i32>} : memref<1x256x128xbf16, #tpu.memory_space<vmem>>, vector<1x256x128xbf16>,
    } else {
    }
    return
  }
  func.func @transform_0(%arg0: i32, %arg1: i32, %arg2: i32) -> (i32, i32, i32, i32) {
    %c0_i32 = arith.constant 0 : i32
    %c0_i32_0 = arith.constant 0 : i32
    %c0_i32_1 = arith.constant 0 : i32
    return %arg0, %c0_i32, %c0_i32_0, %arg2 : i32, i32, i32, i32
  }
  func.func @transform_1(%arg0: i32, %arg1: i32, %arg2: i32) -> (i32, i32, i32) {
    %c0_i32 = arith.constant 0 : i32
    %c0_i32_0 = arith.constant 0 : i32
    return %c0_i32, %arg2, %arg1 : i32, i32, i32
  }
  func.func @transform_2(%arg0: i32, %arg1: i32, %arg2: i32) -> (i32, i32) {
    %c0_i32 = arith.constant 0 : i32
    %c0_i32_0 = arith.constant 0 : i32
    return %c0_i32, %arg1 : i32, i32
  }
  func.func @transform_3(%arg0: i32, %arg1: i32, %arg2: i32) -> (i32, i32, i32) {
    %c0_i32 = arith.constant 0 : i32
    %c0_i32_0 = arith.constant 0 : i32
    return %arg0, %c0_i32, %arg1 : i32, i32, i32
  }
}

module attributes {stable_mosaic.version = 11 : i64} {
  func.func @_blur_rowsplit_kernel(%arg0: i32, %arg1: i32, %arg2: memref<1x21x21x128xbf16, #tpu.memory_space<vmem>>, %arg3: memref<1x9x18x128xbf16, #tpu.memory_space<vmem>>, %arg4: memref<1x9x18x128xbf16, #tpu.memory_space<vmem>>) attributes {dimension_semantics = [#tpu.dimension_semantics<parallel>, #tpu.dimension_semantics<parallel>], iteration_bounds = array<i64: 2, 1>, scalar_prefetch = 0 : i64, scratch_operands = 0 : i64, tpu.core_type = #tpu.core_type<tc>, window_params = [{transform_indices = @transform_0, window_bounds = array<i64: 1, 21, 21, 128>}, {transform_indices = @transform_1, window_bounds = array<i64: 1, 9, 18, 128>}, {transform_indices = @transform_2, window_bounds = array<i64: 1, 9, 18, 128>}]} {
    %c0 = arith.constant 0 : index
    %c0_0 = arith.constant 0 : index
    %c0_1 = arith.constant 0 : index
    %c0_2 = arith.constant 0 : index
    %0 = vector.load %arg2[%c0, %c0_0, %c0_1, %c0_2] : memref<1x21x21x128xbf16, #tpu.memory_space<vmem>>, vector<1x21x21x128xbf16>
    %1 = vector.shape_cast %0 : vector<1x21x21x128xbf16> to vector<21x21x128xbf16>
    %2 = arith.extf %1 : vector<21x21x128xbf16> to vector<21x21x128xf32>
    %3 = vector.extract_strided_slice %2 {offsets = [0, 0, 0], sizes = [21, 18, 128], strides = [1, 1, 1]} : vector<21x21x128xf32> to vector<21x18x128xf32>
    %cst = arith.constant 1.250000e-01 : f32
    %4 = vector.broadcast %cst : f32 to vector<21x18x128xf32>
    %5 = arith.mulf %4, %3 : vector<21x18x128xf32>
    %6 = vector.extract_strided_slice %2 {offsets = [0, 1, 0], sizes = [21, 18, 128], strides = [1, 1, 1]} : vector<21x21x128xf32> to vector<21x18x128xf32>
    %cst_3 = arith.constant 3.750000e-01 : f32
    %7 = vector.broadcast %cst_3 : f32 to vector<21x18x128xf32>
    %8 = arith.mulf %7, %6 : vector<21x18x128xf32>
    %9 = arith.addf %5, %8 : vector<21x18x128xf32>
    %10 = vector.extract_strided_slice %2 {offsets = [0, 2, 0], sizes = [21, 18, 128], strides = [1, 1, 1]} : vector<21x21x128xf32> to vector<21x18x128xf32>
    %cst_4 = arith.constant 3.750000e-01 : f32
    %11 = vector.broadcast %cst_4 : f32 to vector<21x18x128xf32>
    %12 = arith.mulf %11, %10 : vector<21x18x128xf32>
    %13 = arith.addf %9, %12 : vector<21x18x128xf32>
    %14 = vector.extract_strided_slice %2 {offsets = [0, 3, 0], sizes = [21, 18, 128], strides = [1, 1, 1]} : vector<21x21x128xf32> to vector<21x18x128xf32>
    %cst_5 = arith.constant 1.250000e-01 : f32
    %15 = vector.broadcast %cst_5 : f32 to vector<21x18x128xf32>
    %16 = arith.mulf %15, %14 : vector<21x18x128xf32>
    %17 = arith.addf %13, %16 : vector<21x18x128xf32>
    %18 = vector.extract_strided_slice %17 {offsets = [0, 0, 0], sizes = [18, 18, 128], strides = [1, 1, 1]} : vector<21x18x128xf32> to vector<18x18x128xf32>
    %cst_6 = arith.constant 1.250000e-01 : f32
    %19 = vector.broadcast %cst_6 : f32 to vector<18x18x128xf32>
    %20 = arith.mulf %19, %18 : vector<18x18x128xf32>
    %21 = vector.extract_strided_slice %17 {offsets = [1, 0, 0], sizes = [18, 18, 128], strides = [1, 1, 1]} : vector<21x18x128xf32> to vector<18x18x128xf32>
    %cst_7 = arith.constant 3.750000e-01 : f32
    %22 = vector.broadcast %cst_7 : f32 to vector<18x18x128xf32>
    %23 = arith.mulf %22, %21 : vector<18x18x128xf32>
    %24 = arith.addf %20, %23 : vector<18x18x128xf32>
    %25 = vector.extract_strided_slice %17 {offsets = [2, 0, 0], sizes = [18, 18, 128], strides = [1, 1, 1]} : vector<21x18x128xf32> to vector<18x18x128xf32>
    %cst_8 = arith.constant 3.750000e-01 : f32
    %26 = vector.broadcast %cst_8 : f32 to vector<18x18x128xf32>
    %27 = arith.mulf %26, %25 : vector<18x18x128xf32>
    %28 = arith.addf %24, %27 : vector<18x18x128xf32>
    %29 = vector.extract_strided_slice %17 {offsets = [3, 0, 0], sizes = [18, 18, 128], strides = [1, 1, 1]} : vector<21x18x128xf32> to vector<18x18x128xf32>
    %cst_9 = arith.constant 1.250000e-01 : f32
    %30 = vector.broadcast %cst_9 : f32 to vector<18x18x128xf32>
    %31 = arith.mulf %30, %29 : vector<18x18x128xf32>
    %32 = arith.addf %28, %31 : vector<18x18x128xf32>
    %33 = vector.shape_cast %32 : vector<18x18x128xf32> to vector<9x2x18x128xf32>
    %34 = vector.extract_strided_slice %33 {offsets = [0, 0, 0, 0], sizes = [9, 1, 18, 128], strides = [1, 1, 1, 1]} : vector<9x2x18x128xf32> to vector<9x1x18x128xf32>
    %35 = vector.shape_cast %34 : vector<9x1x18x128xf32> to vector<9x18x128xf32>
    %36 = arith.truncf %35 : vector<9x18x128xf32> to vector<9x18x128xbf16>
    %c0_10 = arith.constant 0 : index
    %c0_11 = arith.constant 0 : index
    %c0_12 = arith.constant 0 : index
    %c0_13 = arith.constant 0 : index
    %37 = vector.load %arg3[%c0_10, %c0_11, %c0_12, %c0_13] : memref<1x9x18x128xbf16, #tpu.memory_space<vmem>>, vector<1x9x18x128xbf16>
    %38 = vector.shape_cast %37 : vector<1x9x18x128xbf16> to vector<9x18x128xbf16>
    %39 = vector.shape_cast %36 : vector<9x18x128xbf16> to vector<1x9x18x128xbf16>
    tpu.vector_store %arg3[%c0_10, %c0_11, %c0_12, %c0_13], %39 {strides = array<i32>} : memref<1x9x18x128xbf16, #tpu.memory_space<vmem>>, vector<1x9x18x128xbf16>,
    %40 = vector.extract_strided_slice %33 {offsets = [0, 1, 0, 0], sizes = [9, 1, 18, 128], strides = [1, 1, 1, 1]} : vector<9x2x18x128xf32> to vector<9x1x18x128xf32>
    %41 = vector.shape_cast %40 : vector<9x1x18x128xf32> to vector<9x18x128xf32>
    %42 = arith.truncf %41 : vector<9x18x128xf32> to vector<9x18x128xbf16>
    %c0_14 = arith.constant 0 : index
    %c0_15 = arith.constant 0 : index
    %c0_16 = arith.constant 0 : index
    %c0_17 = arith.constant 0 : index
    %43 = vector.load %arg4[%c0_14, %c0_15, %c0_16, %c0_17] : memref<1x9x18x128xbf16, #tpu.memory_space<vmem>>, vector<1x9x18x128xbf16>
    %44 = vector.shape_cast %43 : vector<1x9x18x128xbf16> to vector<9x18x128xbf16>
    %45 = vector.shape_cast %42 : vector<9x18x128xbf16> to vector<1x9x18x128xbf16>
    tpu.vector_store %arg4[%c0_14, %c0_15, %c0_16, %c0_17], %45 {strides = array<i32>} : memref<1x9x18x128xbf16, #tpu.memory_space<vmem>>, vector<1x9x18x128xbf16>,
    return
  }
  func.func @transform_0(%arg0: i32, %arg1: i32) -> (i32, i32, i32, i32) {
    %c0_i32 = arith.constant 0 : i32
    %c0_i32_0 = arith.constant 0 : i32
    %c0_i32_1 = arith.constant 0 : i32
    return %arg0, %c0_i32, %c0_i32_0, %arg1 : i32, i32, i32, i32
  }
  func.func @transform_1(%arg0: i32, %arg1: i32) -> (i32, i32, i32, i32) {
    %c0_i32 = arith.constant 0 : i32
    %c0_i32_0 = arith.constant 0 : i32
    %c0_i32_1 = arith.constant 0 : i32
    return %arg0, %c0_i32, %c0_i32_0, %arg1 : i32, i32, i32, i32
  }
  func.func @transform_2(%arg0: i32, %arg1: i32) -> (i32, i32, i32, i32) {
    %c0_i32 = arith.constant 0 : i32
    %c0_i32_0 = arith.constant 0 : i32
    %c0_i32_1 = arith.constant 0 : i32
    return %arg0, %c0_i32, %c0_i32_0, %arg1 : i32, i32, i32, i32
  }
}

module attributes {stable_mosaic.version = 11 : i64} {
  func.func @_conv3x3_s2_kernel(%arg0: i32, %arg1: i32, %arg2: i32, %arg3: memref<1x9x9x128xbf16, #tpu.memory_space<vmem>>, %arg4: memref<1x9x9x128xbf16, #tpu.memory_space<vmem>>, %arg5: memref<1x9x9x128xbf16, #tpu.memory_space<vmem>>, %arg6: memref<1x9x9x128xbf16, #tpu.memory_space<vmem>>, %arg7: memref<9x128x128xbf16, #tpu.memory_space<vmem>>, %arg8: memref<1x128xf32, #tpu.memory_space<vmem>>, %arg9: memref<1x64x128xbf16, #tpu.memory_space<vmem>>, %arg10: memref<64x128xf32, #tpu.memory_space<vmem>>) attributes {dimension_semantics = [#tpu.dimension_semantics<parallel>, #tpu.dimension_semantics<parallel>, #tpu.dimension_semantics<arbitrary>], iteration_bounds = array<i64: 2, 1, 1>, scalar_prefetch = 0 : i64, scratch_operands = 1 : i64, tpu.core_type = #tpu.core_type<tc>, window_params = [{transform_indices = @transform_0, window_bounds = array<i64: 1, 9, 9, 128>}, {transform_indices = @transform_1, window_bounds = array<i64: 1, 9, 9, 128>}, {transform_indices = @transform_2, window_bounds = array<i64: 1, 9, 9, 128>}, {transform_indices = @transform_3, window_bounds = array<i64: 1, 9, 9, 128>}, {transform_indices = @transform_4, window_bounds = array<i64: 9, 128, 128>}, {transform_indices = @transform_5, window_bounds = array<i64: 1, 128>}, {transform_indices = @transform_6, window_bounds = array<i64: 1, 64, 128>}]} {
    %c0_i32 = arith.constant 0 : i32
    %0 = arith.cmpi eq, %arg2, %c0_i32 : i32
    %1 = arith.extui %0 : i1 to i32
    %c0_i32_0 = arith.constant 0 : i32
    %2 = arith.cmpi ne, %1, %c0_i32_0 : i32
    scf.if %2 {
      %cst_69 = arith.constant 0.000000e+00 : f32
      %71 = vector.broadcast %cst_69 : f32 to vector<64x128xf32>
      %c0_70 = arith.constant 0 : index
      %c0_71 = arith.constant 0 : index
      %72 = vector.load %arg10[%c0_70, %c0_71] : memref<64x128xf32, #tpu.memory_space<vmem>>, vector<64x128xf32>
      tpu.vector_store %arg10[%c0_70, %c0_71], %71 {strides = array<i32>} : memref<64x128xf32, #tpu.memory_space<vmem>>, vector<64x128xf32>,
    } else {
    }
    %c0 = arith.constant 0 : index
    %c0_1 = arith.constant 0 : index
    %3 = vector.load %arg10[%c0, %c0_1] : memref<64x128xf32, #tpu.memory_space<vmem>>, vector<64x128xf32>
    %c0_2 = arith.constant 0 : index
    %c0_3 = arith.constant 0 : index
    %c0_4 = arith.constant 0 : index
    %c0_5 = arith.constant 0 : index
    %4 = vector.load %arg3[%c0_2, %c0_3, %c0_4, %c0_5] : memref<1x9x9x128xbf16, #tpu.memory_space<vmem>>, vector<1x8x8x128xbf16>
    %5 = vector.shape_cast %4 : vector<1x8x8x128xbf16> to vector<8x8x128xbf16>
    %6 = vector.shape_cast %5 : vector<8x8x128xbf16> to vector<64x128xbf16>
    %c0_6 = arith.constant 0 : index
    %c0_7 = arith.constant 0 : index
    %c0_8 = arith.constant 0 : index
    %7 = vector.load %arg7[%c0_6, %c0_7, %c0_8] : memref<9x128x128xbf16, #tpu.memory_space<vmem>>, vector<1x128x128xbf16>
    %8 = vector.shape_cast %7 : vector<1x128x128xbf16> to vector<128x128xbf16>
    %cst = arith.constant dense<0.000000e+00> : vector<64x128xf32>
    %9 = tpu.matmul %6, %8, %cst {dimension_numbers = #tpu.dot_dimension_numbers<[1], [0], [0], [1], [0, 0, 1, 1], [], []>} : vector<64x128xbf16>, vector<128x128xbf16>, vector<64x128xf32> -> vector<64x128xf32>
    %10 = arith.addf %3, %9 : vector<64x128xf32>
    %c0_9 = arith.constant 0 : index
    %c0_10 = arith.constant 0 : index
    %c0_11 = arith.constant 0 : index
    %c0_12 = arith.constant 0 : index
    %11 = vector.load %arg4[%c0_9, %c0_10, %c0_11, %c0_12] : memref<1x9x9x128xbf16, #tpu.memory_space<vmem>>, vector<1x8x8x128xbf16>
    %12 = vector.shape_cast %11 : vector<1x8x8x128xbf16> to vector<8x8x128xbf16>
    %13 = vector.shape_cast %12 : vector<8x8x128xbf16> to vector<64x128xbf16>
    %c1 = arith.constant 1 : index
    %c0_13 = arith.constant 0 : index
    %c0_14 = arith.constant 0 : index
    %14 = vector.load %arg7[%c1, %c0_13, %c0_14] : memref<9x128x128xbf16, #tpu.memory_space<vmem>>, vector<1x128x128xbf16>
    %15 = vector.shape_cast %14 : vector<1x128x128xbf16> to vector<128x128xbf16>
    %cst_15 = arith.constant dense<0.000000e+00> : vector<64x128xf32>
    %16 = tpu.matmul %13, %15, %cst_15 {dimension_numbers = #tpu.dot_dimension_numbers<[1], [0], [0], [1], [0, 0, 1, 1], [], []>} : vector<64x128xbf16>, vector<128x128xbf16>, vector<64x128xf32> -> vector<64x128xf32>
    %17 = arith.addf %10, %16 : vector<64x128xf32>
    %c0_16 = arith.constant 0 : index
    %c0_17 = arith.constant 0 : index
    %c1_18 = arith.constant 1 : index
    %c0_19 = arith.constant 0 : index
    %18 = vector.load %arg3[%c0_16, %c0_17, %c1_18, %c0_19] : memref<1x9x9x128xbf16, #tpu.memory_space<vmem>>, vector<1x8x8x128xbf16>
    %19 = vector.shape_cast %18 : vector<1x8x8x128xbf16> to vector<8x8x128xbf16>
    %20 = vector.shape_cast %19 : vector<8x8x128xbf16> to vector<64x128xbf16>
    %c2 = arith.constant 2 : index
    %c0_20 = arith.constant 0 : index
    %c0_21 = arith.constant 0 : index
    %21 = vector.load %arg7[%c2, %c0_20, %c0_21] : memref<9x128x128xbf16, #tpu.memory_space<vmem>>, vector<1x128x128xbf16>
    %22 = vector.shape_cast %21 : vector<1x128x128xbf16> to vector<128x128xbf16>
    %cst_22 = arith.constant dense<0.000000e+00> : vector<64x128xf32>
    %23 = tpu.matmul %20, %22, %cst_22 {dimension_numbers = #tpu.dot_dimension_numbers<[1], [0], [0], [1], [0, 0, 1, 1], [], []>} : vector<64x128xbf16>, vector<128x128xbf16>, vector<64x128xf32> -> vector<64x128xf32>
    %24 = arith.addf %17, %23 : vector<64x128xf32>
    %c0_23 = arith.constant 0 : index
    %c0_24 = arith.constant 0 : index
    %c0_25 = arith.constant 0 : index
    %c0_26 = arith.constant 0 : index
    %25 = vector.load %arg5[%c0_23, %c0_24, %c0_25, %c0_26] : memref<1x9x9x128xbf16, #tpu.memory_space<vmem>>, vector<1x8x8x128xbf16>
    %26 = vector.shape_cast %25 : vector<1x8x8x128xbf16> to vector<8x8x128xbf16>
    %27 = vector.shape_cast %26 : vector<8x8x128xbf16> to vector<64x128xbf16>
    %c3 = arith.constant 3 : index
    %c0_27 = arith.constant 0 : index
    %c0_28 = arith.constant 0 : index
    %28 = vector.load %arg7[%c3, %c0_27, %c0_28] : memref<9x128x128xbf16, #tpu.memory_space<vmem>>, vector<1x128x128xbf16>
    %29 = vector.shape_cast %28 : vector<1x128x128xbf16> to vector<128x128xbf16>
    %cst_29 = arith.constant dense<0.000000e+00> : vector<64x128xf32>
    %30 = tpu.matmul %27, %29, %cst_29 {dimension_numbers = #tpu.dot_dimension_numbers<[1], [0], [0], [1], [0, 0, 1, 1], [], []>} : vector<64x128xbf16>, vector<128x128xbf16>, vector<64x128xf32> -> vector<64x128xf32>
    %31 = arith.addf %24, %30 : vector<64x128xf32>
    %c0_30 = arith.constant 0 : index
    %c0_31 = arith.constant 0 : index
    %c0_32 = arith.constant 0 : index
    %c0_33 = arith.constant 0 : index
    %32 = vector.load %arg6[%c0_30, %c0_31, %c0_32, %c0_33] : memref<1x9x9x128xbf16, #tpu.memory_space<vmem>>, vector<1x8x8x128xbf16>
    %33 = vector.shape_cast %32 : vector<1x8x8x128xbf16> to vector<8x8x128xbf16>
    %34 = vector.shape_cast %33 : vector<8x8x128xbf16> to vector<64x128xbf16>
    %c4 = arith.constant 4 : index
    %c0_34 = arith.constant 0 : index
    %c0_35 = arith.constant 0 : index
    %35 = vector.load %arg7[%c4, %c0_34, %c0_35] : memref<9x128x128xbf16, #tpu.memory_space<vmem>>, vector<1x128x128xbf16>
    %36 = vector.shape_cast %35 : vector<1x128x128xbf16> to vector<128x128xbf16>
    %cst_36 = arith.constant dense<0.000000e+00> : vector<64x128xf32>
    %37 = tpu.matmul %34, %36, %cst_36 {dimension_numbers = #tpu.dot_dimension_numbers<[1], [0], [0], [1], [0, 0, 1, 1], [], []>} : vector<64x128xbf16>, vector<128x128xbf16>, vector<64x128xf32> -> vector<64x128xf32>
    %38 = arith.addf %31, %37 : vector<64x128xf32>
    %c0_37 = arith.constant 0 : index
    %c0_38 = arith.constant 0 : index
    %c1_39 = arith.constant 1 : index
    %c0_40 = arith.constant 0 : index
    %39 = vector.load %arg5[%c0_37, %c0_38, %c1_39, %c0_40] : memref<1x9x9x128xbf16, #tpu.memory_space<vmem>>, vector<1x8x8x128xbf16>
    %40 = vector.shape_cast %39 : vector<1x8x8x128xbf16> to vector<8x8x128xbf16>
    %41 = vector.shape_cast %40 : vector<8x8x128xbf16> to vector<64x128xbf16>
    %c5 = arith.constant 5 : index
    %c0_41 = arith.constant 0 : index
    %c0_42 = arith.constant 0 : index
    %42 = vector.load %arg7[%c5, %c0_41, %c0_42] : memref<9x128x128xbf16, #tpu.memory_space<vmem>>, vector<1x128x128xbf16>
    %43 = vector.shape_cast %42 : vector<1x128x128xbf16> to vector<128x128xbf16>
    %cst_43 = arith.constant dense<0.000000e+00> : vector<64x128xf32>
    %44 = tpu.matmul %41, %43, %cst_43 {dimension_numbers = #tpu.dot_dimension_numbers<[1], [0], [0], [1], [0, 0, 1, 1], [], []>} : vector<64x128xbf16>, vector<128x128xbf16>, vector<64x128xf32> -> vector<64x128xf32>
    %45 = arith.addf %38, %44 : vector<64x128xf32>
    %c0_44 = arith.constant 0 : index
    %c1_45 = arith.constant 1 : index
    %c0_46 = arith.constant 0 : index
    %c0_47 = arith.constant 0 : index
    %46 = vector.load %arg3[%c0_44, %c1_45, %c0_46, %c0_47] : memref<1x9x9x128xbf16, #tpu.memory_space<vmem>>, vector<1x8x8x128xbf16>
    %47 = vector.shape_cast %46 : vector<1x8x8x128xbf16> to vector<8x8x128xbf16>
    %48 = vector.shape_cast %47 : vector<8x8x128xbf16> to vector<64x128xbf16>
    %c6 = arith.constant 6 : index
    %c0_48 = arith.constant 0 : index
    %c0_49 = arith.constant 0 : index
    %49 = vector.load %arg7[%c6, %c0_48, %c0_49] : memref<9x128x128xbf16, #tpu.memory_space<vmem>>, vector<1x128x128xbf16>
    %50 = vector.shape_cast %49 : vector<1x128x128xbf16> to vector<128x128xbf16>
    %cst_50 = arith.constant dense<0.000000e+00> : vector<64x128xf32>
    %51 = tpu.matmul %48, %50, %cst_50 {dimension_numbers = #tpu.dot_dimension_numbers<[1], [0], [0], [1], [0, 0, 1, 1], [], []>} : vector<64x128xbf16>, vector<128x128xbf16>, vector<64x128xf32> -> vector<64x128xf32>
    %52 = arith.addf %45, %51 : vector<64x128xf32>
    %c0_51 = arith.constant 0 : index
    %c1_52 = arith.constant 1 : index
    %c0_53 = arith.constant 0 : index
    %c0_54 = arith.constant 0 : index
    %53 = vector.load %arg4[%c0_51, %c1_52, %c0_53, %c0_54] : memref<1x9x9x128xbf16, #tpu.memory_space<vmem>>, vector<1x8x8x128xbf16>
    %54 = vector.shape_cast %53 : vector<1x8x8x128xbf16> to vector<8x8x128xbf16>
    %55 = vector.shape_cast %54 : vector<8x8x128xbf16> to vector<64x128xbf16>
    %c7 = arith.constant 7 : index
    %c0_55 = arith.constant 0 : index
    %c0_56 = arith.constant 0 : index
    %56 = vector.load %arg7[%c7, %c0_55, %c0_56] : memref<9x128x128xbf16, #tpu.memory_space<vmem>>, vector<1x128x128xbf16>
    %57 = vector.shape_cast %56 : vector<1x128x128xbf16> to vector<128x128xbf16>
    %cst_57 = arith.constant dense<0.000000e+00> : vector<64x128xf32>
    %58 = tpu.matmul %55, %57, %cst_57 {dimension_numbers = #tpu.dot_dimension_numbers<[1], [0], [0], [1], [0, 0, 1, 1], [], []>} : vector<64x128xbf16>, vector<128x128xbf16>, vector<64x128xf32> -> vector<64x128xf32>
    %59 = arith.addf %52, %58 : vector<64x128xf32>
    %c0_58 = arith.constant 0 : index
    %c1_59 = arith.constant 1 : index
    %c1_60 = arith.constant 1 : index
    %c0_61 = arith.constant 0 : index
    %60 = vector.load %arg3[%c0_58, %c1_59, %c1_60, %c0_61] : memref<1x9x9x128xbf16, #tpu.memory_space<vmem>>, vector<1x8x8x128xbf16>
    %61 = vector.shape_cast %60 : vector<1x8x8x128xbf16> to vector<8x8x128xbf16>
    %62 = vector.shape_cast %61 : vector<8x8x128xbf16> to vector<64x128xbf16>
    %c8 = arith.constant 8 : index
    %c0_62 = arith.constant 0 : index
    %c0_63 = arith.constant 0 : index
    %63 = vector.load %arg7[%c8, %c0_62, %c0_63] : memref<9x128x128xbf16, #tpu.memory_space<vmem>>, vector<1x128x128xbf16>
    %64 = vector.shape_cast %63 : vector<1x128x128xbf16> to vector<128x128xbf16>
    %cst_64 = arith.constant dense<0.000000e+00> : vector<64x128xf32>
    %65 = tpu.matmul %62, %64, %cst_64 {dimension_numbers = #tpu.dot_dimension_numbers<[1], [0], [0], [1], [0, 0, 1, 1], [], []>} : vector<64x128xbf16>, vector<128x128xbf16>, vector<64x128xf32> -> vector<64x128xf32>
    %66 = arith.addf %59, %65 : vector<64x128xf32>
    %c0_65 = arith.constant 0 : index
    %c0_66 = arith.constant 0 : index
    %67 = vector.load %arg10[%c0_65, %c0_66] : memref<64x128xf32, #tpu.memory_space<vmem>>, vector<64x128xf32>
    tpu.vector_store %arg10[%c0_65, %c0_66], %66 {strides = array<i32>} : memref<64x128xf32, #tpu.memory_space<vmem>>, vector<64x128xf32>,
    %c0_i32_67 = arith.constant 0 : i32
    %68 = arith.cmpi eq, %arg2, %c0_i32_67 : i32
    %69 = arith.extui %68 : i1 to i32
    %c0_i32_68 = arith.constant 0 : i32
    %70 = arith.cmpi ne, %69, %c0_i32_68 : i32
    scf.if %70 {
      %c0_69 = arith.constant 0 : index
      %c0_70 = arith.constant 0 : index
      %71 = vector.load %arg8[%c0_69, %c0_70] : memref<1x128xf32, #tpu.memory_space<vmem>>, vector<1x128xf32>
      %72 = vector.broadcast %71 : vector<1x128xf32> to vector<64x128xf32>
      %73 = arith.addf %66, %72 : vector<64x128xf32>
      %cst_71 = arith.constant 0.000000e+00 : f32
      %74 = vector.broadcast %cst_71 : f32 to vector<64x128xf32>
      %75 = arith.cmpf oge, %73, %74 : vector<64x128xf32>
      %cst_72 = arith.constant 2.000000e-01 : f32
      %76 = vector.broadcast %cst_72 : f32 to vector<64x128xf32>
      %77 = arith.mulf %73, %76 : vector<64x128xf32>
      %78 = arith.select %75, %73, %77 : vector<64x128xi1>, vector<64x128xf32>
      %cst_73 = arith.constant 1.41421354 : f32
      %79 = vector.broadcast %cst_73 : f32 to vector<64x128xf32>
      %80 = arith.mulf %78, %79 : vector<64x128xf32>
      %81 = arith.truncf %80 : vector<64x128xf32> to vector<64x128xbf16>
      %c0_74 = arith.constant 0 : index
      %c0_75 = arith.constant 0 : index
      %c0_76 = arith.constant 0 : index
      %82 = vector.load %arg9[%c0_74, %c0_75, %c0_76] : memref<1x64x128xbf16, #tpu.memory_space<vmem>>, vector<1x64x128xbf16>
      %83 = vector.shape_cast %82 : vector<1x64x128xbf16> to vector<64x128xbf16>
      %84 = vector.shape_cast %81 : vector<64x128xbf16> to vector<1x64x128xbf16>
      tpu.vector_store %arg9[%c0_74, %c0_75, %c0_76], %84 {strides = array<i32>} : memref<1x64x128xbf16, #tpu.memory_space<vmem>>, vector<1x64x128xbf16>,
    } else {
    }
    return
  }
  func.func @transform_0(%arg0: i32, %arg1: i32, %arg2: i32) -> (i32, i32, i32, i32) {
    %c0_i32 = arith.constant 0 : i32
    %c0_i32_0 = arith.constant 0 : i32
    %c0_i32_1 = arith.constant 0 : i32
    return %arg0, %c0_i32, %c0_i32_0, %arg2 : i32, i32, i32, i32
  }
  func.func @transform_1(%arg0: i32, %arg1: i32, %arg2: i32) -> (i32, i32, i32, i32) {
    %c1_i32 = arith.constant 1 : i32
    %0 = arith.addi %c1_i32, %arg2 : i32
    %c0_i32 = arith.constant 0 : i32
    %c0_i32_0 = arith.constant 0 : i32
    %c0_i32_1 = arith.constant 0 : i32
    return %arg0, %c0_i32, %c0_i32_0, %0 : i32, i32, i32, i32
  }
  func.func @transform_2(%arg0: i32, %arg1: i32, %arg2: i32) -> (i32, i32, i32, i32) {
    %c0_i32 = arith.constant 0 : i32
    %c0_i32_0 = arith.constant 0 : i32
    %c0_i32_1 = arith.constant 0 : i32
    return %arg0, %c0_i32, %c0_i32_0, %arg2 : i32, i32, i32, i32
  }
  func.func @transform_3(%arg0: i32, %arg1: i32, %arg2: i32) -> (i32, i32, i32, i32) {
    %c1_i32 = arith.constant 1 : i32
    %0 = arith.addi %c1_i32, %arg2 : i32
    %c0_i32 = arith.constant 0 : i32
    %c0_i32_0 = arith.constant 0 : i32
    %c0_i32_1 = arith.constant 0 : i32
    return %arg0, %c0_i32, %c0_i32_0, %0 : i32, i32, i32, i32
  }
  func.func @transform_4(%arg0: i32, %arg1: i32, %arg2: i32) -> (i32, i32, i32) {
    %c0_i32 = arith.constant 0 : i32
    %c0_i32_0 = arith.constant 0 : i32
    return %c0_i32, %arg2, %arg1 : i32, i32, i32
  }
  func.func @transform_5(%arg0: i32, %arg1: i32, %arg2: i32) -> (i32, i32) {
    %c0_i32 = arith.constant 0 : i32
    %c0_i32_0 = arith.constant 0 : i32
    return %c0_i32, %arg1 : i32, i32
  }
  func.func @transform_6(%arg0: i32, %arg1: i32, %arg2: i32) -> (i32, i32, i32) {
    %c0_i32 = arith.constant 0 : i32
    %c0_i32_0 = arith.constant 0 : i32
    return %arg0, %c0_i32, %arg1 : i32, i32, i32
  }
}

module attributes {stable_mosaic.version = 11 : i64} {
  func.func @_skip_residual_kernel(%arg0: i32, %arg1: i32, %arg2: i32, %arg3: memref<128x128xbf16, #tpu.memory_space<vmem>>, %arg4: memref<128x128xbf16, #tpu.memory_space<vmem>>, %arg5: memref<128x128xbf16, #tpu.memory_space<vmem>>, %arg6: memref<128x128xbf16, #tpu.memory_space<vmem>>, %arg7: memref<128x128xf32, #tpu.memory_space<vmem>>) attributes {dimension_semantics = [#tpu.dimension_semantics<parallel>, #tpu.dimension_semantics<parallel>, #tpu.dimension_semantics<arbitrary>], iteration_bounds = array<i64: 1, 1, 1>, scalar_prefetch = 0 : i64, scratch_operands = 1 : i64, tpu.core_type = #tpu.core_type<tc>, window_params = [{transform_indices = @transform_0, window_bounds = array<i64: 128, 128>}, {transform_indices = @transform_1, window_bounds = array<i64: 128, 128>}, {transform_indices = @transform_2, window_bounds = array<i64: 128, 128>}, {transform_indices = @transform_3, window_bounds = array<i64: 128, 128>}]} {
    %c0_i32 = arith.constant 0 : i32
    %0 = arith.cmpi eq, %arg2, %c0_i32 : i32
    %1 = arith.extui %0 : i1 to i32
    %c0_i32_0 = arith.constant 0 : i32
    %2 = arith.cmpi ne, %1, %c0_i32_0 : i32
    scf.if %2 {
      %cst_10 = arith.constant 0.000000e+00 : f32
      %12 = vector.broadcast %cst_10 : f32 to vector<128x128xf32>
      %c0_11 = arith.constant 0 : index
      %c0_12 = arith.constant 0 : index
      %13 = vector.load %arg7[%c0_11, %c0_12] : memref<128x128xf32, #tpu.memory_space<vmem>>, vector<128x128xf32>
      tpu.vector_store %arg7[%c0_11, %c0_12], %12 {strides = array<i32>} : memref<128x128xf32, #tpu.memory_space<vmem>>, vector<128x128xf32>,
    } else {
    }
    %c0 = arith.constant 0 : index
    %c0_1 = arith.constant 0 : index
    %3 = vector.load %arg7[%c0, %c0_1] : memref<128x128xf32, #tpu.memory_space<vmem>>, vector<128x128xf32>
    %c0_2 = arith.constant 0 : index
    %c0_3 = arith.constant 0 : index
    %4 = vector.load %arg3[%c0_2, %c0_3] : memref<128x128xbf16, #tpu.memory_space<vmem>>, vector<128x128xbf16>
    %c0_4 = arith.constant 0 : index
    %c0_5 = arith.constant 0 : index
    %5 = vector.load %arg4[%c0_4, %c0_5] : memref<128x128xbf16, #tpu.memory_space<vmem>>, vector<128x128xbf16>
    %cst = arith.constant dense<0.000000e+00> : vector<128x128xf32>
    %6 = tpu.matmul %4, %5, %cst {dimension_numbers = #tpu.dot_dimension_numbers<[1], [0], [0], [1], [0, 0, 1, 1], [], []>} : vector<128x128xbf16>, vector<128x128xbf16>, vector<128x128xf32> -> vector<128x128xf32>
    %7 = arith.addf %3, %6 : vector<128x128xf32>
    %c0_6 = arith.constant 0 : index
    %c0_7 = arith.constant 0 : index
    %8 = vector.load %arg7[%c0_6, %c0_7] : memref<128x128xf32, #tpu.memory_space<vmem>>, vector<128x128xf32>
    tpu.vector_store %arg7[%c0_6, %c0_7], %7 {strides = array<i32>} : memref<128x128xf32, #tpu.memory_space<vmem>>, vector<128x128xf32>,
    %c0_i32_8 = arith.constant 0 : i32
    %9 = arith.cmpi eq, %arg2, %c0_i32_8 : i32
    %10 = arith.extui %9 : i1 to i32
    %c0_i32_9 = arith.constant 0 : i32
    %11 = arith.cmpi ne, %10, %c0_i32_9 : i32
    scf.if %11 {
      %c0_10 = arith.constant 0 : index
      %c0_11 = arith.constant 0 : index
      %12 = vector.load %arg7[%c0_10, %c0_11] : memref<128x128xf32, #tpu.memory_space<vmem>>, vector<128x128xf32>
      %c0_12 = arith.constant 0 : index
      %c0_13 = arith.constant 0 : index
      %13 = vector.load %arg5[%c0_12, %c0_13] : memref<128x128xbf16, #tpu.memory_space<vmem>>, vector<128x128xbf16>
      %14 = arith.extf %13 : vector<128x128xbf16> to vector<128x128xf32>
      %15 = arith.addf %12, %14 : vector<128x128xf32>
      %cst_14 = arith.constant 0.707106769 : f32
      %16 = vector.broadcast %cst_14 : f32 to vector<128x128xf32>
      %17 = arith.mulf %15, %16 : vector<128x128xf32>
      %18 = arith.truncf %17 : vector<128x128xf32> to vector<128x128xbf16>
      %c0_15 = arith.constant 0 : index
      %c0_16 = arith.constant 0 : index
      %19 = vector.load %arg6[%c0_15, %c0_16] : memref<128x128xbf16, #tpu.memory_space<vmem>>, vector<128x128xbf16>
      tpu.vector_store %arg6[%c0_15, %c0_16], %18 {strides = array<i32>} : memref<128x128xbf16, #tpu.memory_space<vmem>>, vector<128x128xbf16>,
    } else {
    }
    return
  }
  func.func @transform_0(%arg0: i32, %arg1: i32, %arg2: i32) -> (i32, i32) {
    %c0_i32 = arith.constant 0 : i32
    return %arg0, %arg2 : i32, i32
  }
  func.func @transform_1(%arg0: i32, %arg1: i32, %arg2: i32) -> (i32, i32) {
    %c0_i32 = arith.constant 0 : i32
    return %arg2, %arg1 : i32, i32
  }
  func.func @transform_2(%arg0: i32, %arg1: i32, %arg2: i32) -> (i32, i32) {
    %c0_i32 = arith.constant 0 : i32
    return %arg0, %arg1 : i32, i32
  }
  func.func @transform_3(%arg0: i32, %arg1: i32, %arg2: i32) -> (i32, i32) {
    %c0_i32 = arith.constant 0 : i32
    return %arg0, %arg1 : i32, i32
  }
}

</mosaic_0001>

<bundles_post_ra>
// kernel: resblock_forward.8
= control target key start
LH: loop header
LB: loop body
LE: loop exit
PB: predicated region body
PF: predicated region fallthrough
CT: control target
= control target key end

     0   :  { %s1433_s9 = smov 0   ;;  %s1435_s10 = smov 0   ;;  %s2271_s0 = inlined_call_operand.vmem [shape: bf16[2,18,9,256], index: 0, kind: input, shape index: {}, may-alias: {0,1}]   ;;  %s2272_s1 = inlined_call_operand.vmem [shape: bf16[2,18,9,256], index: 1, kind: input, shape index: {}, may-alias: {0,1}]   ;;  %s2273_s2 = inlined_call_operand.vmem [shape: bf16[2,8,8,128], index: 2, kind: output, shape index: {}]  }
   0x1   :  { %s1437_s11 = smov 0   ;;  %s1439_s12 = smov 0  }
   0x2   :  { %s1441_s13 = smov 0  }
   0x3 LB: > { %s24_s14 = sadd.s32 1, %s1412_s12  ;;  %p40_p1 = scmp.ne.s32.totalorder %s1404_s10, %s1400_s9  ;;  %s1416_s13 = sphi %s1441_s13, %s12_s13   ;;  %s1412_s12 = sphi %s1439_s12, %s2537_s12   ;;  %s1408_s11 = sphi %s1437_s11, %s2536_s11   ;;  %s1404_s10 = sphi %s1435_s10, %s2535_s10   ;;  %s1400_s9 = sphi %s1433_s9, %s2534_s9  }
   0x4   : > { %p26_p0 = scmp.ge.s32.totalorder %s24_s14, 2  ;;  %p41_p2 = scmp.eq.s32.totalorder %s1416_s13, 0 }
   0x5   : > { %s33_s17 = sadd.s32 1, %s1404_s10  ;;  %p1266_p5 = scmp.ge.s32.totalorder %s1416_s13, 2 }
   0x6   : > { %s2539_s14 = smov (%p26_p0, %s24_s14), 0  ;;  %p1464_p3 = por %p41_p2, %p40_p1 }
   0x7   : > { %s28_s16 = ssub.s32 %s1412_s12, %s2539_s14  ;;  %124 = sbr.rel (%p1266_p5) target bundleno = 70 (0x46), region = 16 }
   0x8   : > { %p31_p4 = scmp.eq.s32.totalorder %s28_s16, 0 }
   0xa   : > { %s1472_s18 = scalar_select %p31_p4, %s1404_s10, %s33_s17  }
   0xc   : > { %127 = sbr.rel (!%p1464_p3) target bundleno = 41 (0x29), region = 20  ;;  %s129_s19 = sand.u32 (%p1464_p3), 1, %s1404_s10  }
   0xd   : > { %s1335_s20 = smul.u32 (%p1464_p3), 288, %s1412_s12 }
   0xe   : > { %s1334_s21 = smul.u32 (%p1464_p3), 144, %s129_s19 }
   0xf   : > { %s1482_s24 = scalar_lea.vmem (%p1464_p3), %s2271_s0, %s1335_s20 }
  0x10   : > { %v152_v0 = vld [vmem:[%s1482_s24] sm:$0xf] (%p1464_p3)  ;;  %v154_v1 = vld [vmem:[%s1482_s24 + $0x8] sm:$0xf] (%p1464_p3)  ;;  %s1486_s25 = scalar_lea.vmem (%p1464_p3), [#allocation2], %s1334_s21 }
  0x11   : > { %153 = vst [vmem:[%s1486_s25] sm:$0xf] %v152_v0  ;;  %155 = vst [vmem:[%s1486_s25 + $0x4] sm:$0xf] %v154_v1  ;;  %v156_v2 = vld [vmem:[%s1482_s24 + $0x10] sm:$0xf] }
  0x12   : > { %v158_v3 = vld [vmem:[%s1482_s24 + $0x18] sm:$0xf]  ;;  %v160_v4 = vld [vmem:[%s1482_s24 + $0x20] sm:$0xf]  ;;  %157 = vst [vmem:[%s1486_s25 + $0x8] sm:$0xf] %v156_v2 }
  0x13   : > { %159 = vst [vmem:[%s1486_s25 + $0xc] sm:$0xf] %v158_v3  ;;  %161 = vst [vmem:[%s1486_s25 + $0x10] sm:$0xf] %v160_v4  ;;  %v162_v5 = vld [vmem:[%s1482_s24 + $0x28] sm:$0xf] }
  0x14   : > { %v164_v6 = vld [vmem:[%s1482_s24 + $0x30] sm:$0xf]  ;;  %v166_v7 = vld [vmem:[%s1482_s24 + $0x38] sm:$0xf]  ;;  %163 = vst [vmem:[%s1486_s25 + $0x14] sm:$0xf] %v162_v5 }
  0x15   : > { %165 = vst [vmem:[%s1486_s25 + $0x18] sm:$0xf] %v164_v6  ;;  %167 = vst [vmem:[%s1486_s25 + $0x1c] sm:$0xf] %v166_v7  ;;  %v168_v8 = vld [vmem:[%s1482_s24 + $0x40] sm:$0xf] }
  0x16   : > { %v170_v9 = vld [vmem:[%s1482_s24 + $0x48] sm:$0xf]  ;;  %v172_v10 = vld [vmem:[%s1482_s24 + $0x50] sm:$0xf]  ;;  %169 = vst [vmem:[%s1486_s25 + $0x20] sm:$0xf] %v168_v8 }
  0x17   : > { %171 = vst [vmem:[%s1486_s25 + $0x24] sm:$0xf] %v170_v9  ;;  %173 = vst [vmem:[%s1486_s25 + $0x28] sm:$0xf] %v172_v10  ;;  %v174_v11 = vld [vmem:[%s1482_s24 + $0x58] sm:$0xf] }
  0x18   : > { %v176_v12 = vld [vmem:[%s1482_s24 + $0x60] sm:$0xf]  ;;  %v178_v13 = vld [vmem:[%s1482_s24 + $0x68] sm:$0xf]  ;;  %175 = vst [vmem:[%s1486_s25 + $0x2c] sm:$0xf] %v174_v11 }
  0x19   : > { %177 = vst [vmem:[%s1486_s25 + $0x30] sm:$0xf] %v176_v12  ;;  %179 = vst [vmem:[%s1486_s25 + $0x34] sm:$0xf] %v178_v13  ;;  %v180_v14 = vld [vmem:[%s1482_s24 + $0x70] sm:$0xf] }
  0x1a   : > { %v182_v15 = vld [vmem:[%s1482_s24 + $0x78] sm:$0xf]  ;;  %v184_v16 = vld [vmem:[%s1482_s24 + $0x80] sm:$0xf]  ;;  %181 = vst [vmem:[%s1486_s25 + $0x38] sm:$0xf] %v180_v14 }
  0x1b   : > { %183 = vst [vmem:[%s1486_s25 + $0x3c] sm:$0xf] %v182_v15  ;;  %185 = vst [vmem:[%s1486_s25 + $0x40] sm:$0xf] %v184_v16  ;;  %v186_v17 = vld [vmem:[%s1482_s24 + $0x88] sm:$0xf] }
  0x1c   : > { %v188_v18 = vld [vmem:[%s1482_s24 + $0x90] sm:$0xf]  ;;  %v190_v19 = vld [vmem:[%s1482_s24 + $0x98] sm:$0xf]  ;;  %187 = vst [vmem:[%s1486_s25 + $0x44] sm:$0xf] %v186_v17 }
  0x1d   : > { %189 = vst [vmem:[%s1486_s25 + $0x48] sm:$0xf] %v188_v18  ;;  %191 = vst [vmem:[%s1486_s25 + $0x4c] sm:$0xf] %v190_v19  ;;  %v192_v20 = vld [vmem:[%s1482_s24 + $0xa0] sm:$0xf] }
  0x1e   : > { %v194_v21 = vld [vmem:[%s1482_s24 + $0xa8] sm:$0xf]  ;;  %v196_v22 = vld [vmem:[%s1482_s24 + $0xb0] sm:$0xf]  ;;  %193 = vst [vmem:[%s1486_s25 + $0x50] sm:$0xf] %v192_v20 }
  0x1f   : > { %195 = vst [vmem:[%s1486_s25 + $0x54] sm:$0xf] %v194_v21  ;;  %197 = vst [vmem:[%s1486_s25 + $0x58] sm:$0xf] %v196_v22  ;;  %v198_v23 = vld [vmem:[%s1482_s24 + $0xb8] sm:$0xf] }
  0x20   : > { %v200_v24 = vld [vmem:[%s1482_s24 + $0xc0] sm:$0xf]  ;;  %v202_v25 = vld [vmem:[%s1482_s24 + $0xc8] sm:$0xf]  ;;  %199 = vst [vmem:[%s1486_s25 + $0x5c] sm:$0xf] %v198_v23 }
  0x21   : > { %201 = vst [vmem:[%s1486_s25 + $0x60] sm:$0xf] %v200_v24  ;;  %203 = vst [vmem:[%s1486_s25 + $0x64] sm:$0xf] %v202_v25  ;;  %v204_v26 = vld [vmem:[%s1482_s24 + $0xd0] sm:$0xf] }
  0x22   : > { %v206_v27 = vld [vmem:[%s1482_s24 + $0xd8] sm:$0xf]  ;;  %v208_v28 = vld [vmem:[%s1482_s24 + $0xe0] sm:$0xf]  ;;  %205 = vst [vmem:[%s1486_s25 + $0x68] sm:$0xf] %v204_v26 }
  0x23   : > { %207 = vst [vmem:[%s1486_s25 + $0x6c] sm:$0xf] %v206_v27  ;;  %209 = vst [vmem:[%s1486_s25 + $0x70] sm:$0xf] %v208_v28  ;;  %v210_v29 = vld [vmem:[%s1482_s24 + $0xe8] sm:$0xf] }
  0x24   : > { %v212_v30 = vld [vmem:[%s1482_s24 + $0xf0] sm:$0xf]  ;;  %v214_v31 = vld [vmem:[%s1482_s24 + $0xf8] sm:$0xf]  ;;  %211 = vst [vmem:[%s1486_s25 + $0x74] sm:$0xf] %v210_v29 }
  0x25   : > { %213 = vst [vmem:[%s1486_s25 + $0x78] sm:$0xf] %v212_v30  ;;  %215 = vst [vmem:[%s1486_s25 + $0x7c] sm:$0xf] %v214_v31  ;;  %v216_v32 = vld [vmem:[%s1482_s24 + $0x100] sm:$0xf] }
  0x26   : > { %v218_v33 = vld [vmem:[%s1482_s24 + $0x108] sm:$0xf]  ;;  %v220_v34 = vld [vmem:[%s1482_s24 + $0x110] sm:$0xf]  ;;  %217 = vst [vmem:[%s1486_s25 + $0x80] sm:$0xf] %v216_v32 }
  0x27   : > { %219 = vst [vmem:[%s1486_s25 + $0x84] sm:$0xf] %v218_v33  ;;  %221 = vst [vmem:[%s1486_s25 + $0x88] sm:$0xf] %v220_v34  ;;  %v222_v35 = vld [vmem:[%s1482_s24 + $0x118] sm:$0xf] }
  0x28   : > { %223 = vst [vmem:[%s1486_s25 + $0x8c] sm:$0xf] %v222_v35 }
  0x29 PF: > { %319 = sbr.rel (!%p1464_p3) target bundleno = 70 (0x46), region = 61  ;;  %s321_s26 = sand.u32 (%p1464_p3), 1, %s1404_s10  }
  0x2a   : > { %s1268_s27 = smul.u32 (%p1464_p3), 288, %s1412_s12 }
  0x2b   : > { %s1336_s28 = smul.u32 (%p1464_p3), 144, %s321_s26 }
  0x2c   : > { %s1565_s3 = scalar_lea.vmem (%p1464_p3), %s2272_s1, %s1268_s27 }
  0x2d   : > { %v1269_v36 = vld [vmem:[%s1565_s3 + $0x4] sm:$0xf] (%p1464_p3)  ;;  %v1270_v37 = vld [vmem:[%s1565_s3 + $0xc] sm:$0xf] (%p1464_p3)  ;;  %s1569_s4 = scalar_lea.vmem (%p1464_p3), [#allocation3], %s1336_s28 }
  0x2e   : > { %346 = vst [vmem:[%s1569_s4] sm:$0xf] %v1269_v36  ;;  %348 = vst [vmem:[%s1569_s4 + $0x4] sm:$0xf] %v1270_v37  ;;  %v1271_v38 = vld [vmem:[%s1565_s3 + $0x14] sm:$0xf] }
  0x2f   : > { %v1272_v39 = vld [vmem:[%s1565_s3 + $0x1c] sm:$0xf]  ;;  %v1273_v40 = vld [vmem:[%s1565_s3 + $0x24] sm:$0xf]  ;;  %350 = vst [vmem:[%s1569_s4 + $0x8] sm:$0xf] %v1271_v38 }
  0x30   : > { %352 = vst [vmem:[%s1569_s4 + $0xc] sm:$0xf] %v1272_v39  ;;  %354 = vst [vmem:[%s1569_s4 + $0x10] sm:$0xf] %v1273_v40  ;;  %v1274_v41 = vld [vmem:[%s1565_s3 + $0x2c] sm:$0xf] }
  0x31   : > { %v1275_v42 = vld [vmem:[%s1565_s3 + $0x34] sm:$0xf]  ;;  %v1276_v43 = vld [vmem:[%s1565_s3 + $0x3c] sm:$0xf]  ;;  %356 = vst [vmem:[%s1569_s4 + $0x14] sm:$0xf] %v1274_v41 }
  0x32   : > { %358 = vst [vmem:[%s1569_s4 + $0x18] sm:$0xf] %v1275_v42  ;;  %360 = vst [vmem:[%s1569_s4 + $0x1c] sm:$0xf] %v1276_v43  ;;  %v1277_v44 = vld [vmem:[%s1565_s3 + $0x44] sm:$0xf] }
  0x33   : > { %v1278_v45 = vld [vmem:[%s1565_s3 + $0x4c] sm:$0xf]  ;;  %v1279_v46 = vld [vmem:[%s1565_s3 + $0x54] sm:$0xf]  ;;  %362 = vst [vmem:[%s1569_s4 + $0x20] sm:$0xf] %v1277_v44 }
  0x34   : > { %364 = vst [vmem:[%s1569_s4 + $0x24] sm:$0xf] %v1278_v45  ;;  %366 = vst [vmem:[%s1569_s4 + $0x28] sm:$0xf] %v1279_v46  ;;  %v1280_v47 = vld [vmem:[%s1565_s3 + $0x5c] sm:$0xf] }
  0x35   : > { %v1281_v48 = vld [vmem:[%s1565_s3 + $0x64] sm:$0xf]  ;;  %v1282_v49 = vld [vmem:[%s1565_s3 + $0x6c] sm:$0xf]  ;;  %368 = vst [vmem:[%s1569_s4 + $0x2c] sm:$0xf] %v1280_v47 }
  0x36   : > { %370 = vst [vmem:[%s1569_s4 + $0x30] sm:$0xf] %v1281_v48  ;;  %372 = vst [vmem:[%s1569_s4 + $0x34] sm:$0xf] %v1282_v49  ;;  %v1283_v50 = vld [vmem:[%s1565_s3 + $0x74] sm:$0xf] }
  0x37   : > { %v1284_v51 = vld [vmem:[%s1565_s3 + $0x7c] sm:$0xf]  ;;  %v1285_v52 = vld [vmem:[%s1565_s3 + $0x84] sm:$0xf]  ;;  %374 = vst [vmem:[%s1569_s4 + $0x38] sm:$0xf] %v1283_v50 }
  0x38   : > { %376 = vst [vmem:[%s1569_s4 + $0x3c] sm:$0xf] %v1284_v51  ;;  %378 = vst [vmem:[%s1569_s4 + $0x40] sm:$0xf] %v1285_v52  ;;  %v1286_v53 = vld [vmem:[%s1565_s3 + $0x8c] sm:$0xf] }
  0x39   : > { %v1287_v54 = vld [vmem:[%s1565_s3 + $0x94] sm:$0xf]  ;;  %v1288_v55 = vld [vmem:[%s1565_s3 + $0x9c] sm:$0xf]  ;;  %380 = vst [vmem:[%s1569_s4 + $0x44] sm:$0xf] %v1286_v53 }
  0x3a   : > { %382 = vst [vmem:[%s1569_s4 + $0x48] sm:$0xf] %v1287_v54  ;;  %384 = vst [vmem:[%s1569_s4 + $0x4c] sm:$0xf] %v1288_v55  ;;  %v1289_v56 = vld [vmem:[%s1565_s3 + $0xa4] sm:$0xf] }
  0x3b   : > { %v1290_v57 = vld [vmem:[%s1565_s3 + $0xac] sm:$0xf]  ;;  %v1291_v58 = vld [vmem:[%s1565_s3 + $0xb4] sm:$0xf]  ;;  %386 = vst [vmem:[%s1569_s4 + $0x50] sm:$0xf] %v1289_v56 }
  0x3c   : > { %388 = vst [vmem:[%s1569_s4 + $0x54] sm:$0xf] %v1290_v57  ;;  %390 = vst [vmem:[%s1569_s4 + $0x58] sm:$0xf] %v1291_v58  ;;  %v1292_v59 = vld [vmem:[%s1565_s3 + $0xbc] sm:$0xf] }
  0x3d   : > { %v1293_v60 = vld [vmem:[%s1565_s3 + $0xc4] sm:$0xf]  ;;  %v1294_v61 = vld [vmem:[%s1565_s3 + $0xcc] sm:$0xf]  ;;  %392 = vst [vmem:[%s1569_s4 + $0x5c] sm:$0xf] %v1292_v59 }
  0x3e   : > { %394 = vst [vmem:[%s1569_s4 + $0x60] sm:$0xf] %v1293_v60  ;;  %396 = vst [vmem:[%s1569_s4 + $0x64] sm:$0xf] %v1294_v61  ;;  %v1295_v62 = vld [vmem:[%s1565_s3 + $0xd4] sm:$0xf] }
  0x3f   : > { %v1296_v63 = vld [vmem:[%s1565_s3 + $0xdc] sm:$0xf]  ;;  %v1297_v0 = vld [vmem:[%s1565_s3 + $0xe4] sm:$0xf]  ;;  %398 = vst [vmem:[%s1569_s4 + $0x68] sm:$0xf] %v1295_v62 }
  0x40   : > { %400 = vst [vmem:[%s1569_s4 + $0x6c] sm:$0xf] %v1296_v63  ;;  %402 = vst [vmem:[%s1569_s4 + $0x70] sm:$0xf] %v1297_v0  ;;  %v1298_v1 = vld [vmem:[%s1565_s3 + $0xec] sm:$0xf] }
  0x41   : > { %v1299_v2 = vld [vmem:[%s1565_s3 + $0xf4] sm:$0xf]  ;;  %v1300_v3 = vld [vmem:[%s1565_s3 + $0xfc] sm:$0xf]  ;;  %404 = vst [vmem:[%s1569_s4 + $0x74] sm:$0xf] %v1298_v1 }
  0x42   : > { %406 = vst [vmem:[%s1569_s4 + $0x78] sm:$0xf] %v1299_v2  ;;  %408 = vst [vmem:[%s1569_s4 + $0x7c] sm:$0xf] %v1300_v3  ;;  %v1301_v4 = vld [vmem:[%s1565_s3 + $0x104] sm:$0xf] }
  0x43   : > { %v1302_v5 = vld [vmem:[%s1565_s3 + $0x10c] sm:$0xf]  ;;  %v1303_v6 = vld [vmem:[%s1565_s3 + $0x114] sm:$0xf]  ;;  %410 = vst [vmem:[%s1569_s4 + $0x80] sm:$0xf] %v1301_v4 }
  0x44   : > { %412 = vst [vmem:[%s1569_s4 + $0x84] sm:$0xf] %v1302_v5  ;;  %414 = vst [vmem:[%s1569_s4 + $0x88] sm:$0xf] %v1303_v6  ;;  %v1304_v7 = vld [vmem:[%s1565_s3 + $0x11c] sm:$0xf] }
  0x45   : > { %416 = vst [vmem:[%s1569_s4 + $0x8c] sm:$0xf] %v1304_v7 }
  0x46 PF: > { %p1305_p6 = scmp.ge.s32.totalorder %s1416_s13, 1  ;;  %p511_p7 = scmp.lt.s32.totalorder %s1416_s13, 3 }
  0x48   : > { %p512_p8 = pnand %p1305_p6, %p511_p7 }
  0x4a   : > { %515 = sbr.rel (%p512_p8) target bundleno = 218 (0xda), region = 102 }
  0x4f   : > { %s518_s5 = sand.u32 1, %s1400_s9   ;;  %vm832_vm0 = vcmask 1046528   ;;  %p554_p9 = scmp.lt.s32.totalorder %s1408_s11, 1 }
  0x50   : > { %s1644_s6 = smul.u32 144, %s518_s5 }
  0x51   : > { %s2541_s11 = smov (!%p554_p9, %s1408_s11), 1 }
  0x52   : > { %s1647_s7 = scalar_lea.vmem [#allocation2], %s1644_s6  ;;  %s1766_s8 = scalar_lea.vmem [#allocation3], %s1644_s6 }
  0x53   : > { %v1650_v8 = vld [vmem:[%s1647_s7] ss:$8 sps:$4 sm:$0xff]   ;;  %v1653_v9 = vld [vmem:[%s1647_s7 + $0x4] sm:$0x1]  ;;  %v1656_v10 = vld [vmem:[%s1647_s7 + $0xc] sm:$0x1] }
  0x54   : > { %v1659_v11 = vld [vmem:[%s1647_s7 + $0x10] ss:$8 sps:$4 sm:$0xff]   ;;  %v1662_v12 = vld [vmem:[%s1647_s7 + $0x14] sm:$0x1]  ;;  %v2278_v13 = vunpack.c.l.bf16 %v1650_v8  ;;  %v1668_v16 = vld [vmem:[%s1647_s7 + $0x1c] sm:$0x1]  ;;  %v2362_v29 = vunpack.c.h.bf16 %v1650_v8 }
  0x55   : > { %v1671_v17 = vld [vmem:[%s1647_s7 + $0x20] ss:$8 sps:$4 sm:$0xff]   ;;  %v1674_v18 = vld [vmem:[%s1647_s7 + $0x24] sm:$0x1]  ;;  %v1681_v23 = vld [vmem:[%s1647_s7 + $0x2c] sm:$0x1]  ;;  %v2363_v43 = vunpack.c.l.bf16 %v1659_v11 }
  0x56   : > { %v1684_v24 = vld [vmem:[%s1647_s7 + $0x30] ss:$8 sps:$4 sm:$0xff]   ;;  %v1687_v25 = vld [vmem:[%s1647_s7 + $0x34] sm:$0x1]  ;;  %v1694_v30 = vld [vmem:[%s1647_s7 + $0x3c] sm:$0x1]  ;;  %v2365_v55 = vunpack.c.l.bf16 %v1671_v17  ;;  %v2366_v41 = vunpack.c.h.bf16 %v1671_v17 }
  0x57   : > { %v1697_v31 = vld [vmem:[%s1647_s7 + $0x40] ss:$8 sps:$4 sm:$0xff]   ;;  %v1700_v32 = vld [vmem:[%s1647_s7 + $0x44] sm:$0x1]  ;;  %v1707_v37 = vld [vmem:[%s1647_s7 + $0x4c] sm:$0x1]  ;;  %v2367_v15 = vunpack.c.l.bf16 %v1684_v24 }
  0x58   : > { %v1710_v38 = vld [vmem:[%s1647_s7 + $0x50] ss:$8 sps:$4 sm:$0xff]   ;;  %v1713_v39 = vld [vmem:[%s1647_s7 + $0x54] sm:$0x1]  ;;  %v1720_v44 = vld [vmem:[%s1647_s7 + $0x5c] sm:$0x1] }
  0x59   : > { %2325 = vst [vmem:[#allocation4_spill] sm:$0xff] %v1720_v44  ;;  %v1723_v45 = vld [vmem:[%s1647_s7 + $0x60] ss:$8 sps:$4 sm:$0xff]   ;;  %v1726_v46 = vld [vmem:[%s1647_s7 + $0x64] sm:$0x1]  ;;  %v706_v56 = vmul.f32 0.125, %v2278_v13  ;;  %v2368_v13 = vunpack.c.h.bf16 %v1684_v24 }
  0x5a   : > { %2326 = vst [vmem:[#allocation5_spill] sm:$0xff] %v1723_v45  ;;  %2327 = vst [vmem:[#allocation6_spill] sm:$0xff] %v1726_v46  ;;  %v1733_v51 = vld [vmem:[%s1647_s7 + $0x6c] sm:$0x1]  ;;  %v1736_v52 = vld [vmem:[%s1647_s7 + $0x70] ss:$8 sps:$4 sm:$0xff]  }
  0x5b   : > { %2328 = vst [vmem:[#allocation7_spill] sm:$0xff] %v1733_v51  ;;  %2329 = vst [vmem:[#allocation8_spill] sm:$0xff] %v1736_v52  ;;  %v1739_v53 = vld [vmem:[%s1647_s7 + $0x74] sm:$0x1]  ;;  %v1746_v58 = vld [vmem:[%s1647_s7 + $0x7c] sm:$0x1] }
  0x5c   : > { %2330 = vst [vmem:[#allocation9_spill] sm:$0xff] %v1739_v53  ;;  %2331 = vst [vmem:[#allocation10_spill] sm:$0xff] %v1746_v58  ;;  %v1749_v59 = vld [vmem:[%s1647_s7 + $0x80] ss:$8 sps:$4 sm:$0xff]   ;;  %v1752_v60 = vld [vmem:[%s1647_s7 + $0x84] sm:$0x1] }
  0x5d   : > { %2332 = vst [vmem:[#allocation11_spill] sm:$0xff] %v1749_v59  ;;  %2333 = vst [vmem:[#allocation12_spill] sm:$0xff] %v1752_v60  ;;  %v1759_v1 = vld [vmem:[%s1647_s7 + $0x8c] sm:$0x1]  ;;  %v1769_v6 = vld [vmem:[%s1766_s8] ss:$8 sps:$4 sm:$0xff]  }
  0x5e   : > { %2334 = vst [vmem:[#allocation13_spill] sm:$0xff] %v1759_v1  ;;  %2335 = vst [vmem:[#allocation14_spill] sm:$0xff] %v1769_v6  ;;  %v1772_v7 = vld [vmem:[%s1766_s8 + $0x4] sm:$0x1]  ;;  %v1776_v2 = vld [vmem:[%s1766_s8 + $0xc] sm:$0x1] }
  0x5f   : > { %2336 = vst [vmem:[#allocation15_spill] sm:$0xff] %v1772_v7  ;;  %2337 = vst [vmem:[#allocation16_spill] sm:$0xff] %v1776_v2  ;;  %v1779_v63 = vld [vmem:[%s1766_s8 + $0x10] ss:$8 sps:$4 sm:$0xff]   ;;  %v1782_v61 = vld [vmem:[%s1766_s8 + $0x14] sm:$0x1] }
  0x60   : > { %2338 = vst [vmem:[#allocation17_spill] sm:$0xff] %v1779_v63  ;;  %2339 = vst [vmem:[#allocation18_spill] sm:$0xff] %v1782_v61  ;;  %v1788_v47 = vld [vmem:[%s1766_s8 + $0x1c] sm:$0x1]  ;;  %v1791_v42 = vld [vmem:[%s1766_s8 + $0x20] ss:$8 sps:$4 sm:$0xff]  }
  0x61   : > { %2340 = vst [vmem:[#allocation19_spill] sm:$0xff] %v1788_v47  ;;  %2341 = vst [vmem:[#allocation20_spill] sm:$0xff] %v1791_v42  ;;  %v1794_v4 = vld [vmem:[%s1766_s8 + $0x24] sm:$0x1]  ;;  %v1801_v28 = vld [vmem:[%s1766_s8 + $0x2c] sm:$0x1] }
  0x62   : > { %2342 = vst [vmem:[#allocation21_spill] sm:$0xff] %v1794_v4  ;;  %2343 = vst [vmem:[#allocation22_spill] sm:$0xff] %v1801_v28  ;;  %v1804_v26 = vld [vmem:[%s1766_s8 + $0x30] ss:$8 sps:$4 sm:$0xff]   ;;  %v1807_v21 = vld [vmem:[%s1766_s8 + $0x34] sm:$0x1] }
  0x63   : > { %2344 = vst [vmem:[#allocation23_spill] sm:$0xff] %v1804_v26  ;;  %2345 = vst [vmem:[#allocation24_spill] sm:$0xff] %v1807_v21  ;;  %v1814_v35 = vld [vmem:[%s1766_s8 + $0x3c] sm:$0x1]  ;;  %v1817_v54 = vld [vmem:[%s1766_s8 + $0x40] ss:$8 sps:$4 sm:$0xff]  }
  0x64   : > { %2346 = vst [vmem:[#allocation25_spill] sm:$0xff] %v1814_v35  ;;  %2347 = vst [vmem:[#allocation26_spill] sm:$0xff] %v1817_v54  ;;  %v1820_v49 = vld [vmem:[%s1766_s8 + $0x44] sm:$0x1]  ;;  %v1827_v14 = vld [vmem:[%s1766_s8 + $0x4c] sm:$0x1] }
  0x65   : > { %2348 = vst [vmem:[#allocation27_spill] sm:$0xff] %v1820_v49  ;;  %2349 = vst [vmem:[#allocation28_spill] sm:$0xff] %v1827_v14  ;;  %v1830_v33 = vld [vmem:[%s1766_s8 + $0x50] ss:$8 sps:$4 sm:$0xff]   ;;  %v1833_v3 = vld [vmem:[%s1766_s8 + $0x54] sm:$0x1] }
  0x66   : > { %2350 = vst [vmem:[#allocation29_spill] sm:$0xff] %v1830_v33  ;;  %2351 = vst [vmem:[#allocation30_spill] sm:$0xff] %v1833_v3  ;;  %v1840_v5 = vld [vmem:[%s1766_s8 + $0x5c] sm:$0x1]  ;;  %v1843_v40 = vld [vmem:[%s1766_s8 + $0x60] ss:$8 sps:$4 sm:$0xff]  }
  0x67   : > { %2352 = vst [vmem:[#allocation31_spill] sm:$0xff] %v1840_v5  ;;  %2353 = vst [vmem:[#allocation32_spill] sm:$0xff] %v1843_v40  ;;  %v1846_v57 = vld [vmem:[%s1766_s8 + $0x64] sm:$0x1]  ;;  %v1853_v62 = vld [vmem:[%s1766_s8 + $0x6c] sm:$0x1] }
  0x68   : > { %2354 = vst [vmem:[#allocation33_spill] sm:$0xff] %v1846_v57  ;;  %2355 = vst [vmem:[#allocation34_spill] sm:$0xff] %v1853_v62  ;;  %v1856_v19 = vld [vmem:[%s1766_s8 + $0x70] ss:$8 sps:$4 sm:$0xff]   ;;  %v1859_v48 = vld [vmem:[%s1766_s8 + $0x74] sm:$0x1]  ;;  %v2364_v62 = vunpack.c.h.bf16 %v1659_v11 }
  0x69   : > { %2356 = vst [vmem:[#allocation35_spill] sm:$0xff] %v1856_v19  ;;  %2357 = vst [vmem:[#allocation36_spill] sm:$0xff] %v1859_v48  ;;  %v1866_v50 = vld [vmem:[%s1766_s8 + $0x7c] sm:$0x1]  ;;  %v1869_v0 = vld [vmem:[%s1766_s8 + $0x80] ss:$8 sps:$4 sm:$0xff]  }
  0x6a   : > { %2358 = vst [vmem:[#allocation37_spill] sm:$0xff] %v1866_v50  ;;  %2359 = vst [vmem:[#allocation38_spill] sm:$0xff] %v1869_v0  ;;  %v1872_v34 = vld [vmem:[%s1766_s8 + $0x84] sm:$0x1]  ;;  %v1879_v22 = vld [vmem:[%s1766_s8 + $0x8c] sm:$0x1] }
  0x6b   : > { %2360 = vst [vmem:[#allocation39_spill] sm:$0xff] %v1872_v34  ;;  %2361 = vst [vmem:[#allocation40_spill] sm:$0xff] %v1879_v22  ;;  %v707_v27 = vmul.f32 0.125, %v2362_v29  ;;  %v708_v48 = vmul.f32 0.125, %v2363_v43  ;;  %v709_v36 = vmul.f32 0.125, %v2364_v62  ;;  %v710_v50 = vmul.f32 0.125, %v2365_v55 }
  0x6c   : > { %v711_v20 = vmul.f32 0.125, %v2366_v41  ;;  %v712_v22 = vmul.f32 0.125, %v2367_v15  ;;  %v713_v34 = vmul.f32 0.125, %v2368_v13  ;;  %v2369_v29 = vunpack.c.l.bf16 %v1697_v31  ;;  %s1310_s9 = sshll.u32 %s2541_s11, 5 }
  0x6d   : > { %v2370_v43 = vunpack.c.h.bf16 %v1697_v31  ;;  %v2371_v62 = vunpack.c.l.bf16 %v1710_v38  ;;  %v2372_v55 = vunpack.c.h.bf16 %v1710_v38  ;;  %v2373_v41 = vunpack.c.l.bf16 %v1723_v45  ;;  %s561_s17 = scalar_lea.vmem %s2273_s2, %s1310_s9 }
  0x6e   : > { %v714_v57 = vmul.f32 0.125, %v2369_v29  ;;  %v2374_v15 = vunpack.c.h.bf16 %v1723_v45  ;;  %v2375_v13 = vunpack.c.l.bf16 %v1736_v52  ;;  %v2376_v29 = vunpack.c.h.bf16 %v1736_v52 }
  0x6f   : > { %v715_v5 = vmul.f32 0.125, %v2370_v43  ;;  %v716_v3 = vmul.f32 0.125, %v2371_v62  ;;  %v717_v14 = vmul.f32 0.125, %v2372_v55  ;;  %v718_v49 = vmul.f32 0.125, %v2373_v41 }
  0x70   : > { %v719_v35 = vmul.f32 0.125, %v2374_v15  ;;  %v720_v21 = vmul.f32 0.125, %v2375_v13  ;;  %v721_v28 = vmul.f32 0.125, %v2376_v29  ;;  %v2377_v43 = vunpack.c.l.bf16 %v1749_v59 }
  0x71   : > { %v2378_v62 = vunpack.c.h.bf16 %v1749_v59  ;;  %v2379_v55 = vunpack.c.l.bf16 %v1769_v6  ;;  %v2380_v41 = vunpack.c.h.bf16 %v1769_v6  ;;  %v2381_v15 = vunpack.c.l.bf16 %v1779_v63 }
  0x72   : > { %v722_v4 = vmul.f32 0.125, %v2377_v43  ;;  %v2382_v13 = vunpack.c.h.bf16 %v1779_v63  ;;  %v2383_v29 = vunpack.c.l.bf16 %v1791_v42  ;;  %v2384_v43 = vunpack.c.h.bf16 %v1791_v42 }
  0x73   : > { %v723_v47 = vmul.f32 0.125, %v2378_v62  ;;  %v724_v61 = vmul.f32 0.375, %v2379_v55  ;;  %v725_v2 = vmul.f32 0.375, %v2380_v41  ;;  %v726_v7 = vmul.f32 0.375, %v2381_v15 }
  0x74   : > { %v727_v1 = vmul.f32 0.375, %v2382_v13  ;;  %v728_v60 = vmul.f32 0.375, %v2383_v29  ;;  %v729_v58 = vmul.f32 0.375, %v2384_v43  ;;  %v2385_v62 = vunpack.c.l.bf16 %v1804_v26 }
  0x75   : > { %v2386_v55 = vunpack.c.h.bf16 %v1804_v26  ;;  %v2387_v41 = vunpack.c.l.bf16 %v1817_v54  ;;  %v2388_v15 = vunpack.c.h.bf16 %v1817_v54  ;;  %v2389_v13 = vunpack.c.l.bf16 %v1830_v33 }
  0x76   : > { %v730_v59 = vmul.f32 0.375, %v2385_v62  ;;  %v2390_v29 = vunpack.c.h.bf16 %v1830_v33  ;;  %v2391_v43 = vunpack.c.l.bf16 %v1843_v40  ;;  %v2392_v62 = vunpack.c.h.bf16 %v1843_v40 }
  0x77   : > { %v731_v53 = vmul.f32 0.375, %v2386_v55  ;;  %v732_v6 = vmul.f32 0.375, %v2387_v41  ;;  %v733_v52 = vmul.f32 0.375, %v2388_v15  ;;  %v734_v63 = vmul.f32 0.375, %v2389_v13 }
  0x78   : > { %v735_v51 = vmul.f32 0.375, %v2390_v29  ;;  %v736_v42 = vmul.f32 0.375, %v2391_v43  ;;  %v737_v46 = vmul.f32 0.375, %v2392_v62  ;;  %v2393_v55 = vunpack.c.l.bf16 %v1856_v19 }
  0x79   : > { %v2394_v41 = vunpack.c.h.bf16 %v1856_v19  ;;  %v2395_v15 = vunpack.c.l.bf16 %v1869_v0  ;;  %v2396_v13 = vunpack.c.h.bf16 %v1869_v0  ;;  %v1958_v33 = vadd.f32 %v724_v61, %v706_v56 }
  0x7a   : > { %v738_v26 = vmul.f32 0.375, %v2393_v55  ;;  %v1960_v29 = vadd.f32 %v725_v2, %v707_v27  ;;  %v1962_v43 = vadd.f32 %v726_v7, %v708_v48  ;;  %v1964_v40 = vadd.f32 %v727_v1, %v709_v36 }
  0x7b   : > { %v739_v45 = vmul.f32 0.375, %v2394_v41  ;;  %v740_v54 = vmul.f32 0.375, %v2395_v15  ;;  %v741_v44 = vmul.f32 0.375, %v2396_v13  ;;  %v1966_v62 = vadd.f32 %v728_v60, %v710_v50 }
  0x7c   : > { %v1968_v55 = vadd.f32 %v729_v58, %v711_v20  ;;  %v1970_v19 = vadd.f32 %v730_v59, %v712_v22  ;;  %v1972_v41 = vadd.f32 %v731_v53, %v713_v34  ;;  %v1974_v15 = vadd.f32 %v732_v6, %v714_v57 }
  0x7d   : > { %v1976_v0 = vadd.f32 %v733_v52, %v715_v5  ;;  %v1978_v56 = vadd.f32 %v734_v63, %v716_v3  ;;  %v1980_v27 = vadd.f32 %v735_v51, %v717_v14  ;;  %v1982_v48 = vadd.f32 %v736_v42, %v718_v49 }
  0x7e   : > { %v1984_v36 = vadd.f32 %v737_v46, %v719_v35  ;;  %v1986_v50 = vadd.f32 %v738_v26, %v720_v21  ;;  %v1988_v20 = vadd.f32 %v739_v45, %v721_v28  ;;  %v1990_v22 = vadd.f32 %v740_v54, %v722_v4 }
  0x7f   : > { %2397 = vst [vmem:[#allocation41_spill] sm:$0xff] %v1980_v27  ;;  %2398 = vst [vmem:[#allocation42_spill] sm:$0xff] %v1982_v48  ;;  %v1992_v34 = vadd.f32 %v741_v44, %v723_v47  ;;  %v2404_v53 = vunpack.c.l.bf16 %v1650_v8  ;;  %v2405_v57 = vunpack.c.l.bf16 %v1653_v9  ;;  %v2406_v14 = vunpack.c.h.bf16 %v1650_v8 }
  0x80   : > { %2399 = vst [vmem:[#allocation43_spill] sm:$0xff] %v1984_v36  ;;  %2400 = vst [vmem:[#allocation44_spill] sm:$0xff] %v1986_v50  ;;  %v2407_v35 = vunpack.c.l.bf16 %v1656_v10  ;;  %v2408_v21 = vunpack.c.l.bf16 %v1659_v11  ;;  %v2409_v28 = vunpack.c.l.bf16 %v1662_v12  ;;  %v2410_v45 = vunpack.c.h.bf16 %v1659_v11 }
  0x81   : > { %2401 = vst [vmem:[#allocation45_spill] sm:$0xff] %v1988_v20  ;;  %2402 = vst [vmem:[#allocation46_spill] sm:$0xff] %v1990_v22  ;;  %v760_v52 = vmul.f32 0.375, %v2404_v53  ;;  %v761_v58 = vmul.f32 0.375, %v2405_v57  ;;  %v762_v42 = vmul.f32 0.375, %v2406_v14  ;;  %v2411_v49 = vunpack.c.l.bf16 %v1668_v16  ;;  %v2448_v22 = vld [vmem:[#allocation13_spill] sm:$0xff] }
  0x82   : > { %2403 = vst [vmem:[#allocation47_spill] sm:$0xff] %v1992_v34  ;;  %v763_v46 = vmul.f32 0.375, %v2407_v35  ;;  %v764_v26 = vmul.f32 0.375, %v2408_v21  ;;  %v765_v44 = vmul.f32 0.375, %v2409_v28  ;;  %v766_v47 = vmul.f32 0.375, %v2410_v45  ;;  %v2427_v28 = vld [vmem:[#allocation4_spill] sm:$0xff] }
  0x83   : > { %v767_v9 = vmul.f32 0.375, %v2411_v49  ;;  %v2412_v51 = vunpack.c.l.bf16 %v1671_v17  ;;  %v2413_v54 = vunpack.c.l.bf16 %v1674_v18  ;;  %v2414_v59 = vunpack.c.h.bf16 %v1671_v17 }
  0x84   : > { %v2415_v61 = vunpack.c.l.bf16 %v1681_v23  ;;  %v2416_v12 = vunpack.c.l.bf16 %v1684_v24  ;;  %v2417_v11 = vunpack.c.l.bf16 %v1687_v25  ;;  %v2418_v16 = vunpack.c.h.bf16 %v1684_v24 }
  0x85   : > { %v768_v8 = vmul.f32 0.375, %v2412_v51  ;;  %v769_v10 = vmul.f32 0.375, %v2413_v54  ;;  %v770_v60 = vmul.f32 0.375, %v2414_v59  ;;  %v2419_v4 = vunpack.c.l.bf16 %v1694_v30 }
  0x86   : > { %v771_v63 = vmul.f32 0.375, %v2415_v61  ;;  %v772_v1 = vmul.f32 0.375, %v2416_v12  ;;  %v773_v2 = vmul.f32 0.375, %v2417_v11  ;;  %v774_v3 = vmul.f32 0.375, %v2418_v16  ;;  %v2434_v11 = vld [vmem:[#allocation7_spill] sm:$0xff] }
  0x87   : > { %v775_v5 = vmul.f32 0.375, %v2419_v4  ;;  %v2420_v18 = vunpack.c.l.bf16 %v1697_v31  ;;  %v2421_v17 = vunpack.c.l.bf16 %v1700_v32  ;;  %v2422_v23 = vunpack.c.h.bf16 %v1697_v31  ;;  %v2429_v32 = vld [vmem:[#allocation5_spill] sm:$0xff]  ;;  %v2431_v31 = vld [vmem:[#allocation6_spill] sm:$0xff] }
  0x88   : > { %v2423_v53 = vunpack.c.l.bf16 %v1707_v37  ;;  %v2424_v25 = vunpack.c.l.bf16 %v1710_v38  ;;  %v2425_v24 = vunpack.c.l.bf16 %v1713_v39  ;;  %v2426_v30 = vunpack.c.h.bf16 %v1710_v38  ;;  %v2436_v39 = vld [vmem:[#allocation8_spill] sm:$0xff]  ;;  %v2438_v38 = vld [vmem:[#allocation9_spill] sm:$0xff] }
  0x89   : > { %v776_v6 = vmul.f32 0.375, %v2420_v18  ;;  %v777_v7 = vmul.f32 0.375, %v2421_v17  ;;  %v778_v13 = vmul.f32 0.375, %v2422_v23  ;;  %v2428_v45 = vunpack.c.l.bf16 %v2427_v28 }
  0x8a   : > { %v779_v57 = vmul.f32 0.375, %v2423_v53  ;;  %v780_v14 = vmul.f32 0.375, %v2424_v25  ;;  %v781_v35 = vmul.f32 0.375, %v2425_v24  ;;  %v782_v21 = vmul.f32 0.375, %v2426_v30  ;;  %v2441_v30 = vld [vmem:[#allocation10_spill] sm:$0xff] }
  0x8b   : > { %v783_v49 = vmul.f32 0.375, %v2428_v45  ;;  %v2430_v51 = vunpack.c.l.bf16 %v2429_v32  ;;  %v2432_v59 = vunpack.c.l.bf16 %v2431_v31  ;;  %v2433_v37 = vunpack.c.h.bf16 %v2429_v32  ;;  %v2445_v32 = vld [vmem:[#allocation12_spill] sm:$0xff] }
  0x8c   : > { %v2435_v16 = vunpack.c.l.bf16 %v2434_v11  ;;  %v2437_v18 = vunpack.c.l.bf16 %v2436_v39  ;;  %v2439_v23 = vunpack.c.l.bf16 %v2438_v38  ;;  %v2440_v25 = vunpack.c.h.bf16 %v2436_v39 }
  0x8d   : > { %v784_v54 = vmul.f32 0.375, %v2430_v51  ;;  %v785_v61 = vmul.f32 0.375, %v2432_v59  ;;  %v786_v12 = vmul.f32 0.375, %v2433_v37  ;;  %v2442_v28 = vunpack.c.l.bf16 %v2441_v30  ;;  %v2443_v51 = vld [vmem:[#allocation11_spill] sm:$0xff] }
  0x8e   : > { %v787_v4 = vmul.f32 0.375, %v2435_v16  ;;  %v788_v17 = vmul.f32 0.375, %v2437_v18  ;;  %v789_v53 = vmul.f32 0.375, %v2439_v23  ;;  %v790_v24 = vmul.f32 0.375, %v2440_v25 }
  0x8f   : > { %v791_v45 = vmul.f32 0.375, %v2442_v28  ;;  %v2444_v31 = vunpack.c.l.bf16 %v2443_v51  ;;  %v2446_v37 = vunpack.c.l.bf16 %v2445_v32  ;;  %v2447_v11 = vunpack.c.h.bf16 %v2443_v51 }
  0x90   : > { %v2449_v18 = vunpack.c.l.bf16 %v2448_v22  ;;  %v833_v38 = vrot.slane %v760_v52, 1  ;;  %v834_v23 = vrot.slane %v761_v58, 1  ;;  %v836_v50 = vrot.slane %v762_v42, 1 }
  0x91   : > { %v792_v59 = vmul.f32 0.375, %v2444_v31  ;;  %v793_v34 = vmul.f32 0.375, %v2446_v37  ;;  %v794_v16 = vmul.f32 0.375, %v2447_v11  ;;  %v837_v39 = vrot.slane %v763_v46, 1 }
  0x92   : > { %v795_v20 = vmul.f32 0.375, %v2449_v18  ;;  %v839_v25 = vrot.slane %v764_v26, 1  ;;  %v840_v36 = vrot.slane %v765_v44, 1  ;;  %v842_v30 = vrot.slane %v766_v47, 1 }
  0x93   : > { %v843_v28 = vrot.slane %v767_v9, 1  ;;  %v845_v48 = vrot.slane %v768_v8, 1  ;;  %v835_v31 = vsel %vm832_vm0, %v833_v38, %v834_v23  ;;  %v838_v32 = vsel %vm832_vm0, %v836_v50, %v837_v39 }
  0x94   : > { %v846_v37 = vrot.slane %v769_v10, 1  ;;  %v848_v27 = vrot.slane %v770_v60, 1  ;;  %v841_v51 = vsel %vm832_vm0, %v839_v25, %v840_v36  ;;  %v849_v11 = vrot.slane %v771_v63, 1 }
  0x95   : > { %v844_v22 = vsel %vm832_vm0, %v842_v30, %v843_v28  ;;  %v851_v52 = vrot.slane %v772_v1, 1  ;;  %v852_v42 = vrot.slane %v773_v2, 1  ;;  %v854_v46 = vrot.slane %v774_v3, 1 }
  0x96   : > { %v847_v58 = vsel %vm832_vm0, %v845_v48, %v846_v37  ;;  %v855_v26 = vrot.slane %v775_v5, 1  ;;  %v850_v44 = vsel %vm832_vm0, %v848_v27, %v849_v11  ;;  %v857_v47 = vrot.slane %v776_v6, 1  ;;  %v2464_v11 = vld [vmem:[#allocation14_spill] sm:$0xff] }
  0x97   : > { %v858_v9 = vrot.slane %v777_v7, 1  ;;  %v860_v8 = vrot.slane %v778_v13, 1  ;;  %v853_v50 = vsel %vm832_vm0, %v851_v52, %v852_v42  ;;  %v861_v60 = vrot.slane %v779_v57, 1  ;;  %v2466_v42 = vld [vmem:[#allocation15_spill] sm:$0xff] }
  0x98   : > { %v856_v10 = vsel %vm832_vm0, %v854_v46, %v855_v26  ;;  %v863_v36 = vrot.slane %v780_v14, 1  ;;  %v864_v63 = vrot.slane %v781_v35, 1  ;;  %v866_v1 = vrot.slane %v782_v21, 1 }
  0x99   : > { %v859_v18 = vsel %vm832_vm0, %v857_v47, %v858_v9  ;;  %v867_v38 = vrot.slane %v783_v49, 1  ;;  %v862_v48 = vsel %vm832_vm0, %v860_v8, %v861_v60  ;;  %v869_v2 = vrot.slane %v784_v54, 1  ;;  %v2469_v9 = vld [vmem:[#allocation16_spill] sm:$0xff] }
  0x9a   : > { %v870_v3 = vrot.slane %v785_v61, 1  ;;  %v872_v5 = vrot.slane %v786_v12, 1  ;;  %v865_v27 = vsel %vm832_vm0, %v863_v36, %v864_v63  ;;  %v873_v7 = vrot.slane %v787_v4, 1 }
  0x9b   : > { %v868_v6 = vsel %vm832_vm0, %v866_v1, %v867_v38  ;;  %v875_v13 = vrot.slane %v788_v17, 1  ;;  %v876_v57 = vrot.slane %v789_v53, 1  ;;  %v878_v14 = vrot.slane %v790_v24, 1 }
  0x9c   : > { %v871_v23 = vsel %vm832_vm0, %v869_v2, %v870_v3  ;;  %v879_v39 = vrot.slane %v791_v45, 1  ;;  %v874_v35 = vsel %vm832_vm0, %v872_v5, %v873_v7  ;;  %v881_v21 = vrot.slane %v792_v59, 1  ;;  %v2476_v2 = vld [vmem:[#allocation19_spill] sm:$0xff] }
  0x9d   : > { %v882_v49 = vrot.slane %v793_v34, 1  ;;  %v884_v25 = vrot.slane %v794_v16, 1  ;;  %v877_v54 = vsel %vm832_vm0, %v875_v13, %v876_v57  ;;  %v885_v12 = vrot.slane %v795_v20, 1  ;;  %v2480_v13 = vld [vmem:[#allocation21_spill] sm:$0xff] }
  0x9e   : > { %v880_v61 = vsel %vm832_vm0, %v878_v14, %v879_v39  ;;  %v2083_v30 = vadd.f32 %v835_v31, %v1958_v33  ;;  %v2087_v17 = vadd.f32 %v838_v32, %v1960_v29  ;;  %v2090_v53 = vadd.f32 %v841_v51, %v1962_v43 }
  0x9f   : > { %v883_v4 = vsel %vm832_vm0, %v881_v21, %v882_v49  ;;  %v2093_v24 = vadd.f32 %v844_v22, %v1964_v40  ;;  %v886_v34 = vsel %vm832_vm0, %v884_v25, %v885_v12  ;;  %v2097_v45 = vadd.f32 %v847_v58, %v1966_v62  ;;  %v2450_v62 = vld [vmem:[#allocation41_spill] sm:$0xff]  ;;  %v2485_v25 = vld [vmem:[#allocation23_spill] sm:$0xff]  ;;  %v2487_v12 = vld [vmem:[#allocation24_spill] sm:$0xff] }
  0xa0   : > { %v2100_v20 = vadd.f32 %v850_v44, %v1968_v55  ;;  %v2103_v33 = vadd.f32 %v853_v50, %v1970_v19  ;;  %v2106_v29 = vadd.f32 %v856_v10, %v1972_v41  ;;  %v2109_v43 = vadd.f32 %v859_v18, %v1974_v15  ;;  %v2452_v55 = vld [vmem:[#allocation42_spill] sm:$0xff]  ;;  %v2454_v19 = vld [vmem:[#allocation43_spill] sm:$0xff]  ;;  %v2456_v41 = vld [vmem:[#allocation44_spill] sm:$0xff] }
  0xa1   : > { %v2112_v40 = vadd.f32 %v862_v48, %v1976_v0  ;;  %v2115_v59 = vadd.f32 %v865_v27, %v1978_v56  ;;  %v2118_v16 = vadd.f32 %v868_v6, %v2450_v62  ;;  %v2121_v28 = vadd.f32 %v871_v23, %v2452_v55  ;;  %v2458_v15 = vld [vmem:[#allocation45_spill] sm:$0xff]  ;;  %v2460_v0 = vld [vmem:[#allocation46_spill] sm:$0xff]  ;;  %v2462_v56 = vld [vmem:[#allocation47_spill] sm:$0xff] }
  0xa2   : > { %v2124_v31 = vadd.f32 %v874_v35, %v2454_v19  ;;  %v2127_v32 = vadd.f32 %v877_v54, %v2456_v41  ;;  %v2130_v37 = vadd.f32 %v880_v61, %v2458_v15  ;;  %v2133_v51 = vadd.f32 %v883_v4, %v2460_v0  ;;  %v2471_v10 = vld [vmem:[#allocation17_spill] sm:$0xff]  ;;  %v2473_v18 = vld [vmem:[#allocation18_spill] sm:$0xff]  ;;  %v2478_v27 = vld [vmem:[#allocation20_spill] sm:$0xff] }
  0xa3   : > { %2451 = vst [vmem:[#allocation4_spill] sm:$0xff] %v2118_v16  ;;  %2453 = vst [vmem:[#allocation5_spill] sm:$0xff] %v2121_v28  ;;  %v2136_v22 = vadd.f32 %v886_v34, %v2462_v56  ;;  %v2465_v52 = vunpack.c.l.bf16 %v2464_v11  ;;  %v2467_v46 = vunpack.c.l.bf16 %v2466_v42  ;;  %v2468_v44 = vunpack.c.h.bf16 %v2464_v11  ;;  %v2483_v35 = vld [vmem:[#allocation22_spill] sm:$0xff]  ;;  %v2490_v19 = vld [vmem:[#allocation25_spill] sm:$0xff] }
  0xa4   : > { %2455 = vst [vmem:[#allocation6_spill] sm:$0xff] %v2124_v31  ;;  %2457 = vst [vmem:[#allocation7_spill] sm:$0xff] %v2127_v32  ;;  %v2470_v8 = vunpack.c.l.bf16 %v2469_v9  ;;  %v2472_v60 = vunpack.c.l.bf16 %v2471_v10  ;;  %v2474_v63 = vunpack.c.l.bf16 %v2473_v18  ;;  %v2475_v38 = vunpack.c.h.bf16 %v2471_v10  ;;  %v2492_v0 = vld [vmem:[#allocation26_spill] sm:$0xff]  ;;  %v2499_v18 = vld [vmem:[#allocation29_spill] sm:$0xff] }
  0xa5   : > { %2459 = vst [vmem:[#allocation8_spill] sm:$0xff] %v2130_v37  ;;  %2461 = vst [vmem:[#allocation9_spill] sm:$0xff] %v2133_v51  ;;  %v923_v58 = vmul.f32 0.125, %v2465_v52  ;;  %v924_v26 = vmul.f32 0.125, %v2467_v46  ;;  %v925_v47 = vmul.f32 0.125, %v2468_v44  ;;  %v2477_v3 = vunpack.c.l.bf16 %v2476_v2  ;;  %v2494_v52 = vld [vmem:[#allocation27_spill] sm:$0xff] }
  0xa6   : > { %2463 = vst [vmem:[#allocation10_spill] sm:$0xff] %v2136_v22  ;;  %v926_v50 = vmul.f32 0.125, %v2470_v8  ;;  %v927_v36 = vmul.f32 0.125, %v2472_v60  ;;  %v928_v1 = vmul.f32 0.125, %v2474_v63  ;;  %v929_v48 = vmul.f32 0.125, %v2475_v38  ;;  %v2497_v8 = vld [vmem:[#allocation28_spill] sm:$0xff] }
  0xa7   : > { %v930_v5 = vmul.f32 0.125, %v2477_v3  ;;  %v2479_v6 = vunpack.c.l.bf16 %v2478_v27  ;;  %v2481_v23 = vunpack.c.l.bf16 %v2480_v13  ;;  %v2482_v14 = vunpack.c.h.bf16 %v2478_v27  ;;  %v2501_v2 = vld [vmem:[#allocation30_spill] sm:$0xff]  ;;  %v2525_v51 = vld [vmem:[#allocation40_spill] sm:$0xff] }
  0xa8   : > { %v2484_v21 = vunpack.c.l.bf16 %v2483_v35  ;;  %v2486_v54 = vunpack.c.l.bf16 %v2485_v25  ;;  %v2488_v4 = vunpack.c.l.bf16 %v2487_v12  ;;  %v2489_v62 = vunpack.c.h.bf16 %v2485_v25  ;;  %v2508_v12 = vld [vmem:[#allocation33_spill] sm:$0xff] }
  0xa9   : > { %v931_v7 = vmul.f32 0.125, %v2479_v6  ;;  %v932_v57 = vmul.f32 0.125, %v2481_v23  ;;  %v933_v39 = vmul.f32 0.125, %v2482_v14  ;;  %v2491_v41 = vunpack.c.l.bf16 %v2490_v19  ;;  %v2504_v23 = vld [vmem:[#allocation31_spill] sm:$0xff] }
  0xaa   : > { %v934_v49 = vmul.f32 0.125, %v2484_v21  ;;  %v935_v61 = vmul.f32 0.125, %v2486_v54  ;;  %v936_v34 = vmul.f32 0.125, %v2488_v4  ;;  %v937_v55 = vmul.f32 0.125, %v2489_v62  ;;  %v2506_v21 = vld [vmem:[#allocation32_spill] sm:$0xff] }
  0xab   : > { %v938_v15 = vmul.f32 0.125, %v2491_v41  ;;  %v2493_v56 = vunpack.c.l.bf16 %v2492_v0  ;;  %v2495_v42 = vunpack.c.l.bf16 %v2494_v52  ;;  %v2496_v44 = vunpack.c.h.bf16 %v2492_v0  ;;  %v2511_v0 = vld [vmem:[#allocation34_spill] sm:$0xff] }
  0xac   : > { %v2498_v10 = vunpack.c.l.bf16 %v2497_v8  ;;  %v2500_v63 = vunpack.c.l.bf16 %v2499_v18  ;;  %v2502_v3 = vunpack.c.l.bf16 %v2501_v2  ;;  %v2503_v6 = vunpack.c.h.bf16 %v2499_v18 }
  0xad   : > { %v939_v11 = vmul.f32 0.125, %v2493_v56  ;;  %v940_v46 = vmul.f32 0.125, %v2495_v42  ;;  %v941_v9 = vmul.f32 0.125, %v2496_v44  ;;  %v2505_v14 = vunpack.c.l.bf16 %v2504_v23  ;;  %v2513_v42 = vld [vmem:[#allocation35_spill] sm:$0xff] }
  0xae   : > { %v942_v60 = vmul.f32 0.125, %v2498_v10  ;;  %v943_v38 = vmul.f32 0.125, %v2500_v63  ;;  %v944_v27 = vmul.f32 0.125, %v2502_v3  ;;  %v945_v13 = vmul.f32 0.125, %v2503_v6  ;;  %v2515_v10 = vld [vmem:[#allocation36_spill] sm:$0xff]  ;;  %v2518_v6 = vld [vmem:[#allocation37_spill] sm:$0xff] }
  0xaf   : > { %v946_v35 = vmul.f32 0.125, %v2505_v14  ;;  %v2507_v25 = vunpack.c.l.bf16 %v2506_v21  ;;  %v2509_v4 = vunpack.c.l.bf16 %v2508_v12  ;;  %v2510_v19 = vunpack.c.h.bf16 %v2506_v21  ;;  %v2522_v21 = vld [vmem:[#allocation39_spill] sm:$0xff] }
  0xb0   : > { %v2512_v56 = vunpack.c.l.bf16 %v2511_v0  ;;  %v2514_v44 = vunpack.c.l.bf16 %v2513_v42  ;;  %v2516_v18 = vunpack.c.l.bf16 %v2515_v10  ;;  %v2517_v2 = vunpack.c.h.bf16 %v2513_v42 }
  0xb1   : > { %v947_v54 = vmul.f32 0.125, %v2507_v25  ;;  %v948_v62 = vmul.f32 0.125, %v2509_v4  ;;  %v949_v41 = vmul.f32 0.125, %v2510_v19  ;;  %v2519_v23 = vunpack.c.l.bf16 %v2518_v6  ;;  %v2520_v25 = vld [vmem:[#allocation38_spill] sm:$0xff] }
  0xb2   : > { %v950_v52 = vmul.f32 0.125, %v2512_v56  ;;  %v951_v8 = vmul.f32 0.125, %v2514_v44  ;;  %v952_v63 = vmul.f32 0.125, %v2516_v18  ;;  %v953_v3 = vmul.f32 0.125, %v2517_v2 }
  0xb3   : > { %v954_v14 = vmul.f32 0.125, %v2519_v23  ;;  %v2521_v12 = vunpack.c.l.bf16 %v2520_v25  ;;  %v2523_v19 = vunpack.c.l.bf16 %v2522_v21  ;;  %v2524_v0 = vunpack.c.h.bf16 %v2520_v25 }
  0xb4   : > { %v2526_v44 = vunpack.c.l.bf16 %v2525_v51  ;;  %v995_v10 = vrot.slane %v923_v58, 1  ;;  %v996_v18 = vrot.slane %v924_v26, 1  ;;  %v998_v32 = vrot.slane %v925_v47, 1 }
  0xb5   : > { %v955_v4 = vmul.f32 0.125, %v2521_v12  ;;  %v956_v22 = vmul.f32 0.125, %v2523_v19  ;;  %v957_v56 = vmul.f32 0.125, %v2524_v0  ;;  %v999_v42 = vrot.slane %v926_v50, 1 }
  0xb6   : > { %v958_v37 = vmul.f32 0.125, %v2526_v44  ;;  %v1001_v2 = vrot.slane %v927_v36, 1  ;;  %v1002_v31 = vrot.slane %v928_v1, 1  ;;  %v1004_v6 = vrot.slane %v929_v48, 1 }
  0xb7   : > { %v1005_v23 = vrot.slane %v930_v5, 1  ;;  %v1007_v28 = vrot.slane %v931_v7, 1  ;;  %v997_v12 = vsel %vm832_vm0, %v995_v10, %v996_v18  ;;  %v1000_v21 = vsel %vm832_vm0, %v998_v32, %v999_v42 }
  0xb8   : > { %v1008_v19 = vrot.slane %v932_v57, 1  ;;  %v1010_v16 = vrot.slane %v933_v39, 1  ;;  %v1003_v25 = vsel %vm832_vm0, %v1001_v2, %v1002_v31  ;;  %v1011_v0 = vrot.slane %v934_v49, 1 }
  0xb9   : > { %v1006_v51 = vsel %vm832_vm0, %v1004_v6, %v1005_v23  ;;  %v1013_v58 = vrot.slane %v935_v61, 1  ;;  %v1014_v47 = vrot.slane %v936_v34, 1  ;;  %v1016_v50 = vrot.slane %v937_v55, 1 }
  0xba   : > { %v1009_v26 = vsel %vm832_vm0, %v1007_v28, %v1008_v19  ;;  %v1017_v36 = vrot.slane %v938_v15, 1  ;;  %v1012_v1 = vsel %vm832_vm0, %v1010_v16, %v1011_v0  ;;  %v1019_v48 = vrot.slane %v939_v11, 1  ;;  %v2529_v19 = vld [vmem:[#allocation6_spill] sm:$0xff] }
  0xbb   : > { %v1020_v5 = vrot.slane %v940_v46, 1  ;;  %v1022_v7 = vrot.slane %v941_v9, 1  ;;  %v1015_v32 = vsel %vm832_vm0, %v1013_v58, %v1014_v47  ;;  %v1023_v39 = vrot.slane %v942_v60, 1 }
  0xbc   : > { %v1018_v57 = vsel %vm832_vm0, %v1016_v50, %v1017_v36  ;;  %v1025_v31 = vrot.slane %v943_v38, 1  ;;  %v1026_v49 = vrot.slane %v944_v27, 1  ;;  %v1028_v61 = vrot.slane %v945_v13, 1 }
  0xbd   : > { %v1021_v44 = vsel %vm832_vm0, %v1019_v48, %v1020_v5  ;;  %v1029_v10 = vrot.slane %v946_v35, 1  ;;  %v1024_v28 = vsel %vm832_vm0, %v1022_v7, %v1023_v39  ;;  %v1031_v34 = vrot.slane %v947_v54, 1 }
  0xbe   : > { %v1032_v55 = vrot.slane %v948_v62, 1  ;;  %v1034_v15 = vrot.slane %v949_v41, 1  ;;  %v1027_v16 = vsel %vm832_vm0, %v1025_v31, %v1026_v49  ;;  %v1035_v46 = vrot.slane %v950_v52, 1 }
  0xbf   : > { %v1030_v11 = vsel %vm832_vm0, %v1028_v61, %v1029_v10  ;;  %v1037_v9 = vrot.slane %v951_v8, 1  ;;  %v1038_v60 = vrot.slane %v952_v63, 1  ;;  %v1040_v38 = vrot.slane %v953_v3, 1 }
  0xc0   : > { %v1033_v18 = vsel %vm832_vm0, %v1031_v34, %v1032_v55  ;;  %v1041_v42 = vrot.slane %v954_v14, 1  ;;  %v1036_v27 = vsel %vm832_vm0, %v1034_v15, %v1035_v46  ;;  %v1043_v13 = vrot.slane %v955_v4, 1 }
  0xc1   : > { %v1044_v35 = vrot.slane %v956_v22, 1  ;;  %v1046_v2 = vrot.slane %v957_v56, 1  ;;  %v1039_v54 = vsel %vm832_vm0, %v1037_v9, %v1038_v60  ;;  %v1047_v41 = vrot.slane %v958_v37, 1 }
  0xc2   : > { %v1042_v62 = vsel %vm832_vm0, %v1040_v38, %v1041_v42  ;;  %v1067_v6 = vadd.f32 %v997_v12, %v2083_v30  ;;  %v1068_v8 = vadd.f32 %v1000_v21, %v2087_v17  ;;  %v1069_v63 = vadd.f32 %v1003_v25, %v2090_v53  ;;  %v2527_v12 = vld [vmem:[#allocation4_spill] sm:$0xff]  ;;  %v2528_v21 = vld [vmem:[#allocation5_spill] sm:$0xff] }
  0xc3   : > { %v1045_v52 = vsel %vm832_vm0, %v1043_v13, %v1044_v35  ;;  %v1070_v3 = vadd.f32 %v1006_v51, %v2093_v24  ;;  %v1048_v14 = vsel %vm832_vm0, %v1046_v2, %v1047_v41  ;;  %v1071_v22 = vadd.f32 %v1009_v26, %v2097_v45  ;;  %v2530_v45 = vld [vmem:[#allocation7_spill] sm:$0xff] }
  0xc4   : > { %v1072_v4 = vadd.f32 %v1012_v1, %v2100_v20  ;;  %v1073_v56 = vadd.f32 %v1015_v32, %v2103_v33  ;;  %v1074_v37 = vadd.f32 %v1018_v57, %v2106_v29  ;;  %v1075_v30 = vadd.f32 %v1021_v44, %v2109_v43  ;;  %v2531_v20 = vld [vmem:[#allocation8_spill] sm:$0xff]  ;;  %v2532_v33 = vld [vmem:[#allocation9_spill] sm:$0xff]  ;;  %v2533_v29 = vld [vmem:[#allocation10_spill] sm:$0xff] }
  0xc5   : > { %v1076_v23 = vadd.f32 %v1024_v28, %v2112_v40  ;;  %v1077_v17 = vadd.f32 %v1027_v16, %v2115_v59  ;;  %v1078_v53 = vadd.f32 %v1030_v11, %v2527_v12  ;;  %v1079_v24 = vadd.f32 %v1033_v18, %v2528_v21 }
  0xc6   : > { %v1080_v25 = vadd.f32 %v1036_v27, %v2529_v19  ;;  %v1081_v51 = vadd.f32 %v1039_v54, %v2530_v45  ;;  %v1082_v0 = vadd.f32 %v1042_v62, %v2531_v20  ;;  %v1083_v58 = vadd.f32 %v1045_v52, %v2532_v33 }
  0xc7   : > { %v1084_v26 = vadd.f32 %v1048_v14, %v2533_v29  ;;  %v1085_v43 = vmul.f32 0.125, %v1067_v6  ;;  %v1086_v47 = vmul.f32 0.125, %v1069_v63  ;;  %v1087_v40 = vmul.f32 0.125, %v1071_v22 }
  0xc8   : > { %v1088_v50 = vmul.f32 0.125, %v1073_v56  ;;  %v1089_v59 = vmul.f32 0.125, %v1075_v30  ;;  %v1090_v36 = vmul.f32 0.125, %v1077_v17  ;;  %v1091_v1 = vmul.f32 0.125, %v1079_v24 }
  0xc9   : > { %v1092_v48 = vmul.f32 0.125, %v1081_v51  ;;  %v1093_v5 = vmul.f32 0.375, %v1068_v8  ;;  %v1094_v7 = vmul.f32 0.375, %v1070_v3  ;;  %v1095_v32 = vmul.f32 0.375, %v1072_v4 }
  0xca   : > { %v1096_v57 = vmul.f32 0.375, %v1074_v37  ;;  %v1097_v39 = vmul.f32 0.375, %v1076_v23  ;;  %v1098_v31 = vmul.f32 0.375, %v1078_v53  ;;  %v1099_v44 = vmul.f32 0.375, %v1080_v25 }
  0xcb   : > { %v1100_v49 = vmul.f32 0.375, %v1082_v0  ;;  %v1101_v61 = vadd.f32 %v1093_v5, %v1085_v43  ;;  %v1102_v10 = vadd.f32 %v1094_v7, %v1086_v47  ;;  %v1103_v28 = vadd.f32 %v1095_v32, %v1087_v40 }
  0xcc   : > { %v1104_v34 = vadd.f32 %v1096_v57, %v1088_v50  ;;  %v1105_v55 = vadd.f32 %v1097_v39, %v1089_v59  ;;  %v1106_v15 = vadd.f32 %v1098_v31, %v1090_v36  ;;  %v1107_v16 = vadd.f32 %v1099_v44, %v1091_v1 }
  0xcd   : > { %v1108_v11 = vadd.f32 %v1100_v49, %v1092_v48  ;;  %v1109_v46 = vmul.f32 0.375, %v1069_v63  ;;  %v1110_v9 = vmul.f32 0.375, %v1071_v22  ;;  %v1111_v18 = vmul.f32 0.375, %v1073_v56 }
  0xce   : > { %v1112_v60 = vmul.f32 0.375, %v1075_v30  ;;  %v1113_v38 = vmul.f32 0.375, %v1077_v17  ;;  %v1114_v42 = vmul.f32 0.375, %v1079_v24  ;;  %v1115_v27 = vmul.f32 0.375, %v1081_v51 }
  0xcf   : > { %v1116_v13 = vmul.f32 0.375, %v1083_v58  ;;  %v1117_v35 = vadd.f32 %v1109_v46, %v1101_v61  ;;  %v1118_v2 = vadd.f32 %v1110_v9, %v1102_v10  ;;  %v1119_v54 = vadd.f32 %v1111_v18, %v1103_v28 }
  0xd0   : > { %v1120_v62 = vadd.f32 %v1112_v60, %v1104_v34  ;;  %v1121_v41 = vadd.f32 %v1113_v38, %v1105_v55  ;;  %v1122_v6 = vadd.f32 %v1114_v42, %v1106_v15  ;;  %v1123_v52 = vadd.f32 %v1115_v27, %v1107_v16 }
  0xd1   : > { %v1124_v8 = vadd.f32 %v1116_v13, %v1108_v11  ;;  %v1125_v63 = vmul.f32 0.125, %v1070_v3  ;;  %v1126_v14 = vmul.f32 0.125, %v1072_v4  ;;  %v1127_v12 = vmul.f32 0.125, %v1074_v37 }
  0xd2   : > { %v1128_v22 = vmul.f32 0.125, %v1076_v23  ;;  %v1129_v21 = vmul.f32 0.125, %v1078_v53  ;;  %v1130_v56 = vmul.f32 0.125, %v1080_v25  ;;  %v1131_v30 = vmul.f32 0.125, %v1082_v0 }
  0xd3   : > { %v1132_v17 = vmul.f32 0.125, %v1084_v26  ;;  %v1133_v24 = vadd.f32 %v1125_v63, %v1117_v35  ;;  %v1134_v19 = vadd.f32 %v1126_v14, %v1118_v2  ;;  %v1135_v45 = vadd.f32 %v1127_v12, %v1119_v54 }
  0xd4   : > { %v1136_v51 = vadd.f32 %v1128_v22, %v1120_v62  ;;  %v1137_v20 = vadd.f32 %v1129_v21, %v1121_v41  ;;  %v1138_v33 = vadd.f32 %v1130_v56, %v1122_v6  ;;  %v1139_v58 = vadd.f32 %v1131_v30, %v1123_v52 }
  0xd5   : > { %v1140_v3 = vadd.f32 %v1132_v17, %v1124_v8  ;;  %v1314_v29 = vpack.c.bf16 %v1134_v19, %v1133_v24 }
  0xd6   : > { %v1319_v4 = vpack.c.bf16 %v1136_v51, %v1135_v45  ;;  %v1324_v37 = vpack.c.bf16 %v1138_v33, %v1137_v20 }
  0xd7   : > { %v1329_v23 = vpack.c.bf16 %v1140_v3, %v1139_v58  ;;  %1315 = vst [vmem:[%s561_s17] sm:$0xff] %v1314_v29  }
  0xd8   : > { %1331 = vst [vmem:[%s561_s17 + $0x8] sm:$0xff] %v1319_v4   ;;  %1332 = vst [vmem:[%s561_s17 + $0x10] sm:$0xff] %v1324_v37  }
  0xd9   : > { %1333 = vst [vmem:[%s561_s17 + $0x18] sm:$0xff] %v1329_v23  }
  0xda PF: > { %s12_s13 = sadd.s32 1, %s1416_s13   ;;  %s2534_s9 = smov %s1404_s10 }
  0xdb   : > { %p9_p10 = scmp.ge.s32.totalorder %s12_s13, 4   ;;  %s2535_s10 = smov %s1472_s18 }
  0xdc   : > { %s2536_s11 = smov %s1412_s12  ;;  %s2537_s12 = smov %s2539_s14 }
  0xdd   :  { %11 = sbr.rel (!%p9_p10) target bundleno = 3 (0x3), region = 153 }

// kernel: resblock_forward.6
= control target key start
LH: loop header
LB: loop body
LE: loop exit
PB: predicated region body
PF: predicated region fallthrough
CT: control target
= control target key end

     0   :  { %s2265_s9 = smov 0   ;;  %s2267_s10 = smov 0   ;;  %s3381_s0 = inlined_call_operand.vmem [shape: bf16[2,21,21,128], index: 0, kind: input, shape index: {}]   ;;  %s3382_s1 = inlined_call_operand.vmem [shape: bf16[2,9,18,128], index: 1, kind: output, shape index: {0}]   ;;  %s3383_s2 = inlined_call_operand.vmem [shape: bf16[2,9,18,128], index: 2, kind: output, shape index: {1}]  }
   0x1   :  { %s2269_s11 = smov 0  }
   0x2 LB: > { %s25_s12 = sadd.s32 1, %s2244_s10  ;;  %p1974_p0 = scmp.ge.s32.totalorder %s2248_s11, 1  ;;  %s2248_s11 = sphi %s2269_s11, %s13_s11   ;;  %s2244_s10 = sphi %s2267_s10, %s3593_s10   ;;  %s2240_s9 = sphi %s2265_s9, %s3592_s9  }
   0x3   : > { %p27_p1 = scmp.ge.s32.totalorder %s25_s12, 2  ;;  %p136_p2 = scmp.lt.s32.totalorder %s2248_s11, 3 }
   0x5   : > { %s3595_s12 = smov (%p27_p1, %s25_s12), 0  ;;  %p137_p3 = pnand %p1974_p0, %p136_p2 }
   0x7   : > { %140 = sbr.rel (%p137_p3) target bundleno = 287 (0x11f), region = 24 }
   0xc   : > { %p172_p4 = scmp.lt.s32.totalorder %s2240_s9, 1  ;;  %vm511_vm0 = vcmask 1046528   ;;  %vm743_vm1 = vcmask 1045504   ;;  %vm1038_vm2 = vcmask 1044480  }
   0xe   : > { %s3597_s9 = smov (!%p172_p4, %s2240_s9), 1 }
   0xf   : > { %s2200_s13 = smul.u32 252, %s3597_s9 }
  0x10   : > { %s2201_s17 = smul.u32 108, %s3597_s9 }
  0x11   : > { %s2289_s16 = scalar_lea.vmem %s3381_s0, %s2200_s13 }
  0x12   : > { %v2089_v0 = vld [vmem:[%s2289_s16] sm:$0xff]   ;;  %v198_v1 = vld [vmem:[%s2289_s16 + $0x8] sm:$0x7]  ;;  %v199_v2 = vld [vmem:[%s2289_s16 + $0xc] sm:$0xff]   ;;  %s2460_s20 = scalar_lea.vmem %s3382_s1, %s2201_s17  ;;  %s3257_s23 = scalar_lea.vmem %s3383_s2, %s2201_s17 }
  0x13   : > { %v2090_v3 = vunpack.c.l.bf16 %v2089_v0  ;;  %v2091_v4 = vunpack.c.h.bf16 %v2089_v0  ;;  %v201_v5 = vld [vmem:[%s2289_s16 + $0x14] sm:$0x7]  ;;  %v2182_v6 = vld [vmem:[%s2289_s16 + $0x18] sm:$0xff]   ;;  %v204_v7 = vld [vmem:[%s2289_s16 + $0x20] sm:$0x7]  ;;  %v261_v8 = vunpack.c.l.bf16 %v198_v1  ;;  %v262_v9 = vunpack.c.l.bf16 %v199_v2 }
  0x14   : > { %v2094_v10 = vunpack.c.l.bf16 %v2182_v6  ;;  %v2095_v11 = vunpack.c.h.bf16 %v2182_v6  ;;  %v205_v12 = vld [vmem:[%s2289_s16 + $0x24] sm:$0xff]   ;;  %v207_v13 = vld [vmem:[%s2289_s16 + $0x2c] sm:$0x7]  ;;  %v263_v14 = vunpack.c.h.bf16 %v199_v2  ;;  %v264_v15 = vunpack.c.l.bf16 %v201_v5 }
  0x15   : > { %v267_v16 = vunpack.c.l.bf16 %v204_v7  ;;  %v268_v17 = vunpack.c.l.bf16 %v205_v12  ;;  %v269_v18 = vunpack.c.h.bf16 %v205_v12  ;;  %v270_v19 = vunpack.c.l.bf16 %v207_v13 }
  0x16   : > { %v2299_v20 = vmul.f32 0.125, %v2090_v3  ;;  %v2301_v21 = vmul.f32 0.125, %v2091_v4  ;;  %v2303_v22 = vmul.f32 0.125, %v261_v8  ;;  %v2305_v23 = vmul.f32 0.125, %v262_v9 }
  0x17   : > { %v2307_v24 = vmul.f32 0.125, %v263_v14  ;;  %v2309_v25 = vmul.f32 0.125, %v264_v15  ;;  %v2311_v26 = vmul.f32 0.125, %v2094_v10  ;;  %v2313_v27 = vmul.f32 0.125, %v2095_v11 }
  0x18   : > { %v2315_v28 = vmul.f32 0.125, %v267_v16  ;;  %v2317_v29 = vmul.f32 0.125, %v268_v17  ;;  %v2319_v30 = vmul.f32 0.125, %v269_v18  ;;  %v2321_v31 = vmul.f32 0.125, %v270_v19 }
  0x19   : > { %v385_v32 = vmul.f32 0.375, %v2090_v3  ;;  %v386_v33 = vmul.f32 0.375, %v2091_v4  ;;  %v2323_v34 = vmul.f32 0.375, %v261_v8  ;;  %v388_v35 = vmul.f32 0.375, %v262_v9 }
  0x1a   : > { %v389_v36 = vmul.f32 0.375, %v263_v14  ;;  %v2325_v37 = vmul.f32 0.375, %v264_v15  ;;  %v391_v38 = vmul.f32 0.375, %v2094_v10  ;;  %v392_v39 = vmul.f32 0.375, %v2095_v11 }
  0x1b   : > { %v2327_v40 = vmul.f32 0.375, %v267_v16  ;;  %v394_v41 = vmul.f32 0.375, %v268_v17  ;;  %v395_v42 = vmul.f32 0.375, %v269_v18  ;;  %v2329_v43 = vmul.f32 0.375, %v270_v19 }
  0x1c   : > { %v512_v44 = vrot.slane %v385_v32, 1  ;;  %v513_v45 = vrot.slane %v386_v33, 1  ;;  %v515_v46 = vrot.slane %v2323_v34, 1  ;;  %v517_v47 = vrot.slane %v388_v35, 1 }
  0x1d   : > { %v518_v48 = vrot.slane %v389_v36, 1  ;;  %v520_v49 = vrot.slane %v2325_v37, 1  ;;  %v522_v50 = vrot.slane %v391_v38, 1  ;;  %v523_v51 = vrot.slane %v392_v39, 1 }
  0x1e   : > { %v514_v52 = vsel %vm511_vm0, %v512_v44, %v513_v45  ;;  %v516_v53 = vsel %vm511_vm0, %v513_v45, %v515_v46  ;;  %v525_v54 = vrot.slane %v2327_v40, 1  ;;  %v527_v55 = vrot.slane %v394_v41, 1 }
  0x1f   : > { %v519_v56 = vsel %vm511_vm0, %v517_v47, %v518_v48  ;;  %v521_v57 = vsel %vm511_vm0, %v518_v48, %v520_v49  ;;  %v524_v58 = vsel %vm511_vm0, %v522_v50, %v523_v51  ;;  %v528_v59 = vrot.slane %v395_v42, 1 }
  0x20   : > { %v526_v60 = vsel %vm511_vm0, %v523_v51, %v525_v54  ;;  %v530_v61 = vrot.slane %v2329_v43, 1  ;;  %v680_v62 = vadd.f32 %v514_v52, %v2299_v20  ;;  %v681_v63 = vadd.f32 %v516_v53, %v2301_v21 }
  0x21   : > { %v529_v0 = vsel %vm511_vm0, %v527_v55, %v528_v59  ;;  %v683_v1 = vadd.f32 %v519_v56, %v2305_v23  ;;  %v684_v2 = vadd.f32 %v521_v57, %v2307_v24  ;;  %v686_v3 = vadd.f32 %v524_v58, %v2311_v26 }
  0x22   : > { %v531_v4 = vsel %vm511_vm0, %v528_v59, %v530_v61  ;;  %v687_v5 = vadd.f32 %v526_v60, %v2313_v27  ;;  %v689_v6 = vadd.f32 %v529_v0, %v2317_v29  ;;  %v744_v7 = vrot.slane %v385_v32, 2 }
  0x23   : > { %v690_v8 = vadd.f32 %v531_v4, %v2319_v30  ;;  %v745_v9 = vrot.slane %v386_v33, 2  ;;  %v747_v10 = vrot.slane %v2323_v34, 2  ;;  %v749_v11 = vrot.slane %v388_v35, 2 }
  0x24   : > { %v750_v12 = vrot.slane %v389_v36, 2  ;;  %v752_v13 = vrot.slane %v2325_v37, 2  ;;  %v754_v14 = vrot.slane %v391_v38, 2  ;;  %v755_v15 = vrot.slane %v392_v39, 2 }
  0x25   : > { %v746_v16 = vsel %vm743_vm1, %v744_v7, %v745_v9  ;;  %v748_v17 = vsel %vm743_vm1, %v745_v9, %v747_v10  ;;  %v757_v18 = vrot.slane %v2327_v40, 2  ;;  %v759_v19 = vrot.slane %v394_v41, 2 }
  0x26   : > { %v751_v32 = vsel %vm743_vm1, %v749_v11, %v750_v12  ;;  %v753_v33 = vsel %vm743_vm1, %v750_v12, %v752_v13  ;;  %v756_v35 = vsel %vm743_vm1, %v754_v14, %v755_v15  ;;  %v760_v36 = vrot.slane %v395_v42, 2 }
  0x27   : > { %v758_v38 = vsel %vm743_vm1, %v755_v15, %v757_v18  ;;  %v762_v39 = vrot.slane %v2329_v43, 2  ;;  %v912_v44 = vadd.f32 %v746_v16, %v680_v62  ;;  %v913_v45 = vadd.f32 %v748_v17, %v681_v63 }
  0x28   : > { %v761_v47 = vsel %vm743_vm1, %v759_v19, %v760_v36  ;;  %v915_v41 = vadd.f32 %v751_v32, %v683_v1  ;;  %v916_v48 = vadd.f32 %v753_v33, %v684_v2  ;;  %v918_v50 = vadd.f32 %v756_v35, %v686_v3  ;;  %v2183_v19 = vld [vmem:[%s2289_s16 + $0x30] sm:$0xff]  }
  0x29   : > { %v763_v51 = vsel %vm743_vm1, %v760_v36, %v762_v39  ;;  %v919_v52 = vadd.f32 %v758_v38, %v687_v5  ;;  %v921_v53 = vadd.f32 %v761_v47, %v689_v6  ;;  %v1039_v42 = vrot.slane %v2299_v20, 3 }
  0x2a   : > { %v922_v55 = vadd.f32 %v763_v51, %v690_v8  ;;  %v1040_v56 = vrot.slane %v2301_v21, 3  ;;  %v1042_v57 = vrot.slane %v2303_v22, 3  ;;  %v1044_v58 = vrot.slane %v2305_v23, 3 }
  0x2b   : > { %v1045_v59 = vrot.slane %v2307_v24, 3  ;;  %v1047_v60 = vrot.slane %v2309_v25, 3  ;;  %v1049_v62 = vrot.slane %v2311_v26, 3  ;;  %v1050_v63 = vrot.slane %v2313_v27, 3 }
  0x2c   : > { %v1041_v0 = vsel %vm1038_vm2, %v1039_v42, %v1040_v56  ;;  %v1043_v1 = vsel %vm1038_vm2, %v1040_v56, %v1042_v57  ;;  %v1052_v20 = vrot.slane %v2315_v28, 3  ;;  %v1054_v21 = vrot.slane %v2317_v29, 3 }
  0x2d   : > { %v1046_v2 = vsel %vm1038_vm2, %v1044_v58, %v1045_v59  ;;  %v1048_v23 = vsel %vm1038_vm2, %v1045_v59, %v1047_v60  ;;  %v1051_v24 = vsel %vm1038_vm2, %v1049_v62, %v1050_v63  ;;  %v1055_v3 = vrot.slane %v2319_v30, 3 }
  0x2e   : > { %v1053_v26 = vsel %vm1038_vm2, %v1050_v63, %v1052_v20  ;;  %v1057_v27 = vrot.slane %v2321_v31, 3  ;;  %v1207_v4 = vadd.f32 %v1041_v0, %v912_v44  ;;  %v1208_v5 = vadd.f32 %v1043_v1, %v913_v45 }
  0x2f   : > { %v1056_v6 = vsel %vm1038_vm2, %v1054_v21, %v1055_v3  ;;  %v2398_v7 = vadd.f32 %v1046_v2, %v915_v41  ;;  %v2400_v29 = vadd.f32 %v1048_v23, %v916_v48  ;;  %v2402_v8 = vadd.f32 %v1051_v24, %v918_v50  ;;  %v2184_v41 = vld [vmem:[%s2289_s16 + $0x48] sm:$0xff]  }
  0x30   : > { %v1058_v9 = vsel %vm1038_vm2, %v1055_v3, %v1057_v27  ;;  %v2405_v11 = vadd.f32 %v1053_v26, %v919_v52  ;;  %v2407_v30 = vadd.f32 %v1056_v6, %v921_v53  ;;  %v1270_v12 = vmul.f32 0.125, %v1207_v4  ;;  %v211_v53 = vld [vmem:[%s2289_s16 + $0x3c] sm:$0xff]  }
  0x31   : > { %v2409_v14 = vadd.f32 %v1058_v9, %v922_v55  ;;  %v1271_v15 = vmul.f32 0.125, %v1208_v5  ;;  %v1324_v16 = vmul.f32 0.375, %v2398_v7  ;;  %v1325_v17 = vmul.f32 0.375, %v2400_v29 }
  0x32   : > { %v2415_v32 = vmul.f32 0.125, %v2407_v30  ;;  %v2418_v33 = vmul.f32 0.375, %v2402_v8  ;;  %v2421_v35 = vmul.f32 0.375, %v2405_v11  ;;  %v682_v36 = vadd.f32 %v515_v46, %v2303_v22 }
  0x33   : > { %v2427_v38 = vmul.f32 0.125, %v2409_v14  ;;  %v1378_v44 = vadd.f32 %v1324_v16, %v1270_v12  ;;  %v1379_v45 = vadd.f32 %v1325_v17, %v1271_v15  ;;  %v685_v47 = vadd.f32 %v520_v49, %v2309_v25 }
  0x34   : > { %v688_v48 = vadd.f32 %v525_v54, %v2315_v28  ;;  %v691_v50 = vadd.f32 %v530_v61, %v2321_v31  ;;  %v914_v22 = vadd.f32 %v747_v10, %v682_v36  ;;  %v2098_v46 = vunpack.c.l.bf16 %v2183_v19 }
  0x35   : > { %v1435_v51 = vadd.f32 %v1378_v44, %v2418_v33  ;;  %v1436_v52 = vadd.f32 %v1379_v45, %v2421_v35  ;;  %v917_v25 = vadd.f32 %v752_v13, %v685_v47  ;;  %v2099_v49 = vunpack.c.h.bf16 %v2183_v19 }
  0x36   : > { %v920_v28 = vadd.f32 %v757_v18, %v688_v48  ;;  %v923_v31 = vadd.f32 %v762_v39, %v691_v50  ;;  %v1209_v54 = vadd.f32 %v1042_v57, %v914_v22  ;;  %v2102_v34 = vunpack.c.l.bf16 %v2184_v41 }
  0x37   : > { %v1498_v61 = vadd.f32 %v1435_v51, %v2415_v32  ;;  %v1499_v10 = vadd.f32 %v1436_v52, %v2427_v38  ;;  %v2453_v42 = vadd.f32 %v1047_v60, %v917_v25  ;;  %v2103_v55 = vunpack.c.h.bf16 %v2184_v41 }
  0x38   : > { %v2462_v37 = vadd.f32 %v1052_v20, %v920_v28  ;;  %v2464_v40 = vadd.f32 %v1057_v27, %v923_v31  ;;  %v1272_v43 = vmul.f32 0.125, %v1209_v54  ;;  %v274_v13 = vunpack.c.l.bf16 %v211_v53  ;;  %v210_v54 = vld [vmem:[%s2289_s16 + $0x38] sm:$0x7] }
  0x39   : > { %v2135_v18 = vpack.c.bf16 %v1499_v10, %v1498_v61  ;;  %v1326_v39 = vmul.f32 0.375, %v2453_v42  ;;  %v275_v56 = vunpack.c.h.bf16 %v211_v53  ;;  %v334_v57 = vmul.f32 0.125, %v2098_v46 }
  0x3a   : > { %v2468_v58 = vmul.f32 0.125, %v2464_v40  ;;  %v2471_v59 = vmul.f32 0.375, %v2462_v37  ;;  %v2473_v60 = vmul.f32 0.125, %v2099_v49  ;;  %v337_v62 = vmul.f32 0.125, %v274_v13 }
  0x3b   : > { %2136 = vst [vmem:[%s2460_s20] sm:$0xff] %v2135_v18   ;;  %v1380_v63 = vadd.f32 %v1326_v39, %v1272_v43  ;;  %v2476_v0 = vmul.f32 0.125, %v275_v56  ;;  %v340_v1 = vmul.f32 0.125, %v2102_v34  ;;  %v2478_v20 = vmul.f32 0.125, %v2103_v55  ;;  %v213_v43 = vld [vmem:[%s2289_s16 + $0x44] sm:$0x7] }
  0x3c   : > { %v397_v21 = vmul.f32 0.375, %v2098_v46  ;;  %v2480_v2 = vmul.f32 0.375, %v2099_v49  ;;  %v400_v23 = vmul.f32 0.375, %v274_v13  ;;  %v2482_v24 = vmul.f32 0.375, %v275_v56 }
  0x3d   : > { %v1437_v3 = vadd.f32 %v1380_v63, %v2471_v59  ;;  %v403_v26 = vmul.f32 0.375, %v2102_v34  ;;  %v2485_v27 = vmul.f32 0.375, %v2103_v55  ;;  %v1059_v4 = vrot.slane %v334_v57, 3 }
  0x3e   : > { %v532_v5 = vrot.slane %v397_v21, 1  ;;  %v533_v6 = vrot.slane %v2480_v2, 1  ;;  %v537_v9 = vrot.slane %v400_v23, 1  ;;  %v538_v12 = vrot.slane %v2482_v24, 1 }
  0x3f   : > { %v1500_v15 = vadd.f32 %v1437_v3, %v2468_v58  ;;  %v542_v16 = vrot.slane %v403_v26, 1  ;;  %v543_v17 = vrot.slane %v2485_v27, 1  ;;  %v764_v19 = vrot.slane %v397_v21, 2 }
  0x40   : > { %v534_v36 = vsel %vm511_vm0, %v532_v5, %v533_v6  ;;  %v539_v44 = vsel %vm511_vm0, %v537_v9, %v538_v12  ;;  %v765_v45 = vrot.slane %v2480_v2, 2  ;;  %v769_v47 = vrot.slane %v400_v23, 2 }
  0x41   : > { %v2036_v41 = vpack.c.bf16 %v1500_v15, %v1500_v15  ;;  %v544_v48 = vsel %vm511_vm0, %v542_v16, %v543_v17  ;;  %v692_v50 = vadd.f32 %v534_v36, %v334_v57  ;;  %v695_v22 = vadd.f32 %v539_v44, %v337_v62  ;;  %v216_v57 = vld [vmem:[%s2289_s16 + $0x50] sm:$0x7] }
  0x42   : > { %v698_v46 = vadd.f32 %v544_v48, %v340_v1  ;;  %v766_v51 = vsel %vm743_vm1, %v764_v19, %v765_v45  ;;  %v770_v52 = vrot.slane %v2482_v24, 2  ;;  %v774_v25 = vrot.slane %v403_v26, 2 }
  0x43   : > { %1671 = vst [vmem:[%s2460_s20 + $0x8] sm:$0x1] %v2036_v41  ;;  %v775_v49 = vrot.slane %v2485_v27, 2  ;;  %v924_v53 = vadd.f32 %v766_v51, %v692_v50  ;;  %v1060_v28 = vrot.slane %v2473_v60, 3  ;;  %v1064_v31 = vrot.slane %v337_v62, 3 }
  0x44   : > { %v771_v34 = vsel %vm743_vm1, %v769_v47, %v770_v52  ;;  %v1065_v61 = vrot.slane %v2476_v0, 3  ;;  %v1069_v10 = vrot.slane %v340_v1, 3  ;;  %v1070_v55 = vrot.slane %v2478_v20, 3 }
  0x45   : > { %v776_v13 = vsel %vm743_vm1, %v774_v25, %v775_v49  ;;  %v927_v18 = vadd.f32 %v771_v34, %v695_v22  ;;  %v1061_v39 = vsel %vm1038_vm2, %v1059_v4, %v1060_v28  ;;  %v1276_v56 = vmul.f32 0.125, %v2402_v8 }
  0x46   : > { %v930_v63 = vadd.f32 %v776_v13, %v698_v46  ;;  %v1066_v62 = vsel %vm1038_vm2, %v1064_v31, %v1065_v61  ;;  %v1071_v21 = vsel %vm1038_vm2, %v1069_v10, %v1070_v55  ;;  %v2517_v23 = vadd.f32 %v1061_v39, %v924_v53 }
  0x47   : > { %v1222_v3 = vadd.f32 %v1066_v62, %v927_v18  ;;  %v2520_v1 = vmul.f32 0.375, %v2407_v30  ;;  %v273_v26 = vunpack.c.l.bf16 %v210_v54  ;;  %v276_v5 = vunpack.c.l.bf16 %v213_v43 }
  0x48   : > { %v2522_v9 = vadd.f32 %v1071_v21, %v930_v63  ;;  %v2525_v4 = vmul.f32 0.375, %v2517_v23  ;;  %v279_v8 = vunpack.c.l.bf16 %v216_v57  ;;  %v1277_v15 = vmul.f32 0.125, %v2405_v11 }
  0x49   : > { %v1285_v16 = vmul.f32 0.125, %v1222_v3  ;;  %v2528_v19 = vmul.f32 0.375, %v1222_v3  ;;  %v1384_v36 = vadd.f32 %v2520_v1, %v1276_v56  ;;  %v336_v44 = vmul.f32 0.125, %v273_v26 }
  0x4a   : > { %v2532_v47 = vmul.f32 0.375, %v2522_v9  ;;  %v339_v30 = vmul.f32 0.125, %v276_v5  ;;  %v2534_v41 = vmul.f32 0.125, %v279_v8  ;;  %v399_v48 = vmul.f32 0.375, %v273_v26  ;;  %v217_v26 = vld [vmem:[%s2289_s16 + $0x54] sm:$0xff]  }
  0x4b   : > { %v1441_v50 = vadd.f32 %v1384_v36, %v2525_v4  ;;  %v402_v22 = vmul.f32 0.375, %v276_v5  ;;  %v2537_v46 = vmul.f32 0.375, %v279_v8  ;;  %v1062_v51 = vrot.slane %v336_v44, 3 }
  0x4c   : > { %v2540_v11 = vadd.f32 %v2532_v47, %v1285_v16  ;;  %v535_v25 = vrot.slane %v399_v48, 1  ;;  %v767_v53 = vrot.slane %v399_v48, 2  ;;  %v1067_v31 = vrot.slane %v339_v30, 3  ;;  %v219_v48 = vld [vmem:[%s2289_s16 + $0x5c] sm:$0x7] }
  0x4d   : > { %v1504_v54 = vadd.f32 %v1441_v50, %v1285_v16  ;;  %v540_v34 = vrot.slane %v402_v22, 1  ;;  %v545_v10 = vrot.slane %v2537_v46, 1  ;;  %v772_v43 = vrot.slane %v402_v22, 2 }
  0x4e   : > { %3453 = vst [vmem:[#allocation2_spill] sm:$0xff] %v2540_v11  ;;  %v536_v13 = vsel %vm511_vm0, %v533_v6, %v535_v25  ;;  %v768_v18 = vsel %vm743_vm1, %v765_v45, %v767_v53  ;;  %v777_v39 = vrot.slane %v2537_v46, 2  ;;  %v1063_v56 = vsel %vm1038_vm2, %v1060_v28, %v1062_v51 }
  0x4f   : > { %v2037_v57 = vpack.c.bf16 %v1504_v54, %v1504_v54  ;;  %v541_v63 = vsel %vm511_vm0, %v538_v12, %v540_v34  ;;  %v546_v2 = vsel %vm511_vm0, %v543_v17, %v545_v10  ;;  %v693_v6 = vadd.f32 %v536_v13, %v2473_v60 }
  0x50   : > { %v696_v45 = vadd.f32 %v541_v63, %v2476_v0  ;;  %v699_v62 = vadd.f32 %v546_v2, %v2478_v20  ;;  %v773_v28 = vsel %vm743_vm1, %v770_v52, %v772_v43  ;;  %v778_v24 = vsel %vm743_vm1, %v775_v49, %v777_v39 }
  0x51   : > { %1672 = vst [vmem:[%s2460_s20 + $0xc] sm:$0xf] %v2037_v57  ;;  %v925_v12 = vadd.f32 %v768_v18, %v693_v6  ;;  %v1068_v21 = vsel %vm1038_vm2, %v1065_v61, %v1067_v31  ;;  %v1072_v27 = vrot.slane %v2534_v41, 3  ;;  %v2568_v17 = vmul.f32 0.375, %v2409_v14 }
  0x52   : > { %v928_v60 = vadd.f32 %v773_v28, %v696_v45  ;;  %v931_v0 = vadd.f32 %v778_v24, %v699_v62  ;;  %v694_v3 = vadd.f32 %v535_v25, %v336_v44  ;;  %v697_v20 = vadd.f32 %v540_v34, %v339_v30 }
  0x53   : > { %v1073_v52 = vsel %vm1038_vm2, %v1070_v55, %v1072_v27  ;;  %v1220_v49 = vadd.f32 %v1063_v56, %v925_v12  ;;  %v1385_v5 = vadd.f32 %v2568_v17, %v1277_v15  ;;  %v1278_v61 = vmul.f32 0.125, %v2462_v37 }
  0x54   : > { %v1223_v8 = vadd.f32 %v1068_v21, %v928_v60  ;;  %v2576_v16 = vadd.f32 %v1073_v52, %v931_v0  ;;  %v926_v36 = vadd.f32 %v767_v53, %v694_v3  ;;  %v929_v14 = vadd.f32 %v772_v43, %v697_v20 }
  0x55   : > { %v2579_v50 = vmul.f32 0.375, %v1220_v49  ;;  %v2582_v44 = vmul.f32 0.375, %v2464_v40  ;;  %v280_v30 = vunpack.c.l.bf16 %v217_v26  ;;  %v281_v22 = vunpack.c.h.bf16 %v217_v26 }
  0x56   : > { %v1286_v25 = vmul.f32 0.125, %v1223_v8  ;;  %v2584_v55 = vmul.f32 0.375, %v1223_v8  ;;  %v1340_v15 = vmul.f32 0.375, %v2576_v16  ;;  %v1221_v54 = vadd.f32 %v1062_v51, %v926_v36 }
  0x57   : > { %v1442_v37 = vadd.f32 %v1385_v5, %v2579_v50  ;;  %v1224_v34 = vadd.f32 %v1067_v31, %v929_v14  ;;  %v1386_v53 = vadd.f32 %v2582_v44, %v1278_v61  ;;  %v282_v43 = vunpack.c.l.bf16 %v219_v48 }
  0x58   : > { %v2589_v13 = vadd.f32 %v1340_v15, %v1286_v25  ;;  %v2591_v18 = vmul.f32 0.375, %v1221_v54  ;;  %v343_v40 = vmul.f32 0.125, %v280_v30  ;;  %v344_v56 = vmul.f32 0.125, %v281_v22 }
  0x59   : > { %v1505_v57 = vadd.f32 %v1442_v37, %v1286_v25  ;;  %v2593_v63 = vmul.f32 0.125, %v1224_v34  ;;  %v345_v2 = vmul.f32 0.125, %v282_v43  ;;  %v406_v6 = vmul.f32 0.375, %v280_v30 }
  0x5a   : > { %3454 = vst [vmem:[#allocation3_spill] sm:$0xff] %v2589_v13  ;;  %v1443_v51 = vadd.f32 %v1386_v53, %v2591_v18  ;;  %v407_v45 = vmul.f32 0.375, %v281_v22  ;;  %v408_v62 = vmul.f32 0.375, %v282_v43  ;;  %v1074_v31 = vrot.slane %v343_v40, 3 }
  0x5b   : > { %3455 = vst [vmem:[#allocation4_spill] sm:$0xff] %v2593_v63  ;;  %v2038_v28 = vpack.c.bf16 %v1505_v57, %v1505_v57  ;;  %v547_v24 = vrot.slane %v406_v6, 1  ;;  %v779_v12 = vrot.slane %v406_v6, 2  ;;  %v1075_v21 = vrot.slane %v344_v56, 3  ;;  %v2185_v6 = vld [vmem:[%s2289_s16 + $0x60] sm:$0xff]  }
  0x5c   : > { %v1506_v60 = vadd.f32 %v1443_v51, %v2593_v63  ;;  %v548_v0 = vrot.slane %v407_v45, 1  ;;  %v550_v3 = vrot.slane %v408_v62, 1  ;;  %v780_v20 = vrot.slane %v407_v45, 2 }
  0x5d   : > { %1673 = vst [vmem:[%s2460_s20 + $0x10] sm:$0xf] %v2038_v28  ;;  %v782_v26 = vrot.slane %v408_v62, 2  ;;  %v1076_v52 = vsel %vm1038_vm2, %v1074_v31, %v1075_v21  ;;  %v1077_v5 = vrot.slane %v345_v2, 3  ;;  %v2600_v61 = vmul.f32 0.125, %v2517_v23 }
  0x5e   : > { %v2039_v8 = vpack.c.bf16 %v1506_v60, %v1506_v60  ;;  %v549_v36 = vsel %vm511_vm0, %v547_v24, %v548_v0  ;;  %v551_v14 = vsel %vm511_vm0, %v548_v0, %v550_v3  ;;  %v781_v48 = vsel %vm743_vm1, %v779_v12, %v780_v20  ;;  %v2186_v24 = vld [vmem:[%s2289_s16 + $0x78] sm:$0xff]  }
  0x5f   : > { %v701_v30 = vadd.f32 %v549_v36, %v343_v40  ;;  %v702_v22 = vadd.f32 %v551_v14, %v344_v56  ;;  %v783_v25 = vsel %vm743_vm1, %v780_v20, %v782_v26  ;;  %v1078_v37 = vsel %vm1038_vm2, %v1075_v21, %v1077_v5 }
  0x60   : > { %1674 = vst [vmem:[%s2460_s20 + $0x14] sm:$0x1] %v2039_v8  ;;  %v2608_v53 = vmul.f32 0.125, %v1220_v49  ;;  %v1390_v23 = vadd.f32 %v2528_v19, %v2600_v61  ;;  %v700_v43 = vadd.f32 %v545_v10, %v2534_v41  ;;  %v703_v57 = vadd.f32 %v550_v3, %v345_v2 }
  0x61   : > { %v933_v40 = vadd.f32 %v781_v48, %v701_v30  ;;  %v934_v56 = vadd.f32 %v783_v25, %v702_v22  ;;  %v2616_v51 = vmul.f32 0.125, %v1221_v54  ;;  %v2618_v45 = vmul.f32 0.375, %v1224_v34  ;;  %v223_v34 = vld [vmem:[%s2289_s16 + $0x6c] sm:$0xff]  }
  0x62   : > { %v1391_v49 = vadd.f32 %v2584_v55, %v2608_v53  ;;  %v1447_v62 = vadd.f32 %v1390_v23, %v2532_v47  ;;  %v932_v31 = vadd.f32 %v777_v39, %v700_v43  ;;  %v935_v28 = vadd.f32 %v782_v26, %v703_v57 }
  0x63   : > { %v2626_v10 = vadd.f32 %v1076_v52, %v933_v40  ;;  %v2628_v2 = vadd.f32 %v1078_v37, %v934_v56  ;;  %v1392_v54 = vadd.f32 %v2618_v45, %v2616_v51  ;;  %v2106_v12 = vunpack.c.l.bf16 %v2185_v6 }
  0x64   : > { %v1448_v21 = vadd.f32 %v1391_v49, %v1340_v15  ;;  %v2635_v60 = vadd.f32 %v1072_v27, %v932_v31  ;;  %v2637_v47 = vadd.f32 %v1077_v5, %v935_v28  ;;  %v2107_v46 = vunpack.c.h.bf16 %v2185_v6 }
  0x65   : > { %v2640_v39 = vmul.f32 0.125, %v2626_v10  ;;  %v2643_v0 = vmul.f32 0.125, %v2628_v2  ;;  %v2110_v3 = vunpack.c.l.bf16 %v2186_v24  ;;  %v2111_v20 = vunpack.c.h.bf16 %v2186_v24 }
  0x66   : > { %v2646_v26 = vmul.f32 0.125, %v2637_v47  ;;  %v2649_v15 = vmul.f32 0.375, %v2635_v60  ;;  %v286_v41 = vunpack.c.l.bf16 %v223_v34  ;;  %v287_v27 = vunpack.c.h.bf16 %v223_v34 }
  0x67   : > { %3456 = vst [vmem:[#allocation5_spill] sm:$0xff] %v2640_v39  ;;  %3457 = vst [vmem:[#allocation6_spill] sm:$0xff] %v2643_v0  ;;  %v1510_v52 = vadd.f32 %v1447_v62, %v2640_v39  ;;  %v1511_v5 = vadd.f32 %v1448_v21, %v2643_v0  ;;  %v346_v8 = vmul.f32 0.125, %v2106_v12  ;;  %v2653_v36 = vmul.f32 0.125, %v2107_v46  ;;  %v228_v0 = vld [vmem:[%s2289_s16 + $0x80] sm:$0x7] }
  0x68   : > { %3458 = vst [vmem:[#allocation7_spill] sm:$0xff] %v2646_v26  ;;  %3459 = vst [vmem:[#allocation8_spill] sm:$0xff] %v2649_v15  ;;  %v1449_v14 = vadd.f32 %v1392_v54, %v2649_v15  ;;  %v349_v48 = vmul.f32 0.125, %v286_v41  ;;  %v2656_v30 = vmul.f32 0.125, %v287_v27  ;;  %v352_v22 = vmul.f32 0.125, %v2110_v3 }
  0x69   : > { %v2140_v25 = vpack.c.bf16 %v1511_v5, %v1510_v52  ;;  %v2658_v37 = vmul.f32 0.125, %v2111_v20  ;;  %v409_v23 = vmul.f32 0.375, %v2106_v12  ;;  %v2660_v43 = vmul.f32 0.375, %v2107_v46 }
  0x6a   : > { %v1512_v57 = vadd.f32 %v1449_v14, %v2646_v26  ;;  %v412_v6 = vmul.f32 0.375, %v286_v41  ;;  %v2663_v40 = vmul.f32 0.375, %v287_v27  ;;  %v415_v56 = vmul.f32 0.375, %v2110_v3 }
  0x6b   : > { %2192 = vst [vmem:[%s2460_s20 + $0x18] sm:$0xff] %v2140_v25   ;;  %v2666_v49 = vmul.f32 0.375, %v2111_v20  ;;  %v552_v62 = vrot.slane %v409_v23, 1  ;;  %v3385_v31 = vrot.slane %v2660_v43, 1  ;;  %v784_v28 = vrot.slane %v409_v23, 2 }
  0x6c   : > { %v2042_v24 = vpack.c.bf16 %v1512_v57, %v1512_v57  ;;  %v557_v54 = vrot.slane %v412_v6, 1  ;;  %v3384_v12 = vrot.slane %v2663_v40, 1  ;;  %v562_v34 = vrot.slane %v415_v56, 1 }
  0x6d   : > { %v554_v21 = vsel %vm511_vm0, %v552_v62, %v3385_v31  ;;  %v3386_v46 = vrot.slane %v2666_v49, 1  ;;  %v785_v3 = vrot.slane %v2660_v43, 2  ;;  %v789_v20 = vrot.slane %v412_v6, 2 }
  0x6e   : > { %1677 = vst [vmem:[%s2460_s20 + $0x20] sm:$0x1] %v2042_v24  ;;  %v559_v41 = vsel %vm511_vm0, %v557_v54, %v3384_v12  ;;  %v704_v27 = vadd.f32 %v554_v21, %v346_v8  ;;  %v3390_v52 = vrot.slane %v2663_v40, 2  ;;  %v794_v5 = vrot.slane %v415_v56, 2  ;;  %v222_v21 = vld [vmem:[%s2289_s16 + $0x68] sm:$0x7] }
  0x6f   : > { %v564_v14 = vsel %vm511_vm0, %v562_v34, %v3386_v46  ;;  %v707_v25 = vadd.f32 %v559_v41, %v349_v48  ;;  %v786_v23 = vsel %vm743_vm1, %v784_v28, %v785_v3  ;;  %v795_v57 = vrot.slane %v2666_v49, 2  ;;  %v225_v41 = vld [vmem:[%s2289_s16 + $0x74] sm:$0x7] }
  0x70   : > { %v710_v6 = vadd.f32 %v564_v14, %v352_v22  ;;  %v791_v62 = vsel %vm743_vm1, %v789_v20, %v3390_v52  ;;  %v936_v24 = vadd.f32 %v786_v23, %v704_v27  ;;  %v1079_v54 = vrot.slane %v346_v8, 3 }
  0x71   : > { %v796_v56 = vsel %vm743_vm1, %v794_v5, %v795_v57  ;;  %v939_v12 = vadd.f32 %v791_v62, %v707_v25  ;;  %v1080_v31 = vrot.slane %v2653_v36, 3  ;;  %v1084_v34 = vrot.slane %v349_v48, 3 }
  0x72   : > { %v942_v46 = vadd.f32 %v796_v56, %v710_v6  ;;  %v1085_v28 = vrot.slane %v2656_v30, 3  ;;  %v1089_v26 = vrot.slane %v352_v22, 3  ;;  %v1090_v14 = vrot.slane %v2658_v37, 3 }
  0x73   : > { %v1081_v39 = vsel %vm1038_vm2, %v1079_v54, %v1080_v31  ;;  %v2697_v20 = vmul.f32 0.125, %v2522_v9  ;;  %v2700_v8 = vmul.f32 0.375, %v2626_v10  ;;  %v285_v27 = vunpack.c.l.bf16 %v222_v21 }
  0x74   : > { %v1086_v5 = vsel %vm1038_vm2, %v1084_v34, %v1085_v28  ;;  %v1091_v48 = vsel %vm1038_vm2, %v1089_v26, %v1090_v14  ;;  %v2704_v25 = vadd.f32 %v1081_v39, %v936_v24  ;;  %v288_v23 = vunpack.c.l.bf16 %v225_v41 }
  0x75   : > { %v1234_v22 = vadd.f32 %v1086_v5, %v939_v12  ;;  %v2706_v6 = vadd.f32 %v1091_v48, %v942_v46  ;;  %v1396_v62 = vadd.f32 %v2700_v8, %v2697_v20  ;;  %v291_v54 = vunpack.c.l.bf16 %v228_v0 }
  0x76   : > { %v2711_v9 = vmul.f32 0.375, %v2704_v25  ;;  %v348_v10 = vmul.f32 0.125, %v285_v27  ;;  %v351_v56 = vmul.f32 0.125, %v288_v23  ;;  %v411_v21 = vmul.f32 0.375, %v285_v27 }
  0x77   : > { %v1297_v52 = vmul.f32 0.125, %v1234_v22  ;;  %v2713_v34 = vmul.f32 0.375, %v1234_v22  ;;  %v2716_v39 = vmul.f32 0.375, %v2706_v6  ;;  %v2718_v26 = vmul.f32 0.125, %v291_v54 }
  0x78   : > { %3460 = vst [vmem:[#allocation9_spill] sm:$0xff] %v2711_v9  ;;  %v1453_v12 = vadd.f32 %v1396_v62, %v2711_v9  ;;  %v414_v46 = vmul.f32 0.375, %v288_v23  ;;  %v2721_v24 = vmul.f32 0.375, %v291_v54  ;;  %v555_v0 = vrot.slane %v411_v21, 1 }
  0x79   : > { %3461 = vst [vmem:[#allocation10_spill] sm:$0xff] %v2713_v34  ;;  %v2724_v41 = vadd.f32 %v2716_v39, %v1297_v52  ;;  %v787_v5 = vrot.slane %v411_v21, 2  ;;  %v1082_v48 = vrot.slane %v348_v10, 3  ;;  %v1087_v27 = vrot.slane %v351_v56, 3 }
  0x7a   : > { %v1516_v15 = vadd.f32 %v1453_v12, %v1297_v52  ;;  %v3463_v22 = vrot.slane %v2660_v43, 1  ;;  %v560_v13 = vrot.slane %v414_v46, 1  ;;  %v3396_v11 = vrot.slane %v2721_v24, 1 }
  0x7b   : > { %3462 = vst [vmem:[#allocation11_spill] sm:$0xff] %v2724_v41  ;;  %v788_v62 = vsel %vm743_vm1, %v785_v3, %v787_v5  ;;  %v792_v54 = vrot.slane %v414_v46, 2  ;;  %v3395_v9 = vrot.slane %v2721_v24, 2  ;;  %v3464_v21 = vrot.slane %v2663_v40, 1 }
  0x7c   : > { %v556_v63 = vsel %vm511_vm0, %v3463_v22, %v555_v0  ;;  %v2043_v41 = vpack.c.bf16 %v1516_v15, %v1516_v15  ;;  %v3465_v43 = vrot.slane %v2666_v49, 1  ;;  %v1083_v22 = vsel %vm1038_vm2, %v1080_v31, %v1082_v48 }
  0x7d   : > { %v705_v23 = vadd.f32 %v556_v63, %v2653_v36  ;;  %v561_v52 = vsel %vm511_vm0, %v3464_v21, %v560_v13  ;;  %v3466_v3 = vrot.slane %v2663_v40, 2  ;;  %v798_v46 = vsel %vm743_vm1, %v795_v57, %v3395_v9 }
  0x7e   : > { %v566_v12 = vsel %vm511_vm0, %v3465_v43, %v3396_v11  ;;  %v708_v63 = vadd.f32 %v561_v52, %v2656_v30  ;;  %1678 = vst [vmem:[%s2460_s20 + $0x24] sm:$0xf] %v2043_v41  ;;  %v1088_v49 = vsel %vm1038_vm2, %v1085_v28, %v1087_v27  ;;  %v3394_v43 = vrot.slane %v2718_v26, 3 }
  0x7f   : > { %v711_v36 = vadd.f32 %v566_v12, %v2658_v37  ;;  %v793_v15 = vsel %vm743_vm1, %v3466_v3, %v792_v54  ;;  %v937_v21 = vadd.f32 %v788_v62, %v705_v23  ;;  %v2754_v31 = vmul.f32 0.125, %v2576_v16  ;;  %v229_v12 = vld [vmem:[%s2289_s16 + $0x84] sm:$0xff]   ;;  %v231_v3 = vld [vmem:[%s2289_s16 + $0x8c] sm:$0x7] }
  0x80   : > { %v940_v30 = vadd.f32 %v793_v15, %v708_v63  ;;  %v2757_v40 = vmul.f32 0.375, %v2628_v2  ;;  %v706_v52 = vadd.f32 %v555_v0, %v348_v10  ;;  %v1093_v57 = vsel %vm1038_vm2, %v1090_v14, %v3394_v43 }
  0x81   : > { %3467 = vst [vmem:[#allocation12_spill] sm:$0xff] %v2754_v31  ;;  %v943_v37 = vadd.f32 %v798_v46, %v711_v36  ;;  %v1232_v41 = vadd.f32 %v1083_v22, %v937_v21  ;;  %v709_v23 = vadd.f32 %v560_v13, %v351_v56  ;;  %v2764_v28 = vmul.f32 0.125, %v2635_v60 }
  0x82   : > { %3468 = vst [vmem:[#allocation13_spill] sm:$0xff] %v2757_v40  ;;  %v1235_v62 = vadd.f32 %v1088_v49, %v940_v30  ;;  %v1397_v63 = vadd.f32 %v2757_v40, %v2754_v31  ;;  %v938_v36 = vadd.f32 %v787_v5, %v706_v52  ;;  %v2773_v0 = vmul.f32 0.375, %v2637_v47 }
  0x83   : > { %3469 = vst [vmem:[#allocation14_spill] sm:$0xff] %v2764_v28  ;;  %v2766_v16 = vadd.f32 %v1093_v57, %v943_v37  ;;  %v2770_v2 = vmul.f32 0.375, %v1232_v41  ;;  %v941_v10 = vadd.f32 %v792_v54, %v709_v23  ;;  %v292_v14 = vunpack.c.l.bf16 %v229_v12 }
  0x84   : > { %3471 = vst [vmem:[#allocation16_spill] sm:$0xff] %v2773_v0  ;;  %v1298_v22 = vmul.f32 0.125, %v1235_v62  ;;  %v2776_v13 = vmul.f32 0.375, %v1235_v62  ;;  %v1233_v56 = vadd.f32 %v1082_v48, %v938_v36  ;;  %v1398_v5 = vadd.f32 %v2773_v0, %v2764_v28 }
  0x85   : > { %3470 = vst [vmem:[#allocation15_spill] sm:$0xff] %v2770_v2  ;;  %v1352_v60 = vmul.f32 0.375, %v2766_v16  ;;  %v1454_v15 = vadd.f32 %v1397_v63, %v2770_v2  ;;  %v1236_v46 = vadd.f32 %v1087_v27, %v941_v10  ;;  %v293_v21 = vunpack.c.h.bf16 %v229_v12 }
  0x86   : > { %3472 = vst [vmem:[#allocation17_spill] sm:$0xff] %v2776_v13  ;;  %v2784_v54 = vmul.f32 0.375, %v1233_v56  ;;  %v294_v47 = vunpack.c.l.bf16 %v231_v3  ;;  %v355_v30 = vmul.f32 0.125, %v292_v14  ;;  %v418_v23 = vmul.f32 0.375, %v292_v14 }
  0x87   : > { %v2782_v49 = vadd.f32 %v1352_v60, %v1298_v22  ;;  %v1517_v37 = vadd.f32 %v1454_v15, %v1298_v22  ;;  %v2786_v52 = vmul.f32 0.125, %v1236_v46  ;;  %v356_v57 = vmul.f32 0.125, %v293_v21 }
  0x88   : > { %3474 = vst [vmem:[#allocation19_spill] sm:$0xff] %v2784_v54  ;;  %v1455_v48 = vadd.f32 %v1398_v5, %v2784_v54  ;;  %v357_v62 = vmul.f32 0.125, %v294_v47  ;;  %v419_v27 = vmul.f32 0.375, %v293_v21  ;;  %v420_v63 = vmul.f32 0.375, %v294_v47 }
  0x89   : > { %3473 = vst [vmem:[#allocation18_spill] sm:$0xff] %v2782_v49  ;;  %3475 = vst [vmem:[#allocation20_spill] sm:$0xff] %v2786_v52  ;;  %v2044_v36 = vpack.c.bf16 %v1517_v37, %v1517_v37  ;;  %v567_v10 = vrot.slane %v418_v23, 1  ;;  %v799_v12 = vrot.slane %v418_v23, 2  ;;  %v1094_v43 = vrot.slane %v355_v30, 3 }
  0x8a   : > { %v1518_v9 = vadd.f32 %v1455_v48, %v2786_v52  ;;  %v568_v11 = vrot.slane %v419_v27, 1  ;;  %v570_v3 = vrot.slane %v420_v63, 1  ;;  %v800_v22 = vrot.slane %v419_v27, 2 }
  0x8b   : > { %1679 = vst [vmem:[%s2460_s20 + $0x28] sm:$0xf] %v2044_v36  ;;  %v802_v15 = vrot.slane %v420_v63, 2  ;;  %v1095_v49 = vrot.slane %v356_v57, 3  ;;  %v1097_v14 = vrot.slane %v357_v62, 3  ;;  %v2792_v5 = vmul.f32 0.125, %v2704_v25 }
  0x8c   : > { %v2045_v21 = vpack.c.bf16 %v1518_v9, %v1518_v9  ;;  %v569_v47 = vsel %vm511_vm0, %v567_v10, %v568_v11  ;;  %v571_v37 = vsel %vm511_vm0, %v568_v11, %v570_v3  ;;  %v801_v23 = vsel %vm743_vm1, %v799_v12, %v800_v22 }
  0x8d   : > { %3476 = vst [vmem:[#allocation21_spill] sm:$0xff] %v2792_v5  ;;  %v713_v48 = vadd.f32 %v569_v47, %v355_v30  ;;  %v714_v52 = vadd.f32 %v571_v37, %v356_v57  ;;  %v803_v0 = vsel %vm743_vm1, %v800_v22, %v802_v15  ;;  %v1096_v27 = vsel %vm1038_vm2, %v1094_v43, %v1095_v49  ;;  %v2187_v30 = vld [vmem:[%s2289_s16 + $0x90] sm:$0xff]   ;;  %v2188_v37 = vld [vmem:[%s2289_s16 + $0xa8] sm:$0xff]  }
  0x8e   : > { %1680 = vst [vmem:[%s2460_s20 + $0x2c] sm:$0x1] %v2045_v21  ;;  %v1098_v63 = vsel %vm1038_vm2, %v1095_v49, %v1097_v14  ;;  %v2801_v36 = vmul.f32 0.125, %v1232_v41  ;;  %v1402_v25 = vadd.f32 %v2713_v34, %v2792_v5  ;;  %v3478_v11 = vrot.slane %v2721_v24, 1 }
  0x8f   : > { %v945_v57 = vadd.f32 %v801_v23, %v713_v48  ;;  %v946_v10 = vadd.f32 %v803_v0, %v714_v52  ;;  %v715_v12 = vadd.f32 %v570_v3, %v357_v62  ;;  %v2809_v22 = vmul.f32 0.125, %v1233_v56  ;;  %v235_v52 = vld [vmem:[%s2289_s16 + $0x9c] sm:$0xff]  }
  0x90   : > { %3477 = vst [vmem:[#allocation22_spill] sm:$0xff] %v2801_v36  ;;  %v712_v9 = vadd.f32 %v3478_v11, %v2718_v26  ;;  %v1403_v43 = vadd.f32 %v2776_v13, %v2801_v36  ;;  %v1459_v41 = vadd.f32 %v1402_v25, %v2716_v39  ;;  %v3480_v49 = vrot.slane %v2721_v24, 2  ;;  %v234_v36 = vld [vmem:[%s2289_s16 + $0x98] sm:$0x7] }
  0x91   : > { %3479 = vst [vmem:[#allocation23_spill] sm:$0xff] %v2809_v22  ;;  %v2816_v47 = vmul.f32 0.375, %v1236_v46  ;;  %v2819_v34 = vadd.f32 %v1096_v27, %v945_v57  ;;  %v2821_v11 = vadd.f32 %v1098_v63, %v946_v10  ;;  %v947_v23 = vadd.f32 %v802_v15, %v715_v12 }
  0x92   : > { %v944_v21 = vadd.f32 %v3480_v49, %v712_v9  ;;  %v2114_v0 = vunpack.c.l.bf16 %v2187_v30  ;;  %v1460_v56 = vadd.f32 %v1403_v43, %v1352_v60  ;;  %v3482_v62 = vrot.slane %v2718_v26, 3 }
  0x93   : > { %3481 = vst [vmem:[#allocation24_spill] sm:$0xff] %v2816_v47  ;;  %v1404_v39 = vadd.f32 %v2816_v47, %v2809_v22  ;;  %v2115_v24 = vunpack.c.h.bf16 %v2187_v30  ;;  %v2831_v46 = vmul.f32 0.125, %v2819_v34  ;;  %v2834_v48 = vmul.f32 0.125, %v2821_v11 }
  0x94   : > { %v2826_v3 = vadd.f32 %v3482_v62, %v944_v21  ;;  %v2836_v27 = vadd.f32 %v1097_v14, %v947_v23  ;;  %v2118_v15 = vunpack.c.l.bf16 %v2188_v37  ;;  %v2119_v60 = vunpack.c.h.bf16 %v2188_v37 }
  0x95   : > { %3483 = vst [vmem:[#allocation25_spill] sm:$0xff] %v2831_v46  ;;  %3484 = vst [vmem:[#allocation26_spill] sm:$0xff] %v2834_v48  ;;  %v298_v26 = vunpack.c.l.bf16 %v235_v52  ;;  %v299_v25 = vunpack.c.h.bf16 %v235_v52  ;;  %v1522_v9 = vadd.f32 %v1459_v41, %v2831_v46  ;;  %v1523_v30 = vadd.f32 %v1460_v56, %v2834_v48 }
  0x96   : > { %v2839_v63 = vmul.f32 0.375, %v2826_v3  ;;  %v2844_v57 = vmul.f32 0.125, %v2836_v27  ;;  %v358_v10 = vmul.f32 0.125, %v2114_v0  ;;  %v2847_v14 = vmul.f32 0.125, %v2115_v24 }
  0x97   : > { %v361_v43 = vmul.f32 0.125, %v298_v26  ;;  %v2849_v49 = vmul.f32 0.125, %v299_v25  ;;  %v2145_v21 = vpack.c.bf16 %v1523_v30, %v1522_v9  ;;  %v364_v37 = vmul.f32 0.125, %v2118_v15 }
  0x98   : > { %3485 = vst [vmem:[#allocation27_spill] sm:$0xff] %v2839_v63  ;;  %3486 = vst [vmem:[#allocation28_spill] sm:$0xff] %v2844_v57  ;;  %v1461_v12 = vadd.f32 %v1404_v39, %v2839_v63  ;;  %v2851_v23 = vmul.f32 0.125, %v2119_v60  ;;  %v421_v52 = vmul.f32 0.375, %v2114_v0  ;;  %v2854_v62 = vmul.f32 0.375, %v2115_v24 }
  0x99   : > { %v424_v56 = vmul.f32 0.375, %v298_v26  ;;  %v2856_v48 = vmul.f32 0.375, %v299_v25  ;;  %2193 = vst [vmem:[%s2460_s20 + $0x30] sm:$0xff] %v2145_v21   ;;  %v427_v39 = vmul.f32 0.375, %v2118_v15  ;;  %v2859_v46 = vmul.f32 0.375, %v2119_v60 }
  0x9a   : > { %v1524_v41 = vadd.f32 %v1461_v12, %v2844_v57  ;;  %v572_v63 = vrot.slane %v421_v52, 1  ;;  %v804_v22 = vrot.slane %v421_v52, 2  ;;  %v573_v9 = vrot.slane %v2854_v62, 1 }
  0x9b   : > { %v577_v30 = vrot.slane %v424_v56, 1  ;;  %v3408_v0 = vrot.slane %v2856_v48, 1  ;;  %v582_v13 = vrot.slane %v427_v39, 1  ;;  %v3411_v24 = vrot.slane %v2859_v46, 1 }
  0x9c   : > { %v2048_v47 = vpack.c.bf16 %v1524_v41, %v1524_v41  ;;  %v805_v12 = vrot.slane %v2854_v62, 2  ;;  %v809_v26 = vrot.slane %v424_v56, 2  ;;  %v574_v25 = vsel %vm511_vm0, %v572_v63, %v573_v9 }
  0x9d   : > { %v579_v15 = vsel %vm511_vm0, %v577_v30, %v3408_v0  ;;  %v810_v60 = vrot.slane %v2856_v48, 2  ;;  %v814_v21 = vrot.slane %v427_v39, 2  ;;  %v584_v52 = vsel %vm511_vm0, %v582_v13, %v3411_v24 }
  0x9e   : > { %1683 = vst [vmem:[%s2460_s20 + $0x38] sm:$0x1] %v2048_v47  ;;  %v716_v41 = vadd.f32 %v574_v25, %v358_v10  ;;  %v719_v57 = vadd.f32 %v579_v15, %v361_v43  ;;  %v806_v62 = vsel %vm743_vm1, %v804_v22, %v805_v12  ;;  %v722_v47 = vadd.f32 %v584_v52, %v364_v37  ;;  %v237_v52 = vld [vmem:[%s2289_s16 + $0xa4] sm:$0x7] }
  0x9f   : > { %v811_v63 = vsel %vm743_vm1, %v809_v26, %v810_v60  ;;  %v815_v56 = vrot.slane %v2859_v46, 2  ;;  %v1099_v54 = vrot.slane %v358_v10, 3  ;;  %v1100_v39 = vrot.slane %v2847_v14, 3  ;;  %v240_v10 = vld [vmem:[%s2289_s16 + $0xb0] sm:$0x7] }
  0xa0   : > { %v948_v30 = vadd.f32 %v806_v62, %v716_v41  ;;  %v951_v0 = vadd.f32 %v811_v63, %v719_v57  ;;  %v1104_v2 = vrot.slane %v361_v43, 3  ;;  %v1105_v25 = vrot.slane %v2849_v49, 3 }
  0xa1   : > { %v816_v13 = vsel %vm743_vm1, %v814_v21, %v815_v56  ;;  %v1109_v15 = vrot.slane %v364_v37, 3  ;;  %v1110_v22 = vrot.slane %v2851_v23, 3  ;;  %v1101_v26 = vsel %vm1038_vm2, %v1099_v54, %v1100_v39 }
  0xa2   : > { %v954_v24 = vadd.f32 %v816_v13, %v722_v47  ;;  %v2885_v5 = vmul.f32 0.125, %v2706_v6  ;;  %v2888_v57 = vmul.f32 0.375, %v2819_v34  ;;  %v1106_v43 = vsel %vm1038_vm2, %v1104_v2, %v1105_v25 }
  0xa3   : > { %v1111_v21 = vsel %vm1038_vm2, %v1109_v15, %v1110_v22  ;;  %v2893_v41 = vadd.f32 %v1101_v26, %v948_v30  ;;  %v297_v37 = vunpack.c.l.bf16 %v234_v36  ;;  %v1246_v62 = vadd.f32 %v1106_v43, %v951_v0 }
  0xa4   : > { %3487 = vst [vmem:[#allocation29_spill] sm:$0xff] %v2885_v5  ;;  %3488 = vst [vmem:[#allocation30_spill] sm:$0xff] %v2888_v57  ;;  %v1408_v47 = vadd.f32 %v2888_v57, %v2885_v5  ;;  %v300_v63 = vunpack.c.l.bf16 %v237_v52  ;;  %v303_v6 = vunpack.c.l.bf16 %v240_v10  ;;  %v2900_v28 = vadd.f32 %v1111_v21, %v954_v24 }
  0xa5   : > { %v2898_v54 = vmul.f32 0.375, %v2893_v41  ;;  %v360_v13 = vmul.f32 0.125, %v297_v37  ;;  %v423_v34 = vmul.f32 0.375, %v297_v37  ;;  %v2902_v31 = vmul.f32 0.125, %v1246_v62 }
  0xa6   : > { %v2904_v2 = vmul.f32 0.375, %v1246_v62  ;;  %v363_v36 = vmul.f32 0.125, %v300_v63  ;;  %v426_v0 = vmul.f32 0.375, %v300_v63  ;;  %v2907_v15 = vmul.f32 0.375, %v303_v6 }
  0xa7   : > { %3489 = vst [vmem:[#allocation31_spill] sm:$0xff] %v2898_v54  ;;  %v1465_v30 = vadd.f32 %v1408_v47, %v2898_v54  ;;  %v2909_v26 = vmul.f32 0.125, %v303_v6  ;;  %v575_v52 = vrot.slane %v423_v34, 1  ;;  %v807_v43 = vrot.slane %v423_v34, 2 }
  0xa8   : > { %3490 = vst [vmem:[#allocation32_spill] sm:$0xff] %v2904_v2  ;;  %v1102_v5 = vrot.slane %v360_v13, 3  ;;  %v580_v24 = vrot.slane %v426_v0, 1  ;;  %v3420_v21 = vrot.slane %v2907_v15, 1  ;;  %v812_v37 = vrot.slane %v426_v0, 2 }
  0xa9   : > { %v1528_v10 = vadd.f32 %v1465_v30, %v2902_v31  ;;  %v576_v62 = vsel %vm511_vm0, %v573_v9, %v575_v52  ;;  %v808_v47 = vsel %vm743_vm1, %v805_v12, %v807_v43  ;;  %v3491_v57 = vrot.slane %v2856_v48, 1 }
  0xaa   : > { %v1103_v54 = vsel %vm1038_vm2, %v1100_v39, %v1102_v5  ;;  %v3492_v30 = vrot.slane %v2859_v46, 1  ;;  %v717_v0 = vadd.f32 %v576_v62, %v2847_v14  ;;  %v813_v63 = vsel %vm743_vm1, %v810_v60, %v812_v37 }
  0xab   : > { %v2049_v6 = vpack.c.bf16 %v1528_v10, %v1528_v10  ;;  %v581_v34 = vsel %vm511_vm0, %v3491_v57, %v580_v24  ;;  %v3493_v39 = vrot.slane %v2907_v15, 2  ;;  %v1107_v10 = vrot.slane %v363_v36, 3 }
  0xac   : > { %v586_v40 = vsel %vm511_vm0, %v3492_v30, %v3420_v21  ;;  %v720_v9 = vadd.f32 %v581_v34, %v2849_v49  ;;  %v949_v57 = vadd.f32 %v808_v47, %v717_v0  ;;  %v3419_v46 = vrot.slane %v2909_v26, 3  ;;  %v241_v0 = vld [vmem:[%s2289_s16 + $0xb4] sm:$0xff]  }
  0xad   : > { %v723_v12 = vadd.f32 %v586_v40, %v2851_v23  ;;  %v818_v48 = vsel %vm743_vm1, %v815_v56, %v3493_v39  ;;  %1684 = vst [vmem:[%s2460_s20 + $0x3c] sm:$0xf] %v2049_v6  ;;  %v2935_v30 = vmul.f32 0.125, %v2766_v16  ;;  %v2938_v40 = vmul.f32 0.375, %v2821_v11 }
  0xae   : > { %v952_v14 = vadd.f32 %v813_v63, %v720_v9  ;;  %v718_v49 = vadd.f32 %v575_v52, %v360_v13  ;;  %v1108_v23 = vsel %vm1038_vm2, %v1105_v25, %v1107_v10  ;;  %v1113_v60 = vsel %vm1038_vm2, %v1110_v22, %v3419_v46  ;;  %v243_v22 = vld [vmem:[%s2289_s16 + $0xbc] sm:$0x7] }
  0xaf   : > { %3494 = vst [vmem:[#allocation33_spill] sm:$0xff] %v2935_v30  ;;  %v955_v62 = vadd.f32 %v818_v48, %v723_v12  ;;  %3495 = vst [vmem:[#allocation34_spill] sm:$0xff] %v2938_v40  ;;  %v1244_v56 = vadd.f32 %v1103_v54, %v949_v57  ;;  %v721_v47 = vadd.f32 %v580_v24, %v363_v36  ;;  %v2952_v13 = vmul.f32 0.125, %v2826_v3 }
  0xb0   : > { %v1247_v6 = vadd.f32 %v1108_v23, %v952_v14  ;;  %v1409_v16 = vadd.f32 %v2938_v40, %v2935_v30  ;;  %v950_v63 = vadd.f32 %v807_v43, %v718_v49  ;;  %v2955_v25 = vmul.f32 0.375, %v2836_v27 }
  0xb1   : > { %v2944_v34 = vadd.f32 %v1113_v60, %v955_v62  ;;  %v2949_v9 = vmul.f32 0.375, %v1244_v56  ;;  %v953_v11 = vadd.f32 %v812_v37, %v721_v47  ;;  %3497 = vst [vmem:[#allocation36_spill] sm:$0xff] %v2952_v13  ;;  %v2959_v54 = vmul.f32 0.375, %v2900_v28 }
  0xb2   : > { %3498 = vst [vmem:[#allocation37_spill] sm:$0xff] %v2955_v25  ;;  %v2961_v36 = vmul.f32 0.125, %v1247_v6  ;;  %v2963_v52 = vmul.f32 0.375, %v1247_v6  ;;  %v1245_v24 = vadd.f32 %v1102_v5, %v950_v63  ;;  %v1410_v37 = vadd.f32 %v2955_v25, %v2952_v13 }
  0xb3   : > { %3496 = vst [vmem:[#allocation35_spill] sm:$0xff] %v2949_v9  ;;  %v1466_v43 = vadd.f32 %v1409_v16, %v2949_v9  ;;  %v1248_v12 = vadd.f32 %v1107_v10, %v953_v11  ;;  %v304_v3 = vunpack.c.l.bf16 %v241_v0  ;;  %v2969_v39 = vmul.f32 0.375, %v2944_v34 }
  0xb4   : > { %3499 = vst [vmem:[#allocation38_spill] sm:$0xff] %v2963_v52  ;;  %v2971_v27 = vmul.f32 0.375, %v1245_v24  ;;  %v305_v48 = vunpack.c.h.bf16 %v241_v0  ;;  %v306_v57 = vunpack.c.l.bf16 %v243_v22 }
  0xb5   : > { %v1529_v14 = vadd.f32 %v1466_v43, %v2961_v36  ;;  %v2974_v62 = vmul.f32 0.125, %v1248_v12  ;;  %v367_v5 = vmul.f32 0.125, %v304_v3  ;;  %v430_v49 = vmul.f32 0.375, %v304_v3 }
  0xb6   : > { %3500 = vst [vmem:[#allocation39_spill] sm:$0xff] %v2971_v27  ;;  %v1467_v10 = vadd.f32 %v1410_v37, %v2971_v27  ;;  %v368_v23 = vmul.f32 0.125, %v305_v48  ;;  %v369_v60 = vmul.f32 0.125, %v306_v57  ;;  %v431_v47 = vmul.f32 0.375, %v305_v48 }
  0xb7   : > { %3501 = vst [vmem:[#allocation40_spill] sm:$0xff] %v2974_v62  ;;  %v2050_v6 = vpack.c.bf16 %v1529_v14, %v1529_v14  ;;  %v432_v16 = vmul.f32 0.375, %v306_v57  ;;  %v587_v63 = vrot.slane %v430_v49, 1  ;;  %v819_v11 = vrot.slane %v430_v49, 2 }
  0xb8   : > { %v1530_v46 = vadd.f32 %v1467_v10, %v2974_v62  ;;  %v588_v0 = vrot.slane %v431_v47, 1  ;;  %v820_v22 = vrot.slane %v431_v47, 2  ;;  %v1114_v43 = vrot.slane %v367_v5, 3 }
  0xb9   : > { %1685 = vst [vmem:[%s2460_s20 + $0x40] sm:$0xf] %v2050_v6  ;;  %v590_v21 = vrot.slane %v432_v16, 1  ;;  %v822_v9 = vrot.slane %v432_v16, 2  ;;  %v1115_v3 = vrot.slane %v368_v23, 3  ;;  %v1117_v25 = vrot.slane %v369_v60, 3 }
  0xba   : > { %v2051_v37 = vpack.c.bf16 %v1530_v46, %v1530_v46  ;;  %v589_v27 = vsel %vm511_vm0, %v587_v63, %v588_v0  ;;  %v821_v48 = vsel %vm743_vm1, %v819_v11, %v820_v22  ;;  %v2982_v57 = vmul.f32 0.125, %v2893_v41  ;;  %v2189_v41 = vld [vmem:[%s2289_s16 + $0xc0] sm:$0xff]  }
  0xbb   : > { %v591_v14 = vsel %vm511_vm0, %v588_v0, %v590_v21  ;;  %v725_v49 = vadd.f32 %v589_v27, %v367_v5  ;;  %v823_v10 = vsel %vm743_vm1, %v820_v22, %v822_v9  ;;  %v1116_v47 = vsel %vm1038_vm2, %v1114_v43, %v1115_v3 }
  0xbc   : > { %3502 = vst [vmem:[#allocation41_spill] sm:$0xff] %v2982_v57  ;;  %1686 = vst [vmem:[%s2460_s20 + $0x44] sm:$0x1] %v2051_v37  ;;  %v726_v6 = vadd.f32 %v591_v14, %v368_v23  ;;  %v1118_v16 = vsel %vm1038_vm2, %v1115_v3, %v1117_v25  ;;  %v2989_v46 = vmul.f32 0.125, %v1244_v56  ;;  %v1414_v63 = vadd.f32 %v2904_v2, %v2982_v57  ;;  %v2190_v37 = vld [vmem:[%s2289_s16 + $0xd8] sm:$0xff]  }
  0xbd   : > { %v957_v11 = vadd.f32 %v821_v48, %v725_v49  ;;  %v3504_v27 = vrot.slane %v2907_v15, 1  ;;  %v727_v0 = vadd.f32 %v590_v21, %v369_v60  ;;  %v2997_v22 = vmul.f32 0.125, %v1245_v24 }
  0xbe   : > { %3503 = vst [vmem:[#allocation42_spill] sm:$0xff] %v2989_v46  ;;  %v958_v43 = vadd.f32 %v823_v10, %v726_v6  ;;  %v1415_v23 = vadd.f32 %v2963_v52, %v2989_v46  ;;  %v1471_v56 = vadd.f32 %v1414_v63, %v2959_v54  ;;  %v3002_v3 = vmul.f32 0.375, %v1248_v12 }
  0xbf   : > { %v724_v5 = vadd.f32 %v3504_v27, %v2909_v26  ;;  %3505 = vst [vmem:[#allocation43_spill] sm:$0xff] %v2997_v22  ;;  %v3005_v14 = vadd.f32 %v1116_v47, %v957_v11  ;;  %v3507_v48 = vrot.slane %v2907_v15, 2  ;;  %v959_v62 = vadd.f32 %v822_v9, %v727_v0  ;;  %v247_v27 = vld [vmem:[%s2289_s16 + $0xcc] sm:$0xff]  }
  0xc0   : > { %3506 = vst [vmem:[#allocation44_spill] sm:$0xff] %v3002_v3  ;;  %v2122_v2 = vunpack.c.l.bf16 %v2189_v41  ;;  %v3010_v21 = vadd.f32 %v1118_v16, %v958_v43  ;;  %v1472_v24 = vadd.f32 %v1415_v23, %v2969_v39  ;;  %v1416_v60 = vadd.f32 %v3002_v3, %v2997_v22 }
  0xc1   : > { %v956_v49 = vadd.f32 %v3507_v48, %v724_v5  ;;  %v2123_v10 = vunpack.c.h.bf16 %v2189_v41  ;;  %v3016_v12 = vmul.f32 0.125, %v3005_v14  ;;  %v3509_v47 = vrot.slane %v2909_v26, 3 }
  0xc2   : > { %v3022_v15 = vadd.f32 %v1117_v25, %v959_v62  ;;  %v2126_v9 = vunpack.c.l.bf16 %v2190_v37  ;;  %v3025_v63 = vmul.f32 0.125, %v3010_v21  ;;  %v2127_v16 = vunpack.c.h.bf16 %v2190_v37 }
  0xc3   : > { %3508 = vst [vmem:[#allocation45_spill] sm:$0xff] %v3016_v12  ;;  %v3020_v6 = vadd.f32 %v3509_v47, %v956_v49  ;;  %v310_v11 = vunpack.c.l.bf16 %v247_v27  ;;  %v311_v5 = vunpack.c.h.bf16 %v247_v27  ;;  %v1534_v0 = vadd.f32 %v1471_v56, %v3016_v12 }
  0xc4   : > { %3510 = vst [vmem:[#allocation46_spill] sm:$0xff] %v3025_v63  ;;  %v3029_v41 = vmul.f32 0.125, %v3022_v15  ;;  %v370_v26 = vmul.f32 0.125, %v2122_v2  ;;  %v1535_v23 = vadd.f32 %v1472_v24, %v3025_v63  ;;  %v3035_v25 = vmul.f32 0.125, %v2123_v10 }
  0xc5   : > { %v3032_v43 = vmul.f32 0.375, %v3020_v6  ;;  %v373_v62 = vmul.f32 0.125, %v310_v11  ;;  %v3037_v48 = vmul.f32 0.125, %v311_v5  ;;  %v376_v49 = vmul.f32 0.125, %v2126_v9 }
  0xc6   : > { %3511 = vst [vmem:[#allocation47_spill] sm:$0xff] %v3029_v41  ;;  %v3040_v27 = vmul.f32 0.125, %v2127_v16  ;;  %v433_v56 = vmul.f32 0.375, %v2122_v2  ;;  %v2150_v47 = vpack.c.bf16 %v1535_v23, %v1534_v0  ;;  %v3042_v3 = vmul.f32 0.375, %v2123_v10 }
  0xc7   : > { %3512 = vst [vmem:[#allocation48_spill] sm:$0xff] %v3032_v43  ;;  %v1473_v37 = vadd.f32 %v1416_v60, %v3032_v43  ;;  %v436_v12 = vmul.f32 0.375, %v310_v11  ;;  %v3044_v52 = vmul.f32 0.375, %v311_v5  ;;  %v439_v63 = vmul.f32 0.375, %v2126_v9 }
  0xc8   : > { %v3047_v22 = vmul.f32 0.375, %v2127_v16  ;;  %v592_v46 = vrot.slane %v433_v56, 1  ;;  %2194 = vst [vmem:[%s2460_s20 + $0x48] sm:$0xff] %v2150_v47   ;;  %v3434_v60 = vrot.slane %v3042_v3, 1  ;;  %v824_v2 = vrot.slane %v433_v56, 2 }
  0xc9   : > { %v1536_v24 = vadd.f32 %v1473_v37, %v3029_v41  ;;  %v597_v43 = vrot.slane %v436_v12, 1  ;;  %v3435_v13 = vrot.slane %v3044_v52, 1  ;;  %v602_v10 = vrot.slane %v439_v63, 1 }
  0xca   : > { %v3438_v11 = vrot.slane %v3047_v22, 1  ;;  %v3440_v5 = vrot.slane %v3042_v3, 2  ;;  %v594_v9 = vsel %vm511_vm0, %v592_v46, %v3434_v60  ;;  %v829_v23 = vrot.slane %v436_v12, 2 }
  0xcb   : > { %v2054_v0 = vpack.c.bf16 %v1536_v24, %v1536_v24  ;;  %v599_v16 = vsel %vm511_vm0, %v597_v43, %v3435_v13  ;;  %v3442_v37 = vrot.slane %v3044_v52, 2  ;;  %v728_v47 = vadd.f32 %v594_v9, %v370_v26  ;;  %v246_v9 = vld [vmem:[%s2289_s16 + $0xc8] sm:$0x7] }
  0xcc   : > { %v604_v56 = vsel %vm511_vm0, %v602_v10, %v3438_v11  ;;  %v731_v24 = vadd.f32 %v599_v16, %v373_v62  ;;  %v826_v46 = vsel %vm743_vm1, %v824_v2, %v3440_v5  ;;  %v834_v43 = vrot.slane %v439_v63, 2  ;;  %v249_v16 = vld [vmem:[%s2289_s16 + $0xd4] sm:$0x7]  ;;  %v252_v5 = vld [vmem:[%s2289_s16 + $0xe0] sm:$0x7] }
  0xcd   : > { %1689 = vst [vmem:[%s2460_s20 + $0x50] sm:$0x1] %v2054_v0  ;;  %v734_v60 = vadd.f32 %v604_v56, %v376_v49  ;;  %v831_v12 = vsel %vm743_vm1, %v829_v23, %v3442_v37  ;;  %v835_v13 = vrot.slane %v3047_v22, 2  ;;  %v960_v0 = vadd.f32 %v826_v46, %v728_v47 }
  0xce   : > { %v963_v41 = vadd.f32 %v831_v12, %v731_v24  ;;  %v1119_v30 = vrot.slane %v370_v26, 3  ;;  %v1120_v10 = vrot.slane %v3035_v25, 3  ;;  %v1124_v57 = vrot.slane %v373_v62, 3 }
  0xcf   : > { %v836_v11 = vsel %vm743_vm1, %v834_v43, %v835_v13  ;;  %v1125_v2 = vrot.slane %v3037_v48, 3  ;;  %v1129_v56 = vrot.slane %v376_v49, 3  ;;  %v1130_v63 = vrot.slane %v3040_v27, 3 }
  0xd0   : > { %v966_v40 = vadd.f32 %v836_v11, %v734_v60  ;;  %v1121_v23 = vsel %vm1038_vm2, %v1119_v30, %v1120_v10  ;;  %v3081_v47 = vmul.f32 0.125, %v2900_v28  ;;  %v3087_v46 = vmul.f32 0.375, %v3005_v14 }
  0xd1   : > { %v1126_v26 = vsel %vm1038_vm2, %v1124_v57, %v1125_v2  ;;  %v3084_v24 = vadd.f32 %v1121_v23, %v960_v0  ;;  %v309_v62 = vunpack.c.l.bf16 %v246_v9  ;;  %v1131_v12 = vsel %vm1038_vm2, %v1129_v56, %v1130_v63 }
  0xd2   : > { %3513 = vst [vmem:[#allocation49_spill] sm:$0xff] %v3087_v46  ;;  %v1258_v49 = vadd.f32 %v1126_v26, %v963_v41  ;;  %v312_v43 = vunpack.c.l.bf16 %v249_v16  ;;  %v315_v60 = vunpack.c.l.bf16 %v252_v5  ;;  %v3092_v30 = vadd.f32 %v2959_v54, %v2902_v31 }
  0xd3   : > { %v3095_v28 = vmul.f32 0.375, %v3084_v24  ;;  %v1420_v57 = vadd.f32 %v3087_v46, %v3081_v47  ;;  %v372_v11 = vmul.f32 0.125, %v309_v62  ;;  %v3101_v14 = vadd.f32 %v2969_v39, %v2961_v36 }
  0xd4   : > { %3514 = vst [vmem:[#allocation50_spill] sm:$0xff] %v3092_v30  ;;  %v3103_v0 = vadd.f32 %v1131_v12, %v966_v40  ;;  %v375_v41 = vmul.f32 0.125, %v312_v43  ;;  %v3105_v9 = vmul.f32 0.125, %v315_v60  ;;  %v3107_v5 = vmul.f32 0.125, %v1258_v49 }
  0xd5   : > { %3515 = vst [vmem:[#allocation51_spill] sm:$0xff] %v3095_v28  ;;  %3516 = vst [vmem:[#allocation52_spill] sm:$0xff] %v3101_v14  ;;  %v1477_v31 = vadd.f32 %v1420_v57, %v3095_v28  ;;  %v435_v54 = vmul.f32 0.375, %v309_v62  ;;  %v438_v16 = vmul.f32 0.375, %v312_v43  ;;  %v3110_v56 = vmul.f32 0.375, %v1258_v49 }
  0xd6   : > { %3517 = vst [vmem:[#allocation53_spill] sm:$0xff] %v3103_v0  ;;  %3518 = vst [vmem:[#allocation54_spill] sm:$0xff] %v3107_v5  ;;  %v3112_v23 = vmul.f32 0.375, %v315_v60  ;;  %v1122_v26 = vrot.slane %v372_v11, 3  ;;  %v1127_v37 = vrot.slane %v375_v41, 3  ;;  %v3519_v49 = vrot.slane %v3042_v3, 1 }
  0xd7   : > { %v1540_v36 = vadd.f32 %v1477_v31, %v3107_v5  ;;  %v595_v40 = vrot.slane %v435_v54, 1  ;;  %v600_v39 = vrot.slane %v438_v16, 1  ;;  %v827_v30 = vrot.slane %v435_v54, 2 }
  0xd8   : > { %v3446_v14 = vrot.slane %v3112_v23, 1  ;;  %v832_v46 = vrot.slane %v438_v16, 2  ;;  %v3520_v57 = vrot.slane %v3044_v52, 1  ;;  %v1123_v5 = vsel %vm1038_vm2, %v1120_v10, %v1122_v26 }
  0xd9   : > { %v2055_v43 = vpack.c.bf16 %v1540_v36, %v1540_v36  ;;  %v596_v60 = vsel %vm511_vm0, %v3519_v49, %v595_v40  ;;  %v3521_v12 = vrot.slane %v3047_v22, 1  ;;  %v3522_v62 = vrot.slane %v3042_v3, 2 }
  0xda   : > { %v601_v31 = vsel %vm511_vm0, %v3520_v57, %v600_v39  ;;  %v729_v16 = vadd.f32 %v596_v60, %v3035_v25  ;;  %v3523_v57 = vrot.slane %v3044_v52, 2  ;;  %v3524_v22 = vrot.slane %v3112_v23, 2 }
  0xdb   : > { %v606_v54 = vsel %vm511_vm0, %v3521_v12, %v3446_v14  ;;  %v732_v36 = vadd.f32 %v601_v31, %v3037_v48  ;;  %v828_v49 = vsel %vm743_vm1, %v3522_v62, %v827_v30  ;;  %1690 = vst [vmem:[%s2460_s20 + $0x54] sm:$0xf] %v2055_v43  ;;  %v1128_v25 = vsel %vm1038_vm2, %v1125_v2, %v1127_v37 }
  0xdc   : > { %v735_v28 = vadd.f32 %v606_v54, %v3040_v27  ;;  %v833_v10 = vsel %vm743_vm1, %v3523_v57, %v832_v46  ;;  %v838_v12 = vsel %vm743_vm1, %v835_v13, %v3524_v22  ;;  %v961_v60 = vadd.f32 %v828_v49, %v729_v16 }
  0xdd   : > { %v964_v48 = vadd.f32 %v833_v10, %v732_v36  ;;  %v3525_v3 = vrot.slane %v3105_v9, 3  ;;  %v3148_v27 = vmul.f32 0.125, %v2944_v34  ;;  %v3151_v43 = vmul.f32 0.375, %v3010_v21  ;;  %v253_v36 = vld [vmem:[%s2289_s16 + $0xe4] sm:$0xff]   ;;  %v255_v21 = vld [vmem:[%s2289_s16 + $0xec] sm:$0x7] }
  0xde   : > { %v967_v52 = vadd.f32 %v838_v12, %v735_v28  ;;  %v730_v31 = vadd.f32 %v595_v40, %v372_v11  ;;  %v733_v54 = vadd.f32 %v600_v39, %v375_v41  ;;  %v1256_v57 = vadd.f32 %v1123_v5, %v961_v60 }
  0xdf   : > { %v1133_v62 = vsel %vm1038_vm2, %v1130_v63, %v3525_v3  ;;  %v1259_v13 = vadd.f32 %v1128_v25, %v964_v48  ;;  %v3154_v2 = vmul.f32 0.125, %v3020_v6  ;;  %v3157_v16 = vmul.f32 0.375, %v3022_v15 }
  0xe0   : > { %v3160_v49 = vadd.f32 %v1133_v62, %v967_v52  ;;  %v1421_v34 = vadd.f32 %v3151_v43, %v3148_v27  ;;  %v962_v63 = vadd.f32 %v827_v30, %v730_v31  ;;  %v965_v28 = vadd.f32 %v832_v46, %v733_v54 }
  0xe1   : > { %v3166_v11 = vmul.f32 0.375, %v3103_v0  ;;  %v3168_v41 = vmul.f32 0.125, %v1259_v13  ;;  %v3170_v5 = vmul.f32 0.375, %v1256_v57  ;;  %v3172_v6 = vmul.f32 0.375, %v1259_v13 }
  0xe2   : > { %3526 = vst [vmem:[#allocation55_spill] sm:$0xff] %v3160_v49  ;;  %v1257_v15 = vadd.f32 %v1122_v26, %v962_v63  ;;  %v1260_v40 = vadd.f32 %v1127_v37, %v965_v28  ;;  %v1422_v39 = vadd.f32 %v3157_v16, %v3154_v2  ;;  %v316_v10 = vunpack.c.l.bf16 %v253_v36 }
  0xe3   : > { %3527 = vst [vmem:[#allocation56_spill] sm:$0xff] %v3168_v41  ;;  %3528 = vst [vmem:[#allocation57_spill] sm:$0xff] %v3170_v5  ;;  %v3177_v22 = vmul.f32 0.375, %v3160_v49  ;;  %v1478_v46 = vadd.f32 %v1421_v34, %v3170_v5  ;;  %v317_v30 = vunpack.c.h.bf16 %v253_v36  ;;  %v318_v12 = vunpack.c.l.bf16 %v255_v21 }
  0xe4   : > { %3529 = vst [vmem:[#allocation58_spill] sm:$0xff] %v3172_v6  ;;  %v3180_v25 = vmul.f32 0.125, %v1260_v40  ;;  %v3182_v60 = vmul.f32 0.375, %v1257_v15  ;;  %v379_v48 = vmul.f32 0.125, %v316_v10  ;;  %v3185_v3 = vmul.f32 0.125, %v3084_v24 }
  0xe5   : > { %v1541_v37 = vadd.f32 %v1478_v46, %v3168_v41  ;;  %v380_v26 = vmul.f32 0.125, %v317_v30  ;;  %v381_v62 = vmul.f32 0.125, %v318_v12  ;;  %v442_v52 = vmul.f32 0.375, %v316_v10 }
  0xe6   : > { %3530 = vst [vmem:[#allocation59_spill] sm:$0xff] %v3180_v25  ;;  %v1479_v31 = vadd.f32 %v1422_v39, %v3182_v60  ;;  %v443_v54 = vmul.f32 0.375, %v317_v30  ;;  %v444_v13 = vmul.f32 0.375, %v318_v12  ;;  %v1134_v36 = vrot.slane %v379_v48, 3 }
  0xe7   : > { %v2056_v34 = vpack.c.bf16 %v1541_v37, %v1541_v37  ;;  %v607_v63 = vrot.slane %v442_v52, 1  ;;  %v839_v28 = vrot.slane %v442_v52, 2  ;;  %v1135_v21 = vrot.slane %v380_v26, 3 }
  0xe8   : > { %v1542_v14 = vadd.f32 %v1479_v31, %v3180_v25  ;;  %v608_v49 = vrot.slane %v443_v54, 1  ;;  %v610_v24 = vrot.slane %v444_v13, 1  ;;  %v840_v5 = vrot.slane %v443_v54, 2 }
  0xe9   : > { %1691 = vst [vmem:[%s2460_s20 + $0x58] sm:$0xf] %v2056_v34  ;;  %v842_v46 = vrot.slane %v444_v13, 2  ;;  %v1136_v41 = vsel %vm1038_vm2, %v1134_v36, %v1135_v21  ;;  %v1137_v10 = vrot.slane %v381_v62, 3  ;;  %v3192_v0 = vmul.f32 0.125, %v1256_v57 }
  0xea   : > { %v2057_v39 = vpack.c.bf16 %v1542_v14, %v1542_v14  ;;  %v609_v30 = vsel %vm511_vm0, %v607_v63, %v608_v49  ;;  %v611_v12 = vsel %vm511_vm0, %v608_v49, %v610_v24  ;;  %v841_v37 = vsel %vm743_vm1, %v839_v28, %v840_v5 }
  0xeb   : > { %v737_v52 = vadd.f32 %v609_v30, %v379_v48  ;;  %v738_v31 = vadd.f32 %v611_v12, %v380_v26  ;;  %v843_v25 = vsel %vm743_vm1, %v840_v5, %v842_v46  ;;  %v1138_v54 = vsel %vm1038_vm2, %v1135_v21, %v1137_v10 }
  0xec   : > { %1692 = vst [vmem:[%s2460_s20 + $0x5c] sm:$0x1] %v2057_v39  ;;  %v1426_v13 = vadd.f32 %v3110_v56, %v3185_v3  ;;  %v1427_v57 = vadd.f32 %v3172_v6, %v3192_v0  ;;  %v3531_v14 = vrot.slane %v3112_v23, 1  ;;  %v739_v49 = vadd.f32 %v610_v24, %v381_v62 }
  0xed   : > { %v969_v34 = vadd.f32 %v841_v37, %v737_v52  ;;  %v970_v63 = vadd.f32 %v843_v25, %v738_v31  ;;  %v3207_v48 = vmul.f32 0.125, %v1257_v15  ;;  %v3209_v26 = vmul.f32 0.375, %v1260_v40 }
  0xee   : > { %v736_v36 = vadd.f32 %v3531_v14, %v3105_v9  ;;  %v1483_v5 = vadd.f32 %v1426_v13, %v3166_v11  ;;  %v1484_v28 = vadd.f32 %v1427_v57, %v3177_v22  ;;  %v3532_v21 = vrot.slane %v3112_v23, 2 }
  0xef   : > { %v971_v30 = vadd.f32 %v842_v46, %v739_v49  ;;  %v3215_v12 = vadd.f32 %v1136_v41, %v969_v34  ;;  %v3217_v6 = vadd.f32 %v1138_v54, %v970_v63  ;;  %v1428_v62 = vadd.f32 %v3209_v26, %v3207_v48 }
  0xf0   : > { %v968_v39 = vadd.f32 %v3532_v21, %v736_v36  ;;  %v1273_v15 = vmul.f32 0.125, %v2398_v7  ;;  %v3533_v40 = vrot.slane %v3105_v9, 3  ;;  %v1274_v37 = vmul.f32 0.125, %v2400_v29  ;;  %v3538_v21 = vld [vmem:[#allocation14_spill] sm:$0xff] }
  0xf1   : > { %v3226_v24 = vadd.f32 %v1137_v10, %v971_v30  ;;  %v1275_v23 = vmul.f32 0.125, %v2453_v42  ;;  %v1492_v41 = vmul.f32 0.125, %v3215_v12  ;;  %v1493_v46 = vmul.f32 0.125, %v3217_v6 }
  0xf2   : > { %v3224_v25 = vadd.f32 %v3533_v40, %v968_v39  ;;  %v1381_v52 = vadd.f32 %v2418_v33, %v1273_v15  ;;  %v1387_v31 = vadd.f32 %v2525_v4, %v2415_v32  ;;  %v1382_v10 = vadd.f32 %v2421_v35, %v1274_v37  ;;  %v3539_v39 = vld [vmem:[#allocation21_spill] sm:$0xff]  ;;  %v3542_v40 = vld [vmem:[#allocation8_spill] sm:$0xff] }
  0xf3   : > { %v1494_v9 = vmul.f32 0.125, %v3226_v24  ;;  %v1383_v29 = vadd.f32 %v2471_v59, %v1275_v23  ;;  %v1546_v42 = vadd.f32 %v1492_v41, %v1483_v5  ;;  %v1547_v54 = vadd.f32 %v1493_v46, %v1484_v28  ;;  %v3537_v28 = vld [vmem:[#allocation12_spill] sm:$0xff]  ;;  %v3543_v23 = vld [vmem:[#allocation5_spill] sm:$0xff] }
  0xf4   : > { %v3236_v7 = vmul.f32 0.375, %v3224_v25  ;;  %v1438_v13 = vadd.f32 %v1381_v52, %v2520_v1  ;;  %v1444_v33 = vadd.f32 %v1387_v31, %v2528_v19  ;;  %v1439_v32 = vadd.f32 %v1382_v10, %v2568_v17  ;;  %v3544_v41 = vld [vmem:[#allocation9_spill] sm:$0xff]  ;;  %v3545_v52 = vld [vmem:[#allocation6_spill] sm:$0xff]  ;;  %v3546_v31 = vld [vmem:[#allocation15_spill] sm:$0xff] }
  0xf5   : > { %v1440_v4 = vadd.f32 %v1383_v29, %v2582_v44  ;;  %v1388_v14 = vadd.f32 %v2579_v50, %v2427_v38  ;;  %v2155_v36 = vpack.c.bf16 %v1547_v54, %v1546_v42  ;;  %v1389_v49 = vadd.f32 %v2591_v18, %v2468_v58  ;;  %v3534_v44 = vld [vmem:[#allocation2_spill] sm:$0xff]  ;;  %v3547_v10 = vld [vmem:[#allocation7_spill] sm:$0xff] }
  0xf6   : > { %v1485_v57 = vadd.f32 %v1428_v62, %v3236_v7  ;;  %v1501_v35 = vadd.f32 %v1438_v13, %v2600_v61  ;;  %v1507_v59 = vadd.f32 %v1444_v33, %v2697_v20  ;;  %v1502_v19 = vadd.f32 %v1439_v32, %v2608_v53  ;;  %v3535_v61 = vld [vmem:[#allocation13_spill] sm:$0xff]  ;;  %v3536_v20 = vld [vmem:[#allocation3_spill] sm:$0xff]  ;;  %v3540_v62 = vld [vmem:[#allocation22_spill] sm:$0xff] }
  0xf7   : > { %v1503_v38 = vadd.f32 %v1440_v4, %v2616_v51  ;;  %v1445_v17 = vadd.f32 %v1388_v14, %v2584_v55  ;;  %2195 = vst [vmem:[%s2460_s20 + $0x60] sm:$0xff] %v2155_v36   ;;  %v1446_v58 = vadd.f32 %v1389_v49, %v2618_v45  ;;  %v1450_v18 = vadd.f32 %v3534_v44, %v2700_v8  ;;  %v3541_v45 = vld [vmem:[#allocation4_spill] sm:$0xff]  ;;  %v3548_v29 = vld [vmem:[#allocation19_spill] sm:$0xff]  ;;  %v3550_v32 = vld [vmem:[#allocation30_spill] sm:$0xff] }
  0xf8   : > { %v1548_v1 = vadd.f32 %v1494_v9, %v1485_v57  ;;  %v2064_v50 = vpack.c.bf16 %v1507_v59, %v1507_v59  ;;  %v1451_v34 = vadd.f32 %v3536_v20, %v3535_v61  ;;  %v2160_v5 = vpack.c.bf16 %v1502_v19, %v1501_v35  ;;  %v3549_v33 = vld [vmem:[#allocation16_spill] sm:$0xff]  ;;  %v3551_v4 = vld [vmem:[#allocation11_spill] sm:$0xff]  ;;  %v3552_v36 = vld [vmem:[#allocation10_spill] sm:$0xff] }
  0xf9   : > { %v2063_v53 = vpack.c.bf16 %v1503_v38, %v1503_v38  ;;  %v1508_v51 = vadd.f32 %v1445_v17, %v3537_v28  ;;  %v1509_v55 = vadd.f32 %v1446_v58, %v3538_v21  ;;  %v1513_v30 = vadd.f32 %v1450_v18, %v3539_v39  ;;  %v3553_v59 = vld [vmem:[#allocation17_spill] sm:$0xff]  ;;  %v3555_v38 = vld [vmem:[#allocation34_spill] sm:$0xff]  ;;  %v3557_v58 = vld [vmem:[#allocation23_spill] sm:$0xff] }
  0xfa   : > { %v2060_v63 = vpack.c.bf16 %v1548_v1, %v1548_v1  ;;  %1816 = vst [vmem:[%s3257_s23 + $0xc] sm:$0xf] %v2064_v50  ;;  %v1514_v15 = vadd.f32 %v1451_v34, %v3540_v62  ;;  %v1395_v37 = vadd.f32 %v3542_v40, %v3541_v45  ;;  %2161 = vst [vmem:[%s3257_s23] sm:$0xff] %v2160_v5   ;;  %v3554_v1 = vld [vmem:[#allocation24_spill] sm:$0xff]  ;;  %v3556_v17 = vld [vmem:[#allocation18_spill] sm:$0xff] }
  0xfb   : > { %1815 = vst [vmem:[%s3257_s23 + $0x8] sm:$0x1] %v2063_v53  ;;  %v2065_v8 = vpack.c.bf16 %v1508_v51, %v1508_v51  ;;  %v1399_v46 = vadd.f32 %v3544_v41, %v3543_v23  ;;  %v1400_v9 = vadd.f32 %v3546_v31, %v3545_v52  ;;  %v1401_v42 = vadd.f32 %v3548_v29, %v3547_v10  ;;  %v3558_v18 = vld [vmem:[#allocation41_spill] sm:$0xff]  ;;  %v3559_v20 = vld [vmem:[#allocation20_spill] sm:$0xff]  ;;  %v3560_v34 = vld [vmem:[#allocation27_spill] sm:$0xff] }
  0xfc   : > { %1695 = vst [vmem:[%s2460_s20 + $0x68] sm:$0x1] %v2060_v63  ;;  %v2066_v54 = vpack.c.bf16 %v1509_v55, %v1509_v55  ;;  %v2165_v13 = vpack.c.bf16 %v1514_v15, %v1513_v30  ;;  %v1452_v57 = vadd.f32 %v1395_v37, %v3549_v33  ;;  %v1462_v14 = vadd.f32 %v3551_v4, %v3550_v32  ;;  %v3561_v5 = vld [vmem:[#allocation25_spill] sm:$0xff]  ;;  %v3562_v53 = vld [vmem:[#allocation31_spill] sm:$0xff]  ;;  %v3565_v30 = vld [vmem:[#allocation36_spill] sm:$0xff] }
  0xfd   : > { %1817 = vst [vmem:[%s3257_s23 + $0x10] sm:$0xf] %v2065_v8  ;;  %v1456_v35 = vadd.f32 %v1399_v46, %v3552_v36  ;;  %v1457_v49 = vadd.f32 %v1400_v9, %v3553_v59  ;;  %v1458_v19 = vadd.f32 %v1401_v42, %v3554_v1  ;;  %v1463_v50 = vadd.f32 %v3556_v17, %v3555_v38  ;;  %v3563_v51 = vld [vmem:[#allocation29_spill] sm:$0xff]  ;;  %v3566_v15 = vld [vmem:[#allocation42_spill] sm:$0xff]  ;;  %v3568_v23 = vld [vmem:[#allocation32_spill] sm:$0xff] }
  0xfe   : > { %1818 = vst [vmem:[%s3257_s23 + $0x14] sm:$0x1] %v2066_v54  ;;  %2196 = vst [vmem:[%s3257_s23 + $0x18] sm:$0xff] %v2165_v13   ;;  %v1515_v44 = vadd.f32 %v1452_v57, %v3557_v58  ;;  %v1525_v61 = vadd.f32 %v1462_v14, %v3558_v18  ;;  %v1407_v63 = vadd.f32 %v3560_v34, %v3559_v20  ;;  %v3564_v55 = vld [vmem:[#allocation33_spill] sm:$0xff]  ;;  %v3569_v46 = vld [vmem:[#allocation26_spill] sm:$0xff] }
  0xff   : > { %v1411_v28 = vadd.f32 %v3562_v53, %v3561_v5  ;;  %v1519_v21 = vadd.f32 %v1456_v35, %v3563_v51  ;;  %v1520_v39 = vadd.f32 %v1457_v49, %v3564_v55  ;;  %v1521_v62 = vadd.f32 %v1458_v19, %v3565_v30  ;;  %v3567_v37 = vld [vmem:[#allocation37_spill] sm:$0xff]  ;;  %v3570_v52 = vld [vmem:[#allocation35_spill] sm:$0xff]  ;;  %v3572_v57 = vld [vmem:[#allocation38_spill] sm:$0xff] }
 0x100   : > { %v1526_v45 = vadd.f32 %v1463_v50, %v3566_v15  ;;  %v2069_v40 = vpack.c.bf16 %v1515_v44, %v1515_v44  ;;  %v1464_v8 = vadd.f32 %v1407_v63, %v3567_v37  ;;  %v1412_v31 = vadd.f32 %v3570_v52, %v3569_v46  ;;  %v3571_v54 = vld [vmem:[#allocation43_spill] sm:$0xff]  ;;  %v3573_v4 = vld [vmem:[#allocation28_spill] sm:$0xff]  ;;  %v3575_v35 = vld [vmem:[#allocation49_spill] sm:$0xff] }
 0x101   : > { %v1468_v41 = vadd.f32 %v1411_v28, %v3568_v23  ;;  %v2070_v9 = vpack.c.bf16 %v1519_v21, %v1519_v21  ;;  %v2071_v10 = vpack.c.bf16 %v1520_v39, %v1520_v39  ;;  %v2072_v29 = vpack.c.bf16 %v1521_v62, %v1521_v62  ;;  %v3574_v14 = vld [vmem:[#allocation39_spill] sm:$0xff]  ;;  %v3576_v59 = vld [vmem:[#allocation50_spill] sm:$0xff]  ;;  %v3577_v1 = vld [vmem:[#allocation52_spill] sm:$0xff] }
 0x102   : > { %v2170_v42 = vpack.c.bf16 %v1526_v45, %v1525_v61  ;;  %1821 = vst [vmem:[%s3257_s23 + $0x20] sm:$0x1] %v2069_v40  ;;  %v1527_v13 = vadd.f32 %v1464_v8, %v3571_v54  ;;  %v1469_v32 = vadd.f32 %v1412_v31, %v3572_v57  ;;  %v1413_v36 = vadd.f32 %v3574_v14, %v3573_v4  ;;  %v3578_v38 = vld [vmem:[#allocation40_spill] sm:$0xff]  ;;  %v3580_v50 = vld [vmem:[#allocation45_spill] sm:$0xff]  ;;  %v3581_v58 = vld [vmem:[#allocation51_spill] sm:$0xff] }
 0x103   : > { %v1531_v33 = vadd.f32 %v1468_v41, %v3081_v47  ;;  %1822 = vst [vmem:[%s3257_s23 + $0x24] sm:$0xf] %v2070_v9  ;;  %1823 = vst [vmem:[%s3257_s23 + $0x28] sm:$0xf] %v2071_v10  ;;  %v1474_v49 = vadd.f32 %v3576_v59, %v3575_v35  ;;  %v1475_v19 = vadd.f32 %v3577_v1, %v3151_v43  ;;  %v3579_v17 = vld [vmem:[#allocation48_spill] sm:$0xff]  ;;  %v3583_v55 = vld [vmem:[#allocation53_spill] sm:$0xff] }
 0x104   : > { %1824 = vst [vmem:[%s3257_s23 + $0x2c] sm:$0x1] %v2072_v29  ;;  %2197 = vst [vmem:[%s3257_s23 + $0x30] sm:$0xff] %v2170_v42   ;;  %v1419_v47 = vadd.f32 %v3579_v17, %v3578_v38  ;;  %v1423_v44 = vadd.f32 %v3581_v58, %v3580_v50  ;;  %v2075_v18 = vpack.c.bf16 %v1527_v13, %v1527_v13  ;;  %v3582_v34 = vld [vmem:[#allocation44_spill] sm:$0xff]  ;;  %v3584_v39 = vld [vmem:[#allocation46_spill] sm:$0xff]  ;;  %v1491_v46 = vmul.f32 0.125, %v3224_v25 }
 0x105   : > { %v2076_v61 = vpack.c.bf16 %v1531_v33, %v1531_v33  ;;  %v1532_v20 = vadd.f32 %v1469_v32, %v3148_v27  ;;  %v1470_v63 = vadd.f32 %v1413_v36, %v3582_v34  ;;  %v1537_v5 = vadd.f32 %v1474_v49, %v3185_v3  ;;  %v3585_v30 = vld [vmem:[#allocation57_spill] sm:$0xff]  ;;  %v2191_v15 = vld [vmem:[%s2289_s16 + $0xf0] sm:$0xff]   ;;  %v3586_v45 = vld [vmem:[#allocation55_spill] sm:$0xff] }
 0x106   : > { %v1538_v53 = vadd.f32 %v1475_v19, %v3192_v0  ;;  %v1476_v43 = vadd.f32 %v1419_v47, %v3157_v16  ;;  %v1480_v28 = vadd.f32 %v1423_v44, %v3110_v56  ;;  %1827 = vst [vmem:[%s3257_s23 + $0x38] sm:$0x1] %v2075_v18  ;;  %v1489_v27 = vmul.f32 0.125, %v3583_v55  ;;  %v3587_v40 = vld [vmem:[#allocation47_spill] sm:$0xff]  ;;  %v258_v37 = vld [vmem:[%s2289_s16 + $0xf8] sm:$0x7] }
 0x107   : > { %1828 = vst [vmem:[%s3257_s23 + $0x3c] sm:$0xf] %v2076_v61  ;;  %v2077_v51 = vpack.c.bf16 %v1532_v20, %v1532_v20  ;;  %v1533_v21 = vadd.f32 %v1470_v63, %v3154_v2  ;;  %v1424_v62 = vadd.f32 %v3585_v30, %v3584_v39  ;;  %v1490_v16 = vmul.f32 0.125, %v3586_v45  ;;  %v3588_v23 = vld [vmem:[#allocation58_spill] sm:$0xff]  ;;  %v3590_v17 = vld [vmem:[#allocation56_spill] sm:$0xff] }
 0x108   : > { %v2175_v3 = vpack.c.bf16 %v1538_v53, %v1537_v5  ;;  %v1539_v0 = vadd.f32 %v1476_v43, %v3207_v48  ;;  %v1425_v56 = vadd.f32 %v3182_v60, %v3587_v40  ;;  %v1543_v2 = vadd.f32 %v1489_v27, %v1480_v28  ;;  %v3589_v10 = vld [vmem:[#allocation54_spill] sm:$0xff] }
 0x109   : > { %1829 = vst [vmem:[%s3257_s23 + $0x40] sm:$0xf] %v2077_v51  ;;  %v2078_v8 = vpack.c.bf16 %v1533_v21, %v1533_v21  ;;  %v1481_v41 = vadd.f32 %v1424_v62, %v3588_v23  ;;  %v2130_v48 = vunpack.c.l.bf16 %v2191_v15  ;;  %v2131_v9 = vunpack.c.h.bf16 %v2191_v15  ;;  %v3591_v51 = vld [vmem:[#allocation59_spill] sm:$0xff] }
 0x10a   : > { %2198 = vst [vmem:[%s3257_s23 + $0x48] sm:$0xff] %v2175_v3   ;;  %v2081_v52 = vpack.c.bf16 %v1539_v0, %v1539_v0  ;;  %v1482_v31 = vadd.f32 %v1425_v56, %v3209_v26  ;;  %v1429_v29 = vadd.f32 %v3166_v11, %v3589_v10  ;;  %v2082_v60 = vpack.c.bf16 %v1543_v2, %v1543_v2 }
 0x10b   : > { %1830 = vst [vmem:[%s3257_s23 + $0x44] sm:$0x1] %v2078_v8  ;;  %v1544_v42 = vadd.f32 %v1490_v16, %v1481_v41  ;;  %v321_v54 = vunpack.c.l.bf16 %v258_v37  ;;  %v382_v33 = vmul.f32 0.125, %v2130_v48  ;;  %v383_v57 = vmul.f32 0.125, %v2131_v9 }
 0x10c   : > { %1833 = vst [vmem:[%s3257_s23 + $0x50] sm:$0x1] %v2081_v52  ;;  %v1545_v13 = vadd.f32 %v1491_v46, %v1482_v31  ;;  %v445_v25 = vmul.f32 0.375, %v2130_v48  ;;  %1834 = vst [vmem:[%s3257_s23 + $0x54] sm:$0xf] %v2082_v60  ;;  %v446_v26 = vmul.f32 0.375, %v2131_v9  ;;  %v1430_v47 = vadd.f32 %v3177_v22, %v3590_v17 }
 0x10d   : > { %v2083_v32 = vpack.c.bf16 %v1544_v42, %v1544_v42  ;;  %v384_v4 = vmul.f32 0.125, %v321_v54  ;;  %v447_v14 = vmul.f32 0.375, %v321_v54  ;;  %v1139_v11 = vrot.slane %v382_v33, 3 }
 0x10e   : > { %v2084_v36 = vpack.c.bf16 %v1545_v13, %v1545_v13  ;;  %v612_v35 = vrot.slane %v445_v25, 1  ;;  %v844_v59 = vrot.slane %v445_v25, 2  ;;  %v613_v49 = vrot.slane %v446_v26, 1 }
 0x10f   : > { %1835 = vst [vmem:[%s3257_s23 + $0x58] sm:$0xf] %v2083_v32  ;;  %v615_v1 = vrot.slane %v447_v14, 1  ;;  %v845_v19 = vrot.slane %v446_v26, 2  ;;  %v847_v38 = vrot.slane %v447_v14, 2  ;;  %v1140_v50 = vrot.slane %v383_v57, 3 }
 0x110   : > { %1836 = vst [vmem:[%s3257_s23 + $0x5c] sm:$0x1] %v2084_v36  ;;  %v1142_v58 = vrot.slane %v384_v4, 3  ;;  %v1432_v44 = vmul.f32 0.375, %v3215_v12  ;;  %v614_v18 = vsel %vm511_vm0, %v612_v35, %v613_v49  ;;  %v1433_v43 = vmul.f32 0.375, %v3217_v6 }
 0x111   : > { %v616_v61 = vsel %vm511_vm0, %v613_v49, %v615_v1  ;;  %v846_v20 = vsel %vm743_vm1, %v844_v59, %v845_v19  ;;  %v848_v34 = vsel %vm743_vm1, %v845_v19, %v847_v38  ;;  %v740_v63 = vadd.f32 %v614_v18, %v382_v33 }
 0x112   : > { %v741_v5 = vadd.f32 %v616_v61, %v383_v57  ;;  %v1141_v53 = vsel %vm1038_vm2, %v1139_v11, %v1140_v50  ;;  %v1143_v22 = vsel %vm1038_vm2, %v1140_v50, %v1142_v58  ;;  %v742_v28 = vadd.f32 %v615_v1, %v384_v4 }
 0x113   : > { %v1431_v12 = vadd.f32 %v3236_v7, %v3591_v51  ;;  %v1434_v21 = vmul.f32 0.375, %v3226_v24  ;;  %v972_v55 = vadd.f32 %v846_v20, %v740_v63  ;;  %v1486_v15 = vadd.f32 %v1432_v44, %v1429_v29 }
 0x114   : > { %v973_v27 = vadd.f32 %v848_v34, %v741_v5  ;;  %v974_v39 = vadd.f32 %v847_v38, %v742_v28  ;;  %v1487_v3 = vadd.f32 %v1433_v43, %v1430_v47 }
 0x115   : > { %v1267_v30 = vadd.f32 %v1141_v53, %v972_v55  ;;  %v1488_v45 = vadd.f32 %v1434_v21, %v1431_v12 }
 0x116   : > { %v1268_v62 = vadd.f32 %v1143_v22, %v973_v27  ;;  %v1269_v0 = vadd.f32 %v1142_v58, %v974_v39 }
 0x117   : > { %v1495_v6 = vmul.f32 0.125, %v1267_v30 }
 0x118   : > { %v1496_v16 = vmul.f32 0.125, %v1268_v62  ;;  %v1497_v40 = vmul.f32 0.125, %v1269_v0 }
 0x119   : > { %v1549_v56 = vadd.f32 %v1495_v6, %v1486_v15 }
 0x11a   : > { %v1550_v37 = vadd.f32 %v1496_v16, %v1487_v3  ;;  %v1551_v8 = vadd.f32 %v1497_v40, %v1488_v45 }
 0x11c   : > { %v2180_v7 = vpack.c.bf16 %v1550_v37, %v1549_v56  ;;  %v2087_v2 = vpack.c.bf16 %v1551_v8, %v1551_v8 }
 0x11e   : > { %2199 = vst [vmem:[%s3257_s23 + $0x60] sm:$0xff] %v2180_v7   ;;  %1839 = vst [vmem:[%s3257_s23 + $0x68] sm:$0x1] %v2087_v2 }
 0x11f PF: > { %s13_s11 = sadd.s32 1, %s2248_s11   ;;  %s3592_s9 = smov %s2244_s10 }
 0x120   : > { %p10_p5 = scmp.ge.s32.totalorder %s13_s11, 4   ;;  %s3593_s10 = smov %s3595_s12 }
 0x122   :  { %12 = sbr.rel (!%p10_p5) target bundleno = 2 (0x2), region = 66 }

// kernel: resblock_forward.9
= control target key start
LH: loop header
LB: loop body
LE: loop exit
PB: predicated region body
PF: predicated region fallthrough
CT: control target
= control target key end

     0   :  { %s805_s1 = inlined_call_operand.vmem [shape: bf16[128,128], index: 1, kind: input, shape index: {}]   ;;  %s806_s0 = inlined_call_operand.vmem [shape: bf16[128,128], index: 0, kind: input, shape index: {}]   ;;  %s807_s2 = inlined_call_operand.vmem [shape: bf16[128,128], index: 2, kind: input, shape index: {}, may-alias: {2,3}]   ;;  %s808_s3 = inlined_call_operand.vmem [shape: bf16[128,128], index: 3, kind: output, shape index: {}, may-alias: {2,3}]  }
   0x1   :  { %v673_v0 = vld [vmem:[%s805_s1 + $0x38] sm:$0xff]   ;;  %v674_v1 = vld [vmem:[%s805_s1 + $0x30] sm:$0xff]   ;;  %v675_v2 = vld [vmem:[%s805_s1 + $0x28] sm:$0xff]  }
   0x2   :  { %625 = vmatprep.subr.bf16.mxu0 %v673_v0  ;;  %657 = vmatprep.subr.bf16.mxu1 %v673_v0  ;;  %v676_v3 = vld [vmem:[%s805_s1 + $0x20] sm:$0xff]   ;;  %v677_v6 = vld [vmem:[%s805_s1 + $0x18] sm:$0xff]   ;;  %v678_v7 = vld [vmem:[%s805_s1 + $0x10] sm:$0xff]  }
   0x3   :  { %626 = vmatpush3.bf16.msra.mxu0 %v673_v0  ;;  %665 = vmatpush3.bf16.msra.mxu1 %v673_v0  ;;  %v681_v4 = vld [vmem:[%s806_s0] sm:$0xff]   ;;  %v679_v8 = vld [vmem:[%s805_s1 + $0x8] sm:$0xff]   ;;  %v685_v12 = vld [vmem:[%s806_s0 + $0x10] sm:$0xff]  }
   0x4   :  { %627 = vmatprep.subr.bf16.mxu0 %v674_v1  ;;  %658 = vmatprep.subr.bf16.mxu1 %v674_v1  ;;  %v682_v5 = vld [vmem:[%s806_s0 + $0x20] sm:$0xff]   ;;  %v683_v10 = vld [vmem:[%s806_s0 + $0x8] sm:$0xff]   ;;  %v686_v13 = vld [vmem:[%s806_s0 + $0x30] sm:$0xff]  }
   0x5   :  { %641 = vmatprep.mubr.bf16.mxu0 %v681_v4  ;;  %649 = vmatprep.mubr.bf16.mxu1 %v682_v5  ;;  %v680_v9 = vld [vmem:[%s805_s1] sm:$0xff]   ;;  %v684_v11 = vld [vmem:[%s806_s0 + $0x28] sm:$0xff]   ;;  %v687_v14 = vld [vmem:[%s806_s0 + $0x18] sm:$0xff]  }
   0x6   :  { %v688_v15 = vld [vmem:[%s806_s0 + $0x38] sm:$0xff]   ;;  %v595_v16 = vld [vmem:[%s807_s2 + $0x8] sm:$0xff]   ;;  %v524_v18 = vld [vmem:[%s807_s2] sm:$0xff]  }
   0x7   :  { %628 = vmatpush3.bf16.msra.mxu0 %v674_v1  ;;  %666 = vmatpush3.bf16.msra.mxu1 %v674_v1  ;;  %v599_v17 = vld [vmem:[%s807_s2 + $0x28] sm:$0xff]   ;;  %v598_v19 = vld [vmem:[%s807_s2 + $0x20] sm:$0xff]   ;;  %v529_v20 = vunpack.c.l.bf16 %v595_v16  ;;  %v525_v24 = vunpack.c.l.bf16 %v524_v18  ;;  %v530_v26 = vunpack.c.h.bf16 %v595_v16  ;;  %v597_v32 = vld [vmem:[%s807_s2 + $0x18] sm:$0xff]   ;;  %v526_v34 = vunpack.c.h.bf16 %v524_v18 }
   0x8   :  { %629 = vmatprep.subr.bf16.mxu0 %v675_v2  ;;  %659 = vmatprep.subr.bf16.mxu1 %v675_v2  ;;  %v545_v21 = vunpack.c.l.bf16 %v599_v17  ;;  %v541_v25 = vunpack.c.l.bf16 %v598_v19  ;;  %v546_v27 = vunpack.c.h.bf16 %v599_v17  ;;  %v601_v33 = vld [vmem:[%s807_s2 + $0x38] sm:$0xff]   ;;  %v542_v35 = vunpack.c.h.bf16 %v598_v19  ;;  %v596_v36 = vld [vmem:[%s807_s2 + $0x10] sm:$0xff]  }
   0x9   :  { %v600_v37 = vld [vmem:[%s807_s2 + $0x30] sm:$0xff]   ;;  %v537_v44 = vunpack.c.l.bf16 %v597_v32  ;;  %v553_v45 = vunpack.c.l.bf16 %v601_v33  ;;  %v533_v50 = vunpack.c.l.bf16 %v596_v36  ;;  %v538_v60 = vunpack.c.h.bf16 %v597_v32 }
   0xa   :  { %v549_v51 = vunpack.c.l.bf16 %v600_v37  ;;  %v554_v61 = vunpack.c.h.bf16 %v601_v33 }
   0xb   :  { %630 = vmatpush3.bf16.msra.mxu0 %v675_v2  ;;  %667 = vmatpush3.bf16.msra.mxu1 %v675_v2 }
   0xc   :  { %631 = vmatprep.subr.bf16.mxu0 %v676_v3  ;;  %660 = vmatprep.subr.bf16.mxu1 %v676_v3 }
   0xf   :  { %632 = vmatpush3.bf16.msra.mxu0 %v676_v3  ;;  %668 = vmatpush3.bf16.msra.mxu1 %v676_v3 }
  0x10   :  { %633 = vmatprep.subr.bf16.mxu0 %v677_v6  ;;  %661 = vmatprep.subr.bf16.mxu1 %v677_v6 }
  0x13   :  { %634 = vmatpush3.bf16.msra.mxu0 %v677_v6  ;;  %669 = vmatpush3.bf16.msra.mxu1 %v677_v6 }
  0x14   :  { %635 = vmatprep.subr.bf16.mxu0 %v678_v7  ;;  %662 = vmatprep.subr.bf16.mxu1 %v678_v7 }
  0x17   :  { %636 = vmatpush3.bf16.msra.mxu0 %v678_v7  ;;  %670 = vmatpush3.bf16.msra.mxu1 %v678_v7 }
  0x18   :  { %637 = vmatprep.subr.bf16.mxu0 %v679_v8  ;;  %663 = vmatprep.subr.bf16.mxu1 %v679_v8 }
  0x1b   :  { %638 = vmatpush3.bf16.msra.mxu0 %v679_v8  ;;  %671 = vmatpush3.bf16.msra.mxu1 %v679_v8  ;;  %v534_v8 = vunpack.c.h.bf16 %v596_v36 }
  0x1c   :  { %639 = vmatprep.subr.bf16.mxu0 %v680_v9  ;;  %664 = vmatprep.subr.bf16.mxu1 %v680_v9 }
  0x1f   :  { %640 = vmatpush3.bf16.msra.mxu0 %v680_v9  ;;  %672 = vmatpush3.bf16.msra.mxu1 %v680_v9  ;;  %v550_v9 = vunpack.c.h.bf16 %v600_v37 }
  0x22   :  { %642 = vmatmul.mubr.bf16.vlgmr.msra.gmra.mxu0 %v683_v10  ;;  %650 = vmatmul.mubr.bf16.vlgmr.msra.gmra.mxu1 %v684_v11 }
  0x23   :  { %645 = vmatprep.mubr.bf16.mxu0 %v685_v12  ;;  %653 = vmatprep.mubr.bf16.mxu1 %v686_v13 }
  0x2a   :  { %646 = vmatmul.mubr.bf16.gmra.mxu0 %v687_v14  ;;  %654 = vmatmul.mubr.bf16.gmra.mxu1 %v688_v15 }
  0xe2   :  { %v643_v22 = vpop.f32.mrf.mxu0  ;;  %v651_v23 = vpop.f32.mrf.mxu1 }
  0xe3   :  { %v361_v28 = vadd.f32 %v643_v22, %v529_v20  ;;  %v369_v29 = vadd.f32 %v651_v23, %v545_v21 }
  0xe4   :  { %v213_v30 = vpop.f32.mrf.mxu0  ;;  %v245_v31 = vpop.f32.mrf.mxu1 }
  0xe5   :  { %v359_v38 = vadd.f32 %v525_v24, %v213_v30  ;;  %v367_v39 = vadd.f32 %v541_v25, %v245_v31  ;;  %v377_v46 = vmul.f32 0.70710677, %v361_v28  ;;  %v385_v47 = vmul.f32 0.70710677, %v369_v29 }
  0xe6   :  { %v644_v40 = vpop.f32.mrf.mxu0  ;;  %v652_v41 = vpop.f32.mrf.mxu1 }
  0xe7   :  { %v362_v42 = vadd.f32 %v644_v40, %v530_v26  ;;  %v370_v43 = vadd.f32 %v652_v41, %v546_v27  ;;  %v375_v56 = vmul.f32 0.70710677, %v359_v38  ;;  %v383_v57 = vmul.f32 0.70710677, %v367_v39 }
  0xe8   :  { %v216_v48 = vpop.f32.mrf.mxu0  ;;  %v248_v49 = vpop.f32.mrf.mxu1 }
  0xe9   :  { %v378_v52 = vmul.f32 0.70710677, %v362_v42  ;;  %v386_v53 = vmul.f32 0.70710677, %v370_v43  ;;  %v360_v54 = vadd.f32 %v526_v34, %v216_v48  ;;  %v368_v55 = vadd.f32 %v542_v35, %v248_v49 }
  0xea   :  { %v647_v58 = vpop.f32.mrf.mxu0  ;;  %v655_v59 = vpop.f32.mrf.mxu1 }
  0xeb   :  { %v563_v62 = vpack.c.bf16 %v378_v52, %v377_v46  ;;  %v583_v63 = vpack.c.bf16 %v386_v53, %v385_v47  ;;  %v376_v0 = vmul.f32 0.70710677, %v360_v54  ;;  %v384_v1 = vmul.f32 0.70710677, %v368_v55 }
  0xec   :  { %v365_v2 = vadd.f32 %v647_v58, %v537_v44  ;;  %v373_v3 = vadd.f32 %v655_v59, %v553_v45  ;;  %v229_v4 = vpop.f32.mrf.mxu0  ;;  %v261_v5 = vpop.f32.mrf.mxu1 }
  0xed   :  { %602 = vst [vmem:[%s808_s3 + $0x8] sm:$0xff] %v563_v62   ;;  %606 = vst [vmem:[%s808_s3 + $0x28] sm:$0xff] %v583_v63   ;;  %v558_v6 = vpack.c.bf16 %v376_v0, %v375_v56  ;;  %v578_v7 = vpack.c.bf16 %v384_v1, %v383_v57  ;;  %v363_v10 = vadd.f32 %v533_v50, %v229_v4 }
  0xee   :  { %v371_v11 = vadd.f32 %v549_v51, %v261_v5  ;;  %v648_v12 = vpop.f32.mrf.mxu0  ;;  %v656_v13 = vpop.f32.mrf.mxu1  ;;  %v381_v16 = vmul.f32 0.70710677, %v365_v2  ;;  %v389_v17 = vmul.f32 0.70710677, %v373_v3 }
  0xef   :  { %559 = vst [vmem:[%s808_s3] sm:$0xff] %v558_v6   ;;  %605 = vst [vmem:[%s808_s3 + $0x20] sm:$0xff] %v578_v7   ;;  %v366_v14 = vadd.f32 %v648_v12, %v538_v60  ;;  %v374_v15 = vadd.f32 %v656_v13, %v554_v61  ;;  %v379_v24 = vmul.f32 0.70710677, %v363_v10 }
  0xf0   :  { %v232_v18 = vpop.f32.mrf.mxu0  ;;  %v264_v19 = vpop.f32.mrf.mxu1  ;;  %v387_v25 = vmul.f32 0.70710677, %v371_v11 }
  0xf1   :  { %v382_v20 = vmul.f32 0.70710677, %v366_v14  ;;  %v390_v21 = vmul.f32 0.70710677, %v374_v15  ;;  %v364_v22 = vadd.f32 %v534_v8, %v232_v18  ;;  %v372_v23 = vadd.f32 %v550_v9, %v264_v19 }
  0xf3   :  { %v573_v26 = vpack.c.bf16 %v382_v20, %v381_v16  ;;  %v593_v27 = vpack.c.bf16 %v390_v21, %v389_v17  ;;  %v380_v28 = vmul.f32 0.70710677, %v364_v22  ;;  %v388_v29 = vmul.f32 0.70710677, %v372_v23 }
  0xf5   :  { %604 = vst [vmem:[%s808_s3 + $0x18] sm:$0xff] %v573_v26   ;;  %608 = vst [vmem:[%s808_s3 + $0x38] sm:$0xff] %v593_v27   ;;  %v568_v30 = vpack.c.bf16 %v380_v28, %v379_v24  ;;  %v588_v31 = vpack.c.bf16 %v388_v29, %v387_v25 }
  0xf7   :  { %603 = vst [vmem:[%s808_s3 + $0x10] sm:$0xff] %v568_v30   ;;  %607 = vst [vmem:[%s808_s3 + $0x30] sm:$0xff] %v588_v31  }

// kernel: resblock_forward.7
= control target key start
LH: loop header
LB: loop body
LE: loop exit
PB: predicated region body
PF: predicated region fallthrough
CT: control target
= control target key end

     0   :  { %s3942_s21 = smov 0   ;;  %s3944_s22 = smov 0   ;;  %s4591_s0 = inlined_call_operand.vmem [shape: bf16[2,9,9,256], index: 0, kind: input, shape index: {}, may-alias: {0,1}]   ;;  %s4592_s1 = inlined_call_operand.vmem [shape: bf16[2,9,9,256], index: 1, kind: input, shape index: {}, may-alias: {0,1}]   ;;  %s4593_s2 = inlined_call_operand.vmem [shape: bf16[2,9,9,256], index: 2, kind: input, shape index: {}, may-alias: {2,3}]   ;;  %s4594_s3 = inlined_call_operand.vmem [shape: bf16[2,9,9,256], index: 3, kind: input, shape index: {}, may-alias: {2,3}]   ;;  %s4595_s4 = inlined_call_operand.vmem [shape: bf16[9,128,128], index: 4, kind: input, shape index: {}]   ;;  %s4596_s5 = inlined_call_operand.vmem [shape: f32[1,128], index: 5, kind: input, shape index: {}]   ;;  %s4597_s6 = inlined_call_operand.vmem [shape: bf16[2,64,128], index: 6, kind: output, shape index: {}]  }
   0x1   :  { %s3946_s23 = smov 0   ;;  %s3948_s24 = smov 0  }
   0x2   :  { %s3950_s25 = smov 0  }
   0x3 LB: > { %s35_s26 = sadd.s32 1, %s3901_s24  ;;  %p51_p1 = scmp.ne.s32.totalorder %s3893_s22, %s3889_s21  ;;  %s3905_s25 = sphi %s3950_s25, %s16_s25   ;;  %s3901_s24 = sphi %s3948_s24, %s4620_s24   ;;  %s3897_s23 = sphi %s3946_s23, %s4619_s23   ;;  %s3893_s22 = sphi %s3944_s22, %s4618_s22   ;;  %s3889_s21 = sphi %s3942_s21, %s4617_s21  }
   0x4   : > { %p37_p0 = scmp.ge.s32.totalorder %s35_s26, 2  ;;  %p52_p2 = scmp.eq.s32.totalorder %s3905_s25, 0 }
   0x5   : > { %s44_s29 = sadd.s32 1, %s3893_s22  ;;  %p3029_p5 = scmp.ge.s32.totalorder %s3905_s25, 2 }
   0x6   : > { %s4622_s26 = smov (%p37_p0, %s35_s26), 0  ;;  %p3973_p3 = por %p52_p2, %p51_p1 }
   0x7   : > { %s39_s28 = ssub.s32 %s3901_s24, %s4622_s26  ;;  %265 = sbr.rel (%p3029_p5) target bundleno = 80 (0x50), region = 24 }
   0x8   : > { %p42_p4 = scmp.eq.s32.totalorder %s39_s28, 0 }
   0xa   : > { %s3981_s30 = scalar_select %p42_p4, %s3893_s22, %s44_s29  }
   0xc   : > { %268 = sbr.rel (!%p3973_p3) target bundleno = 29 (0x1d), region = 28  ;;  %s270_s7 = sand.u32 (%p3973_p3), 1, %s3893_s22  }
   0xd   : > { %s3725_s8 = smul.u32 (%p3973_p3), 144, %s3901_s24 }
   0xe   : > { %s3724_s9 = smul.u32 (%p3973_p3), 72, %s270_s7 }
   0xf   : > { %s3991_s12 = scalar_lea.vmem (%p3973_p3), %s4591_s0, %s3725_s8 }
  0x10   : > { %v293_v0 = vld [vmem:[%s3991_s12] sm:$0xf] (%p3973_p3)  ;;  %v295_v1 = vld [vmem:[%s3991_s12 + $0x8] sm:$0xf] (%p3973_p3)  ;;  %s3995_s13 = scalar_lea.vmem (%p3973_p3), [#allocation3], %s3724_s9 }
  0x11   : > { %294 = vst [vmem:[%s3995_s13] sm:$0xf] %v293_v0  ;;  %296 = vst [vmem:[%s3995_s13 + $0x4] sm:$0xf] %v295_v1  ;;  %v297_v2 = vld [vmem:[%s3991_s12 + $0x10] sm:$0xf] }
  0x12   : > { %v299_v3 = vld [vmem:[%s3991_s12 + $0x18] sm:$0xf]  ;;  %v301_v4 = vld [vmem:[%s3991_s12 + $0x20] sm:$0xf]  ;;  %298 = vst [vmem:[%s3995_s13 + $0x8] sm:$0xf] %v297_v2 }
  0x13   : > { %300 = vst [vmem:[%s3995_s13 + $0xc] sm:$0xf] %v299_v3  ;;  %302 = vst [vmem:[%s3995_s13 + $0x10] sm:$0xf] %v301_v4  ;;  %v303_v5 = vld [vmem:[%s3991_s12 + $0x28] sm:$0xf] }
  0x14   : > { %v305_v6 = vld [vmem:[%s3991_s12 + $0x30] sm:$0xf]  ;;  %v307_v7 = vld [vmem:[%s3991_s12 + $0x38] sm:$0xf]  ;;  %304 = vst [vmem:[%s3995_s13 + $0x14] sm:$0xf] %v303_v5 }
  0x15   : > { %306 = vst [vmem:[%s3995_s13 + $0x18] sm:$0xf] %v305_v6  ;;  %308 = vst [vmem:[%s3995_s13 + $0x1c] sm:$0xf] %v307_v7  ;;  %v309_v8 = vld [vmem:[%s3991_s12 + $0x40] sm:$0xf] }
  0x16   : > { %v311_v9 = vld [vmem:[%s3991_s12 + $0x48] sm:$0xf]  ;;  %v313_v10 = vld [vmem:[%s3991_s12 + $0x50] sm:$0xf]  ;;  %310 = vst [vmem:[%s3995_s13 + $0x20] sm:$0xf] %v309_v8 }
  0x17   : > { %312 = vst [vmem:[%s3995_s13 + $0x24] sm:$0xf] %v311_v9  ;;  %314 = vst [vmem:[%s3995_s13 + $0x28] sm:$0xf] %v313_v10  ;;  %v315_v11 = vld [vmem:[%s3991_s12 + $0x58] sm:$0xf] }
  0x18   : > { %v317_v12 = vld [vmem:[%s3991_s12 + $0x60] sm:$0xf]  ;;  %v319_v13 = vld [vmem:[%s3991_s12 + $0x68] sm:$0xf]  ;;  %316 = vst [vmem:[%s3995_s13 + $0x2c] sm:$0xf] %v315_v11 }
  0x19   : > { %318 = vst [vmem:[%s3995_s13 + $0x30] sm:$0xf] %v317_v12  ;;  %320 = vst [vmem:[%s3995_s13 + $0x34] sm:$0xf] %v319_v13  ;;  %v321_v14 = vld [vmem:[%s3991_s12 + $0x70] sm:$0xf] }
  0x1a   : > { %v323_v15 = vld [vmem:[%s3991_s12 + $0x78] sm:$0xf]  ;;  %v325_v16 = vld [vmem:[%s3991_s12 + $0x80] sm:$0xf]  ;;  %322 = vst [vmem:[%s3995_s13 + $0x38] sm:$0xf] %v321_v14 }
  0x1b   : > { %324 = vst [vmem:[%s3995_s13 + $0x3c] sm:$0xf] %v323_v15  ;;  %326 = vst [vmem:[%s3995_s13 + $0x40] sm:$0xf] %v325_v16  ;;  %v327_v17 = vld [vmem:[%s3991_s12 + $0x88] sm:$0xf] }
  0x1c   : > { %328 = vst [vmem:[%s3995_s13 + $0x44] sm:$0xf] %v327_v17 }
  0x1d PF: > { %388 = sbr.rel (!%p3973_p3) target bundleno = 46 (0x2e), region = 69  ;;  %s390_s14 = sand.u32 (%p3973_p3), 1, %s3893_s22  }
  0x1e   : > { %s3031_s15 = smul.u32 (%p3973_p3), 144, %s3901_s24 }
  0x1f   : > { %s3726_s16 = smul.u32 (%p3973_p3), 72, %s390_s14 }
  0x20   : > { %s4038_s19 = scalar_lea.vmem (%p3973_p3), %s4592_s1, %s3031_s15 }
  0x21   : > { %v3032_v18 = vld [vmem:[%s4038_s19 + $0x4] sm:$0xf] (%p3973_p3)  ;;  %v3033_v19 = vld [vmem:[%s4038_s19 + $0xc] sm:$0xf] (%p3973_p3)  ;;  %s4042_s20 = scalar_lea.vmem (%p3973_p3), [#allocation4], %s3726_s16 }
  0x22   : > { %415 = vst [vmem:[%s4042_s20] sm:$0xf] %v3032_v18  ;;  %417 = vst [vmem:[%s4042_s20 + $0x4] sm:$0xf] %v3033_v19  ;;  %v3034_v20 = vld [vmem:[%s4038_s19 + $0x14] sm:$0xf] }
  0x23   : > { %v3035_v21 = vld [vmem:[%s4038_s19 + $0x1c] sm:$0xf]  ;;  %v3036_v22 = vld [vmem:[%s4038_s19 + $0x24] sm:$0xf]  ;;  %419 = vst [vmem:[%s4042_s20 + $0x8] sm:$0xf] %v3034_v20 }
  0x24   : > { %421 = vst [vmem:[%s4042_s20 + $0xc] sm:$0xf] %v3035_v21  ;;  %423 = vst [vmem:[%s4042_s20 + $0x10] sm:$0xf] %v3036_v22  ;;  %v3037_v23 = vld [vmem:[%s4038_s19 + $0x2c] sm:$0xf] }
  0x25   : > { %v3038_v24 = vld [vmem:[%s4038_s19 + $0x34] sm:$0xf]  ;;  %v3039_v25 = vld [vmem:[%s4038_s19 + $0x3c] sm:$0xf]  ;;  %425 = vst [vmem:[%s4042_s20 + $0x14] sm:$0xf] %v3037_v23 }
  0x26   : > { %427 = vst [vmem:[%s4042_s20 + $0x18] sm:$0xf] %v3038_v24  ;;  %429 = vst [vmem:[%s4042_s20 + $0x1c] sm:$0xf] %v3039_v25  ;;  %v3040_v26 = vld [vmem:[%s4038_s19 + $0x44] sm:$0xf] }
  0x27   : > { %v3041_v27 = vld [vmem:[%s4038_s19 + $0x4c] sm:$0xf]  ;;  %v3042_v28 = vld [vmem:[%s4038_s19 + $0x54] sm:$0xf]  ;;  %431 = vst [vmem:[%s4042_s20 + $0x20] sm:$0xf] %v3040_v26 }
  0x28   : > { %433 = vst [vmem:[%s4042_s20 + $0x24] sm:$0xf] %v3041_v27  ;;  %435 = vst [vmem:[%s4042_s20 + $0x28] sm:$0xf] %v3042_v28  ;;  %v3043_v29 = vld [vmem:[%s4038_s19 + $0x5c] sm:$0xf] }
  0x29   : > { %v3044_v30 = vld [vmem:[%s4038_s19 + $0x64] sm:$0xf]  ;;  %v3045_v31 = vld [vmem:[%s4038_s19 + $0x6c] sm:$0xf]  ;;  %437 = vst [vmem:[%s4042_s20 + $0x2c] sm:$0xf] %v3043_v29 }
  0x2a   : > { %439 = vst [vmem:[%s4042_s20 + $0x30] sm:$0xf] %v3044_v30  ;;  %441 = vst [vmem:[%s4042_s20 + $0x34] sm:$0xf] %v3045_v31  ;;  %v3046_v32 = vld [vmem:[%s4038_s19 + $0x74] sm:$0xf] }
  0x2b   : > { %v3047_v33 = vld [vmem:[%s4038_s19 + $0x7c] sm:$0xf]  ;;  %v3048_v34 = vld [vmem:[%s4038_s19 + $0x84] sm:$0xf]  ;;  %443 = vst [vmem:[%s4042_s20 + $0x38] sm:$0xf] %v3046_v32 }
  0x2c   : > { %445 = vst [vmem:[%s4042_s20 + $0x3c] sm:$0xf] %v3047_v33  ;;  %447 = vst [vmem:[%s4042_s20 + $0x40] sm:$0xf] %v3048_v34  ;;  %v3049_v35 = vld [vmem:[%s4038_s19 + $0x8c] sm:$0xf] }
  0x2d   : > { %449 = vst [vmem:[%s4042_s20 + $0x44] sm:$0xf] %v3049_v35 }
  0x2e PF: > { %509 = sbr.rel (!%p3973_p3) target bundleno = 63 (0x3f), region = 110  ;;  %s511_s28 = sand.u32 (%p3973_p3), 1, %s3893_s22  }
  0x2f   : > { %s3728_s29 = smul.u32 (%p3973_p3), 144, %s3901_s24 }
  0x30   : > { %s3727_s7 = smul.u32 (%p3973_p3), 72, %s511_s28 }
  0x31   : > { %s4085_s10 = scalar_lea.vmem (%p3973_p3), %s4593_s2, %s3728_s29 }
  0x32   : > { %v534_v36 = vld [vmem:[%s4085_s10] sm:$0xf] (%p3973_p3)  ;;  %v536_v37 = vld [vmem:[%s4085_s10 + $0x8] sm:$0xf] (%p3973_p3)  ;;  %s4089_s11 = scalar_lea.vmem (%p3973_p3), [#allocation5], %s3727_s7 }
  0x33   : > { %535 = vst [vmem:[%s4089_s11] sm:$0xf] %v534_v36  ;;  %537 = vst [vmem:[%s4089_s11 + $0x4] sm:$0xf] %v536_v37  ;;  %v538_v38 = vld [vmem:[%s4085_s10 + $0x10] sm:$0xf] }
  0x34   : > { %v540_v39 = vld [vmem:[%s4085_s10 + $0x18] sm:$0xf]  ;;  %v542_v40 = vld [vmem:[%s4085_s10 + $0x20] sm:$0xf]  ;;  %539 = vst [vmem:[%s4089_s11 + $0x8] sm:$0xf] %v538_v38 }
  0x35   : > { %541 = vst [vmem:[%s4089_s11 + $0xc] sm:$0xf] %v540_v39  ;;  %543 = vst [vmem:[%s4089_s11 + $0x10] sm:$0xf] %v542_v40  ;;  %v544_v41 = vld [vmem:[%s4085_s10 + $0x28] sm:$0xf] }
  0x36   : > { %v546_v42 = vld [vmem:[%s4085_s10 + $0x30] sm:$0xf]  ;;  %v548_v43 = vld [vmem:[%s4085_s10 + $0x38] sm:$0xf]  ;;  %545 = vst [vmem:[%s4089_s11 + $0x14] sm:$0xf] %v544_v41 }
  0x37   : > { %547 = vst [vmem:[%s4089_s11 + $0x18] sm:$0xf] %v546_v42  ;;  %549 = vst [vmem:[%s4089_s11 + $0x1c] sm:$0xf] %v548_v43  ;;  %v550_v44 = vld [vmem:[%s4085_s10 + $0x40] sm:$0xf] }
  0x38   : > { %v552_v45 = vld [vmem:[%s4085_s10 + $0x48] sm:$0xf]  ;;  %v554_v46 = vld [vmem:[%s4085_s10 + $0x50] sm:$0xf]  ;;  %551 = vst [vmem:[%s4089_s11 + $0x20] sm:$0xf] %v550_v44 }
  0x39   : > { %553 = vst [vmem:[%s4089_s11 + $0x24] sm:$0xf] %v552_v45  ;;  %555 = vst [vmem:[%s4089_s11 + $0x28] sm:$0xf] %v554_v46  ;;  %v556_v47 = vld [vmem:[%s4085_s10 + $0x58] sm:$0xf] }
  0x3a   : > { %v558_v48 = vld [vmem:[%s4085_s10 + $0x60] sm:$0xf]  ;;  %v560_v49 = vld [vmem:[%s4085_s10 + $0x68] sm:$0xf]  ;;  %557 = vst [vmem:[%s4089_s11 + $0x2c] sm:$0xf] %v556_v47 }
  0x3b   : > { %559 = vst [vmem:[%s4089_s11 + $0x30] sm:$0xf] %v558_v48  ;;  %561 = vst [vmem:[%s4089_s11 + $0x34] sm:$0xf] %v560_v49  ;;  %v562_v50 = vld [vmem:[%s4085_s10 + $0x70] sm:$0xf] }
  0x3c   : > { %v564_v51 = vld [vmem:[%s4085_s10 + $0x78] sm:$0xf]  ;;  %v566_v52 = vld [vmem:[%s4085_s10 + $0x80] sm:$0xf]  ;;  %563 = vst [vmem:[%s4089_s11 + $0x38] sm:$0xf] %v562_v50 }
  0x3d   : > { %565 = vst [vmem:[%s4089_s11 + $0x3c] sm:$0xf] %v564_v51  ;;  %567 = vst [vmem:[%s4089_s11 + $0x40] sm:$0xf] %v566_v52  ;;  %v568_v53 = vld [vmem:[%s4085_s10 + $0x88] sm:$0xf] }
  0x3e   : > { %569 = vst [vmem:[%s4089_s11 + $0x44] sm:$0xf] %v568_v53 }
  0x3f PF: > { %629 = sbr.rel (!%p3973_p3) target bundleno = 80 (0x50), region = 151  ;;  %s631_s12 = sand.u32 (%p3973_p3), 1, %s3893_s22  }
  0x40   : > { %s3051_s13 = smul.u32 (%p3973_p3), 144, %s3901_s24 }
  0x41   : > { %s3729_s14 = smul.u32 (%p3973_p3), 72, %s631_s12 }
  0x42   : > { %s4132_s17 = scalar_lea.vmem (%p3973_p3), %s4594_s3, %s3051_s13 }
  0x43   : > { %v3052_v54 = vld [vmem:[%s4132_s17 + $0x4] sm:$0xf] (%p3973_p3)  ;;  %v3053_v55 = vld [vmem:[%s4132_s17 + $0xc] sm:$0xf] (%p3973_p3)  ;;  %s4136_s27 = scalar_lea.vmem (%p3973_p3), [#allocation6], %s3729_s14 }
  0x44   : > { %656 = vst [vmem:[%s4136_s27] sm:$0xf] %v3052_v54  ;;  %658 = vst [vmem:[%s4136_s27 + $0x4] sm:$0xf] %v3053_v55  ;;  %v3054_v56 = vld [vmem:[%s4132_s17 + $0x14] sm:$0xf] }
  0x45   : > { %v3055_v57 = vld [vmem:[%s4132_s17 + $0x1c] sm:$0xf]  ;;  %v3056_v58 = vld [vmem:[%s4132_s17 + $0x24] sm:$0xf]  ;;  %660 = vst [vmem:[%s4136_s27 + $0x8] sm:$0xf] %v3054_v56 }
  0x46   : > { %662 = vst [vmem:[%s4136_s27 + $0xc] sm:$0xf] %v3055_v57  ;;  %664 = vst [vmem:[%s4136_s27 + $0x10] sm:$0xf] %v3056_v58  ;;  %v3057_v59 = vld [vmem:[%s4132_s17 + $0x2c] sm:$0xf] }
  0x47   : > { %v3058_v60 = vld [vmem:[%s4132_s17 + $0x34] sm:$0xf]  ;;  %v3059_v61 = vld [vmem:[%s4132_s17 + $0x3c] sm:$0xf]  ;;  %666 = vst [vmem:[%s4136_s27 + $0x14] sm:$0xf] %v3057_v59 }
  0x48   : > { %668 = vst [vmem:[%s4136_s27 + $0x18] sm:$0xf] %v3058_v60  ;;  %670 = vst [vmem:[%s4136_s27 + $0x1c] sm:$0xf] %v3059_v61  ;;  %v3060_v62 = vld [vmem:[%s4132_s17 + $0x44] sm:$0xf] }
  0x49   : > { %v3061_v63 = vld [vmem:[%s4132_s17 + $0x4c] sm:$0xf]  ;;  %v3062_v0 = vld [vmem:[%s4132_s17 + $0x54] sm:$0xf]  ;;  %672 = vst [vmem:[%s4136_s27 + $0x20] sm:$0xf] %v3060_v62 }
  0x4a   : > { %674 = vst [vmem:[%s4136_s27 + $0x24] sm:$0xf] %v3061_v63  ;;  %676 = vst [vmem:[%s4136_s27 + $0x28] sm:$0xf] %v3062_v0  ;;  %v3063_v1 = vld [vmem:[%s4132_s17 + $0x5c] sm:$0xf] }
  0x4b   : > { %v3064_v2 = vld [vmem:[%s4132_s17 + $0x64] sm:$0xf]  ;;  %v3065_v3 = vld [vmem:[%s4132_s17 + $0x6c] sm:$0xf]  ;;  %678 = vst [vmem:[%s4136_s27 + $0x2c] sm:$0xf] %v3063_v1 }
  0x4c   : > { %680 = vst [vmem:[%s4136_s27 + $0x30] sm:$0xf] %v3064_v2  ;;  %682 = vst [vmem:[%s4136_s27 + $0x34] sm:$0xf] %v3065_v3  ;;  %v3066_v4 = vld [vmem:[%s4132_s17 + $0x74] sm:$0xf] }
  0x4d   : > { %v3067_v5 = vld [vmem:[%s4132_s17 + $0x7c] sm:$0xf]  ;;  %v3068_v6 = vld [vmem:[%s4132_s17 + $0x84] sm:$0xf]  ;;  %684 = vst [vmem:[%s4136_s27 + $0x38] sm:$0xf] %v3066_v4 }
  0x4e   : > { %686 = vst [vmem:[%s4136_s27 + $0x3c] sm:$0xf] %v3067_v5  ;;  %688 = vst [vmem:[%s4136_s27 + $0x40] sm:$0xf] %v3068_v6  ;;  %v3069_v7 = vld [vmem:[%s4132_s17 + $0x8c] sm:$0xf] }
  0x4f   : > { %690 = vst [vmem:[%s4136_s27 + $0x44] sm:$0xf] %v3069_v7 }
  0x50 PF: > { %p3070_p6 = scmp.ge.s32.totalorder %s3905_s25, 1  ;;  %p749_p7 = scmp.lt.s32.totalorder %s3905_s25, 3 }
  0x52   : > { %p750_p8 = pnand %p3070_p6, %p749_p7 }
  0x54   : > { %753 = sbr.rel (%p750_p8) target bundleno = 464 (0x1d0), region = 192 }
  0x59   : > { %v3771_v8 = vld [vmem:[%s4595_s4 + $0x38] sm:$0xff]   ;;  %v3773_v10 = vld [vmem:[%s4595_s4 + $0x30] sm:$0xff]   ;;  %v3775_v12 = vld [vmem:[%s4595_s4 + $0x28] sm:$0xff]   ;;  %s756_s14 = sand.u32 1, %s3889_s21   ;;  %vm1230_vm0 = vsmask.f32 3328 }
  0x5a   : > { %v3772_v9 = vld [vmem:[%s4595_s4 + $0x78] sm:$0xff]   ;;  %3492 = vmatprep.subr.bf16.mxu0 %v3771_v8  ;;  %v3774_v11 = vld [vmem:[%s4595_s4 + $0x70] sm:$0xff]   ;;  %v3776_v13 = vld [vmem:[%s4595_s4 + $0x68] sm:$0xff]   ;;  %s4199_s18 = smul.u32 72, %s756_s14  ;;  %vm1231_vm1 = vsmask.f32 7440 }
  0x5b   : > { %3516 = vmatprep.subr.bf16.mxu1 %v3772_v9  ;;  %3493 = vmatpush3.bf16.msra.mxu0 %v3771_v8  ;;  %v3777_v14 = vld [vmem:[%s4595_s4 + $0x20] sm:$0xff]   ;;  %v3779_v16 = vld [vmem:[%s4595_s4 + $0x18] sm:$0xff]   ;;  %v3781_v18 = vld [vmem:[%s4595_s4 + $0x10] sm:$0xff]   ;;  %p846_p9 = scmp.lt.s32.totalorder %s3897_s23, 1 }
  0x5c   : > { %3517 = vmatpush3.bf16.msra.mxu1 %v3772_v9  ;;  %3494 = vmatprep.subr.bf16.mxu0 %v3773_v10  ;;  %v3778_v15 = vld [vmem:[%s4595_s4 + $0x60] sm:$0xff]   ;;  %v3780_v17 = vld [vmem:[%s4595_s4 + $0x58] sm:$0xff]   ;;  %v3782_v19 = vld [vmem:[%s4595_s4 + $0x50] sm:$0xff]   ;;  %s4214_s10 = scalar_lea.vmem [#allocation3], %s4199_s18  ;;  %s4218_s11 = scalar_lea.vmem [#allocation4], %s4199_s18 }
  0x5d   : > { %3518 = vmatprep.subr.bf16.mxu1 %v3774_v11  ;;  %v3787_v20 = vld [vmem:[%s4214_s10] ss:$8 sps:$4 sm:$0xff]   ;;  %v3788_v21 = vld [vmem:[%s4218_s11] ss:$8 sps:$4 sm:$0xff]   ;;  %v1215_v41 = vld [vmem:[%s4214_s10 + $0x4] sm:$0x1] }
  0x5e   : > { %3508 = vmatprep.mubr.bf16.mxu0 %v3787_v20  ;;  %3532 = vmatprep.mubr.bf16.mxu1 %v3788_v21  ;;  %v3783_v22 = vld [vmem:[%s4595_s4 + $0x8] sm:$0xff]   ;;  %v3785_v24 = vld [vmem:[%s4595_s4] sm:$0xff]   ;;  %v3791_v27 = vld [vmem:[%s4595_s4 + $0xb8] sm:$0xff]   ;;  %v1243_v47 = vshll.u32 %v1215_v41, 16  ;;  %s4271_s29 = scalar_lea.vmem [#allocation5], %s4199_s18  ;;  %s4360_s9 = scalar_lea.vmem [#allocation6], %s4199_s18 }
  0x5f   : > { %3495 = vmatpush3.bf16.msra.mxu0 %v3773_v10  ;;  %v3784_v23 = vld [vmem:[%s4595_s4 + $0x48] sm:$0xff]   ;;  %v3786_v25 = vld [vmem:[%s4595_s4 + $0x40] sm:$0xff]   ;;  %v3792_v28 = vld [vmem:[%s4595_s4 + $0xf8] sm:$0xff]   ;;  %s4624_s23 = smov (!%p846_p9, %s3897_s23), 1 }
  0x60   : > { %3519 = vmatpush3.bf16.msra.mxu1 %v3774_v11  ;;  %3496 = vmatprep.subr.bf16.mxu0 %v3775_v12  ;;  %v3789_v26 = vld [vmem:[%s4214_s10 + $0x10] ss:$8 sps:$4 sm:$0xff]   ;;  %v3790_v29 = vld [vmem:[%s4218_s11 + $0x10] ss:$8 sps:$4 sm:$0xff]   ;;  %v1217_v43 = vld [vmem:[%s4214_s10 + $0xc] sm:$0x1] }
  0x61   : > { %3520 = vmatprep.subr.bf16.mxu1 %v3776_v13  ;;  %v3793_v30 = vld [vmem:[%s4595_s4 + $0xb0] sm:$0xff]   ;;  %v3795_v34 = vld [vmem:[%s4595_s4 + $0xa8] sm:$0xff]   ;;  %v3797_v36 = vld [vmem:[%s4595_s4 + $0xa0] sm:$0xff]   ;;  %v1257_v50 = vshll.u32 %v1217_v43, 16  ;;  %v1245_v57 = vrot.slane %v1243_v47, 5 }
  0x62   : > { %v3794_v31 = vld [vmem:[%s4595_s4 + $0xf0] sm:$0xff]   ;;  %v3796_v35 = vld [vmem:[%s4595_s4 + $0xe8] sm:$0xff]   ;;  %v3798_v38 = vld [vmem:[%s4595_s4 + $0xe0] sm:$0xff]  }
  0x63   : > { %3497 = vmatpush3.bf16.msra.mxu0 %v3775_v12  ;;  %v3801_v32 = vld [vmem:[%s4214_s10 + $0x20] ss:$8 sps:$4 sm:$0xff]   ;;  %v3802_v33 = vld [vmem:[%s4218_s11 + $0x20] ss:$8 sps:$4 sm:$0xff]   ;;  %v1219_v59 = vld [vmem:[%s4214_s10 + $0x14] sm:$0x1] }
  0x64   : > { %3521 = vmatpush3.bf16.msra.mxu1 %v3776_v13  ;;  %3498 = vmatprep.subr.bf16.mxu0 %v3777_v14  ;;  %v3803_v37 = vld [vmem:[%s4214_s10 + $0x30] ss:$8 sps:$4 sm:$0xff]   ;;  %v3804_v39 = vld [vmem:[%s4218_s11 + $0x30] ss:$8 sps:$4 sm:$0xff]   ;;  %v1221_v62 = vld [vmem:[%s4214_s10 + $0x1c] sm:$0x1] }
  0x65   : > { %3522 = vmatprep.subr.bf16.mxu1 %v3778_v15  ;;  %v1214_v40 = vld [vmem:[%s4214_s10] sm:$0xf]  ;;  %v1216_v42 = vld [vmem:[%s4214_s10 + $0x8] sm:$0xf]  ;;  %v3799_v44 = vld [vmem:[%s4595_s4 + $0x98] sm:$0xff]   ;;  %v1271_v1 = vshll.u32 %v1219_v59, 16 }
  0x66   : > { %v1234_v45 = vshrl.u32 %v1214_v40, 16  ;;  %v1237_v46 = vshll.u32 %v1214_v40, 16  ;;  %v1248_v48 = vshrl.u32 %v1216_v42, 16  ;;  %v1251_v49 = vshll.u32 %v1216_v42, 16  ;;  %v3811_v51 = vld [vmem:[%s4271_s29] ss:$8 sps:$4 sm:$0xff]   ;;  %vm4286_vm2 = vmor %vm1230_vm0, %vm1231_vm1 }
  0x67   : > { %3499 = vmatpush3.bf16.msra.mxu0 %v3777_v14  ;;  %v3800_v52 = vld [vmem:[%s4595_s4 + $0xd8] sm:$0xff]   ;;  %v3805_v2 = vld [vmem:[%s4595_s4 + $0x90] sm:$0xff]   ;;  %v1259_v5 = vrot.slane %v1257_v50, 5  ;;  %v1285_v11 = vshll.u32 %v1221_v62, 16  ;;  %v4293_v14 = vrot.slane %v1271_v1, 5 }
  0x68   : > { %3523 = vmatpush3.bf16.msra.mxu1 %v3778_v15  ;;  %3500 = vmatprep.subr.bf16.mxu0 %v3779_v16  ;;  %v1236_v53 = vrot.slane %v1234_v45, 4  ;;  %v1239_v54 = vrot.slane %v1237_v46, 5  ;;  %v1250_v55 = vrot.slane %v1248_v48, 4  ;;  %v1218_v56 = vld [vmem:[%s4214_s10 + $0x10] sm:$0xf]  ;;  %v1253_v58 = vrot.slane %v1251_v49, 5 }
  0x69   : > { %3524 = vmatprep.subr.bf16.mxu1 %v3780_v17  ;;  %v1220_v60 = vld [vmem:[%s4214_s10 + $0x18] sm:$0xf]  ;;  %v1262_v63 = vshrl.u32 %v1218_v56, 16  ;;  %v1265_v0 = vshll.u32 %v1218_v56, 16  ;;  %v3806_v12 = vld [vmem:[%s4595_s4 + $0xd0] sm:$0xff]  }
  0x6a   : > { %v1240_v61 = vor.u32 %v1239_v54, %v1236_v53  ;;  %v1254_v4 = vor.u32 %v1253_v58, %v1250_v55  ;;  %v1276_v6 = vshrl.u32 %v1220_v60, 16  ;;  %v1279_v7 = vshll.u32 %v1220_v60, 16  ;;  %v1228_v48 = vld [vmem:[%s4214_s10 + $0x38] sm:$0xf] }
  0x6b   : > { %3501 = vmatpush3.bf16.msra.mxu0 %v3779_v16  ;;  %v1264_v9 = vrot.slane %v1262_v63, 4  ;;  %v1267_v10 = vrot.slane %v1265_v0, 5  ;;  %v1335_v58 = vshll.u32 %v1228_v48, 16  ;;  %v3813_v59 = vld [vmem:[%s4595_s4 + $0x138] sm:$0xff]  }
  0x6c   : > { %3525 = vmatpush3.bf16.msra.mxu1 %v3780_v17  ;;  %3502 = vmatprep.subr.bf16.mxu0 %v3781_v18  ;;  %v1241_v8 = vrot.slane %v1240_v61, 4  ;;  %v1255_v13 = vrot.slane %v1254_v4, 4  ;;  %v1278_v15 = vrot.slane %v1276_v6, 4  ;;  %v1281_v16 = vrot.slane %v1279_v7, 5  ;;  %v3807_v17 = vld [vmem:[%s4595_s4 + $0x88] sm:$0xff]   ;;  %v3814_v63 = vld [vmem:[%s4595_s4 + $0x178] sm:$0xff]  }
  0x6d   : > { %3526 = vmatprep.subr.bf16.mxu1 %v3782_v19 }
  0x6e   : > { %v1260_v20 = vsel %vm4286_vm2, %v1255_v13, %v1259_v5  ;;  %v1282_v21 = vor.u32 %v1281_v16, %v1278_v15  ;;  %v3812_v5 = vld [vmem:[%s4271_s29 + $0x10] ss:$8 sps:$4 sm:$0xff]  }
  0x6f   : > { %3503 = vmatpush3.bf16.msra.mxu0 %v3781_v18  ;;  %v1246_v18 = vsel %vm4286_vm2, %v1241_v8, %v1245_v57  ;;  %v1332_v57 = vshrl.u32 %v1228_v48, 16  ;;  %v3816_v15 = vld [vmem:[%s4595_s4 + $0x170] sm:$0xff]  }
  0x70   : > { %3527 = vmatpush3.bf16.msra.mxu1 %v3782_v19  ;;  %3504 = vmatprep.subr.bf16.mxu0 %v3783_v22  ;;  %v1268_v19 = vor.u32 %v1267_v10, %v1264_v9  ;;  %v1844_v48 = vld [vmem:[%s4271_s29 + $0x14] sm:$0x1] }
  0x71   : > { %3528 = vmatprep.subr.bf16.mxu1 %v3784_v23  ;;  %v1334_v1 = vrot.slane %v1332_v57, 4 }
  0x73   : > { %3505 = vmatpush3.bf16.msra.mxu0 %v3783_v22  ;;  %v3129_v22 = vcombine.low %v1246_v18, %v1260_v20  ;;  %v3817_v18 = vld [vmem:[%s4595_s4 + $0x128] sm:$0xff]  }
  0x74   : > { %3529 = vmatpush3.bf16.msra.mxu1 %v3784_v23  ;;  %3506 = vmatprep.subr.bf16.mxu0 %v3785_v24  ;;  %v1269_v23 = vrot.slane %v1268_v19, 4 }
  0x75   : > { %3530 = vmatprep.subr.bf16.mxu1 %v3786_v25 }
  0x77   : > { %3507 = vmatpush3.bf16.msra.mxu0 %v3785_v24  ;;  %v1287_v24 = vrot.slane %v1285_v11, 5 }
  0x78   : > { %3531 = vmatpush3.bf16.msra.mxu1 %v3786_v25  ;;  %3540 = vmatprep.subr.bf16.mxu0 %v3791_v27  ;;  %v3808_v25 = vld [vmem:[%s4595_s4 + $0xc8] sm:$0xff]  }
  0x79   : > { %3564 = vmatprep.subr.bf16.mxu1 %v3792_v28 }
  0x7a   : > { %3509 = vmatmul.mubr.bf16.vlgmr.msra.gmra.mxu0 %v3789_v26  ;;  %v1283_v26 = vrot.slane %v1282_v21, 4  ;;  %v3818_v21 = vld [vmem:[%s4595_s4 + $0x168] sm:$0xff]  }
  0x7b   : > { %3533 = vmatmul.mubr.bf16.vlgmr.msra.gmra.mxu1 %v3790_v29  ;;  %3541 = vmatpush3.bf16.msra.mxu0 %v3791_v27  ;;  %v1222_v27 = vld [vmem:[%s4214_s10 + $0x20] sm:$0xf]  ;;  %v1224_v29 = vld [vmem:[%s4214_s10 + $0x28] sm:$0xf] }
  0x7c   : > { %3565 = vmatpush3.bf16.msra.mxu1 %v3792_v28  ;;  %3542 = vmatprep.subr.bf16.mxu0 %v3793_v30  ;;  %v1223_v28 = vld [vmem:[%s4214_s10 + $0x24] sm:$0x1]  ;;  %v1288_v40 = vsel %vm4286_vm2, %v1283_v26, %v1287_v24  ;;  %v3823_v26 = vld [vmem:[%s4595_s4 + $0x118] sm:$0xff]  }
  0x7d   : > { %3566 = vmatprep.subr.bf16.mxu1 %v3794_v31  ;;  %3512 = vmatprep.mubr.bf16.mxu0 %v3801_v32  ;;  %v1293_v32 = vshll.u32 %v1222_v27, 16  ;;  %v3821_v24 = vld [vmem:[%s4595_s4 + $0x120] sm:$0xff]  }
  0x7e   : > { %3536 = vmatprep.mubr.bf16.mxu1 %v3802_v33  ;;  %v3809_v33 = vld [vmem:[%s4595_s4 + $0x80] sm:$0xff]  }
  0x7f   : > { %3543 = vmatpush3.bf16.msra.mxu0 %v3793_v30  ;;  %v1225_v30 = vld [vmem:[%s4214_s10 + $0x2c] sm:$0x1]  ;;  %v1295_v42 = vrot.slane %v1293_v32, 5 }
  0x80   : > { %3567 = vmatpush3.bf16.msra.mxu1 %v3794_v31  ;;  %3544 = vmatprep.subr.bf16.mxu0 %v3795_v34  ;;  %v1290_v31 = vshrl.u32 %v1222_v27, 16  ;;  %v1313_v43 = vshll.u32 %v1225_v30, 16  ;;  %v3831_v27 = vld [vmem:[%s4360_s9] ss:$8 sps:$4 sm:$0xff]   ;;  %v1841_v30 = vld [vmem:[%s4271_s29 + $0x8] sm:$0xf] }
  0x81   : > { %3568 = vmatprep.subr.bf16.mxu1 %v3796_v35 }
  0x82   : > { %3513 = vmatmul.mubr.bf16.gmra.mxu0 %v3803_v37  ;;  %v1307_v37 = vshll.u32 %v1224_v29, 16  ;;  %v1292_v41 = vrot.slane %v1290_v31, 4  ;;  %v1842_v31 = vld [vmem:[%s4271_s29 + $0xc] sm:$0x1] }
  0x83   : > { %3545 = vmatpush3.bf16.msra.mxu0 %v3795_v34  ;;  %3537 = vmatmul.mubr.bf16.gmra.mxu1 %v3804_v39  ;;  %v1274_v34 = vsel %vm4286_vm2, %v1269_v23, %v4293_v14  ;;  %v3810_v39 = vld [vmem:[%s4595_s4 + $0xc0] sm:$0xff]  }
  0x84   : > { %3569 = vmatpush3.bf16.msra.mxu1 %v3796_v35  ;;  %3546 = vmatprep.subr.bf16.mxu0 %v3797_v36  ;;  %v1299_v35 = vshll.u32 %v1223_v28, 16  ;;  %v1309_v47 = vrot.slane %v1307_v37, 5  ;;  %v1296_v50 = vor.u32 %v1295_v42, %v1292_v41  ;;  %v3130_v4 = vcombine.low %v1274_v34, %v1288_v40  ;;  %v3819_v14 = vld [vmem:[%s4271_s29 + $0x20] ss:$8 sps:$4 sm:$0xff]   ;;  %v3820_v23 = vld [vmem:[%s4271_s29 + $0x30] ss:$8 sps:$4 sm:$0xff]  }
  0x85   : > { %3570 = vmatprep.subr.bf16.mxu1 %v3798_v38  ;;  %3580 = vmatprep.mubr.bf16.mxu1 %v3811_v51  ;;  %v1315_v51 = vrot.slane %v1313_v43, 5  ;;  %v1839_v28 = vld [vmem:[%s4271_s29] sm:$0xf]  ;;  %v1879_v37 = vshll.u32 %v1842_v31, 16  ;;  %v3825_v41 = vld [vmem:[%s4595_s4 + $0x110] sm:$0xff]  }
  0x86   : > { %3556 = vmatprep.mubr.bf16.mxu0 %v3129_v22  ;;  %v1301_v45 = vrot.slane %v1299_v35, 5  ;;  %v1297_v60 = vrot.slane %v1296_v50, 4  ;;  %v1856_v32 = vshrl.u32 %v1839_v28, 16  ;;  %v1870_v35 = vshrl.u32 %v1841_v30, 16  ;;  %v1846_v50 = vld [vmem:[%s4271_s29 + $0x1c] sm:$0x1] }
  0x87   : > { %3547 = vmatpush3.bf16.msra.mxu0 %v3797_v36  ;;  %v1304_v36 = vshrl.u32 %v1224_v29, 16  ;;  %v1840_v29 = vld [vmem:[%s4271_s29 + $0x4] sm:$0x1]  ;;  %v1851_v31 = vld [vmem:[%s4271_s29 + $0x30] sm:$0xf] }
  0x88   : > { %3571 = vmatpush3.bf16.msra.mxu1 %v3798_v38  ;;  %3548 = vmatprep.subr.bf16.mxu0 %v3799_v44  ;;  %v1226_v38 = vld [vmem:[%s4214_s10 + $0x30] sm:$0xf]  ;;  %v1302_v6 = vsel %vm4286_vm2, %v1297_v60, %v1301_v45  ;;  %v1865_v34 = vshll.u32 %v1840_v29, 16  ;;  %v1872_v43 = vrot.slane %v1870_v35, 4  ;;  %v1881_v45 = vrot.slane %v1879_v37, 5 }
  0x89   : > { %3572 = vmatprep.subr.bf16.mxu1 %v3800_v52  ;;  %v1306_v46 = vrot.slane %v1304_v36, 4  ;;  %v1318_v49 = vshrl.u32 %v1226_v38, 16  ;;  %v1321_v53 = vshll.u32 %v1226_v38, 16  ;;  %v1873_v36 = vshll.u32 %v1841_v30, 16  ;;  %v3824_v38 = vld [vmem:[%s4595_s4 + $0x158] sm:$0xff]  }
  0x8a   : > { %v1867_v42 = vrot.slane %v1865_v34, 5  ;;  %v1853_v37 = vld [vmem:[%s4271_s29 + $0x38] sm:$0xf] }
  0x8b   : > { %3549 = vmatpush3.bf16.msra.mxu0 %v3799_v44  ;;  %v1227_v44 = vld [vmem:[%s4214_s10 + $0x34] sm:$0x1]  ;;  %v1310_v55 = vor.u32 %v1309_v47, %v1306_v46  ;;  %v1320_v56 = vrot.slane %v1318_v49, 4  ;;  %v1323_v61 = vrot.slane %v1321_v53, 5  ;;  %v1843_v46 = vld [vmem:[%s4271_s29 + $0x10] sm:$0xf] }
  0x8c   : > { %3573 = vmatpush3.bf16.msra.mxu1 %v3800_v52  ;;  %3550 = vmatprep.subr.bf16.mxu0 %v3805_v2  ;;  %v1229_v52 = vld [vmem:[%s4214_s10 + $0x3c] sm:$0x1]  ;;  %v1327_v54 = vshll.u32 %v1227_v44, 16  ;;  %v1875_v44 = vrot.slane %v1873_v36, 5  ;;  %v1845_v49 = vld [vmem:[%s4271_s29 + $0x18] sm:$0xf] }
  0x8d   : > { %3574 = vmatprep.subr.bf16.mxu1 %v3806_v12  ;;  %v1341_v62 = vshll.u32 %v1229_v52, 16  ;;  %v1311_v0 = vrot.slane %v1310_v55, 4  ;;  %v1324_v7 = vor.u32 %v1323_v61, %v1320_v56  ;;  %v1884_v53 = vshrl.u32 %v1843_v46, 16 }
  0x8e   : > { %v1329_v9 = vrot.slane %v1327_v54, 5  ;;  %v1876_v52 = vor.u32 %v1875_v44, %v1872_v43  ;;  %v1887_v54 = vshll.u32 %v1843_v46, 16  ;;  %v1893_v55 = vshll.u32 %v1844_v48, 16  ;;  %v3837_v43 = vld [vmem:[%s4360_s9 + $0x20] ss:$8 sps:$4 sm:$0xff]  }
  0x8f   : > { %3551 = vmatpush3.bf16.msra.mxu0 %v3805_v2  ;;  %v1337_v2 = vrot.slane %v1335_v58, 5  ;;  %v1316_v8 = vsel %vm4286_vm2, %v1311_v0, %v1315_v51  ;;  %v1343_v11 = vrot.slane %v1341_v62, 5  ;;  %v1325_v13 = vrot.slane %v1324_v7, 4  ;;  %v3826_v51 = vld [vmem:[%s4595_s4 + $0x150] sm:$0xff]  }
  0x90   : > { %3575 = vmatpush3.bf16.msra.mxu1 %v3806_v12  ;;  %3552 = vmatprep.subr.bf16.mxu0 %v3807_v17  ;;  %v3815_v12 = vld [vmem:[%s4595_s4 + $0x130] sm:$0xff]   ;;  %v3131_v16 = vcombine.low %v1302_v6, %v1316_v8  ;;  %v1898_v57 = vshrl.u32 %v1845_v49, 16  ;;  %v1901_v58 = vshll.u32 %v1845_v49, 16  ;;  %v1877_v60 = vrot.slane %v1876_v52, 4 }
  0x91   : > { %3576 = vmatprep.subr.bf16.mxu1 %v3808_v25  ;;  %v1338_v10 = vor.u32 %v1337_v2, %v1334_v1  ;;  %v1330_v19 = vsel %vm4286_vm2, %v1325_v13, %v1329_v9  ;;  %v1886_v61 = vrot.slane %v1884_v53, 4  ;;  %v1889_v62 = vrot.slane %v1887_v54, 5  ;;  %v3835_v48 = vld [vmem:[%s4595_s4 + $0x1b0] sm:$0xff]  }
  0x92   : > { %v1900_v1 = vrot.slane %v1898_v57, 4  ;;  %v1903_v2 = vrot.slane %v1901_v58, 5  ;;  %v1895_v8 = vrot.slane %v1893_v55, 5  ;;  %v1954_v46 = vshrl.u32 %v1853_v37, 16  ;;  %v3836_v53 = vld [vmem:[%s4595_s4 + $0x1f0] sm:$0xff]  }
  0x93   : > { %3553 = vmatpush3.bf16.msra.mxu0 %v3807_v17  ;;  %v1339_v17 = vrot.slane %v1338_v10, 4  ;;  %v1890_v6 = vor.u32 %v1889_v62, %v1886_v61 }
  0x94   : > { %3577 = vmatpush3.bf16.msra.mxu1 %v3808_v25  ;;  %3554 = vmatprep.subr.bf16.mxu0 %v3809_v33  ;;  %v3822_v25 = vld [vmem:[%s4595_s4 + $0x160] sm:$0xff]   ;;  %v1904_v9 = vor.u32 %v1903_v2, %v1900_v1  ;;  %v1956_v55 = vrot.slane %v1954_v46, 4  ;;  %v3840_v2 = vld [vmem:[%s4595_s4 + $0x1e8] sm:$0xff]   ;;  %v3856_v46 = vld [vmem:[%s4595_s4 + $0x230] sm:$0xff]  }
  0x95   : > { %3578 = vmatprep.subr.bf16.mxu1 %v3810_v39  ;;  %v1344_v20 = vsel %vm4286_vm2, %v1339_v17, %v1343_v11  ;;  %v1891_v11 = vrot.slane %v1890_v6, 4  ;;  %v3833_v17 = vld [vmem:[%s4595_s4 + $0x1b8] sm:$0xff]   ;;  %v3838_v6 = vld [vmem:[%s4360_s9 + $0x30] ss:$8 sps:$4 sm:$0xff]  }
  0x96   : > { %v3132_v22 = vcombine.low %v1330_v19, %v1344_v20  ;;  %v1905_v13 = vrot.slane %v1904_v9, 4  ;;  %v1848_v19 = vld [vmem:[%s4271_s29 + $0x24] sm:$0x1]  ;;  %v1849_v20 = vld [vmem:[%s4271_s29 + $0x28] sm:$0xf] }
  0x97   : > { %3555 = vmatpush3.bf16.msra.mxu0 %v3809_v33  ;;  %v1859_v33 = vshll.u32 %v1839_v28, 16  ;;  %v1929_v29 = vshll.u32 %v1849_v20, 16 }
  0x98   : > { %3579 = vmatpush3.bf16.msra.mxu1 %v3810_v39  ;;  %3588 = vmatprep.subr.bf16.mxu0 %v3813_v59  ;;  %v1858_v39 = vrot.slane %v1856_v32, 4  ;;  %v1852_v32 = vld [vmem:[%s4271_s29 + $0x34] sm:$0x1] }
  0x99   : > { %3612 = vmatprep.subr.bf16.mxu1 %v3814_v63  ;;  %v1861_v40 = vrot.slane %v1859_v33, 5 }
  0x9a   : > { %3557 = vmatmul.mubr.bf16.vlgmr.msra.gmra.mxu0 %v3130_v4  ;;  %v3828_v4 = vld [vmem:[%s4595_s4 + $0x148] sm:$0xff]  }
  0x9b   : > { %3581 = vmatmul.mubr.bf16.vlgmr.msra.gmra.mxu1 %v3812_v5  ;;  %3589 = vmatpush3.bf16.msra.mxu0 %v3813_v59  ;;  %v1862_v47 = vor.u32 %v1861_v40, %v1858_v39  ;;  %v1907_v59 = vshll.u32 %v1846_v50, 16  ;;  %v1882_v5 = vsel %vm4286_vm2, %v1877_v60, %v1881_v45  ;;  %v1854_v40 = vld [vmem:[%s4271_s29 + $0x3c] sm:$0x1]  ;;  %v1949_v45 = vshll.u32 %v1852_v32, 16  ;;  %v3305_v32 = vld [vmem:[%s4214_s10 + $0x28] sm:$0xf] }
  0x9c   : > { %3613 = vmatpush3.bf16.msra.mxu1 %v3814_v63  ;;  %3590 = vmatprep.subr.bf16.mxu0 %v3815_v12  ;;  %v3827_v63 = vld [vmem:[%s4595_s4 + $0x108] sm:$0xff]   ;;  %v1963_v52 = vshll.u32 %v1854_v40, 16  ;;  %v3308_v40 = vld [vmem:[%s4214_s10 + $0x34] sm:$0x1] }
  0x9d   : > { %3614 = vmatprep.subr.bf16.mxu1 %v3816_v15  ;;  %3560 = vmatprep.mubr.bf16.mxu0 %v3131_v16  ;;  %v1863_v56 = vrot.slane %v1862_v47, 4  ;;  %v1909_v10 = vrot.slane %v1907_v59, 5  ;;  %v1957_v47 = vshll.u32 %v1853_v37, 16  ;;  %v1951_v59 = vrot.slane %v1949_v45, 5 }
  0x9e   : > { %3584 = vmatprep.mubr.bf16.mxu1 %v3819_v14  ;;  %v3830_v14 = vld [vmem:[%s4595_s4 + $0x140] sm:$0xff]   ;;  %v1965_v62 = vrot.slane %v1963_v52, 5  ;;  %v2539_v45 = vshll.u32 %v3305_v32, 16 }
  0x9f   : > { %3591 = vmatpush3.bf16.msra.mxu0 %v3815_v12  ;;  %v1868_v0 = vsel %vm4286_vm2, %v1863_v56, %v1867_v42  ;;  %v3829_v12 = vld [vmem:[%s4595_s4 + $0x100] sm:$0xff]   ;;  %v1910_v16 = vsel %vm4286_vm2, %v1905_v13, %v1909_v10  ;;  %v1943_v42 = vshll.u32 %v1851_v31, 16  ;;  %v1959_v56 = vrot.slane %v1957_v47, 5  ;;  %v3851_v13 = vld [vmem:[%s4214_s10 + $0x8] ss:$8 sps:$4 sm:$0xff]  }
  0xa0   : > { %3615 = vmatpush3.bf16.msra.mxu1 %v3816_v15  ;;  %3592 = vmatprep.subr.bf16.mxu0 %v3817_v18  ;;  %v3213_v7 = vcombine.low %v1868_v0, %v1882_v5  ;;  %v1896_v15 = vsel %vm4286_vm2, %v1891_v11, %v1895_v8  ;;  %v3841_v10 = vld [vmem:[%s4595_s4 + $0x1a0] sm:$0xff]  }
  0xa1   : > { %3616 = vmatprep.subr.bf16.mxu1 %v3818_v21  ;;  %v3214_v28 = vcombine.low %v1896_v15, %v1910_v16  ;;  %v1960_v61 = vor.u32 %v1959_v56, %v1956_v55  ;;  %v3842_v11 = vld [vmem:[%s4595_s4 + $0x1e0] sm:$0xff]   ;;  %v3844_v15 = vld [vmem:[%s4595_s4 + $0x1d8] sm:$0xff]   ;;  %v3845_v16 = vld [vmem:[%s4595_s4 + $0x190] sm:$0xff]   ;;  %v2559_v55 = vshll.u32 %v3308_v40, 16 }
  0xa2   : > { %3561 = vmatmul.mubr.bf16.gmra.mxu0 %v3132_v22  ;;  %v1850_v22 = vld [vmem:[%s4271_s29 + $0x2c] sm:$0x1]  ;;  %v3860_v56 = vld [vmem:[%s4218_s11 + $0x28] ss:$8 sps:$4 sm:$0xff]   ;;  %v3312_v40 = vld [vmem:[%s4214_s10 + $0x44] sm:$0x1] }
  0xa3   : > { %3593 = vmatpush3.bf16.msra.mxu0 %v3817_v18  ;;  %3585 = vmatmul.mubr.bf16.gmra.mxu1 %v3820_v23  ;;  %v1847_v18 = vld [vmem:[%s4271_s29 + $0x20] sm:$0xf]  ;;  %v1935_v30 = vshll.u32 %v1850_v22, 16  ;;  %v1961_v5 = vrot.slane %v1960_v61, 4  ;;  %v3855_v22 = vld [vmem:[%s4595_s4 + $0x238] sm:$0xff]  }
  0xa4   : > { %3617 = vmatpush3.bf16.msra.mxu1 %v3818_v21  ;;  %3594 = vmatprep.subr.bf16.mxu0 %v3821_v24  ;;  %v3834_v21 = vld [vmem:[%s4595_s4 + $0x1f8] sm:$0xff]   ;;  %v1912_v23 = vshrl.u32 %v1847_v18, 16 }
  0xa5   : > { %3618 = vmatprep.subr.bf16.mxu1 %v3822_v25  ;;  %3604 = vmatprep.mubr.bf16.mxu0 %v3831_v27  ;;  %v3832_v27 = vld [vmem:[%s4360_s9 + $0x10] ss:$8 sps:$4 sm:$0xff]   ;;  %v1937_v39 = vrot.slane %v1935_v30, 5  ;;  %v1966_v8 = vsel %vm4286_vm2, %v1961_v5, %v1965_v62  ;;  %s3352_s9 = sshll.u32 %s4624_s23, 5 }
  0xa6   : > { %3628 = vmatprep.mubr.bf16.mxu1 %v3213_v7  ;;  %v1914_v33 = vrot.slane %v1912_v23, 4  ;;  %v3297_v23 = vld [vmem:[%s4214_s10 + $0x8] sm:$0xf]  ;;  %v3858_v5 = vld [vmem:[%s4214_s10 + $0x38] ss:$8 sps:$4 sm:$0xff]   ;;  %s853_s16 = scalar_lea.vmem %s4597_s6, %s3352_s9 }
  0xa7   : > { %3595 = vmatpush3.bf16.msra.mxu0 %v3821_v24  ;;  %v1915_v24 = vshll.u32 %v1847_v18, 16  ;;  %v3847_v18 = vld [vmem:[%s4595_s4 + $0x188] sm:$0xff]  }
  0xa8   : > { %3619 = vmatpush3.bf16.msra.mxu1 %v3822_v25  ;;  %3596 = vmatprep.subr.bf16.mxu0 %v3823_v26  ;;  %v1921_v25 = vshll.u32 %v1848_v19, 16  ;;  %v3848_v19 = vld [vmem:[%s4595_s4 + $0x1c8] sm:$0xff]  }
  0xa9   : > { %3620 = vmatprep.subr.bf16.mxu1 %v3824_v38  ;;  %v1917_v34 = vrot.slane %v1915_v24, 5  ;;  %v3298_v24 = vld [vmem:[%s4214_s10 + $0xc] sm:$0x1] }
  0xaa   : > { %v1923_v35 = vrot.slane %v1921_v25, 5  ;;  %v3299_v25 = vld [vmem:[%s4214_s10 + $0x10] sm:$0xf]  ;;  %v2489_v30 = vshll.u32 %v3298_v24, 16 }
  0xab   : > { %3597 = vmatpush3.bf16.msra.mxu0 %v3823_v26  ;;  %v1926_v26 = vshrl.u32 %v1849_v20, 16  ;;  %v1918_v44 = vor.u32 %v1917_v34, %v1914_v33  ;;  %v3849_v20 = vld [vmem:[%s4595_s4 + $0x180] sm:$0xff]   ;;  %v2497_v33 = vshll.u32 %v3299_v25, 16  ;;  %v3306_v34 = vld [vmem:[%s4214_s10 + $0x2c] sm:$0x1] }
  0xac   : > { %3621 = vmatpush3.bf16.msra.mxu1 %v3824_v38  ;;  %3598 = vmatprep.subr.bf16.mxu0 %v3825_v41  ;;  %v1931_v38 = vrot.slane %v1929_v29, 5  ;;  %v2483_v29 = vshll.u32 %v3297_v23, 16 }
  0xad   : > { %3622 = vmatprep.subr.bf16.mxu1 %v3826_v51  ;;  %v1928_v36 = vrot.slane %v1926_v26, 4  ;;  %v1919_v54 = vrot.slane %v1918_v44, 4  ;;  %v3300_v26 = vld [vmem:[%s4214_s10 + $0x14] sm:$0x1]  ;;  %v2536_v44 = vshrl.u32 %v3305_v32, 16 }
  0xae   : > { %v2485_v37 = vrot.slane %v2483_v29, 5  ;;  %v3302_v29 = vld [vmem:[%s4214_s10 + $0x1c] sm:$0x1] }
  0xaf   : > { %3599 = vmatpush3.bf16.msra.mxu0 %v3825_v41  ;;  %v1940_v41 = vshrl.u32 %v1851_v31, 16  ;;  %v1932_v49 = vor.u32 %v1931_v38, %v1928_v36  ;;  %v1924_v60 = vsel %vm4286_vm2, %v1919_v54, %v1923_v35  ;;  %v2494_v31 = vshrl.u32 %v3299_v25, 16  ;;  %v3307_v35 = vld [vmem:[%s4214_s10 + $0x30] sm:$0xf] }
  0xb0   : > { %3623 = vmatpush3.bf16.msra.mxu1 %v3826_v51  ;;  %3600 = vmatprep.subr.bf16.mxu0 %v3827_v63  ;;  %v1945_v51 = vrot.slane %v1943_v42, 5  ;;  %v2491_v42 = vrot.slane %v2489_v30, 5  ;;  %v2541_v54 = vrot.slane %v2539_v45, 5  ;;  %v3865_v45 = vld [vmem:[%s4595_s4 + $0x208] sm:$0xff]  }
  0xb1   : > { %3624 = vmatprep.subr.bf16.mxu1 %v3828_v4  ;;  %v1942_v50 = vrot.slane %v1940_v41, 4  ;;  %v1933_v57 = vrot.slane %v1932_v49, 4  ;;  %v2496_v38 = vrot.slane %v2494_v31, 4  ;;  %v3854_v41 = vld [vmem:[%s4218_s11 + $0x18] ss:$8 sps:$4 sm:$0xff]   ;;  %v2550_v49 = vshrl.u32 %v3307_v35, 16 }
  0xb3   : > { %3601 = vmatpush3.bf16.msra.mxu0 %v3827_v63  ;;  %v1946_v58 = vor.u32 %v1945_v51, %v1942_v50  ;;  %v3839_v63 = vld [vmem:[%s4595_s4 + $0x1a8] sm:$0xff]   ;;  %v1938_v0 = vsel %vm4286_vm2, %v1933_v57, %v1937_v39  ;;  %v2503_v39 = vshll.u32 %v3300_v26, 16  ;;  %v2553_v50 = vshll.u32 %v3307_v35, 16 }
  0xb4   : > { %3625 = vmatpush3.bf16.msra.mxu1 %v3828_v4  ;;  %3602 = vmatprep.subr.bf16.mxu0 %v3829_v12  ;;  %v3215_v4 = vcombine.low %v1924_v60, %v1938_v0  ;;  %v3857_v51 = vld [vmem:[%s4214_s10 + $0x28] ss:$8 sps:$4 sm:$0xff]  }
  0xb5   : > { %3626 = vmatprep.subr.bf16.mxu1 %v3830_v14  ;;  %v1947_v1 = vrot.slane %v1946_v58, 4  ;;  %v2505_v58 = vrot.slane %v2503_v39, 5  ;;  %v2555_v60 = vrot.slane %v2553_v50, 5  ;;  %v3859_v0 = vld [vmem:[%s4595_s4 + $0x228] sm:$0xff]   ;;  %v3310_v39 = vld [vmem:[%s4214_s10 + $0x3c] sm:$0x1] }
  0xb7   : > { %3603 = vmatpush3.bf16.msra.mxu0 %v3829_v12  ;;  %v1952_v7 = vsel %vm4286_vm2, %v1947_v1, %v1951_v59  ;;  %v3843_v12 = vld [vmem:[%s4595_s4 + $0x198] sm:$0xff]   ;;  %v2552_v59 = vrot.slane %v2550_v49, 4  ;;  %v2587_v49 = vshll.u32 %v3312_v40, 16 }
  0xb8   : > { %3627 = vmatpush3.bf16.msra.mxu1 %v3830_v14  ;;  %3636 = vmatprep.subr.bf16.mxu0 %v3833_v17  ;;  %v3216_v9 = vcombine.low %v1952_v7, %v1966_v8  ;;  %v3852_v14 = vld [vmem:[%s4218_s11 + $0x8] ss:$8 sps:$4 sm:$0xff]  }
  0xb9   : > { %3660 = vmatprep.subr.bf16.mxu1 %v3834_v21  ;;  %v2556_v1 = vor.u32 %v2555_v60, %v2552_v59 }
  0xba   : > { %3605 = vmatmul.mubr.bf16.vlgmr.msra.gmra.mxu0 %v3832_v27  ;;  %v3853_v27 = vld [vmem:[%s4214_s10 + $0x18] ss:$8 sps:$4 sm:$0xff]  }
  0xbb   : > { %3629 = vmatmul.mubr.bf16.vlgmr.msra.gmra.mxu1 %v3214_v28  ;;  %3637 = vmatpush3.bf16.msra.mxu0 %v3833_v17  ;;  %v3846_v17 = vld [vmem:[%s4595_s4 + $0x1d0] sm:$0xff]   ;;  %v2480_v28 = vshrl.u32 %v3297_v23, 16  ;;  %v2557_v8 = vrot.slane %v2556_v1, 4  ;;  %v3863_v23 = vld [vmem:[%s4595_s4 + $0x218] sm:$0xff]  }
  0xbc   : > { %3661 = vmatpush3.bf16.msra.mxu1 %v3834_v21  ;;  %3638 = vmatprep.subr.bf16.mxu0 %v3835_v48  ;;  %v3850_v21 = vld [vmem:[%s4595_s4 + $0x1c0] sm:$0xff]  }
  0xbd   : > { %3662 = vmatprep.subr.bf16.mxu1 %v3836_v53  ;;  %3608 = vmatprep.mubr.bf16.mxu0 %v3837_v43  ;;  %v2482_v36 = vrot.slane %v2480_v28, 4  ;;  %v2499_v43 = vrot.slane %v2497_v33, 5  ;;  %v3864_v28 = vld [vmem:[%s4595_s4 + $0x210] sm:$0xff]  }
  0xbe   : > { %3632 = vmatprep.mubr.bf16.mxu1 %v3215_v4 }
  0xbf   : > { %3639 = vmatpush3.bf16.msra.mxu0 %v3835_v48  ;;  %v2486_v47 = vor.u32 %v2485_v37, %v2482_v36  ;;  %v2545_v48 = vshll.u32 %v3306_v34, 16  ;;  %v2500_v52 = vor.u32 %v2499_v43, %v2496_v38  ;;  %v3304_v34 = vld [vmem:[%s4214_s10 + $0x24] sm:$0x1] }
  0xc0   : > { %3663 = vmatpush3.bf16.msra.mxu1 %v3836_v53  ;;  %3640 = vmatprep.subr.bf16.mxu0 %v3839_v63  ;;  %v2538_v53 = vrot.slane %v2536_v44, 4  ;;  %v2531_v44 = vshll.u32 %v3304_v34, 16 }
  0xc1   : > { %3664 = vmatprep.subr.bf16.mxu1 %v3840_v2  ;;  %v2487_v57 = vrot.slane %v2486_v47, 4  ;;  %v2501_v61 = vrot.slane %v2500_v52, 4  ;;  %v2573_v47 = vshll.u32 %v3310_v39, 16 }
  0xc2   : > { %3609 = vmatmul.mubr.bf16.gmra.mxu0 %v3838_v6  ;;  %v2542_v62 = vor.u32 %v2541_v54, %v2538_v53  ;;  %v2533_v53 = vrot.slane %v2531_v44, 5  ;;  %v3866_v54 = vld [vmem:[%s4595_s4 + $0x200] sm:$0xff]  }
  0xc3   : > { %3641 = vmatpush3.bf16.msra.mxu0 %v3839_v63  ;;  %3633 = vmatmul.mubr.bf16.gmra.mxu1 %v3216_v9  ;;  %v2547_v63 = vrot.slane %v2545_v48, 5  ;;  %v2492_v6 = vsel %vm4286_vm2, %v2487_v57, %v2491_v42  ;;  %v2506_v7 = vsel %vm4286_vm2, %v2501_v61, %v2505_v58  ;;  %v3861_v9 = vld [vmem:[%s4218_s11 + $0x38] ss:$8 sps:$4 sm:$0xff]   ;;  %v2517_v42 = vshll.u32 %v3302_v29, 16 }
  0xc4   : > { %3665 = vmatpush3.bf16.msra.mxu1 %v3840_v2  ;;  %3642 = vmatprep.subr.bf16.mxu0 %v3841_v10  ;;  %v2561_v2 = vrot.slane %v2559_v55, 5  ;;  %v2543_v4 = vrot.slane %v2542_v62, 4  ;;  %v2589_v58 = vrot.slane %v2587_v49, 5 }
  0xc5   : > { %3666 = vmatprep.subr.bf16.mxu1 %v3842_v11  ;;  %3652 = vmatprep.mubr.bf16.mxu0 %v3851_v13  ;;  %v3301_v13 = vld [vmem:[%s4214_s10 + $0x18] sm:$0xf] }
  0xc6   : > { %3676 = vmatprep.mubr.bf16.mxu1 %v3852_v14  ;;  %v3303_v14 = vld [vmem:[%s4214_s10 + $0x20] sm:$0xf] }
  0xc7   : > { %3643 = vmatpush3.bf16.msra.mxu0 %v3841_v10  ;;  %v2548_v10 = vsel %vm4286_vm2, %v2543_v4, %v2547_v63 }
  0xc8   : > { %3667 = vmatpush3.bf16.msra.mxu1 %v3842_v11  ;;  %3644 = vmatprep.subr.bf16.mxu0 %v3843_v12  ;;  %v3862_v11 = vld [vmem:[%s4595_s4 + $0x220] sm:$0xff]  }
  0xc9   : > { %3668 = vmatprep.subr.bf16.mxu1 %v3844_v15 }
  0xcb   : > { %3645 = vmatpush3.bf16.msra.mxu0 %v3843_v12  ;;  %v2562_v12 = vsel %vm4286_vm2, %v2557_v8, %v2561_v2 }
  0xcc   : > { %3669 = vmatpush3.bf16.msra.mxu1 %v3844_v15  ;;  %3646 = vmatprep.subr.bf16.mxu0 %v3845_v16  ;;  %v3329_v15 = vcombine.low %v2492_v6, %v2506_v7 }
  0xcd   : > { %3670 = vmatprep.subr.bf16.mxu1 %v3846_v17 }
  0xcf   : > { %3647 = vmatpush3.bf16.msra.mxu0 %v3845_v16  ;;  %v3309_v16 = vld [vmem:[%s4214_s10 + $0x38] sm:$0xf] }
  0xd0   : > { %3671 = vmatpush3.bf16.msra.mxu1 %v3846_v17  ;;  %3648 = vmatprep.subr.bf16.mxu0 %v3847_v18  ;;  %v3311_v17 = vld [vmem:[%s4214_s10 + $0x40] sm:$0xf]  ;;  %v2564_v24 = vshrl.u32 %v3309_v16, 16  ;;  %v2567_v25 = vshll.u32 %v3309_v16, 16 }
  0xd1   : > { %3672 = vmatprep.subr.bf16.mxu1 %v3848_v19  ;;  %v2578_v26 = vshrl.u32 %v3311_v17, 16 }
  0xd2   : > { %v2566_v35 = vrot.slane %v2564_v24, 4  ;;  %v2569_v36 = vrot.slane %v2567_v25, 5 }
  0xd3   : > { %3649 = vmatpush3.bf16.msra.mxu0 %v3847_v18  ;;  %v3331_v18 = vcombine.low %v2548_v10, %v2562_v12  ;;  %v2580_v37 = vrot.slane %v2578_v26, 4 }
  0xd4   : > { %3673 = vmatpush3.bf16.msra.mxu1 %v3848_v19  ;;  %3650 = vmatprep.subr.bf16.mxu0 %v3849_v20  ;;  %v2508_v19 = vshrl.u32 %v3301_v13, 16 }
  0xd5   : > { %3674 = vmatprep.subr.bf16.mxu1 %v3850_v21 }
  0xd6   : > { %v2510_v30 = vrot.slane %v2508_v19, 4 }
  0xd7   : > { %3651 = vmatpush3.bf16.msra.mxu0 %v3849_v20  ;;  %v2511_v20 = vshll.u32 %v3301_v13, 16 }
  0xd8   : > { %3675 = vmatpush3.bf16.msra.mxu1 %v3850_v21  ;;  %3684 = vmatprep.subr.bf16.mxu0 %v3855_v22  ;;  %v2522_v21 = vshrl.u32 %v3303_v14, 16 }
  0xd9   : > { %3708 = vmatprep.subr.bf16.mxu1 %v3855_v22  ;;  %v2513_v31 = vrot.slane %v2511_v20, 5 }
  0xda   : > { %3653 = vmatmul.mubr.bf16.vlgmr.msra.gmra.mxu0 %v3853_v27  ;;  %v2581_v27 = vshll.u32 %v3311_v17, 16  ;;  %v2524_v32 = vrot.slane %v2522_v21, 4 }
  0xdb   : > { %3677 = vmatmul.mubr.bf16.vlgmr.msra.gmra.mxu1 %v3854_v41  ;;  %3685 = vmatpush3.bf16.msra.mxu0 %v3855_v22  ;;  %v2514_v41 = vor.u32 %v2513_v31, %v2510_v30 }
  0xdc   : > { %3716 = vmatpush3.bf16.msra.mxu1 %v3855_v22  ;;  %3686 = vmatprep.subr.bf16.mxu0 %v3856_v46  ;;  %v2525_v22 = vshll.u32 %v3303_v14, 16  ;;  %v2583_v38 = vrot.slane %v2581_v27, 5 }
  0xdd   : > { %3709 = vmatprep.subr.bf16.mxu1 %v3856_v46  ;;  %3656 = vmatprep.mubr.bf16.mxu0 %v3857_v51  ;;  %v2515_v50 = vrot.slane %v2514_v41, 4  ;;  %v2519_v51 = vrot.slane %v2517_v42, 5 }
  0xde   : > { %3680 = vmatprep.mubr.bf16.mxu1 %v3860_v56  ;;  %v2527_v33 = vrot.slane %v2525_v22, 5  ;;  %v2584_v48 = vor.u32 %v2583_v38, %v2580_v37  ;;  %v2575_v56 = vrot.slane %v2573_v47, 5 }
  0xdf   : > { %3687 = vmatpush3.bf16.msra.mxu0 %v3856_v46  ;;  %v2520_v59 = vsel %vm4286_vm2, %v2515_v50, %v2519_v51 }
  0xe0   : > { %3717 = vmatpush3.bf16.msra.mxu1 %v3856_v46  ;;  %3688 = vmatprep.subr.bf16.mxu0 %v3859_v0  ;;  %v2528_v43 = vor.u32 %v2527_v33, %v2524_v32  ;;  %v2570_v46 = vor.u32 %v2569_v36, %v2566_v35  ;;  %v2585_v57 = vrot.slane %v2584_v48, 4 }
  0xe1   : > { %3710 = vmatprep.subr.bf16.mxu1 %v3859_v0 }
  0xe2   : > { %3657 = vmatmul.mubr.bf16.gmra.mxu0 %v3858_v5  ;;  %v2529_v52 = vrot.slane %v2528_v43, 4  ;;  %v2571_v55 = vrot.slane %v2570_v46, 4  ;;  %v2590_v62 = vsel %vm4286_vm2, %v2585_v57, %v2589_v58 }
  0xe3   : > { %3689 = vmatpush3.bf16.msra.mxu0 %v3859_v0  ;;  %3681 = vmatmul.mubr.bf16.gmra.mxu1 %v3861_v9 }
  0xe4   : > { %3718 = vmatpush3.bf16.msra.mxu1 %v3859_v0  ;;  %3690 = vmatprep.subr.bf16.mxu0 %v3862_v11  ;;  %v2534_v60 = vsel %vm4286_vm2, %v2529_v52, %v2533_v53  ;;  %v2576_v61 = vsel %vm4286_vm2, %v2571_v55, %v2575_v56 }
  0xe5   : > { %3711 = vmatprep.subr.bf16.mxu1 %v3862_v11  ;;  %3700 = vmatprep.mubr.bf16.mxu0 %v3329_v15  ;;  %v3330_v63 = vcombine.low %v2520_v59, %v2534_v60  ;;  %v3332_v0 = vcombine.low %v2576_v61, %v2590_v62 }
  0xe6   : > { %3704 = vmatprep.mubr.bf16.mxu1 %v3331_v18 }
  0xe7   : > { %3691 = vmatpush3.bf16.msra.mxu0 %v3862_v11 }
  0xe8   : > { %3719 = vmatpush3.bf16.msra.mxu1 %v3862_v11  ;;  %3692 = vmatprep.subr.bf16.mxu0 %v3863_v23 }
  0xe9   : > { %3712 = vmatprep.subr.bf16.mxu1 %v3863_v23 }
  0xeb   : > { %3693 = vmatpush3.bf16.msra.mxu0 %v3863_v23 }
  0xec   : > { %3720 = vmatpush3.bf16.msra.mxu1 %v3863_v23  ;;  %3694 = vmatprep.subr.bf16.mxu0 %v3864_v28 }
  0xed   : > { %3713 = vmatprep.subr.bf16.mxu1 %v3864_v28 }
  0xef   : > { %3695 = vmatpush3.bf16.msra.mxu0 %v3864_v28 }
  0xf0   : > { %3721 = vmatpush3.bf16.msra.mxu1 %v3864_v28  ;;  %3696 = vmatprep.subr.bf16.mxu0 %v3865_v45 }
  0xf1   : > { %3714 = vmatprep.subr.bf16.mxu1 %v3865_v45 }
  0xf3   : > { %3697 = vmatpush3.bf16.msra.mxu0 %v3865_v45 }
  0xf4   : > { %3722 = vmatpush3.bf16.msra.mxu1 %v3865_v45  ;;  %3698 = vmatprep.subr.bf16.mxu0 %v3866_v54 }
  0xf5   : > { %3715 = vmatprep.subr.bf16.mxu1 %v3866_v54 }
  0xf7   : > { %3699 = vmatpush3.bf16.msra.mxu0 %v3866_v54 }
  0xf8   : > { %3723 = vmatpush3.bf16.msra.mxu1 %v3866_v54 }
  0xfa   : > { %3701 = vmatmul.mubr.bf16.vlgmr.msra.gmra.mxu0 %v3330_v63 }
  0xfb   : > { %3705 = vmatmul.mubr.bf16.vlgmr.msra.gmra.mxu1 %v3332_v0 }
 0x13a   : > { %v3510_v1 = vpop.f32.mrf.mxu0 }
 0x13b   : > { %v3534_v4 = vpop.f32.mrf.mxu1 }
 0x13c   : > { %v1005_v2 = vpop.f32.mrf.mxu0  ;;  %v1208_v54 = vadd.f32 %v3534_v4, %v3510_v1 }
 0x13d   : > { %v1175_v6 = vpop.f32.mrf.mxu1 }
 0x13e   : > { %v3511_v5 = vpop.f32.mrf.mxu0  ;;  %v1206_v58 = vadd.f32 %v1175_v6, %v1005_v2 }
 0x13f   : > { %v3535_v9 = vpop.f32.mrf.mxu1 }
 0x140   : > { %v4534_v7 = vpop.f32.mrf.mxu0  ;;  %v1209_v62 = vadd.f32 %v3535_v9, %v3511_v5 }
 0x141   : > { %4601 = vst [vmem:[#allocation7_spill] sm:$0xff] %v4534_v7  ;;  %v4536_v11 = vpop.f32.mrf.mxu1 }
 0x142   : > { %v3514_v8 = vpop.f32.mrf.mxu0  ;;  %4602 = vst [vmem:[#allocation8_spill] sm:$0xff] %v4536_v11 }
 0x143   : > { %v3538_v3 = vpop.f32.mrf.mxu1 }
 0x144   : > { %v1021_v10 = vpop.f32.mrf.mxu0  ;;  %v1212_v56 = vadd.f32 %v3538_v3, %v3514_v8 }
 0x145   : > { %v1191_v13 = vpop.f32.mrf.mxu1 }
 0x146   : > { %v3515_v12 = vpop.f32.mrf.mxu0  ;;  %v1210_v60 = vadd.f32 %v1191_v13, %v1021_v10 }
 0x147   : > { %v3539_v16 = vpop.f32.mrf.mxu1 }
 0x148   : > { %v1024_v14 = vpop.f32.mrf.mxu0 }
 0x149   : > { %v1194_v18 = vpop.f32.mrf.mxu1  ;;  %v4610_v8 = vld [vmem:[#allocation8_spill] sm:$0xff] }
 0x14a   : > { %v1211_v6 = vadd.f32 %v1194_v18, %v1024_v14 }
 0x15a   : > { %v3558_v15 = vpop.f32.mrf.mxu0 }
 0x15b   : > { %v3582_v19 = vpop.f32.mrf.mxu1  ;;  %v1493_v59 = vadd.f32 %v3558_v15, %v1208_v54 }
 0x15c   : > { %v1460_v17 = vpop.f32.mrf.mxu0 }
 0x15d   : > { %v1630_v21 = vpop.f32.mrf.mxu1  ;;  %v1491_v63 = vadd.f32 %v1460_v17, %v1206_v58 }
 0x15e   : > { %v3559_v20 = vpop.f32.mrf.mxu0 }
 0x15f   : > { %v3583_v23 = vpop.f32.mrf.mxu1  ;;  %v1494_v11 = vadd.f32 %v3559_v20, %v1209_v62 }
 0x160   : > { %v1463_v22 = vpop.f32.mrf.mxu0 }
 0x161   : > { %v4538_v25 = vpop.f32.mrf.mxu1  ;;  %v1664_v9 = vadd.f32 %v3583_v23, %v1494_v11 }
 0x162   : > { %v3562_v24 = vpop.f32.mrf.mxu0  ;;  %4603 = vst [vmem:[#allocation9_spill] sm:$0xff] %v4538_v25  ;;  %v1663_v25 = vadd.f32 %v3582_v19, %v1493_v59 }
 0x163   : > { %v3586_v27 = vpop.f32.mrf.mxu1  ;;  %v1497_v61 = vadd.f32 %v3562_v24, %v1212_v56 }
 0x164   : > { %v1476_v26 = vpop.f32.mrf.mxu0 }
 0x165   : > { %v1646_v29 = vpop.f32.mrf.mxu1  ;;  %v1667_v1 = vadd.f32 %v3586_v27, %v1497_v61 }
 0x166   : > { %v3563_v28 = vpop.f32.mrf.mxu0 }
 0x167   : > { %v3587_v31 = vpop.f32.mrf.mxu1 }
 0x168   : > { %v1479_v30 = vpop.f32.mrf.mxu0 }
 0x169   : > { %v4540_v33 = vpop.f32.mrf.mxu1  ;;  %v4611_v54 = vld [vmem:[#allocation9_spill] sm:$0xff] }
 0x16a   : > { %4604 = vst [vmem:[#allocation10_spill] sm:$0xff] %v4540_v33 }
 0x171   : > { %v4612_v18 = vld [vmem:[#allocation10_spill] sm:$0xff] }
 0x17a   : > { %v3606_v32 = vpop.f32.mrf.mxu0 }
 0x17b   : > { %v3630_v35 = vpop.f32.mrf.mxu1  ;;  %v1833_v2 = vadd.f32 %v3606_v32, %v1663_v25 }
 0x17c   : > { %v1800_v34 = vpop.f32.mrf.mxu0 }
 0x17d   : > { %v2082_v37 = vpop.f32.mrf.mxu1  ;;  %v2115_v20 = vadd.f32 %v3630_v35, %v1833_v2 }
 0x17e   : > { %v3607_v36 = vpop.f32.mrf.mxu0 }
 0x17f   : > { %v3631_v39 = vpop.f32.mrf.mxu1 }
 0x180   : > { %v1803_v38 = vpop.f32.mrf.mxu0 }
 0x181   : > { %v4542_v41 = vpop.f32.mrf.mxu1 }
 0x182   : > { %v3610_v40 = vpop.f32.mrf.mxu0  ;;  %4605 = vst [vmem:[#allocation11_spill] sm:$0xff] %v4542_v41  ;;  %v1213_v41 = vadd.f32 %v3539_v16, %v3515_v12  ;;  %v1496_v16 = vadd.f32 %v1479_v30, %v1211_v6 }
 0x183   : > { %v3634_v42 = vpop.f32.mrf.mxu1  ;;  %v1837_v13 = vadd.f32 %v3610_v40, %v1667_v1 }
 0x184   : > { %v1816_v43 = vpop.f32.mrf.mxu0  ;;  %v1498_v4 = vadd.f32 %v3563_v28, %v1213_v41 }
 0x185   : > { %v2098_v44 = vpop.f32.mrf.mxu1  ;;  %v2119_v27 = vadd.f32 %v3634_v42, %v1837_v13 }
 0x186   : > { %v3611_v45 = vpop.f32.mrf.mxu0  ;;  %v1668_v24 = vadd.f32 %v3587_v31, %v1498_v4 }
 0x187   : > { %v3635_v46 = vpop.f32.mrf.mxu1 }
 0x188   : > { %v1819_v47 = vpop.f32.mrf.mxu0  ;;  %v1838_v28 = vadd.f32 %v3611_v45, %v1668_v24 }
 0x189   : > { %v4544_v49 = vpop.f32.mrf.mxu1 }
 0x18a   : > { %4606 = vst [vmem:[#allocation12_spill] sm:$0xff] %v4544_v49  ;;  %v1495_v49 = vadd.f32 %v1476_v26, %v1210_v60  ;;  %v1834_v26 = vadd.f32 %v3607_v36, %v1664_v9  ;;  %v2120_v31 = vadd.f32 %v3635_v46, %v1838_v28 }
 0x18c   : > { %v1665_v10 = vadd.f32 %v1646_v29, %v1495_v49  ;;  %v1666_v29 = vadd.f32 %v4612_v18, %v1496_v16 }
 0x18e   : > { %v1835_v19 = vadd.f32 %v1816_v43, %v1665_v10  ;;  %v1836_v30 = vadd.f32 %v1819_v47, %v1666_v29 }
 0x190   : > { %v2117_v32 = vadd.f32 %v2098_v44, %v1835_v19  ;;  %v4613_v44 = vld [vmem:[#allocation11_spill] sm:$0xff] }
 0x191   : > { %v4614_v47 = vld [vmem:[#allocation12_spill] sm:$0xff] }
 0x192   : > { %v2118_v46 = vadd.f32 %v4614_v47, %v1836_v30 }
 0x19a   : > { %v3654_v48 = vpop.f32.mrf.mxu0 }
 0x19b   : > { %v3678_v50 = vpop.f32.mrf.mxu1  ;;  %v2286_v25 = vadd.f32 %v3654_v48, %v2115_v20  ;;  %v3341_v48 = vld [vmem:[%s4596_s5] ss:$0 sm:$0xff] }
 0x19c   : > { %v2253_v51 = vpop.f32.mrf.mxu0 }
 0x19d   : > { %v2424_v52 = vpop.f32.mrf.mxu1  ;;  %v2457_v36 = vadd.f32 %v3678_v50, %v2286_v25 }
 0x19e   : > { %v3655_v53 = vpop.f32.mrf.mxu0 }
 0x19f   : > { %v4546_v55 = vpop.f32.mrf.mxu1 }
 0x1a0   : > { %4607 = vst [vmem:[#allocation13_spill] sm:$0xff] %v4546_v55  ;;  %v4548_v57 = vpop.f32.mrf.mxu0  ;;  %v4609_v55 = vld [vmem:[#allocation7_spill] sm:$0xff] }
 0x1a1   : > { %4608 = vst [vmem:[#allocation14_spill] sm:$0xff] %v4548_v57  ;;  %v4550_v0 = vpop.f32.mrf.mxu1  ;;  %v1207_v3 = vadd.f32 %v4610_v8, %v4609_v55  ;;  %v1661_v57 = vadd.f32 %v1630_v21, %v1491_v63 }
 0x1a2   : > { %v3658_v33 = vpop.f32.mrf.mxu0 }
 0x1a3   : > { %v3682_v7 = vpop.f32.mrf.mxu1  ;;  %v1492_v15 = vadd.f32 %v1463_v22, %v1207_v3  ;;  %v1831_v17 = vadd.f32 %v1800_v34, %v1661_v57  ;;  %v2290_v11 = vadd.f32 %v3658_v33, %v2119_v27  ;;  %v2116_v22 = vadd.f32 %v3631_v39, %v1834_v26 }
 0x1a4   : > { %v2269_v5 = vpop.f32.mrf.mxu0 }
 0x1a5   : > { %v2440_v12 = vpop.f32.mrf.mxu1  ;;  %v1662_v55 = vadd.f32 %v4611_v54, %v1492_v15  ;;  %v2113_v21 = vadd.f32 %v2082_v37, %v1831_v17  ;;  %v2288_v40 = vadd.f32 %v2269_v5, %v2117_v32  ;;  %v2287_v42 = vadd.f32 %v3655_v53, %v2116_v22 }
 0x1a6   : > { %v3659_v41 = vpop.f32.mrf.mxu0  ;;  %v2461_v45 = vadd.f32 %v3682_v7, %v2290_v11 }
 0x1a7   : > { %v3683_v14 = vpop.f32.mrf.mxu1  ;;  %v1832_v23 = vadd.f32 %v1803_v38, %v1662_v55  ;;  %v2284_v34 = vadd.f32 %v2253_v51, %v2113_v21  ;;  %v2291_v49 = vadd.f32 %v3659_v41, %v2120_v31  ;;  %v2459_v56 = vadd.f32 %v2440_v12, %v2288_v40  ;;  %v4615_v50 = vld [vmem:[#allocation13_spill] sm:$0xff] }
 0x1a8   : > { %v2272_v35 = vpop.f32.mrf.mxu0  ;;  %v2458_v53 = vadd.f32 %v4615_v50, %v2287_v42  ;;  %v4616_v7 = vld [vmem:[#allocation14_spill] sm:$0xff] }
 0x1a9   : > { %v2443_v43 = vpop.f32.mrf.mxu1  ;;  %v2114_v33 = vadd.f32 %v4613_v44, %v1832_v23  ;;  %v2455_v39 = vadd.f32 %v2424_v52, %v2284_v34  ;;  %v2289_v63 = vadd.f32 %v2272_v35, %v2118_v46  ;;  %v2462_v1 = vadd.f32 %v3683_v14, %v2291_v49 }
 0x1ab   : > { %v2285_v59 = vadd.f32 %v4616_v7, %v2114_v33  ;;  %v2460_v24 = vadd.f32 %v2443_v43, %v2289_v63 }
 0x1ad   : > { %v2456_v16 = vadd.f32 %v4550_v0, %v2285_v59 }
 0x1ba   : > { %v3702_v37 = vpop.f32.mrf.mxu0 }
 0x1bb   : > { %v2739_v38 = vadd.f32 %v3702_v37, %v2457_v36  ;;  %v3706_v51 = vpop.f32.mrf.mxu1 }
 0x1bc   : > { %v2743_v57 = vadd.f32 %v3706_v51, %v2461_v45  ;;  %v2706_v58 = vpop.f32.mrf.mxu0 }
 0x1bd   : > { %v2765_v60 = vadd.f32 %v3341_v48, %v2739_v38  ;;  %v2737_v61 = vadd.f32 %v2706_v58, %v2455_v39  ;;  %v2722_v62 = vpop.f32.mrf.mxu1 }
 0x1be   : > { %v2769_v52 = vadd.f32 %v3341_v48, %v2743_v57  ;;  %v2741_v4 = vadd.f32 %v2722_v62, %v2459_v56  ;;  %v3703_v8 = vpop.f32.mrf.mxu0 }
 0x1bf   : > { %vm2773_vm3 = vcmp.ge.f32.partialorder %v2765_v60, 0.0  ;;  %v2781_v3 = vmul.f32 0.2, %v2765_v60  ;;  %v2763_v2 = vadd.f32 %v3341_v48, %v2737_v61  ;;  %v2740_v6 = vadd.f32 %v3703_v8, %v2458_v53  ;;  %v3707_v10 = vpop.f32.mrf.mxu1 }
 0x1c0   : > { %v2785_v13 = vmul.f32 0.2, %v2769_v52  ;;  %v2744_v5 = vadd.f32 %v3707_v10, %v2462_v1  ;;  %vm2777_vm4 = vcmp.ge.f32.partialorder %v2769_v52, 0.0  ;;  %v2767_v15 = vadd.f32 %v3341_v48, %v2741_v4  ;;  %v2709_v12 = vpop.f32.mrf.mxu0 }
 0x1c1   : > { %v2789_v9 = vsel %vm2773_vm3, %v2765_v60, %v2781_v3  ;;  %v2766_v17 = vadd.f32 %v3341_v48, %v2740_v6  ;;  %v2725_v19 = vpop.f32.mrf.mxu1  ;;  %vm2771_vm5 = vcmp.ge.f32.partialorder %v2763_v2, 0.0  ;;  %v2779_v20 = vmul.f32 0.2, %v2763_v2 }
 0x1c2   : > { %v2797_v27 = vmul.f32 1.4142135, %v2789_v9  ;;  %v2793_v28 = vsel %vm2777_vm4, %v2769_v52, %v2785_v13  ;;  %v2770_v41 = vadd.f32 %v3341_v48, %v2744_v5  ;;  %v2738_v54 = vadd.f32 %v2709_v12, %v2456_v16 }
 0x1c3   : > { %vm2774_vm6 = vcmp.ge.f32.partialorder %v2766_v17, 0.0  ;;  %v2782_v26 = vmul.f32 0.2, %v2766_v17  ;;  %vm2775_vm7 = vcmp.ge.f32.partialorder %v2767_v15, 0.0  ;;  %v2783_v55 = vmul.f32 0.2, %v2767_v15 }
 0x1c4   : > { %v2742_v25 = vadd.f32 %v2725_v19, %v2460_v24  ;;  %vm2778_vm8 = vcmp.ge.f32.partialorder %v2770_v41, 0.0  ;;  %v2786_v18 = vmul.f32 0.2, %v2770_v41  ;;  %v2764_v29 = vadd.f32 %v3341_v48, %v2738_v54 }
 0x1c5   : > { %v2790_v21 = vsel %vm2774_vm6, %v2766_v17, %v2782_v26  ;;  %v2801_v0 = vmul.f32 1.4142135, %v2793_v28  ;;  %v2787_v32 = vsel %vm2771_vm5, %v2763_v2, %v2779_v20  ;;  %v2791_v30 = vsel %vm2775_vm7, %v2767_v15, %v2783_v55 }
 0x1c6   : > { %v2798_v14 = vmul.f32 1.4142135, %v2790_v21  ;;  %v2768_v11 = vadd.f32 %v3341_v48, %v2742_v25  ;;  %v2794_v23 = vsel %vm2778_vm8, %v2770_v41, %v2786_v18  ;;  %vm2772_vm9 = vcmp.ge.f32.partialorder %v2764_v29, 0.0 }
 0x1c7   : > { %v2780_v34 = vmul.f32 0.2, %v2764_v29  ;;  %v2802_v31 = vmul.f32 1.4142135, %v2794_v23  ;;  %v2795_v36 = vmul.f32 1.4142135, %v2787_v32 }
 0x1c8   : > { %v3369_v22 = vpack.c.bf16 %v2798_v14, %v2797_v27  ;;  %vm2776_vm10 = vcmp.ge.f32.partialorder %v2768_v11, 0.0  ;;  %v2784_v40 = vmul.f32 0.2, %v2768_v11  ;;  %v2799_v49 = vmul.f32 1.4142135, %v2791_v30 }
 0x1c9   : > { %v2788_v35 = vsel %vm2772_vm9, %v2764_v29, %v2780_v34  ;;  %v3379_v42 = vpack.c.bf16 %v2802_v31, %v2801_v0 }
 0x1ca   : > { %3381 = vst [vmem:[%s853_s16 + $0x8] sm:$0xff] %v3369_v22   ;;  %v2796_v43 = vmul.f32 1.4142135, %v2788_v35  ;;  %v2792_v45 = vsel %vm2776_vm10, %v2768_v11, %v2784_v40 }
 0x1cb   : > { %v2800_v37 = vmul.f32 1.4142135, %v2792_v45  ;;  %3383 = vst [vmem:[%s853_s16 + $0x18] sm:$0xff] %v3379_v42  }
 0x1cc   : > { %v3364_v44 = vpack.c.bf16 %v2796_v43, %v2795_v36 }
 0x1cd   : > { %v3374_v48 = vpack.c.bf16 %v2800_v37, %v2799_v49 }
 0x1ce   : > { %3365 = vst [vmem:[%s853_s16] sm:$0xff] %v3364_v44  }
 0x1cf   : > { %3382 = vst [vmem:[%s853_s16 + $0x10] sm:$0xff] %v3374_v48  }
 0x1d0 PF: > { %s16_s25 = sadd.s32 1, %s3905_s25   ;;  %s4617_s21 = smov %s3893_s22 }
 0x1d1   : > { %p13_p10 = scmp.ge.s32.totalorder %s16_s25, 4   ;;  %s4618_s22 = smov %s3981_s30 }
 0x1d2   : > { %s4619_s23 = smov %s3901_s24  ;;  %s4620_s24 = smov %s4622_s26 }
 0x1d3   :  { %15 = sbr.rel (!%p13_p10) target bundleno = 3 (0x3), region = 291 }

// kernel: resblock_forward.5
= control target key start
LH: loop header
LB: loop body
LE: loop exit
PB: predicated region body
PF: predicated region fallthrough
CT: control target
= control target key end

     0   :  { %s7335_s12 = smov 0   ;;  %s7337_s13 = smov 0   ;;  %s9137_s0 = inlined_call_operand.vmem [shape: bf16[2,18,18,128], index: 0, kind: input, shape index: {}]   ;;  %s9138_s1 = inlined_call_operand.vmem [shape: bf16[9,128,128], index: 1, kind: input, shape index: {}]   ;;  %s9139_s2 = inlined_call_operand.vmem [shape: f32[1,128], index: 2, kind: input, shape index: {}]   ;;  %s9140_s3 = inlined_call_operand.vmem [shape: bf16[2,256,128], index: 3, kind: output, shape index: {}]  }
   0x1   :  { %s7339_s14 = smov 0  }
   0x2 LB: > { %s32_s15 = sadd.s32 1, %s7309_s13  ;;  %p5731_p0 = scmp.ge.s32.totalorder %s7313_s14, 1  ;;  %s7313_s14 = sphi %s7339_s14, %s13_s14   ;;  %s7309_s13 = sphi %s7337_s13, %s9193_s13   ;;  %s7305_s12 = sphi %s7335_s12, %s9192_s12  }
   0x3   : > { %p34_p1 = scmp.ge.s32.totalorder %s32_s15, 2  ;;  %p187_p2 = scmp.lt.s32.totalorder %s7313_s14, 3 }
   0x5   : > { %s9195_s15 = smov (%p34_p1, %s32_s15), 0  ;;  %p188_p3 = pnand %p5731_p0, %p187_p2 }
   0x7   : > { %191 = sbr.rel (%p188_p3) target bundleno = 581 (0x245), region = 32 }
   0xc   : > { %v7171_v0 = vld [vmem:[%s9138_s1 + $0x38] sm:$0xff]   ;;  %p228_p4 = scmp.lt.s32.totalorder %s7305_s12, 1  ;;  %v7172_v1 = vld [vmem:[%s9138_s1 + $0x30] sm:$0xff]   ;;  %v7173_v2 = vld [vmem:[%s9138_s1 + $0x28] sm:$0xff]   ;;  %vm1531_vm0 = vcmask 1042432   ;;  %vm1532_vm1 = vcmask 1046532  }
   0xd   : > { %6698 = vmatprep.subr.bf16.mxu0 %v7171_v0  ;;  %7130 = vmatprep.subr.bf16.mxu1 %v7171_v0  ;;  %v7174_v3 = vld [vmem:[%s9138_s1 + $0x20] sm:$0xff]   ;;  %v7175_v6 = vld [vmem:[%s9138_s1 + $0x18] sm:$0xff]   ;;  %v7176_v7 = vld [vmem:[%s9138_s1 + $0x10] sm:$0xff]   ;;  %vm758_vm2 = vsmask.f32 3328 }
   0xe   : > { %s9197_s12 = smov (!%p228_p4, %s7305_s12), 1  ;;  %6699 = vmatpush3.bf16.msra.mxu0 %v7171_v0  ;;  %7138 = vmatpush3.bf16.msra.mxu1 %v7171_v0  ;;  %v7177_v8 = vld [vmem:[%s9138_s1 + $0x8] sm:$0xff]   ;;  %v7178_v9 = vld [vmem:[%s9138_s1] sm:$0xff]   ;;  %v7183_v10 = vld [vmem:[%s9138_s1 + $0x78] sm:$0xff]   ;;  %vm759_vm3 = vsmask.f32 7440 }
   0xf   : > { %6700 = vmatprep.subr.bf16.mxu0 %v7172_v1  ;;  %7131 = vmatprep.subr.bf16.mxu1 %v7172_v1  ;;  %s7146_s22 = smul.u32 216, %s9197_s12  ;;  %v7184_v12 = vld [vmem:[%s9138_s1 + $0xb8] sm:$0xff]   ;;  %v7185_v14 = vld [vmem:[%s9138_s1 + $0x70] sm:$0xff]   ;;  %v7191_v18 = vld [vmem:[%s9138_s1 + $0x68] sm:$0xff]   ;;  %s6354_s6 = sshll.u32 %s9197_s12, 7 }
  0x10   : > { %v7186_v15 = vld [vmem:[%s9138_s1 + $0xb0] sm:$0xff]   ;;  %v7192_v20 = vld [vmem:[%s9138_s1 + $0xa8] sm:$0xff]   ;;  %v7193_v22 = vld [vmem:[%s9138_s1 + $0x60] sm:$0xff]   ;;  %s9051_s12 = scalar_lea.vmem %s9140_s3, %s6354_s6 }
  0x11   : > { %s7368_s25 = scalar_lea.vmem %s9137_s0, %s7146_s22  ;;  %v7194_v23 = vld [vmem:[%s9138_s1 + $0xa0] sm:$0xff]   ;;  %v7425_v31 = vld [vmem:[%s9138_s1 + $0x58] sm:$0xff]   ;;  %vm7435_vm4 = vmor %vm1531_vm0, %vm1532_vm1 }
  0x12   : > { %6701 = vmatpush3.bf16.msra.mxu0 %v7172_v1  ;;  %7139 = vmatpush3.bf16.msra.mxu1 %v7172_v1  ;;  %v7179_v4 = vld [vmem:[%s7368_s25] sm:$0xff]   ;;  %v7181_v11 = vld [vmem:[%s7368_s25 + $0xc] sm:$0xff]   ;;  %v7187_v16 = vld [vmem:[%s7368_s25 + $0x18] sm:$0xff]  }
  0x13   : > { %6702 = vmatprep.subr.bf16.mxu0 %v7173_v2  ;;  %7132 = vmatprep.subr.bf16.mxu1 %v7173_v2  ;;  %v7180_v5 = vld [vmem:[%s7368_s25 + $0x60] sm:$0xff]   ;;  %v7182_v13 = vld [vmem:[%s7368_s25 + $0x6c] sm:$0xff]   ;;  %v7188_v17 = vld [vmem:[%s7368_s25 + $0x78] sm:$0xff]  }
  0x14   : > { %6714 = vmatprep.mubr.bf16.mxu0 %v7179_v4  ;;  %6730 = vmatprep.mubr.bf16.mxu1 %v7180_v5  ;;  %v7189_v19 = vld [vmem:[%s7368_s25 + $0x24] sm:$0xff]   ;;  %v7195_v24 = vld [vmem:[%s7368_s25 + $0x30] sm:$0xff]   ;;  %v710_v26 = vld [vmem:[%s7368_s25] sm:$0xf] }
  0x15   : > { %v7190_v21 = vld [vmem:[%s7368_s25 + $0x84] sm:$0xff]   ;;  %v7196_v25 = vld [vmem:[%s7368_s25 + $0x90] sm:$0xff]   ;;  %v762_v29 = vshrl.u32 %v710_v26, 16  ;;  %v765_v30 = vshll.u32 %v710_v26, 16  ;;  %v7430_v32 = vld [vmem:[%s9138_s1 + $0x98] sm:$0xff]  }
  0x16   : > { %6703 = vmatpush3.bf16.msra.mxu0 %v7173_v2  ;;  %7140 = vmatpush3.bf16.msra.mxu1 %v7173_v2  ;;  %v711_v27 = vld [vmem:[%s7368_s25 + $0x4] sm:$0xf]  ;;  %v712_v28 = vld [vmem:[%s7368_s25 + $0x8] sm:$0x1]  ;;  %v1467_v36 = vld [vmem:[%s7368_s25] sm:$0xe] }
  0x17   : > { %6704 = vmatprep.subr.bf16.mxu0 %v7174_v3  ;;  %7133 = vmatprep.subr.bf16.mxu1 %v7174_v3  ;;  %v771_v33 = vshll.u32 %v711_v27, 16  ;;  %v775_v34 = vshrl.u32 %v711_v27, 16  ;;  %v781_v35 = vshll.u32 %v712_v28, 16  ;;  %v1536_v38 = vrot.slane %v711_v27, 5  ;;  %v713_v43 = vld [vmem:[%s7368_s25 + $0xc] sm:$0xf]  ;;  %vm7454_vm5 = vmor %vm758_vm2, %vm759_vm3 }
  0x18   : > { %v764_v39 = vrot.slane %v762_v29, 4  ;;  %v767_v40 = vrot.slane %v765_v30, 5  ;;  %v5799_v41 = vrot.slane %v1467_v36, 9  ;;  %v1539_v42 = vrot.slane %v712_v28, 5  ;;  %v7197_v44 = vld [vmem:[%s7368_s25 + $0x3c] sm:$0xff]   ;;  %v7201_v57 = vld [vmem:[%s9138_s1 + $0x50] sm:$0xff]  }
  0x19   : > { %v7198_v45 = vld [vmem:[%s7368_s25 + $0x9c] sm:$0xff]   ;;  %v773_v46 = vrot.slane %v771_v33, 5  ;;  %v777_v47 = vrot.slane %v775_v34, 4  ;;  %v783_v48 = vrot.slane %v781_v35, 5  ;;  %v1538_v49 = vrot.slane %v1536_v38, 4  ;;  %v7202_v63 = vld [vmem:[%s9138_s1 + $0x90] sm:$0xff]  }
  0x1a   : > { %6705 = vmatpush3.bf16.msra.mxu0 %v7174_v3  ;;  %7141 = vmatpush3.bf16.msra.mxu1 %v7174_v3  ;;  %v714_v50 = vld [vmem:[%s7368_s25 + $0x10] sm:$0xf]  ;;  %v768_v51 = vor.u32 %v767_v40, %v764_v39  ;;  %v7445_v52 = vsel %vm7435_vm4, %v5799_v41, %v1536_v38  ;;  %v715_v53 = vld [vmem:[%s7368_s25 + $0x14] sm:$0x1]  ;;  %v786_v54 = vshrl.u32 %v713_v43, 16  ;;  %v789_v55 = vshll.u32 %v713_v43, 16 }
  0x1b   : > { %6706 = vmatprep.subr.bf16.mxu0 %v7175_v6  ;;  %7134 = vmatprep.subr.bf16.mxu1 %v7175_v6  ;;  %v1468_v56 = vld [vmem:[%s7368_s25 + $0xc] sm:$0xe]  ;;  %v778_v59 = vor.u32 %v777_v47, %v773_v46  ;;  %v7460_v60 = vsel %vm7435_vm4, %v1538_v49, %v1539_v42  ;;  %v795_v61 = vshll.u32 %v714_v50, 16  ;;  %v799_v62 = vshrl.u32 %v714_v50, 16  ;;  %v7205_v27 = vld [vmem:[%s7368_s25 + $0x54] sm:$0xff]  }
  0x1c   : > { %v769_v0 = vrot.slane %v768_v51, 4  ;;  %v5831_v1 = vcombine.low %v7445_v52, %v7460_v60  ;;  %v788_v2 = vrot.slane %v786_v54, 4  ;;  %v791_v3 = vrot.slane %v789_v55, 5  ;;  %v7206_v28 = vld [vmem:[%s7368_s25 + $0xb4] sm:$0xff]   ;;  %v719_v39 = vld [vmem:[%s7368_s25 + $0x24] sm:$0xf] }
  0x1d   : > { %v779_v4 = vrot.slane %v778_v59, 4  ;;  %v797_v5 = vrot.slane %v795_v61, 5  ;;  %v1469_v33 = vld [vmem:[%s7368_s25 + $0x18] sm:$0xe]  ;;  %v7506_v40 = vld [vmem:[%s7368_s25 + $0x28] sm:$0xf] }
  0x1e   : > { %6707 = vmatpush3.bf16.msra.mxu0 %v7175_v6  ;;  %7142 = vmatpush3.bf16.msra.mxu1 %v7175_v6  ;;  %v801_v6 = vrot.slane %v799_v62, 4  ;;  %v834_v59 = vshrl.u32 %v719_v39, 16  ;;  %v837_v61 = vshll.u32 %v719_v39, 16  ;;  %v843_v62 = vshll.u32 %v7506_v40, 16 }
  0x1f   : > { %6708 = vmatprep.subr.bf16.mxu0 %v7176_v7  ;;  %7135 = vmatprep.subr.bf16.mxu1 %v7176_v7 }
  0x22   : > { %6709 = vmatpush3.bf16.msra.mxu0 %v7176_v7  ;;  %7143 = vmatpush3.bf16.msra.mxu1 %v7176_v7  ;;  %v805_v7 = vshll.u32 %v715_v53, 16 }
  0x23   : > { %6710 = vmatprep.subr.bf16.mxu0 %v7177_v8  ;;  %7136 = vmatprep.subr.bf16.mxu1 %v7177_v8 }
  0x26   : > { %6711 = vmatpush3.bf16.msra.mxu0 %v7177_v8  ;;  %7144 = vmatpush3.bf16.msra.mxu1 %v7177_v8  ;;  %v7203_v8 = vld [vmem:[%s7368_s25 + $0x48] sm:$0xff]  }
  0x27   : > { %6712 = vmatprep.subr.bf16.mxu0 %v7178_v9  ;;  %7137 = vmatprep.subr.bf16.mxu1 %v7178_v9 }
  0x2a   : > { %6713 = vmatpush3.bf16.msra.mxu0 %v7178_v9  ;;  %7145 = vmatpush3.bf16.msra.mxu1 %v7178_v9  ;;  %v7204_v9 = vld [vmem:[%s7368_s25 + $0xa8] sm:$0xff]  }
  0x2b   : > { %6746 = vmatprep.subr.bf16.mxu1 %v7183_v10  ;;  %6794 = vmatprep.subr.bf16.mxu0 %v7184_v12 }
  0x2d   : > { %6715 = vmatmul.mubr.bf16.vlgmr.msra.gmra.mxu0 %v7181_v11  ;;  %6731 = vmatmul.mubr.bf16.vlgmr.msra.gmra.mxu1 %v7182_v13  ;;  %v792_v11 = vor.u32 %v791_v3, %v788_v2  ;;  %v1543_v13 = vrot.slane %v714_v50, 5  ;;  %v7210_v50 = vld [vmem:[%s9138_s1 + $0x80] sm:$0xff]   ;;  %v847_v3 = vshrl.u32 %v7506_v40, 16 }
  0x2e   : > { %6747 = vmatpush3.bf16.msra.mxu1 %v7183_v10  ;;  %6795 = vmatpush3.bf16.msra.mxu0 %v7184_v12  ;;  %v774_v10 = vsel %vm7454_vm5, %v769_v0, %v773_v46  ;;  %v5800_v12 = vrot.slane %v1468_v56, 9 }
  0x2f   : > { %6748 = vmatprep.subr.bf16.mxu1 %v7185_v14  ;;  %6796 = vmatprep.subr.bf16.mxu0 %v7186_v15  ;;  %v1545_v26 = vrot.slane %v1543_v13, 4 }
  0x30   : > { %6718 = vmatprep.mubr.bf16.mxu0 %v7187_v16  ;;  %6734 = vmatprep.mubr.bf16.mxu1 %v7188_v17  ;;  %v802_v16 = vor.u32 %v801_v6, %v797_v5  ;;  %v807_v17 = vrot.slane %v805_v7, 5  ;;  %v836_v6 = vrot.slane %v834_v59, 4  ;;  %v839_v7 = vrot.slane %v837_v61, 5 }
  0x32   : > { %6749 = vmatpush3.bf16.msra.mxu1 %v7185_v14  ;;  %6797 = vmatpush3.bf16.msra.mxu0 %v7186_v15  ;;  %v716_v14 = vld [vmem:[%s7368_s25 + $0x18] sm:$0xf]  ;;  %v784_v15 = vsel %vm7454_vm5, %v779_v4, %v783_v48  ;;  %v803_v29 = vrot.slane %v802_v16, 4  ;;  %v1470_v4 = vld [vmem:[%s7368_s25 + $0x24] sm:$0xe] }
  0x33   : > { %6750 = vmatprep.subr.bf16.mxu1 %v7191_v18  ;;  %6798 = vmatprep.subr.bf16.mxu0 %v7192_v20  ;;  %v810_v30 = vshrl.u32 %v716_v14, 16 }
  0x34   : > { %v808_v41 = vsel %vm7454_vm5, %v803_v29, %v807_v17 }
  0x35   : > { %6719 = vmatmul.mubr.bf16.gmra.mxu0 %v7189_v19  ;;  %6735 = vmatmul.mubr.bf16.gmra.mxu1 %v7190_v21  ;;  %v717_v19 = vld [vmem:[%s7368_s25 + $0x1c] sm:$0xf]  ;;  %v7207_v21 = vld [vmem:[%s9138_s1 + $0x48] sm:$0xff]   ;;  %v812_v43 = vrot.slane %v810_v30, 4 }
  0x36   : > { %6751 = vmatpush3.bf16.msra.mxu1 %v7191_v18  ;;  %6799 = vmatpush3.bf16.msra.mxu0 %v7192_v20  ;;  %v1546_v18 = vrot.slane %v715_v53, 5  ;;  %v7478_v20 = vld [vmem:[%s7368_s25 + $0x20] sm:$0x1]  ;;  %v823_v36 = vshrl.u32 %v717_v19, 16  ;;  %v5801_v53 = vrot.slane %v1469_v33, 9  ;;  %v1550_v54 = vrot.slane %v717_v19, 5 }
  0x37   : > { %6752 = vmatprep.subr.bf16.mxu1 %v7193_v22  ;;  %6800 = vmatprep.subr.bf16.mxu0 %v7194_v23  ;;  %v829_v38 = vshll.u32 %v7478_v20, 16  ;;  %v1553_v55 = vrot.slane %v7478_v20, 5  ;;  %v723_v20 = vld [vmem:[%s7368_s25 + $0x34] sm:$0xf] }
  0x38   : > { %6722 = vmatprep.mubr.bf16.mxu0 %v7195_v24  ;;  %6738 = vmatprep.mubr.bf16.mxu1 %v7196_v25  ;;  %v793_v24 = vrot.slane %v792_v11, 4  ;;  %v7492_v25 = vsel %vm7435_vm4, %v5800_v12, %v1543_v13  ;;  %v7501_v35 = vsel %vm7435_vm4, %v1545_v26, %v1546_v18  ;;  %v825_v48 = vrot.slane %v823_v36, 4  ;;  %v7214_v36 = vld [vmem:[%s9138_s1 + $0x130] sm:$0xff]  }
  0x39   : > { %v5832_v42 = vcombine.low %v7492_v25, %v7501_v35  ;;  %v831_v49 = vrot.slane %v829_v38, 5  ;;  %v7525_v0 = vsel %vm7435_vm4, %v5801_v53, %v1550_v54  ;;  %v1552_v2 = vrot.slane %v1550_v54, 4  ;;  %v726_v25 = vld [vmem:[%s7368_s25 + $0x40] sm:$0xf]  ;;  %v7215_v35 = vld [vmem:[%s9138_s1 + $0xe8] sm:$0xff]  }
  0x3a   : > { %6753 = vmatpush3.bf16.msra.mxu1 %v7193_v22  ;;  %6801 = vmatpush3.bf16.msra.mxu0 %v7194_v23  ;;  %v7208_v22 = vld [vmem:[%s9138_s1 + $0x88] sm:$0xff]   ;;  %v7488_v23 = vcombine.low %v774_v10, %v784_v15  ;;  %v798_v34 = vsel %vm7454_vm5, %v793_v24, %v797_v5  ;;  %v7212_v10 = vld [vmem:[%s9138_s1 + $0x138] sm:$0xff]   ;;  %v849_v13 = vrot.slane %v847_v3, 4  ;;  %v722_v15 = vld [vmem:[%s7368_s25 + $0x30] sm:$0xf]  ;;  %v840_v18 = vor.u32 %v839_v7, %v836_v6 }
  0x3b   : > { %6754 = vmatprep.subr.bf16.mxu1 %v7425_v31  ;;  %6802 = vmatprep.subr.bf16.mxu0 %v7430_v32  ;;  %v7515_v46 = vcombine.low %v798_v34, %v808_v41  ;;  %v1554_v12 = vsel %vm7435_vm4, %v1552_v2, %v1553_v55  ;;  %v1557_v26 = vrot.slane %v7506_v40, 5  ;;  %v867_v33 = vshll.u32 %v723_v20, 16 }
  0x3c   : > { %v5833_v17 = vcombine.low %v7525_v0, %v1554_v12  ;;  %v841_v52 = vrot.slane %v840_v18, 4  ;;  %v871_v40 = vshrl.u32 %v723_v20, 16  ;;  %v1564_v54 = vrot.slane %v723_v20, 5  ;;  %v7218_v20 = vld [vmem:[%s9138_s1 + $0x120] sm:$0xff]  }
  0x3d   : > { %6723 = vmatmul.mubr.bf16.gmra.mxu0 %v7197_v44  ;;  %6739 = vmatmul.mubr.bf16.gmra.mxu1 %v7198_v45  ;;  %v7209_v45 = vld [vmem:[%s9138_s1 + $0x40] sm:$0xff]   ;;  %v891_v3 = vshll.u32 %v726_v25, 16 }
  0x3e   : > { %6755 = vmatpush3.bf16.msra.mxu1 %v7425_v31  ;;  %6803 = vmatpush3.bf16.msra.mxu0 %v7430_v32  ;;  %v813_v31 = vshll.u32 %v716_v14, 16  ;;  %v819_v32 = vshll.u32 %v717_v19, 16  ;;  %v5802_v19 = vrot.slane %v1470_v4, 9  ;;  %v1566_v2 = vrot.slane %v1564_v54, 4 }
  0x3f   : > { %6756 = vmatprep.subr.bf16.mxu1 %v7201_v57  ;;  %6804 = vmatprep.subr.bf16.mxu0 %v7202_v63  ;;  %v895_v4 = vshrl.u32 %v726_v25, 16  ;;  %v893_v12 = vrot.slane %v891_v3, 5 }
  0x40   : > { %6726 = vmatprep.mubr.bf16.mxu0 %v7203_v8  ;;  %6742 = vmatprep.mubr.bf16.mxu1 %v7204_v9  ;;  %v815_v44 = vrot.slane %v813_v31, 5  ;;  %v821_v47 = vrot.slane %v819_v32, 5  ;;  %v845_v8 = vrot.slane %v843_v62, 5  ;;  %v7211_v9 = vld [vmem:[%s9138_s1 + $0xf8] sm:$0xff]   ;;  %v7555_v30 = vsel %vm7435_vm4, %v5802_v19, %v1557_v26  ;;  %v7213_v32 = vld [vmem:[%s9138_s1 + $0xf0] sm:$0xff]  }
  0x41   : > { %v1559_v31 = vrot.slane %v1557_v26, 4  ;;  %v1571_v26 = vrot.slane %v726_v25, 5  ;;  %v732_v25 = vld [vmem:[%s7368_s25 + $0x58] sm:$0xf] }
  0x42   : > { %6757 = vmatpush3.bf16.msra.mxu1 %v7201_v57  ;;  %6805 = vmatpush3.bf16.msra.mxu0 %v7202_v63  ;;  %v816_v51 = vor.u32 %v815_v44, %v812_v43  ;;  %v826_v56 = vor.u32 %v825_v48, %v821_v47  ;;  %v721_v57 = vld [vmem:[%s7368_s25 + $0x2c] sm:$0x1]  ;;  %v846_v34 = vsel %vm7454_vm5, %v841_v52, %v845_v8  ;;  %v869_v44 = vrot.slane %v867_v33, 5 }
  0x43   : > { %6758 = vmatprep.subr.bf16.mxu1 %v7207_v21  ;;  %6806 = vmatprep.subr.bf16.mxu0 %v7208_v22  ;;  %v853_v14 = vshll.u32 %v721_v57, 16  ;;  %v1560_v60 = vrot.slane %v721_v57, 5  ;;  %v939_v3 = vshll.u32 %v732_v25, 16 }
  0x44   : > { %v817_v63 = vrot.slane %v816_v51, 4  ;;  %v827_v5 = vrot.slane %v826_v56, 4  ;;  %v7585_v56 = vld [vmem:[%s7368_s25 + $0x44] sm:$0x1] }
  0x45   : > { %6727 = vmatmul.mubr.bf16.gmra.mxu0 %v7205_v27  ;;  %6743 = vmatmul.mubr.bf16.gmra.mxu1 %v7206_v28  ;;  %v855_v24 = vrot.slane %v853_v14, 5  ;;  %v7550_v27 = vld [vmem:[%s7368_s25 + $0x38] sm:$0x1]  ;;  %v1471_v28 = vld [vmem:[%s7368_s25 + $0x30] sm:$0xe]  ;;  %v1561_v43 = vsel %vm7435_vm4, %v1559_v31, %v1560_v60  ;;  %v901_v14 = vshll.u32 %v7585_v56, 16 }
  0x46   : > { %6759 = vmatpush3.bf16.msra.mxu1 %v7207_v21  ;;  %6807 = vmatpush3.bf16.msra.mxu0 %v7208_v22  ;;  %v822_v11 = vsel %vm7454_vm5, %v817_v63, %v821_v47  ;;  %v832_v16 = vsel %vm7454_vm5, %v827_v5, %v831_v49  ;;  %v850_v22 = vor.u32 %v849_v13, %v845_v8  ;;  %v725_v47 = vld [vmem:[%s7368_s25 + $0x3c] sm:$0xf]  ;;  %v5803_v53 = vrot.slane %v1471_v28, 9  ;;  %v728_v5 = vld [vmem:[%s7368_s25 + $0x48] sm:$0xf] }
  0x47   : > { %6760 = vmatprep.subr.bf16.mxu1 %v7209_v45  ;;  %6808 = vmatprep.subr.bf16.mxu0 %v7210_v50  ;;  %v5777_v21 = vcombine.low %v822_v11, %v832_v16  ;;  %v1567_v55 = vrot.slane %v7550_v27, 5  ;;  %v882_v61 = vshrl.u32 %v725_v47, 16  ;;  %v885_v62 = vshll.u32 %v725_v47, 16  ;;  %v1472_v63 = vld [vmem:[%s7368_s25 + $0x3c] sm:$0xe] }
  0x48   : > { %6762 = vmatprep.mubr.bf16.mxu1 %v7488_v23  ;;  %6810 = vmatprep.mubr.bf16.mxu0 %v5831_v1  ;;  %v858_v1 = vshrl.u32 %v722_v15, 16  ;;  %v861_v23 = vshll.u32 %v722_v15, 16  ;;  %v851_v29 = vrot.slane %v850_v22, 4  ;;  %v1565_v0 = vsel %vm7435_vm4, %v5803_v53, %v1564_v54  ;;  %v7217_v15 = vld [vmem:[%s9138_s1 + $0xe0] sm:$0xff]   ;;  %v730_v60 = vld [vmem:[%s7368_s25 + $0x50] sm:$0x1] }
  0x49   : > { %v884_v8 = vrot.slane %v882_v61, 4  ;;  %v1568_v11 = vsel %vm7435_vm4, %v1566_v2, %v1567_v55  ;;  %v897_v13 = vrot.slane %v895_v4, 4  ;;  %v5804_v19 = vrot.slane %v1472_v63, 9  ;;  %v731_v47 = vld [vmem:[%s7368_s25 + $0x54] sm:$0xf] }
  0x4a   : > { %6761 = vmatpush3.bf16.msra.mxu1 %v7209_v45  ;;  %6809 = vmatpush3.bf16.msra.mxu0 %v7210_v50  ;;  %v860_v38 = vrot.slane %v858_v1, 4  ;;  %v863_v39 = vrot.slane %v861_v23, 5  ;;  %v856_v41 = vsel %vm7454_vm5, %v851_v29, %v855_v24  ;;  %v877_v45 = vshll.u32 %v7550_v27, 16  ;;  %v7222_v63 = vld [vmem:[%s9138_s1 + $0x110] sm:$0xff]  }
  0x4b   : > { %6842 = vmatprep.subr.bf16.mxu1 %v7211_v9  ;;  %6890 = vmatprep.subr.bf16.mxu0 %v7212_v10  ;;  %v5778_v48 = vcombine.low %v846_v34, %v856_v41  ;;  %v873_v50 = vrot.slane %v871_v40, 4  ;;  %v898_v22 = vor.u32 %v897_v13, %v893_v12  ;;  %v903_v24 = vrot.slane %v901_v14, 5  ;;  %v7220_v40 = vld [vmem:[%s9138_s1 + $0x118] sm:$0xff]   ;;  %v734_v13 = vld [vmem:[%s7368_s25 + $0x60] sm:$0xf] }
  0x4c   : > { %v864_v49 = vor.u32 %v863_v39, %v860_v38  ;;  %v879_v51 = vrot.slane %v877_v45, 5  ;;  %v1574_v52 = vrot.slane %v7585_v56, 5  ;;  %v906_v1 = vshrl.u32 %v728_v5, 16  ;;  %v1473_v39 = vld [vmem:[%s7368_s25 + $0x48] sm:$0xe] }
  0x4d   : > { %6763 = vmatmul.mubr.bf16.vlgmr.msra.gmra.mxu1 %v7515_v46  ;;  %6811 = vmatmul.mubr.bf16.vlgmr.msra.gmra.mxu0 %v5832_v42  ;;  %v5834_v46 = vcombine.low %v7555_v30, %v1561_v43  ;;  %v7216_v42 = vld [vmem:[%s9138_s1 + $0x128] sm:$0xff]   ;;  %v874_v59 = vor.u32 %v873_v50, %v869_v44  ;;  %v909_v23 = vshll.u32 %v728_v5, 16  ;;  %v899_v28 = vrot.slane %v898_v22, 4  ;;  %v1474_v56 = vld [vmem:[%s7368_s25 + $0x54] sm:$0xe] }
  0x4e   : > { %6843 = vmatpush3.bf16.msra.mxu1 %v7211_v9  ;;  %6891 = vmatpush3.bf16.msra.mxu0 %v7212_v10  ;;  %v865_v57 = vrot.slane %v864_v49, 4  ;;  %v887_v9 = vrot.slane %v885_v62, 5  ;;  %v7594_v10 = vld [vmem:[%s7368_s25 + $0x4c] sm:$0xf]  ;;  %v1572_v29 = vsel %vm7435_vm4, %v5804_v19, %v1571_v26  ;;  %v1573_v30 = vrot.slane %v1571_v26, 4 }
  0x4f   : > { %6766 = vmatprep.mubr.bf16.mxu1 %v5777_v21  ;;  %6814 = vmatprep.mubr.bf16.mxu0 %v5833_v17  ;;  %v875_v7 = vrot.slane %v874_v59, 4  ;;  %v5835_v17 = vcombine.low %v1565_v0, %v1568_v11  ;;  %v915_v31 = vshll.u32 %v7594_v10, 16  ;;  %v908_v34 = vrot.slane %v906_v1, 4  ;;  %v7223_v19 = vld [vmem:[%s9138_s1 + $0xc8] sm:$0xff]  }
  0x50   : > { %6844 = vmatprep.subr.bf16.mxu1 %v7213_v32  ;;  %6892 = vmatprep.subr.bf16.mxu0 %v7214_v36  ;;  %v870_v6 = vsel %vm7454_vm5, %v865_v57, %v869_v44  ;;  %v888_v18 = vor.u32 %v887_v9, %v884_v8  ;;  %v919_v38 = vshrl.u32 %v7594_v10, 16  ;;  %v904_v41 = vsel %vm7454_vm5, %v899_v28, %v903_v24  ;;  %v1475_v28 = vld [vmem:[%s7368_s25 + $0x60] sm:$0xe] }
  0x51   : > { %v880_v16 = vsel %vm7454_vm5, %v875_v7, %v879_v51  ;;  %v1575_v43 = vsel %vm7435_vm4, %v1573_v30, %v1574_v52  ;;  %v917_v44 = vrot.slane %v915_v31, 5  ;;  %v925_v45 = vshll.u32 %v730_v60, 16 }
  0x52   : > { %6845 = vmatpush3.bf16.msra.mxu1 %v7213_v32  ;;  %6893 = vmatpush3.bf16.msra.mxu0 %v7214_v36  ;;  %v5779_v21 = vcombine.low %v870_v6, %v880_v16  ;;  %v889_v27 = vrot.slane %v888_v18, 4  ;;  %v7219_v32 = vld [vmem:[%s9138_s1 + $0xd8] sm:$0xff]   ;;  %v911_v36 = vrot.slane %v909_v23, 5  ;;  %v921_v50 = vrot.slane %v919_v38, 4  ;;  %v735_v18 = vld [vmem:[%s7368_s25 + $0x64] sm:$0xf] }
  0x53   : > { %6846 = vmatprep.subr.bf16.mxu1 %v7215_v35  ;;  %6894 = vmatprep.subr.bf16.mxu0 %v7216_v42  ;;  %v927_v51 = vrot.slane %v925_v45, 5  ;;  %v5805_v53 = vrot.slane %v1473_v39, 9  ;;  %v1578_v54 = vrot.slane %v7594_v10, 5  ;;  %v1581_v55 = vrot.slane %v730_v60, 5 }
  0x54   : > { %v894_v33 = vsel %vm7454_vm5, %v889_v27, %v893_v12  ;;  %v912_v49 = vor.u32 %v911_v36, %v908_v34  ;;  %v922_v59 = vor.u32 %v921_v50, %v917_v44  ;;  %v930_v61 = vshrl.u32 %v731_v47, 16  ;;  %v736_v27 = vld [vmem:[%s7368_s25 + $0x68] sm:$0x1]  ;;  %v7225_v34 = vld [vmem:[%s9138_s1 + $0xc0] sm:$0xff]  }
  0x55   : > { %6767 = vmatmul.mubr.bf16.gmra.mxu1 %v5778_v48  ;;  %6815 = vmatmul.mubr.bf16.gmra.mxu0 %v5834_v46  ;;  %v5780_v48 = vcombine.low %v894_v33, %v904_v41  ;;  %v5836_v46 = vcombine.low %v1572_v29, %v1575_v43  ;;  %v933_v62 = vshll.u32 %v731_v47, 16  ;;  %v1579_v0 = vsel %vm7435_vm4, %v5805_v53, %v1578_v54  ;;  %v737_v33 = vld [vmem:[%s7368_s25 + $0x6c] sm:$0xf]  ;;  %v7668_v41 = vld [vmem:[%s7368_s25 + $0x70] sm:$0xf]  ;;  %v7226_v43 = vld [vmem:[%s9138_s1 + $0x100] sm:$0xff]  }
  0x56   : > { %6818 = vmatprep.mubr.bf16.mxu0 %v5835_v17  ;;  %6847 = vmatpush3.bf16.msra.mxu1 %v7215_v35  ;;  %v7629_v35 = vld [vmem:[%s7368_s25 + $0x5c] sm:$0x1]  ;;  %v913_v57 = vrot.slane %v912_v49, 4  ;;  %v1580_v2 = vrot.slane %v1578_v54, 4  ;;  %v943_v4 = vshrl.u32 %v732_v25, 16  ;;  %v923_v6 = vrot.slane %v922_v59, 4 }
  0x57   : > { %6770 = vmatprep.mubr.bf16.mxu1 %v5779_v21  ;;  %6895 = vmatpush3.bf16.msra.mxu0 %v7216_v42  ;;  %v7221_v42 = vld [vmem:[%s9138_s1 + $0xd0] sm:$0xff]   ;;  %v932_v7 = vrot.slane %v930_v61, 4  ;;  %v935_v8 = vrot.slane %v933_v62, 5  ;;  %v941_v10 = vrot.slane %v939_v3, 5  ;;  %v949_v12 = vshll.u32 %v7629_v35, 16  ;;  %v7680_v54 = vld [vmem:[%s9138_s1 + $0x178] sm:$0xff]  }
  0x58   : > { %6848 = vmatprep.subr.bf16.mxu1 %v7217_v15  ;;  %6896 = vmatprep.subr.bf16.mxu0 %v7218_v20  ;;  %v918_v5 = vsel %vm7454_vm5, %v913_v57, %v917_v44  ;;  %v1582_v9 = vsel %vm7435_vm4, %v1580_v2, %v1581_v55  ;;  %v945_v11 = vrot.slane %v943_v4, 4  ;;  %v928_v14 = vsel %vm7454_vm5, %v923_v6, %v927_v51  ;;  %v739_v57 = vld [vmem:[%s7368_s25 + $0x74] sm:$0x1]  ;;  %v7686_v62 = vld [vmem:[%s9138_s1 + $0x1b8] sm:$0xff]   ;;  %v1476_v4 = vld [vmem:[%s7368_s25 + $0x6c] sm:$0xe] }
  0x59   : > { %v936_v16 = vor.u32 %v935_v8, %v932_v7  ;;  %v5806_v17 = vrot.slane %v1474_v56, 9  ;;  %v5781_v21 = vcombine.low %v918_v5, %v928_v14  ;;  %v951_v24 = vrot.slane %v949_v12, 5 }
  0x5a   : > { %6849 = vmatpush3.bf16.msra.mxu1 %v7217_v15  ;;  %v5837_v15 = vcombine.low %v1579_v0, %v1582_v9  ;;  %v946_v22 = vor.u32 %v945_v11, %v941_v10  ;;  %v1585_v26 = vrot.slane %v732_v25, 5  ;;  %v1588_v60 = vrot.slane %v7629_v35, 5 }
  0x5b   : > { %6897 = vmatpush3.bf16.msra.mxu0 %v7218_v20  ;;  %6850 = vmatprep.subr.bf16.mxu1 %v7219_v32  ;;  %v7224_v20 = vld [vmem:[%s9138_s1 + $0x108] sm:$0xff]   ;;  %v937_v52 = vrot.slane %v936_v16, 4  ;;  %v954_v1 = vshrl.u32 %v734_v13, 16  ;;  %v957_v23 = vshll.u32 %v734_v13, 16  ;;  %v1592_v51 = vrot.slane %v735_v18, 5 }
  0x5c   : > { %6898 = vmatprep.subr.bf16.mxu0 %v7220_v40  ;;  %v947_v29 = vrot.slane %v946_v22, 4  ;;  %v1586_v30 = vsel %vm7435_vm4, %v5806_v17, %v1585_v26  ;;  %v1587_v31 = vrot.slane %v1585_v26, 4  ;;  %v1595_v53 = vrot.slane %v736_v27, 5  ;;  %v740_v13 = vld [vmem:[%s7368_s25 + $0x78] sm:$0xf] }
  0x5d   : > { %6771 = vmatmul.mubr.bf16.gmra.mxu1 %v5780_v48  ;;  %6819 = vmatmul.mubr.bf16.gmra.mxu0 %v5836_v46  ;;  %v942_v36 = vsel %vm7454_vm5, %v937_v52, %v941_v10  ;;  %v956_v38 = vrot.slane %v954_v1, 4  ;;  %v959_v39 = vrot.slane %v957_v23, 5  ;;  %v973_v48 = vshll.u32 %v736_v27, 16  ;;  %v1477_v1 = vld [vmem:[%s7368_s25 + $0x78] sm:$0xe] }
  0x5e   : > { %6851 = vmatpush3.bf16.msra.mxu1 %v7219_v32  ;;  %6822 = vmatprep.mubr.bf16.mxu0 %v5837_v15  ;;  %v963_v32 = vshll.u32 %v735_v18, 16  ;;  %v952_v44 = vsel %vm7454_vm5, %v947_v29, %v951_v24  ;;  %v1589_v45 = vsel %vm7435_vm4, %v1587_v31, %v1588_v60  ;;  %v978_v59 = vshrl.u32 %v737_v33, 16  ;;  %v742_v24 = vld [vmem:[%s7368_s25 + $0x80] sm:$0x1] }
  0x5f   : > { %6899 = vmatpush3.bf16.msra.mxu0 %v7220_v40  ;;  %6852 = vmatprep.subr.bf16.mxu1 %v7221_v42  ;;  %v967_v40 = vshrl.u32 %v735_v18, 16  ;;  %v5782_v46 = vcombine.low %v942_v36, %v952_v44  ;;  %v5838_v49 = vcombine.low %v1586_v30, %v1589_v45  ;;  %v960_v50 = vor.u32 %v959_v39, %v956_v38  ;;  %v741_v18 = vld [vmem:[%s7368_s25 + $0x7c] sm:$0xf] }
  0x60   : > { %6900 = vmatprep.subr.bf16.mxu0 %v7222_v63  ;;  %6774 = vmatprep.mubr.bf16.mxu1 %v5781_v21  ;;  %v965_v47 = vrot.slane %v963_v32, 5  ;;  %v975_v35 = vrot.slane %v973_v48, 5  ;;  %v981_v61 = vshll.u32 %v737_v33, 16  ;;  %v1594_v0 = vrot.slane %v1592_v51, 4  ;;  %v744_v48 = vld [vmem:[%s7368_s25 + $0x88] sm:$0xf] }
  0x61   : > { %v969_v25 = vrot.slane %v967_v40, 4  ;;  %v961_v55 = vrot.slane %v960_v50, 4  ;;  %v987_v2 = vshll.u32 %v7668_v41, 16  ;;  %v991_v3 = vshrl.u32 %v7668_v41, 16 }
  0x62   : > { %6853 = vmatpush3.bf16.msra.mxu1 %v7221_v42  ;;  %v5807_v42 = vrot.slane %v1475_v28, 9  ;;  %v980_v7 = vrot.slane %v978_v59, 4  ;;  %v983_v8 = vrot.slane %v981_v61, 5  ;;  %v1596_v9 = vsel %vm7435_vm4, %v1594_v0, %v1595_v53  ;;  %v746_v0 = vld [vmem:[%s7368_s25 + $0x90] sm:$0xf] }
  0x63   : > { %6901 = vmatpush3.bf16.msra.mxu0 %v7222_v63  ;;  %6854 = vmatprep.subr.bf16.mxu1 %v7223_v19  ;;  %v970_v56 = vor.u32 %v969_v25, %v965_v47  ;;  %v966_v5 = vsel %vm7454_vm5, %v961_v55, %v965_v47  ;;  %v989_v10 = vrot.slane %v987_v2, 5  ;;  %v993_v11 = vrot.slane %v991_v3, 4 }
  0x64   : > { %6902 = vmatprep.subr.bf16.mxu0 %v7224_v20  ;;  %v1593_v63 = vsel %vm7435_vm4, %v5807_v42, %v1592_v51  ;;  %v997_v12 = vshll.u32 %v739_v57, 16  ;;  %v984_v16 = vor.u32 %v983_v8, %v980_v7  ;;  %v5808_v17 = vrot.slane %v1476_v4, 9 }
  0x65   : > { %6775 = vmatmul.mubr.bf16.gmra.mxu1 %v5782_v46  ;;  %6823 = vmatmul.mubr.bf16.gmra.mxu0 %v5838_v49  ;;  %v971_v6 = vrot.slane %v970_v56, 4  ;;  %v5839_v15 = vcombine.low %v1593_v63, %v1596_v9  ;;  %v1599_v22 = vrot.slane %v7668_v41, 5  ;;  %v1602_v27 = vrot.slane %v739_v57, 5  ;;  %v743_v41 = vld [vmem:[%s7368_s25 + $0x84] sm:$0xf] }
  0x66   : > { %6855 = vmatpush3.bf16.msra.mxu1 %v7223_v19  ;;  %v999_v21 = vrot.slane %v997_v12, 5  ;;  %v985_v26 = vrot.slane %v984_v16, 4  ;;  %v1002_v52 = vshrl.u32 %v740_v13, 16  ;;  %v1005_v60 = vshll.u32 %v740_v13, 16  ;;  %v1478_v56 = vld [vmem:[%s7368_s25 + $0x84] sm:$0xe] }
  0x67   : > { %6903 = vmatpush3.bf16.msra.mxu0 %v7224_v20  ;;  %6856 = vmatprep.subr.bf16.mxu1 %v7225_v34  ;;  %v976_v14 = vsel %vm7454_vm5, %v971_v6, %v975_v35  ;;  %v994_v20 = vor.u32 %v993_v11, %v989_v10  ;;  %v1600_v28 = vsel %vm7435_vm4, %v5808_v17, %v1599_v22  ;;  %v1601_v29 = vrot.slane %v1599_v22, 4  ;;  %v745_v35 = vld [vmem:[%s7368_s25 + $0x8c] sm:$0x1]  ;;  %v747_v6 = vld [vmem:[%s7368_s25 + $0x94] sm:$0xf] }
  0x68   : > { %6904 = vmatprep.subr.bf16.mxu0 %v7226_v43  ;;  %v5783_v19 = vcombine.low %v966_v5, %v976_v14  ;;  %6826 = vmatprep.mubr.bf16.mxu0 %v5839_v15  ;;  %v1011_v30 = vshll.u32 %v741_v18, 16  ;;  %v990_v31 = vsel %vm7454_vm5, %v985_v26, %v989_v10  ;;  %v1004_v32 = vrot.slane %v1002_v52, 4  ;;  %v748_v15 = vld [vmem:[%s7368_s25 + $0x98] sm:$0x1] }
  0x69   : > { %v995_v23 = vrot.slane %v994_v20, 4  ;;  %v1007_v33 = vrot.slane %v1005_v60, 5  ;;  %v1603_v38 = vsel %vm7435_vm4, %v1601_v29, %v1602_v27  ;;  %v1021_v40 = vshll.u32 %v742_v24, 16 }
  0x6a   : > { %6857 = vmatpush3.bf16.msra.mxu1 %v7225_v34  ;;  %6778 = vmatprep.mubr.bf16.mxu1 %v5783_v19  ;;  %v1015_v34 = vshrl.u32 %v741_v18, 16  ;;  %v1013_v39 = vrot.slane %v1011_v30, 5  ;;  %v5840_v44 = vcombine.low %v1600_v28, %v1603_v38  ;;  %v5809_v49 = vrot.slane %v1477_v1, 9  ;;  %v1479_v30 = vld [vmem:[%s7368_s25 + $0x90] sm:$0xe] }
  0x6b   : > { %6905 = vmatpush3.bf16.msra.mxu0 %v7226_v43  ;;  %6938 = vmatprep.subr.bf16.mxu1 %v7680_v54  ;;  %v1000_v36 = vsel %vm7454_vm5, %v995_v23, %v999_v21  ;;  %v1008_v45 = vor.u32 %v1007_v33, %v1004_v32  ;;  %v1023_v46 = vrot.slane %v1021_v40, 5  ;;  %v1606_v50 = vrot.slane %v741_v18, 5 }
  0x6c   : > { %6986 = vmatprep.subr.bf16.mxu0 %v7686_v62  ;;  %v5784_v43 = vcombine.low %v990_v31, %v1000_v36  ;;  %v1017_v47 = vrot.slane %v1015_v34, 4  ;;  %v1609_v25 = vrot.slane %v742_v24, 5  ;;  %v1026_v53 = vshrl.u32 %v743_v41, 16  ;;  %v749_v36 = vld [vmem:[%s7368_s25 + $0x9c] sm:$0xf] }
  0x6d   : > { %6827 = vmatmul.mubr.bf16.gmra.mxu0 %v5840_v44  ;;  %v1009_v42 = vrot.slane %v1008_v45, 4  ;;  %v1029_v55 = vshll.u32 %v743_v41, 16  ;;  %v1607_v57 = vsel %vm7435_vm4, %v5809_v49, %v1606_v50  ;;  %v1608_v59 = vrot.slane %v1606_v50, 4 }
  0x6e   : > { %6779 = vmatmul.mubr.bf16.gmra.mxu1 %v5784_v43  ;;  %v1018_v51 = vor.u32 %v1017_v47, %v1013_v39  ;;  %v1035_v61 = vshll.u32 %v744_v48, 16  ;;  %v1039_v63 = vshrl.u32 %v744_v48, 16  ;;  %v1028_v4 = vrot.slane %v1026_v53, 4  ;;  %v750_v43 = vld [vmem:[%s7368_s25 + $0xa0] sm:$0xf] }
  0x6f   : > { %v1014_v2 = vsel %vm7454_vm5, %v1009_v42, %v1013_v39  ;;  %v1031_v5 = vrot.slane %v1029_v55, 5  ;;  %v1610_v7 = vsel %vm7435_vm4, %v1608_v59, %v1609_v25  ;;  %v1045_v10 = vshll.u32 %v745_v35, 16  ;;  %v1480_v42 = vld [vmem:[%s7368_s25 + $0x9c] sm:$0xe] }
  0x70   : > { %v1019_v3 = vrot.slane %v1018_v51, 4  ;;  %v1037_v8 = vrot.slane %v1035_v61, 5  ;;  %v1041_v9 = vrot.slane %v1039_v63, 4  ;;  %v5841_v12 = vcombine.low %v1607_v57, %v1610_v7  ;;  %v752_v57 = vld [vmem:[%s7368_s25 + $0xa8] sm:$0xf] }
  0x71   : > { %v1032_v13 = vor.u32 %v1031_v5, %v1028_v4  ;;  %v5810_v14 = vrot.slane %v1478_v56, 9  ;;  %v1047_v18 = vrot.slane %v1045_v10, 5  ;;  %v1613_v19 = vrot.slane %v744_v48, 5 }
  0x72   : > { %v1024_v11 = vsel %vm7454_vm5, %v1019_v3, %v1023_v46  ;;  %v1042_v17 = vor.u32 %v1041_v9, %v1037_v8  ;;  %6830 = vmatprep.mubr.bf16.mxu0 %v5841_v12  ;;  %v1616_v21 = vrot.slane %v745_v35, 5  ;;  %v1050_v22 = vshrl.u32 %v746_v0, 16  ;;  %v751_v46 = vld [vmem:[%s7368_s25 + $0xa4] sm:$0x1] }
  0x73   : > { %v5785_v16 = vcombine.low %v1014_v2, %v1024_v11  ;;  %v1033_v20 = vrot.slane %v1032_v13, 4  ;;  %v1053_v24 = vshll.u32 %v746_v0, 16  ;;  %v1614_v27 = vsel %vm7435_vm4, %v5810_v14, %v1613_v19  ;;  %v753_v2 = vld [vmem:[%s7368_s25 + $0xac] sm:$0xf] }
  0x74   : > { %v1043_v26 = vrot.slane %v1042_v17, 4  ;;  %v1615_v52 = vrot.slane %v1613_v19, 4  ;;  %v1059_v60 = vshll.u32 %v747_v6, 16  ;;  %v1052_v23 = vrot.slane %v1050_v22, 4  ;;  %v754_v17 = vld [vmem:[%s7368_s25 + $0xb0] sm:$0x1] }
  0x75   : > { %6782 = vmatprep.mubr.bf16.mxu1 %v5785_v16  ;;  %v1038_v1 = vsel %vm7454_vm5, %v1033_v20, %v1037_v8  ;;  %v1055_v28 = vrot.slane %v1053_v24, 5  ;;  %v1063_v29 = vshrl.u32 %v747_v6, 16  ;;  %v1069_v34 = vshll.u32 %v748_v15, 16 }
  0x76   : > { %v1048_v31 = vsel %vm7454_vm5, %v1043_v26, %v1047_v18  ;;  %v1617_v32 = vsel %vm7435_vm4, %v1615_v52, %v1616_v21  ;;  %v1061_v33 = vrot.slane %v1059_v60, 5  ;;  %v5811_v45 = vrot.slane %v1479_v30, 9  ;;  %v1481_v26 = vld [vmem:[%s7368_s25 + $0xa8] sm:$0xe] }
  0x77   : > { %v5786_v38 = vcombine.low %v1038_v1, %v1048_v31  ;;  %v5842_v39 = vcombine.low %v1614_v27, %v1617_v32  ;;  %v1056_v40 = vor.u32 %v1055_v28, %v1052_v23  ;;  %v1065_v41 = vrot.slane %v1063_v29, 4  ;;  %v755_v31 = vld [vmem:[%s7368_s25 + $0xb4] sm:$0xf] }
  0x78   : > { %v1071_v44 = vrot.slane %v1069_v34, 5  ;;  %v1620_v47 = vrot.slane %v747_v6, 5  ;;  %v1623_v48 = vrot.slane %v748_v15, 5  ;;  %v1074_v25 = vshrl.u32 %v749_v36, 16 }
  0x79   : > { %6783 = vmatmul.mubr.bf16.gmra.mxu1 %v5786_v38  ;;  %6831 = vmatmul.mubr.bf16.gmra.mxu0 %v5842_v39  ;;  %v1057_v49 = vrot.slane %v1056_v40, 4  ;;  %v1066_v50 = vor.u32 %v1065_v41, %v1061_v33  ;;  %v1077_v35 = vshll.u32 %v749_v36, 16  ;;  %v1083_v55 = vshll.u32 %v750_v43, 16  ;;  %v756_v38 = vld [vmem:[%s7368_s25 + $0xb8] sm:$0xf] }
  0x7a   : > { %v1621_v51 = vsel %vm7435_vm4, %v5811_v45, %v1620_v47  ;;  %v1622_v53 = vrot.slane %v1620_v47, 4  ;;  %v1087_v56 = vshrl.u32 %v750_v43, 16  ;;  %v1076_v63 = vrot.slane %v1074_v25, 4  ;;  %v757_v39 = vld [vmem:[%s7368_s25 + $0xbc] sm:$0x1] }
  0x7b   : > { %v1062_v59 = vsel %vm7454_vm5, %v1057_v49, %v1061_v33  ;;  %v1067_v61 = vrot.slane %v1066_v50, 4  ;;  %v1079_v0 = vrot.slane %v1077_v35, 5  ;;  %v1085_v4 = vrot.slane %v1083_v55, 5  ;;  %v1482_v45 = vld [vmem:[%s7368_s25 + $0xb4] sm:$0xe] }
  0x7c   : > { %v1624_v3 = vsel %vm7435_vm4, %v1622_v53, %v1623_v48  ;;  %v1089_v5 = vrot.slane %v1087_v56, 4  ;;  %v1093_v6 = vshll.u32 %v751_v46, 16  ;;  %v5812_v10 = vrot.slane %v1480_v42, 9 }
  0x7d   : > { %v1072_v7 = vsel %vm7454_vm5, %v1067_v61, %v1071_v44  ;;  %v5843_v8 = vcombine.low %v1621_v51, %v1624_v3  ;;  %v1080_v9 = vor.u32 %v1079_v0, %v1076_v63  ;;  %v1627_v14 = vrot.slane %v750_v43, 5  ;;  %v5927_v51 = vld [vmem:[%s7368_s25 + $0xc] sm:$0xf] }
  0x7e   : > { %v5787_v11 = vcombine.low %v1062_v59, %v1072_v7  ;;  %v1090_v12 = vor.u32 %v1089_v5, %v1085_v4  ;;  %v1095_v13 = vrot.slane %v1093_v6, 5  ;;  %v1630_v16 = vrot.slane %v751_v46, 5  ;;  %v7776_v6 = vld [vmem:[%s7368_s25 + $0x10] sm:$0xf] }
  0x7f   : > { %6834 = vmatprep.mubr.bf16.mxu0 %v5843_v8  ;;  %v1081_v15 = vrot.slane %v1080_v9, 4  ;;  %v1098_v18 = vshrl.u32 %v752_v57, 16  ;;  %v1101_v19 = vshll.u32 %v752_v57, 16  ;;  %v1628_v21 = vsel %vm7435_vm4, %v5812_v10, %v1627_v14 }
  0x80   : > { %6786 = vmatprep.mubr.bf16.mxu1 %v5787_v11  ;;  %v1091_v20 = vrot.slane %v1090_v12, 4  ;;  %v1629_v22 = vrot.slane %v1627_v14, 4  ;;  %v1107_v24 = vshll.u32 %v753_v2, 16  ;;  %v1111_v1 = vshrl.u32 %v753_v2, 16  ;;  %v7779_v11 = vld [vmem:[%s7368_s25 + $0x14] sm:$0x1] }
  0x81   : > { %v1086_v27 = vsel %vm7454_vm5, %v1081_v15, %v1085_v4  ;;  %v1100_v52 = vrot.slane %v1098_v18, 4  ;;  %v1103_v60 = vrot.slane %v1101_v19, 5  ;;  %v1117_v30 = vshll.u32 %v754_v17, 16 }
  0x82   : > { %v1096_v23 = vsel %vm7454_vm5, %v1091_v20, %v1095_v13  ;;  %v1631_v28 = vsel %vm7435_vm4, %v1629_v22, %v1630_v16  ;;  %v1109_v29 = vrot.slane %v1107_v24, 5  ;;  %v1113_v36 = vrot.slane %v1111_v1, 4  ;;  %v5930_v16 = vld [vmem:[%s7368_s25 + $0x18] sm:$0xf]  ;;  %v7227_v22 = vld [vmem:[%s7368_s25 + $0xc] sm:$0xff]  }
  0x83   : > { %v5788_v32 = vcombine.low %v1086_v27, %v1096_v23  ;;  %v5844_v33 = vcombine.low %v1628_v21, %v1631_v28  ;;  %v1104_v34 = vor.u32 %v1103_v60, %v1100_v52  ;;  %v1119_v40 = vrot.slane %v1117_v30, 5  ;;  %v7790_v52 = vld [vmem:[%s7368_s25 + $0x1c] sm:$0xf]  ;;  %v5933_v30 = vld [vmem:[%s7368_s25 + $0x24] sm:$0xf] }
  0x84   : > { %v5813_v41 = vrot.slane %v1481_v26, 9  ;;  %v1634_v43 = vrot.slane %v753_v2, 5  ;;  %v1637_v44 = vrot.slane %v754_v17, 5  ;;  %v1114_v48 = vor.u32 %v1113_v36, %v1109_v29  ;;  %v7802_v36 = vld [vmem:[%s7368_s25 + $0x28] sm:$0xf] }
  0x85   : > { %6787 = vmatmul.mubr.bf16.gmra.mxu1 %v5788_v32  ;;  %6835 = vmatmul.mubr.bf16.gmra.mxu0 %v5844_v33  ;;  %v1105_v47 = vrot.slane %v1104_v34, 4  ;;  %v1122_v46 = vshrl.u32 %v755_v31, 16  ;;  %v1125_v49 = vshll.u32 %v755_v31, 16  ;;  %v1131_v35 = vshll.u32 %v756_v38, 16 }
  0x86   : > { %v1635_v50 = vsel %vm7435_vm4, %v5813_v41, %v1634_v43  ;;  %v1636_v25 = vrot.slane %v1634_v43, 4  ;;  %v1135_v42 = vshrl.u32 %v756_v38, 16  ;;  %v1115_v55 = vrot.slane %v1114_v48, 4  ;;  %v7806_v43 = vld [vmem:[%s7368_s25 + $0x2c] sm:$0x1] }
  0x87   : > { %v1110_v53 = vsel %vm7454_vm5, %v1105_v47, %v1109_v29  ;;  %v1124_v56 = vrot.slane %v1122_v46, 4  ;;  %v1127_v57 = vrot.slane %v1125_v49, 5  ;;  %v1133_v61 = vrot.slane %v1131_v35, 5  ;;  %v7798_v29 = vld [vmem:[%s7368_s25 + $0x20] sm:$0x1] }
  0x88   : > { %v1638_v59 = vsel %vm7435_vm4, %v1636_v25, %v1637_v44  ;;  %v1137_v63 = vrot.slane %v1135_v42, 4  ;;  %v1141_v0 = vshll.u32 %v757_v39, 16  ;;  %v1120_v2 = vsel %vm7454_vm5, %v1115_v55, %v1119_v40 }
  0x89   : > { %v5845_v3 = vcombine.low %v1635_v50, %v1638_v59  ;;  %v1128_v4 = vor.u32 %v1127_v57, %v1124_v56  ;;  %v5814_v5 = vrot.slane %v1482_v45, 9  ;;  %v5789_v7 = vcombine.low %v1110_v53, %v1120_v2 }
  0x8a   : > { %v1138_v8 = vor.u32 %v1137_v63, %v1133_v61  ;;  %v1143_v9 = vrot.slane %v1141_v0, 5  ;;  %v1641_v10 = vrot.slane %v756_v38, 5  ;;  %v1644_v13 = vrot.slane %v757_v39, 5  ;;  %v7228_v0 = vld [vmem:[%s7368_s25 + $0x18] sm:$0xff]  }
  0x8b   : > { %6838 = vmatprep.mubr.bf16.mxu0 %v5845_v3  ;;  %v1129_v12 = vrot.slane %v1128_v4, 4  ;;  %v2404_v14 = vshrl.u32 %v5927_v51, 16  ;;  %v2407_v15 = vshll.u32 %v5927_v51, 16  ;;  %6790 = vmatprep.mubr.bf16.mxu1 %v5789_v7  ;;  %v2413_v20 = vshll.u32 %v7776_v6, 16  ;;  %v7231_v3 = vld [vmem:[%s7368_s25 + $0x24] sm:$0xff]  }
  0x8c   : > { %v1139_v17 = vrot.slane %v1138_v8, 4  ;;  %v1642_v18 = vsel %vm7435_vm4, %v5814_v5, %v1641_v10  ;;  %v1643_v19 = vrot.slane %v1641_v10, 4  ;;  %v2417_v27 = vshrl.u32 %v7776_v6, 16  ;;  %v7821_v7 = vld [vmem:[%s7368_s25 + $0x34] sm:$0xf] }
  0x8d   : > { %v1134_v21 = vsel %vm7454_vm5, %v1129_v12, %v1133_v61  ;;  %v2406_v24 = vrot.slane %v2404_v14, 4  ;;  %v2409_v26 = vrot.slane %v2407_v15, 5  ;;  %v2415_v23 = vrot.slane %v2413_v20, 5  ;;  %v5936_v61 = vld [vmem:[%s7368_s25 + $0x30] sm:$0xf] }
  0x8e   : > { %v1144_v60 = vsel %vm7454_vm5, %v1139_v17, %v1143_v9  ;;  %v1645_v1 = vsel %vm7435_vm4, %v1643_v19, %v1644_v13  ;;  %v2423_v28 = vshll.u32 %v7779_v11, 16  ;;  %v2419_v34 = vrot.slane %v2417_v27, 4  ;;  %v7233_v13 = vld [vmem:[%s9138_s1 + $0x170] sm:$0xff]   ;;  %v7829_v20 = vld [vmem:[%s7368_s25 + $0x38] sm:$0x1] }
  0x8f   : > { %v5790_v31 = vcombine.low %v1134_v21, %v1144_v60  ;;  %v5846_v32 = vcombine.low %v1642_v18, %v1645_v1  ;;  %v2410_v33 = vor.u32 %v2409_v26, %v2406_v24  ;;  %v2428_v39 = vshrl.u32 %v5930_v16, 16  ;;  %v7234_v24 = vld [vmem:[%s9138_s1 + $0x1b0] sm:$0xff]   ;;  %v5939_v26 = vld [vmem:[%s7368_s25 + $0x3c] sm:$0xf] }
  0x90   : > { %v2425_v38 = vrot.slane %v2423_v28, 5  ;;  %v2431_v40 = vshll.u32 %v5930_v16, 16  ;;  %v2437_v41 = vshll.u32 %v7790_v52, 16  ;;  %v2420_v45 = vor.u32 %v2419_v34, %v2415_v23  ;;  %v7840_v28 = vld [vmem:[%s7368_s25 + $0x40] sm:$0xf] }
  0x91   : > { %6791 = vmatmul.mubr.bf16.gmra.mxu1 %v5790_v31  ;;  %6839 = vmatmul.mubr.bf16.gmra.mxu0 %v5846_v32  ;;  %v2411_v44 = vrot.slane %v2410_v33, 4  ;;  %v2441_v47 = vshrl.u32 %v7790_v52, 16  ;;  %v2447_v48 = vshll.u32 %v7798_v29, 16  ;;  %v2430_v46 = vrot.slane %v2428_v39, 4  ;;  %v7844_v34 = vld [vmem:[%s7368_s25 + $0x44] sm:$0x1] }
  0x92   : > { %6858 = vmatprep.mubr.bf16.mxu1 %v7227_v22  ;;  %v2433_v49 = vrot.slane %v2431_v40, 5  ;;  %v2439_v50 = vrot.slane %v2437_v41, 5  ;;  %v2452_v25 = vshrl.u32 %v5933_v30, 16  ;;  %v2421_v42 = vrot.slane %v2420_v45, 4  ;;  %v7237_v39 = vld [vmem:[%s9138_s1 + $0x168] sm:$0xff]   ;;  %v7232_v41 = vld [vmem:[%s7368_s25 + $0x30] sm:$0xff]  }
  0x93   : > { %v2416_v35 = vsel %vm7454_vm5, %v2411_v44, %v2415_v23  ;;  %v2443_v51 = vrot.slane %v2441_v47, 4  ;;  %v2449_v53 = vrot.slane %v2447_v48, 5  ;;  %v2455_v57 = vshll.u32 %v5933_v30, 16 }
  0x94   : > { %v2434_v55 = vor.u32 %v2433_v49, %v2430_v46  ;;  %v2454_v56 = vrot.slane %v2452_v25, 4  ;;  %v2461_v59 = vshll.u32 %v7802_v36, 16  ;;  %v2426_v63 = vsel %vm7454_vm5, %v2421_v42, %v2425_v38  ;;  %v5942_v38 = vld [vmem:[%s7368_s25 + $0x48] sm:$0xf]  ;;  %v7235_v46 = vld [vmem:[%s7368_s25 + $0x3c] sm:$0xff]  }
  0x95   : > { %v2444_v2 = vor.u32 %v2443_v51, %v2439_v50  ;;  %v2465_v4 = vshrl.u32 %v7802_v36, 16  ;;  %v2471_v5 = vshll.u32 %v7806_v43, 16  ;;  %v5991_v8 = vcombine.low %v2416_v35, %v2426_v63  ;;  %v7241_v63 = vld [vmem:[%s9138_s1 + $0x160] sm:$0xff]  }
  0x96   : > { %v2435_v9 = vrot.slane %v2434_v55, 4  ;;  %v2457_v10 = vrot.slane %v2455_v57, 5  ;;  %v2463_v12 = vrot.slane %v2461_v59, 5  ;;  %v2476_v17 = vshrl.u32 %v5936_v61, 16  ;;  %v7238_v55 = vld [vmem:[%s9138_s1 + $0x1a8] sm:$0xff]  }
  0x97   : > { %v2445_v14 = vrot.slane %v2444_v2, 4  ;;  %v2467_v15 = vrot.slane %v2465_v4, 4  ;;  %v2473_v16 = vrot.slane %v2471_v5, 5  ;;  %6906 = vmatprep.mubr.bf16.mxu0 %v5991_v8  ;;  %v2479_v21 = vshll.u32 %v5936_v61, 16  ;;  %v5945_v5 = vld [vmem:[%s7368_s25 + $0x54] sm:$0xf] }
  0x98   : > { %v2440_v18 = vsel %vm7454_vm5, %v2435_v9, %v2439_v50  ;;  %v2458_v19 = vor.u32 %v2457_v10, %v2454_v56  ;;  %v2485_v22 = vshll.u32 %v7821_v7, 16  ;;  %v2478_v1 = vrot.slane %v2476_v17, 4  ;;  %v7882_v17 = vld [vmem:[%s7368_s25 + $0x58] sm:$0xf] }
  0x99   : > { %6859 = vmatmul.mubr.bf16.vlgmr.msra.gmra.mxu1 %v7228_v0  ;;  %v2450_v27 = vsel %vm7454_vm5, %v2445_v14, %v2449_v53  ;;  %v2468_v60 = vor.u32 %v2467_v15, %v2463_v12  ;;  %v2489_v23 = vshrl.u32 %v7821_v7, 16  ;;  %v2481_v32 = vrot.slane %v2479_v21, 5  ;;  %v7860_v53 = vld [vmem:[%s7368_s25 + $0x4c] sm:$0xf] }
  0x9a   : > { %v5992_v30 = vcombine.low %v2440_v18, %v2450_v27  ;;  %6939 = vmatpush3.bf16.msra.mxu1 %v7680_v54  ;;  %6862 = vmatprep.mubr.bf16.mxu1 %v7231_v3  ;;  %v2459_v31 = vrot.slane %v2458_v19, 4  ;;  %v2487_v33 = vrot.slane %v2485_v22, 5  ;;  %v2495_v45 = vshll.u32 %v7829_v20, 16 }
  0x9b   : > { %v2469_v40 = vrot.slane %v2468_v60, 4  ;;  %v2491_v44 = vrot.slane %v2489_v23, 4  ;;  %6940 = vmatprep.subr.bf16.mxu1 %v7233_v13  ;;  %v2500_v54 = vshrl.u32 %v5939_v26, 16  ;;  %v2482_v48 = vor.u32 %v2481_v32, %v2478_v1  ;;  %v7236_v60 = vld [vmem:[%s7368_s25 + $0x48] sm:$0xff]   ;;  %v7245_v32 = vld [vmem:[%s9138_s1 + $0x158] sm:$0xff]  }
  0x9c   : > { %6907 = vmatmul.mubr.bf16.vlgmr.msra.gmra.mxu0 %v5992_v30  ;;  %v2464_v47 = vsel %vm7454_vm5, %v2459_v31, %v2463_v12  ;;  %v2503_v49 = vshll.u32 %v5939_v26, 16  ;;  %v2509_v50 = vshll.u32 %v7840_v28, 16  ;;  %v2497_v42 = vrot.slane %v2495_v45, 5  ;;  %v7887_v26 = vld [vmem:[%s7368_s25 + $0x5c] sm:$0x1] }
  0x9d   : > { %6987 = vmatpush3.bf16.msra.mxu0 %v7686_v62  ;;  %v2474_v25 = vsel %vm7454_vm5, %v2469_v40, %v2473_v16  ;;  %v2492_v35 = vor.u32 %v2491_v44, %v2487_v33  ;;  %v2502_v51 = vrot.slane %v2500_v54, 4  ;;  %v2483_v57 = vrot.slane %v2482_v48, 4  ;;  %v7868_v62 = vld [vmem:[%s7368_s25 + $0x50] sm:$0x1]  ;;  %v5948_v31 = vld [vmem:[%s7368_s25 + $0x60] sm:$0xf] }
  0x9e   : > { %v5993_v56 = vcombine.low %v2464_v47, %v2474_v25  ;;  %6941 = vmatpush3.bf16.msra.mxu1 %v7233_v13  ;;  %6988 = vmatprep.subr.bf16.mxu0 %v7234_v24  ;;  %v2505_v59 = vrot.slane %v2503_v49, 5  ;;  %v7865_v61 = vrot.slane %v2509_v50, 5  ;;  %v2513_v2 = vshrl.u32 %v7840_v28, 16  ;;  %v7906_v48 = vld [vmem:[%s7368_s25 + $0x64] sm:$0xf] }
  0x9f   : > { %v2493_v0 = vrot.slane %v2492_v35, 4  ;;  %v2519_v3 = vshll.u32 %v7844_v34, 16  ;;  %v2524_v4 = vshrl.u32 %v5942_v38, 16  ;;  %6942 = vmatprep.subr.bf16.mxu1 %v7237_v39  ;;  %v2488_v8 = vsel %vm7454_vm5, %v2483_v57, %v2487_v33 }
  0xa0   : > { %6910 = vmatprep.mubr.bf16.mxu0 %v5993_v56  ;;  %v2506_v9 = vor.u32 %v2505_v59, %v2502_v51  ;;  %v2527_v10 = vshll.u32 %v5942_v38, 16  ;;  %v2533_v12 = vshll.u32 %v7860_v53, 16  ;;  %v2515_v14 = vrot.slane %v2513_v2, 4  ;;  %v7920_v2 = vld [vmem:[%s7368_s25 + $0x68] sm:$0x1] }
  0xa1   : > { %6863 = vmatmul.mubr.bf16.gmra.mxu1 %v7232_v41  ;;  %v2498_v13 = vsel %vm7454_vm5, %v2493_v0, %v2497_v42  ;;  %6989 = vmatpush3.bf16.msra.mxu0 %v7234_v24  ;;  %v2521_v15 = vrot.slane %v2519_v3, 5  ;;  %v2526_v16 = vrot.slane %v2524_v4, 4  ;;  %v7242_v24 = vld [vmem:[%s9138_s1 + $0x1a0] sm:$0xff]   ;;  %v2537_v1 = vshrl.u32 %v7860_v53, 16  ;;  %v7249_v3 = vld [vmem:[%s9138_s1 + $0x150] sm:$0xff]  }
  0xa2   : > { %v5994_v18 = vcombine.low %v2488_v8, %v2498_v13  ;;  %6866 = vmatprep.mubr.bf16.mxu1 %v7235_v46  ;;  %v2507_v19 = vrot.slane %v2506_v9, 4  ;;  %v2529_v21 = vrot.slane %v2527_v10, 5  ;;  %v7884_v22 = vrot.slane %v2533_v12, 5  ;;  %6943 = vmatpush3.bf16.msra.mxu1 %v7237_v39  ;;  %v7239_v39 = vld [vmem:[%s7368_s25 + $0x54] sm:$0xff]   ;;  %v7927_v10 = vld [vmem:[%s7368_s25 + $0x70] sm:$0xf] }
  0xa3   : > { %v2516_v27 = vor.u32 %v2515_v14, %v7865_v61  ;;  %v2543_v23 = vshll.u32 %v7868_v62, 16  ;;  %6990 = vmatprep.subr.bf16.mxu0 %v7238_v55  ;;  %v2548_v30 = vshrl.u32 %v5945_v5, 16  ;;  %6944 = vmatprep.subr.bf16.mxu1 %v7241_v63  ;;  %v2551_v40 = vshll.u32 %v5945_v5, 16  ;;  %v7246_v46 = vld [vmem:[%s9138_s1 + $0x198] sm:$0xff]  }
  0xa4   : > { %6911 = vmatmul.mubr.bf16.gmra.mxu0 %v5994_v18  ;;  %v2512_v33 = vsel %vm7454_vm5, %v2507_v19, %v7865_v61  ;;  %v2530_v38 = vor.u32 %v2529_v21, %v2526_v16  ;;  %v2557_v41 = vshll.u32 %v7882_v17, 16  ;;  %v2539_v45 = vrot.slane %v2537_v1, 4  ;;  %v7250_v16 = vld [vmem:[%s9138_s1 + $0x190] sm:$0xff]   ;;  %v7240_v19 = vld [vmem:[%s7368_s25 + $0x60] sm:$0xff]  }
  0xa5   : > { %v2517_v44 = vrot.slane %v2516_v27, 4  ;;  %v2545_v54 = vrot.slane %v2543_v23, 5  ;;  %6991 = vmatpush3.bf16.msra.mxu0 %v7238_v55  ;;  %v2550_v47 = vrot.slane %v2548_v30, 4  ;;  %v2553_v50 = vrot.slane %v2551_v40, 5  ;;  %v7253_v27 = vld [vmem:[%s9138_s1 + $0x148] sm:$0xff]  }
  0xa6   : > { %v2531_v49 = vrot.slane %v2530_v38, 4  ;;  %v2559_v25 = vrot.slane %v2557_v41, 5  ;;  %v2561_v35 = vshrl.u32 %v7882_v17, 16  ;;  %6945 = vmatpush3.bf16.msra.mxu1 %v7241_v63  ;;  %6992 = vmatprep.subr.bf16.mxu0 %v7242_v24  ;;  %v2540_v51 = vor.u32 %v2539_v45, %v7884_v22  ;;  %v5951_v63 = vld [vmem:[%s7368_s25 + $0x6c] sm:$0xf] }
  0xa7   : > { %v2522_v42 = vsel %vm7454_vm5, %v2517_v44, %v2521_v15  ;;  %v2567_v55 = vshll.u32 %v7887_v26, 16  ;;  %v2572_v56 = vshrl.u32 %v5948_v31, 16  ;;  %6946 = vmatprep.subr.bf16.mxu1 %v7245_v32  ;;  %v2554_v61 = vor.u32 %v2553_v50, %v2550_v47  ;;  %v5954_v38 = vld [vmem:[%s7368_s25 + $0x78] sm:$0xf]  ;;  %v7949_v44 = vld [vmem:[%s7368_s25 + $0x7c] sm:$0xf] }
  0xa8   : > { %v5995_v57 = vcombine.low %v2512_v33, %v2522_v42  ;;  %v2536_v59 = vsel %vm7454_vm5, %v2531_v49, %v7884_v22  ;;  %v2563_v0 = vrot.slane %v2561_v35, 4  ;;  %v2541_v4 = vrot.slane %v2540_v51, 4  ;;  %v7945_v33 = vld [vmem:[%s7368_s25 + $0x74] sm:$0x1]  ;;  %v7954_v45 = vld [vmem:[%s9138_s1 + $0x188] sm:$0xff]  }
  0xa9   : > { %6867 = vmatmul.mubr.bf16.gmra.mxu1 %v7236_v60  ;;  %v2569_v5 = vrot.slane %v2567_v55, 5  ;;  %v2574_v8 = vrot.slane %v2572_v56, 4  ;;  %v2575_v9 = vshll.u32 %v5948_v31, 16  ;;  %6993 = vmatpush3.bf16.msra.mxu0 %v7242_v24  ;;  %v2555_v12 = vrot.slane %v2554_v61, 4  ;;  %v7243_v31 = vld [vmem:[%s7368_s25 + $0x6c] sm:$0xff]  }
  0xaa   : > { %6914 = vmatprep.mubr.bf16.mxu0 %v5995_v57  ;;  %6870 = vmatprep.mubr.bf16.mxu1 %v7239_v39  ;;  %v2564_v13 = vor.u32 %v2563_v0, %v2559_v25  ;;  %v2581_v14 = vshll.u32 %v7906_v48, 16  ;;  %v2585_v15 = vshrl.u32 %v7906_v48, 16  ;;  %v2546_v18 = vsel %vm7454_vm5, %v2541_v4, %v2545_v54 }
  0xab   : > { %v2577_v21 = vrot.slane %v2575_v9, 5  ;;  %v2591_v22 = vshll.u32 %v7920_v2, 16  ;;  %v2596_v24 = vshrl.u32 %v5951_v63, 16  ;;  %6947 = vmatpush3.bf16.msra.mxu1 %v7245_v32  ;;  %6994 = vmatprep.subr.bf16.mxu0 %v7246_v46  ;;  %v5996_v60 = vcombine.low %v2536_v59, %v2546_v18 }
  0xac   : > { %v2560_v1 = vsel %vm7454_vm5, %v2555_v12, %v2559_v25  ;;  %v2565_v23 = vrot.slane %v2564_v13, 4  ;;  %v2583_v30 = vrot.slane %v2581_v14, 5  ;;  %6948 = vmatprep.subr.bf16.mxu1 %v7249_v3  ;;  %v2587_v40 = vrot.slane %v2585_v15, 4  ;;  %v7961_v25 = vld [vmem:[%s7368_s25 + $0x80] sm:$0x1]  ;;  %v7244_v15 = vld [vmem:[%s7368_s25 + $0x78] sm:$0xff]  }
  0xad   : > { %v2578_v39 = vor.u32 %v2577_v21, %v2574_v8  ;;  %v2593_v32 = vrot.slane %v2591_v22, 5  ;;  %v2598_v41 = vrot.slane %v2596_v24, 4  ;;  %6995 = vmatpush3.bf16.msra.mxu0 %v7246_v46  ;;  %v2599_v47 = vshll.u32 %v5951_v63, 16  ;;  %v7257_v46 = vld [vmem:[%s9138_s1 + $0x140] sm:$0xff]   ;;  %v7977_v22 = vld [vmem:[%s7368_s25 + $0x88] sm:$0xf] }
  0xae   : > { %6915 = vmatmul.mubr.bf16.gmra.mxu0 %v5996_v60  ;;  %v2570_v54 = vsel %vm7454_vm5, %v2565_v23, %v2569_v5  ;;  %v2605_v49 = vshll.u32 %v7927_v10, 16  ;;  %v2609_v50 = vshrl.u32 %v7927_v10, 16  ;;  %6996 = vmatprep.subr.bf16.mxu0 %v7250_v16  ;;  %v2588_v51 = vor.u32 %v2587_v40, %v2583_v30  ;;  %v5957_v13 = vld [vmem:[%s7368_s25 + $0x84] sm:$0xf] }
  0xaf   : > { %v5997_v35 = vcombine.low %v2560_v1, %v2570_v54  ;;  %v2579_v42 = vrot.slane %v2578_v39, 4  ;;  %v2615_v55 = vshll.u32 %v7945_v33, 16  ;;  %6949 = vmatpush3.bf16.msra.mxu1 %v7249_v3  ;;  %v2601_v56 = vrot.slane %v2599_v47, 5  ;;  %v7258_v24 = vld [vmem:[%s9138_s1 + $0x180] sm:$0xff]  }
  0xb0   : > { %v2607_v57 = vrot.slane %v2605_v49, 5  ;;  %v2611_v59 = vrot.slane %v2609_v50, 4  ;;  %v2620_v61 = vshrl.u32 %v5954_v38, 16  ;;  %6950 = vmatprep.subr.bf16.mxu1 %v7253_v27  ;;  %v2589_v63 = vrot.slane %v2588_v51, 4  ;;  %v7247_v40 = vld [vmem:[%s7368_s25 + $0x84] sm:$0xff]  }
  0xb1   : > { %6918 = vmatprep.mubr.bf16.mxu0 %v5997_v35  ;;  %6871 = vmatmul.mubr.bf16.gmra.mxu1 %v7240_v19  ;;  %v2584_v0 = vsel %vm7454_vm5, %v2579_v42, %v2583_v30  ;;  %v2617_v4 = vrot.slane %v2615_v55, 5  ;;  %v2623_v5 = vshll.u32 %v5954_v38, 16  ;;  %v2602_v8 = vor.u32 %v2601_v56, %v2598_v41  ;;  %v7984_v30 = vld [vmem:[%s7368_s25 + $0x8c] sm:$0x1]  ;;  %v5960_v50 = vld [vmem:[%s7368_s25 + $0x90] sm:$0xf] }
  0xb2   : > { %6874 = vmatprep.mubr.bf16.mxu1 %v7243_v31  ;;  %v2612_v9 = vor.u32 %v2611_v59, %v2607_v57  ;;  %v2622_v3 = vrot.slane %v2620_v61, 4  ;;  %v2629_v12 = vshll.u32 %v7949_v44, 16  ;;  %6997 = vmatpush3.bf16.msra.mxu0 %v7250_v16  ;;  %v2594_v14 = vsel %vm7454_vm5, %v2589_v63, %v2593_v32  ;;  %v7989_v31 = vld [vmem:[%s9138_s1 + $0x1f8] sm:$0xff]   ;;  %v7999_v56 = vld [vmem:[%s7368_s25 + $0x94] sm:$0xf] }
  0xb3   : > { %v2625_v18 = vrot.slane %v2623_v5, 5  ;;  %v2633_v19 = vshrl.u32 %v7949_v44, 16  ;;  %v2639_v21 = vshll.u32 %v7961_v25, 16  ;;  %6951 = vmatpush3.bf16.msra.mxu1 %v7253_v27  ;;  %6998 = vmatprep.subr.bf16.mxu0 %v7954_v45  ;;  %v5998_v16 = vcombine.low %v2584_v0, %v2594_v14  ;;  %v5963_v5 = vld [vmem:[%s7368_s25 + $0x9c] sm:$0xf] }
  0xb4   : > { %v2603_v60 = vrot.slane %v2602_v8, 4  ;;  %v2613_v1 = vrot.slane %v2612_v9, 4  ;;  %v2631_v23 = vrot.slane %v2629_v12, 5  ;;  %6952 = vmatprep.subr.bf16.mxu1 %v7257_v46  ;;  %v2644_v32 = vshrl.u32 %v5957_v13, 16 }
  0xb5   : > { %v2626_v27 = vor.u32 %v2625_v18, %v2622_v3  ;;  %v2635_v38 = vrot.slane %v2633_v19, 4  ;;  %v2641_v39 = vrot.slane %v2639_v21, 5  ;;  %v2647_v47 = vshll.u32 %v5957_v13, 16  ;;  %v8017_v3 = vld [vmem:[%s7368_s25 + $0xa0] sm:$0xf] }
  0xb6   : > { %6919 = vmatmul.mubr.bf16.gmra.mxu0 %v5998_v16  ;;  %v2608_v41 = vsel %vm7454_vm5, %v2603_v60, %v2607_v57  ;;  %v2618_v54 = vsel %vm7454_vm5, %v2613_v1, %v2617_v4  ;;  %v2653_v49 = vshll.u32 %v7977_v22, 16  ;;  %v2646_v55 = vrot.slane %v2644_v32, 4  ;;  %v8005_v57 = vld [vmem:[%s9138_s1 + $0x238] sm:$0xff]  }
  0xb7   : > { %v5999_v35 = vcombine.low %v2608_v41, %v2618_v54  ;;  %v2627_v42 = vrot.slane %v2626_v27, 4  ;;  %v2636_v51 = vor.u32 %v2635_v38, %v2631_v23  ;;  %6999 = vmatpush3.bf16.msra.mxu0 %v7954_v45  ;;  %6953 = vmatpush3.bf16.msra.mxu1 %v7257_v46  ;;  %v2649_v59 = vrot.slane %v2647_v47, 5  ;;  %v8010_v4 = vld [vmem:[%s7368_s25 + $0x98] sm:$0x1]  ;;  %v7248_v38 = vld [vmem:[%s7368_s25 + $0x90] sm:$0xff]  }
  0xb8   : > { %v2655_v61 = vrot.slane %v2653_v49, 5  ;;  %v2657_v0 = vshrl.u32 %v7977_v22, 16  ;;  %v2663_v63 = vshll.u32 %v7984_v30, 16  ;;  %7000 = vmatprep.subr.bf16.mxu0 %v7258_v24  ;;  %7034 = vmatprep.subr.bf16.mxu1 %v7989_v31  ;;  %v2668_v8 = vshrl.u32 %v5960_v50, 16  ;;  %v7251_v49 = vld [vmem:[%s7368_s25 + $0x9c] sm:$0xff]  }
  0xb9   : > { %6922 = vmatprep.mubr.bf16.mxu0 %v5999_v35  ;;  %6875 = vmatmul.mubr.bf16.gmra.mxu1 %v7244_v15  ;;  %v2632_v45 = vsel %vm7454_vm5, %v2627_v42, %v2631_v23  ;;  %v2637_v46 = vrot.slane %v2636_v51, 4  ;;  %v2671_v9 = vshll.u32 %v5960_v50, 16  ;;  %v2650_v12 = vor.u32 %v2649_v59, %v2646_v55  ;;  %v5966_v42 = vld [vmem:[%s7368_s25 + $0xa8] sm:$0xf] }
  0xba   : > { %6878 = vmatprep.mubr.bf16.mxu1 %v7247_v40  ;;  %v2659_v13 = vrot.slane %v2657_v0, 4  ;;  %v2665_v14 = vrot.slane %v2663_v63, 5  ;;  %v2677_v18 = vshll.u32 %v7999_v56, 16  ;;  %v2670_v15 = vrot.slane %v2668_v8, 4  ;;  %v8035_v63 = vld [vmem:[%s7368_s25 + $0xac] sm:$0xf] }
  0xbb   : > { %v2642_v19 = vsel %vm7454_vm5, %v2637_v46, %v2641_v39  ;;  %v2673_v21 = vrot.slane %v2671_v9, 5  ;;  %v2681_v16 = vshrl.u32 %v7999_v56, 16  ;;  %7001 = vmatpush3.bf16.msra.mxu0 %v7258_v24  ;;  %v2651_v1 = vrot.slane %v2650_v12, 4  ;;  %v8027_v39 = vld [vmem:[%s7368_s25 + $0xa4] sm:$0x1] }
  0xbc   : > { %v6000_v60 = vcombine.low %v2632_v45, %v2642_v19  ;;  %v2660_v23 = vor.u32 %v2659_v13, %v2655_v61  ;;  %v2679_v27 = vrot.slane %v2677_v18, 5  ;;  %7082 = vmatprep.subr.bf16.mxu0 %v8005_v57  ;;  %v2687_v41 = vshll.u32 %v8010_v4, 16  ;;  %v8044_v18 = vld [vmem:[%s7368_s25 + $0xb0] sm:$0x1] }
  0xbd   : > { %v2674_v40 = vor.u32 %v2673_v21, %v2670_v15  ;;  %v2683_v32 = vrot.slane %v2681_v16, 4  ;;  %v2692_v54 = vshrl.u32 %v5963_v5, 16  ;;  %v2656_v24 = vsel %vm7454_vm5, %v2651_v1, %v2655_v61  ;;  %v5969_v16 = vld [vmem:[%s7368_s25 + $0xb4] sm:$0xf] }
  0xbe   : > { %6923 = vmatmul.mubr.bf16.gmra.mxu0 %v6000_v60  ;;  %v2661_v47 = vrot.slane %v2660_v23, 4  ;;  %v2695_v50 = vshll.u32 %v5963_v5, 16  ;;  %v2701_v35 = vshll.u32 %v8017_v3, 16  ;;  %v2689_v59 = vrot.slane %v2687_v41, 5  ;;  %v7252_v23 = vld [vmem:[%s7368_s25 + $0xa8] sm:$0xff]  }
  0xbf   : > { %v2675_v51 = vrot.slane %v2674_v40, 4  ;;  %v2684_v55 = vor.u32 %v2683_v32, %v2679_v27  ;;  %v2694_v0 = vrot.slane %v2692_v54, 4  ;;  %v2705_v61 = vshrl.u32 %v8017_v3, 16  ;;  %v8053_v40 = vld [vmem:[%s7368_s25 + $0xb8] sm:$0xf] }
  0xc0   : > { %v2666_v45 = vsel %vm7454_vm5, %v2661_v47, %v2665_v14  ;;  %v2697_v46 = vrot.slane %v2695_v50, 5  ;;  %v2703_v8 = vrot.slane %v2701_v35, 5  ;;  %v2711_v13 = vshll.u32 %v8027_v39, 16 }
  0xc1   : > { %v6001_v5 = vcombine.low %v2656_v24, %v2666_v45  ;;  %6879 = vmatmul.mubr.bf16.gmra.mxu1 %v7248_v38  ;;  %v2680_v9 = vsel %vm7454_vm5, %v2675_v51, %v2679_v27  ;;  %v2685_v12 = vrot.slane %v2684_v55, 4  ;;  %v2707_v15 = vrot.slane %v2705_v61, 4  ;;  %v5972_v51 = vld [vmem:[%s7368_s25 + $0xc0] sm:$0xf] }
  0xc2   : > { %6882 = vmatprep.mubr.bf16.mxu1 %v7251_v49  ;;  %v2698_v19 = vor.u32 %v2697_v46, %v2694_v0  ;;  %v2716_v14 = vshrl.u32 %v5966_v42, 16  ;;  %v2719_v21 = vshll.u32 %v5966_v42, 16  ;;  %v2713_v1 = vrot.slane %v2711_v13, 5  ;;  %v8057_v42 = vld [vmem:[%s7368_s25 + $0xbc] sm:$0x1]  ;;  %v7255_v0 = vld [vmem:[%s7368_s25 + $0xb4] sm:$0xff]  }
  0xc3   : > { %6926 = vmatprep.mubr.bf16.mxu0 %v6001_v5  ;;  %v2690_v60 = vsel %vm7454_vm5, %v2685_v12, %v2689_v59  ;;  %v2725_v27 = vshll.u32 %v8035_v63, 16  ;;  %v2729_v38 = vshrl.u32 %v8035_v63, 16  ;;  %v2708_v54 = vor.u32 %v2707_v15, %v2703_v8  ;;  %v8065_v13 = vld [vmem:[%s7368_s25 + $0xc4] sm:$0xf] }
  0xc4   : > { %v6002_v32 = vcombine.low %v2680_v9, %v2690_v60  ;;  %v2699_v41 = vrot.slane %v2698_v19, 4  ;;  %v2718_v24 = vrot.slane %v2716_v14, 4  ;;  %v2721_v47 = vrot.slane %v2719_v21, 5 }
  0xc5   : > { %v2727_v49 = vrot.slane %v2725_v27, 5  ;;  %v2731_v50 = vrot.slane %v2729_v38, 4  ;;  %v2735_v35 = vshll.u32 %v8044_v18, 16  ;;  %v2709_v59 = vrot.slane %v2708_v54, 4  ;;  %v8071_v38 = vld [vmem:[%s7368_s25 + $0xc8] sm:$0x1] }
  0xc6   : > { %6927 = vmatmul.mubr.bf16.gmra.mxu0 %v6002_v32  ;;  %v2704_v55 = vsel %vm7454_vm5, %v2699_v41, %v2703_v8  ;;  %v2740_v45 = vshrl.u32 %v5969_v16, 16  ;;  %v2743_v46 = vshll.u32 %v5969_v16, 16  ;;  %v2722_v61 = vor.u32 %v2721_v47, %v2718_v24  ;;  %v6015_v32 = vld [vmem:[%s7368_s25 + $0xc] sm:$0xe] }
  0xc7   : > { %v2732_v5 = vor.u32 %v2731_v50, %v2727_v49  ;;  %v2737_v9 = vrot.slane %v2735_v35, 5  ;;  %v2749_v12 = vshll.u32 %v8053_v40, 16  ;;  %v2714_v19 = vsel %vm7454_vm5, %v2709_v59, %v2713_v1  ;;  %v7256_v50 = vld [vmem:[%s7368_s25 + $0xc0] sm:$0xff]   ;;  %v6016_v59 = vld [vmem:[%s7368_s25 + $0x18] sm:$0xe] }
  0xc8   : > { %v2742_v15 = vrot.slane %v2740_v45, 4  ;;  %v2745_v14 = vrot.slane %v2743_v46, 5  ;;  %v2753_v8 = vshrl.u32 %v8053_v40, 16  ;;  %v6003_v21 = vcombine.low %v2704_v55, %v2714_v19 }
  0xc9   : > { %6883 = vmatmul.mubr.bf16.gmra.mxu1 %v7252_v23  ;;  %v2723_v60 = vrot.slane %v2722_v61, 4  ;;  %v2733_v16 = vrot.slane %v2732_v5, 4  ;;  %v2751_v27 = vrot.slane %v2749_v12, 5  ;;  %v2759_v24 = vshll.u32 %v8057_v42, 16 }
  0xca   : > { %6886 = vmatprep.mubr.bf16.mxu1 %v7255_v0  ;;  %v2746_v41 = vor.u32 %v2745_v14, %v2742_v15  ;;  %v2755_v54 = vrot.slane %v2753_v8, 4  ;;  %v2764_v1 = vshrl.u32 %v5972_v51, 16  ;;  %6930 = vmatprep.mubr.bf16.mxu0 %v6003_v21  ;;  %v2767_v35 = vshll.u32 %v5972_v51, 16  ;;  %v6017_v8 = vld [vmem:[%s7368_s25 + $0x24] sm:$0xe] }
  0xcb   : > { %v2728_v47 = vsel %vm7454_vm5, %v2723_v60, %v2727_v49  ;;  %v2738_v23 = vsel %vm7454_vm5, %v2733_v16, %v2737_v9  ;;  %v2773_v55 = vshll.u32 %v8065_v13, 16  ;;  %v2761_v61 = vrot.slane %v2759_v24, 5 }
  0xcc   : > { %v6004_v45 = vcombine.low %v2728_v47, %v2738_v23  ;;  %v2747_v0 = vrot.slane %v2746_v41, 4  ;;  %v2756_v46 = vor.u32 %v2755_v54, %v2751_v27  ;;  %v2766_v5 = vrot.slane %v2764_v1, 4 }
  0xcd   : > { %v2769_v12 = vrot.slane %v2767_v35, 5  ;;  %v2775_v19 = vrot.slane %v2773_v55, 5  ;;  %v2777_v15 = vshrl.u32 %v8065_v13, 16  ;;  %v2783_v51 = vshll.u32 %v8071_v38, 16  ;;  %v6018_v55 = vld [vmem:[%s7368_s25 + $0x30] sm:$0xe] }
  0xce   : > { %6931 = vmatmul.mubr.bf16.gmra.mxu0 %v6004_v45  ;;  %v2752_v49 = vsel %vm7454_vm5, %v2747_v0, %v2751_v27  ;;  %v2757_v9 = vrot.slane %v2756_v46, 4  ;;  %v6031_v14 = vrot.slane %v6015_v32, 9  ;;  %v3175_v16 = vrot.slane %v7776_v6, 5 }
  0xcf   : > { %v2770_v21 = vor.u32 %v2769_v12, %v2766_v5  ;;  %v2779_v60 = vrot.slane %v2777_v15, 4  ;;  %v3178_v41 = vrot.slane %v7779_v11, 5  ;;  %v2785_v24 = vrot.slane %v2783_v51, 5 }
  0xd0   : > { %v2762_v54 = vsel %vm7454_vm5, %v2757_v9, %v2761_v61  ;;  %v6032_v1 = vrot.slane %v6016_v59, 9  ;;  %v3182_v27 = vrot.slane %v7790_v52, 5  ;;  %v3176_v32 = vsel %vm7435_vm4, %v6031_v14, %v3175_v16  ;;  %v6019_v14 = vld [vmem:[%s7368_s25 + $0x3c] sm:$0xe] }
  0xd1   : > { %v6005_v47 = vcombine.low %v2752_v49, %v2762_v54  ;;  %6887 = vmatmul.mubr.bf16.gmra.mxu1 %v7256_v50  ;;  %v2771_v23 = vrot.slane %v2770_v21, 4  ;;  %v2780_v35 = vor.u32 %v2779_v60, %v2775_v19  ;;  %v3177_v45 = vrot.slane %v3175_v16, 4  ;;  %v7259_v50 = vld [vmem:[%s7368_s25 + $0x18] sm:$0xff]   ;;  %v6020_v54 = vld [vmem:[%s7368_s25 + $0x48] sm:$0xe] }
  0xd2   : > { %v3183_v6 = vsel %vm7435_vm4, %v6032_v1, %v3182_v27  ;;  %v3184_v11 = vrot.slane %v3182_v27, 4  ;;  %v3185_v0 = vrot.slane %v7798_v29, 5  ;;  %v6033_v46 = vrot.slane %v6017_v8, 9 }
  0xd3   : > { %6934 = vmatprep.mubr.bf16.mxu0 %v6005_v47  ;;  %v2776_v52 = vsel %vm7454_vm5, %v2771_v23, %v2775_v19  ;;  %v2781_v59 = vrot.slane %v2780_v35, 4  ;;  %v3189_v61 = vrot.slane %v7802_v36, 5  ;;  %v3179_v5 = vsel %vm7435_vm4, %v3177_v45, %v3178_v41  ;;  %v7269_v35 = vld [vmem:[%s9138_s1 + $0x1e8] sm:$0xff]  }
  0xd4   : > { %v3186_v12 = vsel %vm7435_vm4, %v3184_v11, %v3185_v0  ;;  %v3192_v15 = vrot.slane %v7806_v43, 5  ;;  %v6034_v49 = vrot.slane %v6018_v55, 9  ;;  %v6063_v9 = vcombine.low %v3176_v32, %v3179_v5  ;;  %v7265_v43 = vld [vmem:[%s9138_s1 + $0x1f0] sm:$0xff]  }
  0xd5   : > { %v2786_v29 = vsel %vm7454_vm5, %v2781_v59, %v2785_v24  ;;  %v6064_v19 = vcombine.low %v3183_v6, %v3186_v12  ;;  %v3190_v51 = vsel %vm7435_vm4, %v6033_v46, %v3189_v61  ;;  %v3191_v8 = vrot.slane %v3189_v61, 4  ;;  %v6021_v11 = vld [vmem:[%s7368_s25 + $0x54] sm:$0xe]  ;;  %v6022_v59 = vld [vmem:[%s7368_s25 + $0x60] sm:$0xe] }
  0xd6   : > { %v6006_v36 = vcombine.low %v2776_v52, %v2786_v29  ;;  %v3196_v21 = vrot.slane %v7821_v7, 5  ;;  %v3199_v60 = vrot.slane %v7829_v20, 5  ;;  %6954 = vmatprep.mubr.bf16.mxu1 %v6063_v9  ;;  %v6035_v16 = vrot.slane %v6019_v14, 9  ;;  %v6023_v29 = vld [vmem:[%s7368_s25 + $0x6c] sm:$0xe] }
  0xd7   : > { %v3203_v41 = vrot.slane %v7840_v28, 5  ;;  %v3210_v24 = vrot.slane %v7860_v53, 5  ;;  %v3193_v1 = vsel %vm7435_vm4, %v3191_v8, %v3192_v15  ;;  %v3206_v27 = vrot.slane %v7844_v34, 5  ;;  %v7260_v28 = vld [vmem:[%s7368_s25 + $0x24] sm:$0xff]   ;;  %v7263_v34 = vld [vmem:[%s7368_s25 + $0x30] sm:$0xff]   ;;  %v7264_v8 = vld [vmem:[%s7368_s25 + $0x3c] sm:$0xff]  }
  0xd8   : > { %6935 = vmatmul.mubr.bf16.gmra.mxu0 %v6006_v36  ;;  %v3197_v7 = vsel %vm7435_vm4, %v6034_v49, %v3196_v21  ;;  %v3198_v20 = vrot.slane %v3196_v21, 4  ;;  %v6065_v47 = vcombine.low %v3190_v51, %v3193_v1  ;;  %v3217_v32 = vrot.slane %v7882_v17, 5  ;;  %v7273_v15 = vld [vmem:[%s9138_s1 + $0x1e0] sm:$0xff]   ;;  %v8158_v14 = vld [vmem:[%s7368_s25 + $0x78] sm:$0xe] }
  0xd9   : > { %7002 = vmatprep.mubr.bf16.mxu0 %v7259_v50  ;;  %6955 = vmatmul.mubr.bf16.vlgmr.msra.gmra.mxu1 %v6064_v19  ;;  %v3205_v23 = vrot.slane %v3203_v41, 4  ;;  %v6036_v45 = vrot.slane %v6020_v54, 9  ;;  %v3212_v6 = vrot.slane %v3210_v24, 4  ;;  %v3204_v0 = vsel %vm7435_vm4, %v6035_v16, %v3203_v41  ;;  %v6025_v54 = vld [vmem:[%s7368_s25 + $0x84] sm:$0xe] }
  0xda   : > { %7035 = vmatpush3.bf16.msra.mxu1 %v7989_v31  ;;  %v3200_v53 = vsel %vm7435_vm4, %v3198_v20, %v3199_v60  ;;  %6958 = vmatprep.mubr.bf16.mxu1 %v6065_v47  ;;  %v7266_v31 = vld [vmem:[%s9138_s1 + $0x230] sm:$0xff]   ;;  %v3213_v17 = vrot.slane %v7868_v62, 5  ;;  %v3224_v50 = vrot.slane %v7906_v48, 5  ;;  %v6037_v46 = vrot.slane %v6021_v11, 9  ;;  %v7270_v62 = vld [vmem:[%s9138_s1 + $0x228] sm:$0xff]   ;;  %v7278_v11 = vld [vmem:[%s9138_s1 + $0x218] sm:$0xff]  }
  0xdb   : > { %v6066_v55 = vcombine.low %v3197_v7, %v3200_v53  ;;  %7036 = vmatprep.subr.bf16.mxu1 %v7265_v43  ;;  %v3207_v52 = vsel %vm7435_vm4, %v3205_v23, %v3206_v27  ;;  %v3219_v61 = vrot.slane %v3217_v32, 4  ;;  %v3220_v5 = vrot.slane %v7887_v26, 5  ;;  %v7267_v60 = vld [vmem:[%s7368_s25 + $0x48] sm:$0xff]  }
  0xdc   : > { %v6038_v12 = vrot.slane %v6022_v59, 9  ;;  %v6067_v49 = vcombine.low %v3204_v0, %v3207_v52  ;;  %v3226_v48 = vrot.slane %v3224_v50, 4  ;;  %v3227_v9 = vrot.slane %v7920_v2, 5  ;;  %v7268_v59 = vld [vmem:[%s7368_s25 + $0x54] sm:$0xff]  }
  0xdd   : > { %v6039_v26 = vrot.slane %v6023_v29, 9  ;;  %v3231_v19 = vrot.slane %v7927_v10, 5  ;;  %v3234_v51 = vrot.slane %v7945_v33, 5  ;;  %v3238_v36 = vrot.slane %v7949_v44, 5  ;;  %v7277_v33 = vld [vmem:[%s9138_s1 + $0x1d8] sm:$0xff]  }
  0xde   : > { %7037 = vmatpush3.bf16.msra.mxu1 %v7265_v43  ;;  %v3211_v2 = vsel %vm7435_vm4, %v6036_v45, %v3210_v24  ;;  %v3214_v21 = vsel %vm7435_vm4, %v3212_v6, %v3213_v17  ;;  %v6040_v44 = vrot.slane %v8158_v14, 9  ;;  %v3245_v43 = vrot.slane %v7977_v22, 5  ;;  %v6027_v17 = vld [vmem:[%s7368_s25 + $0x9c] sm:$0xe]  ;;  %v6028_v29 = vld [vmem:[%s7368_s25 + $0xa8] sm:$0xe] }
  0xdf   : > { %7038 = vmatprep.subr.bf16.mxu1 %v7269_v35  ;;  %v3233_v10 = vrot.slane %v3231_v19, 4  ;;  %v3218_v16 = vsel %vm7435_vm4, %v6037_v46, %v3217_v32  ;;  %v3221_v41 = vsel %vm7435_vm4, %v3219_v61, %v3220_v5  ;;  %v6068_v24 = vcombine.low %v3211_v2, %v3214_v21  ;;  %v7281_v32 = vld [vmem:[%s9138_s1 + $0x1d0] sm:$0xff]   ;;  %v8228_v5 = vld [vmem:[%s9138_s1 + $0x1c8] sm:$0xff]  }
  0xe0   : > { %7003 = vmatmul.mubr.bf16.vlgmr.msra.gmra.mxu0 %v7260_v28  ;;  %v3240_v1 = vrot.slane %v3238_v36, 4  ;;  %v6041_v7 = vrot.slane %v6025_v54, 9  ;;  %v3247_v47 = vrot.slane %v3245_v43, 4  ;;  %v3248_v23 = vrot.slane %v7984_v30, 5  ;;  %v6026_v28 = vld [vmem:[%s7368_s25 + $0x90] sm:$0xe] }
  0xe1   : > { %7083 = vmatpush3.bf16.msra.mxu0 %v8005_v57  ;;  %7006 = vmatprep.mubr.bf16.mxu0 %v7263_v34  ;;  %v3241_v57 = vrot.slane %v7961_v25, 5  ;;  %v7274_v25 = vld [vmem:[%s9138_s1 + $0x220] sm:$0xff]   ;;  %v3252_v53 = vrot.slane %v7999_v56, 5  ;;  %v6069_v34 = vcombine.low %v3218_v16, %v3221_v41  ;;  %v3259_v45 = vrot.slane %v8017_v3, 5  ;;  %v8253_v14 = vld [vmem:[%s9138_s1 + $0x210] sm:$0xff]  }
  0xe2   : > { %6959 = vmatmul.mubr.bf16.gmra.mxu1 %v6066_v55  ;;  %7084 = vmatprep.subr.bf16.mxu0 %v7266_v31  ;;  %v6042_v55 = vrot.slane %v6026_v28, 9  ;;  %v8197_v30 = vsel %vm7435_vm4, %v6038_v12, %v3224_v50  ;;  %v8201_v56 = vsel %vm7435_vm4, %v3226_v48, %v3227_v9  ;;  %v8213_v0 = vsel %vm7435_vm4, %v6039_v26, %v3231_v19  ;;  %v7271_v12 = vld [vmem:[%s7368_s25 + $0x60] sm:$0xff]  }
  0xe3   : > { %6962 = vmatprep.mubr.bf16.mxu1 %v6067_v49  ;;  %7039 = vmatpush3.bf16.msra.mxu1 %v7269_v35  ;;  %v3255_v35 = vrot.slane %v8010_v4, 5  ;;  %v3254_v3 = vrot.slane %v3252_v53, 4  ;;  %v8217_v52 = vsel %vm7435_vm4, %v3233_v10, %v3234_v51  ;;  %v3261_v61 = vrot.slane %v3259_v45, 4 }
  0xe4   : > { %7040 = vmatprep.subr.bf16.mxu1 %v7273_v15  ;;  %v8235_v49 = vsel %vm7435_vm4, %v6040_v44, %v3238_v36  ;;  %v3269_v48 = vrot.slane %v8044_v18, 5  ;;  %v6071_v9 = vcombine.low %v8213_v0, %v8217_v52  ;;  %v8244_v26 = vsel %vm7435_vm4, %v3240_v1, %v3241_v57 }
  0xe5   : > { %7085 = vmatpush3.bf16.msra.mxu0 %v7266_v31  ;;  %v3262_v31 = vrot.slane %v8027_v39, 5  ;;  %v6043_v39 = vrot.slane %v6027_v17, 9  ;;  %v3273_v18 = vrot.slane %v8053_v40, 5  ;;  %v8260_v36 = vsel %vm7435_vm4, %v6041_v7, %v3245_v43  ;;  %v6159_v17 = vld [vmem:[%s7368_s25 + $0x18] sm:$0xf] }
  0xe6   : > { %7086 = vmatprep.subr.bf16.mxu0 %v7270_v62  ;;  %v3276_v21 = vrot.slane %v8057_v42, 5  ;;  %v8273_v40 = vsel %vm7435_vm4, %v6042_v55, %v3252_v53  ;;  %v8277_v22 = vsel %vm7435_vm4, %v3254_v3, %v3255_v35  ;;  %v3280_v44 = vrot.slane %v8065_v13, 5  ;;  %v7286_v53 = vld [vmem:[%s9138_s1 + $0x208] sm:$0xff]   ;;  %v7275_v3 = vld [vmem:[%s7368_s25 + $0x78] sm:$0xff]  }
  0xe7   : > { %7041 = vmatpush3.bf16.msra.mxu1 %v7273_v15  ;;  %v6070_v15 = vcombine.low %v8197_v30, %v8201_v56  ;;  %v8283_v42 = vsel %vm7435_vm4, %v6043_v39, %v3259_v45  ;;  %v8287_v43 = vsel %vm7435_vm4, %v3261_v61, %v3262_v31  ;;  %v3283_v41 = vrot.slane %v8071_v38, 5  ;;  %v6030_v38 = vld [vmem:[%s7368_s25 + $0xc0] sm:$0xe]  ;;  %v6161_v39 = vld [vmem:[%s7368_s25 + $0x20] sm:$0x1] }
  0xe8   : > { %7007 = vmatmul.mubr.bf16.gmra.mxu0 %v7264_v8  ;;  %7042 = vmatprep.subr.bf16.mxu1 %v7277_v33  ;;  %v8264_v8 = vsel %vm7435_vm4, %v3247_v47, %v3248_v23  ;;  %v3282_v7 = vrot.slane %v3280_v44, 4  ;;  %v7289_v47 = vld [vmem:[%s9138_s1 + $0x1c0] sm:$0xff]   ;;  %v6072_v23 = vcombine.low %v8235_v49, %v8244_v26 }
  0xe9   : > { %7010 = vmatprep.mubr.bf16.mxu0 %v7267_v60  ;;  %7087 = vmatpush3.bf16.msra.mxu0 %v7270_v62  ;;  %v3266_v62 = vrot.slane %v8035_v63, 5  ;;  %v6044_v63 = vrot.slane %v6028_v29, 9  ;;  %v3275_v60 = vrot.slane %v3273_v18, 4  ;;  %v6073_v28 = vcombine.low %v8260_v36, %v8264_v8 }
  0xea   : > { %6963 = vmatmul.mubr.bf16.gmra.mxu1 %v6068_v24  ;;  %7088 = vmatprep.subr.bf16.mxu0 %v7274_v25  ;;  %v4043_v29 = vshrl.u32 %v6159_v17, 16 }
  0xeb   : > { %6966 = vmatprep.mubr.bf16.mxu1 %v6069_v34  ;;  %7043 = vmatpush3.bf16.msra.mxu1 %v7277_v33  ;;  %v3268_v2 = vrot.slane %v3266_v62, 4  ;;  %v6029_v33 = vld [vmem:[%s7368_s25 + $0xb4] sm:$0xe]  ;;  %v8296_v13 = vsel %vm7435_vm4, %v6044_v63, %v3266_v62  ;;  %v8305_v1 = vsel %vm7435_vm4, %v3275_v60, %v3276_v21  ;;  %v7272_v34 = vld [vmem:[%s7368_s25 + $0x6c] sm:$0xff]   ;;  %v4046_v62 = vshll.u32 %v6159_v17, 16 }
  0xec   : > { %7044 = vmatprep.subr.bf16.mxu1 %v7281_v32  ;;  %v6045_v16 = vrot.slane %v6029_v33, 9  ;;  %v6162_v33 = vld [vmem:[%s7368_s25 + $0x24] sm:$0xf] }
  0xed   : > { %v8181_v20 = vpop.f32.mrf.mxu0  ;;  %v8183_v27 = vpop.f32.mrf.mxu1  ;;  %7089 = vmatpush3.bf16.msra.mxu0 %v7274_v25  ;;  %v8300_v24 = vsel %vm7435_vm4, %v3268_v2, %v3269_v48 }
  0xee   : > { %7090 = vmatprep.subr.bf16.mxu0 %v7278_v11  ;;  %v8320_v35 = vsel %vm7435_vm4, %v6045_v16, %v3273_v18  ;;  %v4062_v18 = vshll.u32 %v6161_v39, 16  ;;  %v4045_v16 = vrot.slane %v4043_v29, 4 }
  0xef   : > { %v8203_v4 = vpop.f32.mrf.mxu0  ;;  %v8205_v6 = vpop.f32.mrf.mxu1  ;;  %7045 = vmatpush3.bf16.msra.mxu1 %v7281_v32  ;;  %v6046_v32 = vrot.slane %v6030_v38, 9 }
  0xf0   : > { %7011 = vmatmul.mubr.bf16.gmra.mxu0 %v7268_v59  ;;  %7046 = vmatprep.subr.bf16.mxu1 %v8228_v5  ;;  %v6160_v59 = vld [vmem:[%s7368_s25 + $0x1c] sm:$0xf] }
  0xf1   : > { %v8221_v50 = vpop.f32.mrf.mxu0  ;;  %v8223_v46 = vpop.f32.mrf.mxu1  ;;  %7014 = vmatprep.mubr.bf16.mxu0 %v7271_v12  ;;  %7091 = vmatpush3.bf16.msra.mxu0 %v7278_v11  ;;  %v8334_v11 = vsel %vm7435_vm4, %v3282_v7, %v3283_v41  ;;  %v8344_v52 = vsel %vm7435_vm4, %v6046_v32, %v3280_v44  ;;  %v4052_v48 = vshll.u32 %v6160_v59, 16  ;;  %v4056_v63 = vshrl.u32 %v6160_v59, 16  ;;  %v6163_v32 = vld [vmem:[%s7368_s25 + $0x28] sm:$0xf] }
  0xf2   : > { %6967 = vmatmul.mubr.bf16.gmra.mxu1 %v6070_v15  ;;  %7092 = vmatprep.subr.bf16.mxu0 %v8253_v14  ;;  %v4814_v21 = vrot.slane %v6160_v59, 5  ;;  %v4048_v41 = vrot.slane %v4046_v62, 5  ;;  %v4817_v7 = vrot.slane %v6161_v39, 5  ;;  %v4064_v15 = vrot.slane %v4062_v18, 5 }
  0xf3   : > { %v8246_v19 = vpop.f32.mrf.mxu0  ;;  %v8248_v51 = vpop.f32.mrf.mxu1  ;;  %6970 = vmatprep.mubr.bf16.mxu1 %v6071_v9  ;;  %7047 = vmatpush3.bf16.msra.mxu1 %v8228_v5  ;;  %v7290_v5 = vld [vmem:[%s9138_s1 + $0x200] sm:$0xff]   ;;  %v6247_v9 = vld [vmem:[%s7368_s25 + $0x18] sm:$0xe]  ;;  %v4054_v38 = vrot.slane %v4052_v48, 5  ;;  %v4058_v17 = vrot.slane %v4056_v63, 4  ;;  %v4067_v62 = vshrl.u32 %v6162_v33, 16 }
  0xf4   : > { %7048 = vmatprep.subr.bf16.mxu1 %v7289_v47  ;;  %v6263_v2 = vrot.slane %v6247_v9, 9  ;;  %v4816_v59 = vrot.slane %v4814_v21, 4  ;;  %v6164_v9 = vld [vmem:[%s7368_s25 + $0x2c] sm:$0x1]  ;;  %v4049_v29 = vor.u32 %v4048_v41, %v4045_v16  ;;  %v4070_v48 = vshll.u32 %v6162_v33, 16 }
  0xf5   : > { %v8267_v10 = vpop.f32.mrf.mxu0  ;;  %v8269_v57 = vpop.f32.mrf.mxu1  ;;  %7093 = vmatpush3.bf16.msra.mxu0 %v8253_v14  ;;  %v4076_v39 = vshll.u32 %v6163_v32, 16  ;;  %v4080_v18 = vshrl.u32 %v6163_v32, 16  ;;  %v4069_v16 = vrot.slane %v4067_v62, 4  ;;  %v4821_v55 = vrot.slane %v6163_v32, 5 }
  0xf6   : > { %7094 = vmatprep.subr.bf16.mxu0 %v7286_v53  ;;  %v8368_v14 = vsel %vm7435_vm4, %v6263_v2, %v4814_v21  ;;  %v8377_v63 = vsel %vm7435_vm4, %v4816_v59, %v4817_v7  ;;  %v4086_v2 = vshll.u32 %v6164_v9, 16  ;;  %v4072_v41 = vrot.slane %v4070_v48, 5  ;;  %v6165_v7 = vld [vmem:[%s7368_s25 + $0x30] sm:$0xf]  ;;  %v7276_v59 = vld [vmem:[%s7368_s25 + $0x84] sm:$0xff]  }
  0xf7   : > { %v8290_v25 = vpop.f32.mrf.mxu0  ;;  %v8292_v54 = vpop.f32.mrf.mxu1  ;;  %7049 = vmatpush3.bf16.msra.mxu1 %v7289_v47  ;;  %v4059_v47 = vor.u32 %v4058_v17, %v4054_v38  ;;  %v4078_v26 = vrot.slane %v4076_v39, 5  ;;  %v6167_v39 = vld [vmem:[%s7368_s25 + $0x38] sm:$0x1] }
  0xf8   : > { %7015 = vmatmul.mubr.bf16.gmra.mxu0 %v7272_v34  ;;  %v6248_v34 = vld [vmem:[%s7368_s25 + $0x24] sm:$0xe]  ;;  %v4088_v17 = vrot.slane %v4086_v2, 5 }
  0xf9   : > { %v8326_v45 = vpop.f32.mrf.mxu0  ;;  %v8328_v30 = vpop.f32.mrf.mxu1  ;;  %7018 = vmatprep.mubr.bf16.mxu0 %v7275_v3  ;;  %7095 = vmatpush3.bf16.msra.mxu0 %v7286_v53  ;;  %v4050_v3 = vrot.slane %v4049_v29, 4  ;;  %v4060_v49 = vrot.slane %v4059_v47, 4  ;;  %v4073_v53 = vor.u32 %v4072_v41, %v4069_v16  ;;  %v6264_v48 = vrot.slane %v6248_v34, 9  ;;  %v6249_v16 = vld [vmem:[%s7368_s25 + $0x30] sm:$0xe] }
  0xfa   : > { %9145 = vst [vmem:[#allocation3_spill] sm:$0xff] %v8328_v30  ;;  %6971 = vmatmul.mubr.bf16.gmra.mxu1 %v6072_v23  ;;  %7096 = vmatprep.subr.bf16.mxu0 %v7290_v5  ;;  %v4082_v23 = vrot.slane %v4080_v18, 4  ;;  %v4091_v47 = vshrl.u32 %v6165_v7, 16 }
  0xfb   : > { %v8349_v61 = vpop.f32.mrf.mxu0  ;;  %v8351_v12 = vpop.f32.mrf.mxu1  ;;  %6974 = vmatprep.mubr.bf16.mxu1 %v6073_v28  ;;  %v4055_v62 = vsel %vm7454_vm5, %v4050_v3, %v4054_v38  ;;  %v4065_v36 = vsel %vm7454_vm5, %v4060_v49, %v4064_v15  ;;  %v4824_v28 = vrot.slane %v6164_v9, 5  ;;  %v4074_v38 = vrot.slane %v4073_v53, 4 }
  0xfc   : > { %9146 = vst [vmem:[#allocation4_spill] sm:$0xff] %v8351_v12  ;;  %v4083_v8 = vor.u32 %v4082_v23, %v4078_v26  ;;  %v8413_v32 = vsel %vm7435_vm4, %v6264_v48, %v4821_v55  ;;  %v4093_v3 = vrot.slane %v4091_v47, 4  ;;  %v4094_v15 = vshll.u32 %v6165_v7, 16  ;;  %v6168_v48 = vld [vmem:[%s7368_s25 + $0x3c] sm:$0xf] }
  0xfd   : > { %v8361_v60 = vpop.f32.mrf.mxu0  ;;  %v8363_v44 = vpop.f32.mrf.mxu1  ;;  %7097 = vmatpush3.bf16.msra.mxu0 %v7290_v5  ;;  %v4823_v5 = vrot.slane %v4821_v55, 4  ;;  %v4079_v23 = vsel %vm7454_vm5, %v4074_v38, %v4078_v26  ;;  %v4110_v55 = vshll.u32 %v6167_v39, 16  ;;  %v8432_v47 = vld [vmem:[%s7368_s25 + $0x40] sm:$0xf]  ;;  %v9153_v26 = vcombine.low %v8273_v40, %v8277_v22 }
  0xfe   : > { %9147 = vst [vmem:[#allocation5_spill] sm:$0xff] %v8363_v44  ;;  %v4084_v34 = vrot.slane %v4083_v8, 4  ;;  %v4115_v40 = vshrl.u32 %v6168_v48, 16  ;;  %v7280_v22 = vld [vmem:[%s7368_s25 + $0x9c] sm:$0xff]  }
  0xff   : > { %v8371_v0 = vpop.f32.mrf.mxu0  ;;  %v8373_v31 = vpop.f32.mrf.mxu1  ;;  %v8424_v53 = vsel %vm7435_vm4, %v4823_v5, %v4824_v28  ;;  %v4112_v5 = vrot.slane %v4110_v55, 5  ;;  %v4124_v55 = vshll.u32 %v8432_v47, 16 }
 0x100   : > { %9148 = vst [vmem:[#allocation6_spill] sm:$0xff] %v8373_v31  ;;  %v7279_v31 = vld [vmem:[%s7368_s25 + $0x90] sm:$0xff]   ;;  %7019 = vmatmul.mubr.bf16.gmra.mxu0 %v7276_v59  ;;  %v4089_v7 = vsel %vm7454_vm5, %v4084_v34, %v4088_v17  ;;  %v6265_v34 = vrot.slane %v6249_v16, 9  ;;  %v4128_v16 = vshrl.u32 %v8432_v47, 16 }
 0x101   : > { %v8383_v21 = vpop.f32.mrf.mxu0  ;;  %v8385_v33 = vpop.f32.mrf.mxu1  ;;  %7022 = vmatprep.mubr.bf16.mxu0 %v7279_v31  ;;  %v8441_v31 = vcombine.low %v4079_v23, %v4089_v7  ;;  %v8452_v23 = vld [vmem:[%s7368_s25 + $0x44] sm:$0x1] }
 0x102   : > { %9149 = vst [vmem:[#allocation7_spill] sm:$0xff] %v8385_v33  ;;  %v6166_v33 = vld [vmem:[%s7368_s25 + $0x34] sm:$0xf]  ;;  %6975 = vmatmul.mubr.bf16.gmra.mxu1 %v9153_v26 }
 0x103   : > { %v8394_v56 = vpop.f32.mrf.mxu0  ;;  %v8396_v29 = vpop.f32.mrf.mxu1  ;;  %v4100_v9 = vshll.u32 %v6166_v33, 16  ;;  %v4828_v59 = vrot.slane %v6166_v33, 5 }
 0x104   : > { %9150 = vst [vmem:[#allocation8_spill] sm:$0xff] %v8396_v29  ;;  %v8409_v29 = vcombine.low %v4055_v62, %v4065_v36  ;;  %v4104_v62 = vshrl.u32 %v6166_v33, 16  ;;  %v4096_v36 = vrot.slane %v4094_v15, 5  ;;  %v9155_v15 = vcombine.low %v8283_v42, %v8287_v43  ;;  %v7283_v42 = vld [vmem:[%s7368_s25 + $0xa8] sm:$0xff]  }
 0x105   : > { %v8405_v18 = vpop.f32.mrf.mxu0  ;;  %v8407_v2 = vpop.f32.mrf.mxu1  ;;  %v4102_v8 = vrot.slane %v4100_v9, 5  ;;  %v8459_v33 = vsel %vm7435_vm4, %v6265_v34, %v4828_v59  ;;  %v4134_v34 = vshll.u32 %v8452_v23, 16 }
 0x106   : > { %9151 = vst [vmem:[#allocation9_spill] sm:$0xff] %v8407_v2  ;;  %v4106_v17 = vrot.slane %v4104_v62, 4  ;;  %6978 = vmatprep.mubr.bf16.mxu1 %v9155_v15  ;;  %v4097_v9 = vor.u32 %v4096_v36, %v4093_v3  ;;  %v4118_v62 = vshll.u32 %v6168_v48, 16  ;;  %v4117_v3 = vrot.slane %v4115_v40, 4 }
 0x107   : > { %v8416_v41 = vpop.f32.mrf.mxu0  ;;  %v8418_v49 = vpop.f32.mrf.mxu1  ;;  %v4130_v48 = vrot.slane %v4128_v16, 4  ;;  %v6171_v16 = vld [vmem:[%s7368_s25 + $0x48] sm:$0xf] }
 0x108   : > { %9152 = vst [vmem:[#allocation10_spill] sm:$0xff] %v8418_v49  ;;  %v4831_v49 = vrot.slane %v6167_v39, 5  ;;  %v4098_v43 = vrot.slane %v4097_v9, 4  ;;  %v4830_v39 = vrot.slane %v4828_v59, 4  ;;  %v6250_v59 = vld [vmem:[%s7368_s25 + $0x3c] sm:$0xe]  ;;  %7023 = vmatmul.mubr.bf16.gmra.mxu0 %v7280_v22 }
 0x109   : > { %v8437_v28 = vpop.f32.mrf.mxu0  ;;  %v8439_v38 = vpop.f32.mrf.mxu1  ;;  %7026 = vmatprep.mubr.bf16.mxu0 %v7283_v42  ;;  %v4136_v22 = vrot.slane %v4134_v34, 5 }
 0x10a   : > { %9154 = vst [vmem:[#allocation11_spill] sm:$0xff] %v8439_v38  ;;  %v4107_v38 = vor.u32 %v4106_v17, %v4102_v8  ;;  %v4120_v17 = vrot.slane %v4118_v62, 5  ;;  %v4103_v12 = vsel %vm7454_vm5, %v4098_v43, %v4102_v8  ;;  %v8466_v9 = vsel %vm7435_vm4, %v4830_v39, %v4831_v49 }
 0x10b   : > { %v8447_v26 = vpop.f32.mrf.mxu0  ;;  %v8449_v2 = vpop.f32.mrf.mxu1  ;;  %v9157_v39 = vcombine.low %v8296_v13, %v8300_v24  ;;  %v4838_v13 = vrot.slane %v8452_v23, 5  ;;  %v6172_v24 = vld [vmem:[%s7368_s25 + $0x4c] sm:$0xf] }
 0x10c   : > { %9156 = vst [vmem:[#allocation12_spill] sm:$0xff] %v8449_v2  ;;  %v4108_v15 = vrot.slane %v4107_v38, 4  ;;  %v4126_v2 = vrot.slane %v4124_v55, 5 }
 0x10d   : > { %v6764_v7 = vpop.f32.mrf.mxu1  ;;  %v6812_v36 = vpop.f32.mrf.mxu0  ;;  %6979 = vmatmul.mubr.bf16.gmra.mxu1 %v9157_v39 }
 0x10e   : > { %v1437_v44 = vadd.f32 %v6764_v7, %v8181_v20  ;;  %v4113_v38 = vsel %vm7454_vm5, %v4108_v15, %v4112_v5  ;;  %v4121_v20 = vor.u32 %v4120_v17, %v4117_v3  ;;  %v4131_v55 = vor.u32 %v4130_v48, %v4126_v2  ;;  %v7284_v48 = vld [vmem:[%s7368_s25 + $0xb4] sm:$0xff]  }
 0x10f   : > { %v1308_v40 = vpop.f32.mrf.mxu1  ;;  %v1809_v30 = vpop.f32.mrf.mxu0  ;;  %v8478_v43 = vcombine.low %v4103_v12, %v4113_v38  ;;  %v6266_v17 = vrot.slane %v6250_v59, 9 }
 0x110   : > { %v8475_v8 = vadd.f32 %v6812_v36, %v1437_v44  ;;  %v1435_v49 = vadd.f32 %v1308_v40, %v8203_v4  ;;  %v4122_v15 = vrot.slane %v4121_v20, 4  ;;  %v4132_v3 = vrot.slane %v4131_v55, 4  ;;  %7027 = vmatmul.mubr.bf16.gmra.mxu0 %v7284_v48 }
 0x111   : > { %v6765_v5 = vpop.f32.mrf.mxu1  ;;  %v6813_v7 = vpop.f32.mrf.mxu0  ;;  %v4835_v44 = vrot.slane %v8432_v47, 5  ;;  %v9158_v4 = vcombine.low %v8320_v35, %v8305_v1  ;;  %v4139_v36 = vshrl.u32 %v6171_v16, 16 }
 0x112   : > { %v8487_v12 = vadd.f32 %v1809_v30, %v1435_v49  ;;  %v1438_v42 = vadd.f32 %v6765_v5, %v8221_v50  ;;  %v4127_v59 = vsel %vm7454_vm5, %v4122_v15, %v4126_v2  ;;  %v4137_v47 = vsel %vm7454_vm5, %v4132_v3, %v4136_v22  ;;  %v6173_v50 = vld [vmem:[%s7368_s25 + $0x50] sm:$0x1]  ;;  %v7287_v30 = vld [vmem:[%s7368_s25 + $0xc0] sm:$0xff]   ;;  %v6251_v49 = vld [vmem:[%s7368_s25 + $0x48] sm:$0xe] }
 0x113   : > { %6982 = vmatprep.mubr.bf16.mxu1 %v9158_v4  ;;  %v1311_v34 = vpop.f32.mrf.mxu1  ;;  %v1812_v40 = vpop.f32.mrf.mxu0  ;;  %v8499_v1 = vsel %vm7435_vm4, %v6266_v17, %v4835_v44  ;;  %v4837_v35 = vrot.slane %v4835_v44, 4  ;;  %v8506_v20 = vcombine.low %v4127_v59, %v4137_v47  ;;  %v4141_v55 = vrot.slane %v4139_v36, 4  ;;  %v6174_v4 = vld [vmem:[%s7368_s25 + $0x54] sm:$0xf]  ;;  %7030 = vmatprep.mubr.bf16.mxu0 %v7287_v30 }
 0x114   : > { %v8503_v23 = vadd.f32 %v6813_v7, %v1438_v42  ;;  %v1436_v38 = vadd.f32 %v1311_v34, %v8246_v19  ;;  %v4142_v5 = vshll.u32 %v6171_v16, 16  ;;  %v4148_v15 = vshll.u32 %v6172_v24, 16 }
 0x115   : > { %v6768_v2 = vpop.f32.mrf.mxu1  ;;  %v6816_v39 = vpop.f32.mrf.mxu0  ;;  %v8511_v22 = vsel %vm7435_vm4, %v4837_v35, %v4838_v13  ;;  %v4152_v3 = vshrl.u32 %v6172_v24, 16  ;;  %v4158_v44 = vshll.u32 %v6173_v50, 16  ;;  %v6267_v47 = vrot.slane %v6251_v49, 9 }
 0x116   : > { %v8513_v17 = vadd.f32 %v1812_v40, %v1436_v38  ;;  %v1441_v7 = vadd.f32 %v6768_v2, %v8267_v10  ;;  %v4144_v34 = vrot.slane %v4142_v5, 5  ;;  %v4150_v59 = vrot.slane %v4148_v15, 5  ;;  %v6175_v15 = vld [vmem:[%s7368_s25 + $0x58] sm:$0xf] }
 0x117   : > { %v1324_v42 = vpop.f32.mrf.mxu1  ;;  %v1825_v36 = vpop.f32.mrf.mxu0  ;;  %v4154_v13 = vrot.slane %v4152_v3, 4  ;;  %v4160_v10 = vrot.slane %v4158_v44, 5  ;;  %v4842_v35 = vrot.slane %v6172_v24, 5  ;;  %v9159_v38 = vcombine.low %v8344_v52, %v8334_v11  ;;  %v7288_v52 = vld [vmem:[%s7368_s25 + $0xcc] sm:$0xff]  }
 0x118   : > { %v8519_v16 = vadd.f32 %v6816_v39, %v1441_v7  ;;  %v1439_v40 = vadd.f32 %v1324_v42, %v8290_v25  ;;  %v4145_v19 = vor.u32 %v4144_v34, %v4141_v55  ;;  %v4845_v5 = vrot.slane %v6173_v50, 5  ;;  %7031 = vmatmul.mubr.bf16.gmra.mxu0 %v7288_v52 }
 0x119   : > { %6983 = vmatmul.mubr.bf16.gmra.mxu1 %v9159_v38  ;;  %v6769_v48 = vpop.f32.mrf.mxu1  ;;  %v6817_v2 = vpop.f32.mrf.mxu0  ;;  %v4155_v62 = vor.u32 %v4154_v13, %v4150_v59  ;;  %v4163_v3 = vshrl.u32 %v6174_v4, 16  ;;  %v8532_v24 = vsel %vm7435_vm4, %v6267_v47, %v4842_v35  ;;  %v4844_v11 = vrot.slane %v4842_v35, 4  ;;  %v6252_v13 = vld [vmem:[%s7368_s25 + $0x54] sm:$0xe] }
 0x11a   : > { %7050 = vmatprep.mubr.bf16.mxu1 %v8409_v29  ;;  %v8527_v30 = vadd.f32 %v1825_v36, %v1439_v40  ;;  %v1442_v25 = vadd.f32 %v6769_v48, %v8326_v45  ;;  %v4146_v39 = vrot.slane %v4145_v19, 4  ;;  %v4166_v44 = vshll.u32 %v6174_v4, 16  ;;  %v6176_v36 = vld [vmem:[%s7368_s25 + $0x5c] sm:$0x1] }
 0x11b   : > { %v1327_v49 = vpop.f32.mrf.mxu1  ;;  %v1828_v55 = vpop.f32.mrf.mxu0  ;;  %v4156_v50 = vrot.slane %v4155_v62, 4  ;;  %v4165_v7 = vrot.slane %v4163_v3, 4  ;;  %v8540_v45 = vsel %vm7435_vm4, %v4844_v11, %v4845_v5  ;;  %v4172_v34 = vshll.u32 %v6175_v15, 16  ;;  %v6177_v5 = vld [vmem:[%s7368_s25 + $0x60] sm:$0xf] }
 0x11c   : > { %v8535_v42 = vadd.f32 %v6817_v2, %v1442_v25  ;;  %v1440_v29 = vadd.f32 %v1327_v49, %v8349_v61  ;;  %v4151_v47 = vsel %vm7454_vm5, %v4146_v39, %v4150_v59  ;;  %v6299_v19 = vcombine.low %v8532_v24, %v8540_v45 }
 0x11d   : > { %v4161_v62 = vsel %vm7454_vm5, %v4156_v50, %v4160_v10  ;;  %v6772_v4 = vpop.f32.mrf.mxu1  ;;  %v6820_v40 = vpop.f32.mrf.mxu0  ;;  %v4168_v35 = vrot.slane %v4166_v44, 5  ;;  %v4174_v2 = vrot.slane %v4172_v34, 5  ;;  %v4176_v59 = vshrl.u32 %v6175_v15, 16 }
 0x11e   : > { %v8550_v61 = vadd.f32 %v1828_v55, %v1440_v29  ;;  %v8552_v38 = vcombine.low %v4151_v47, %v4161_v62  ;;  %v1445_v48 = vadd.f32 %v6772_v4, %v8361_v60  ;;  %v4182_v25 = vshll.u32 %v6176_v36, 16  ;;  %v6178_v47 = vld [vmem:[%s7368_s25 + $0x64] sm:$0xf] }
 0x11f   : > { %v4169_v3 = vor.u32 %v4168_v35, %v4165_v7  ;;  %v6268_v10 = vrot.slane %v6252_v13, 9  ;;  %v1340_v11 = vpop.f32.mrf.mxu1  ;;  %v1841_v49 = vpop.f32.mrf.mxu0  ;;  %v9160_v39 = vcombine.low %v8368_v14, %v8377_v63  ;;  %v4849_v50 = vrot.slane %v6175_v15, 5 }
 0x120   : > { %v8559_v55 = vadd.f32 %v6820_v40, %v1445_v48  ;;  %v4852_v44 = vrot.slane %v6176_v36, 5  ;;  %v1443_v60 = vadd.f32 %v1340_v11, %v8371_v0  ;;  %v4178_v7 = vrot.slane %v4176_v59, 4  ;;  %v6179_v40 = vld [vmem:[%s7368_s25 + $0x68] sm:$0x1] }
 0x121   : > { %7098 = vmatprep.mubr.bf16.mxu0 %v9160_v39  ;;  %7051 = vmatmul.mubr.bf16.vlgmr.msra.gmra.mxu1 %v8441_v31  ;;  %v4170_v52 = vrot.slane %v4169_v3, 4  ;;  %v4184_v29 = vrot.slane %v4182_v25, 5  ;;  %v6773_v34 = vpop.f32.mrf.mxu1  ;;  %v6821_v13 = vpop.f32.mrf.mxu0  ;;  %v4187_v62 = vshrl.u32 %v6177_v5, 16  ;;  %v8567_v14 = vsel %vm7435_vm4, %v6268_v10, %v4849_v50  ;;  %v6253_v3 = vld [vmem:[%s7368_s25 + $0x60] sm:$0xe] }
 0x122   : > { %7054 = vmatprep.mubr.bf16.mxu1 %v8478_v43  ;;  %v4851_v63 = vrot.slane %v4849_v50, 4  ;;  %v8569_v15 = vadd.f32 %v1841_v49, %v1443_v60  ;;  %v1446_v0 = vadd.f32 %v6773_v34, %v8383_v21  ;;  %v4179_v36 = vor.u32 %v4178_v7, %v4174_v2  ;;  %v6180_v50 = vld [vmem:[%s7368_s25 + $0x6c] sm:$0xf] }
 0x123   : > { %v4175_v31 = vsel %vm7454_vm5, %v4170_v52, %v4174_v2  ;;  %v1343_v4 = vpop.f32.mrf.mxu1  ;;  %v4189_v35 = vrot.slane %v4187_v62, 4  ;;  %v4190_v48 = vshll.u32 %v6177_v5, 16  ;;  %v1844_v10 = vpop.f32.mrf.mxu0  ;;  %v4196_v21 = vshll.u32 %v6178_v47, 16 }
 0x124   : > { %v8578_v43 = vsel %vm7435_vm4, %v4851_v63, %v4852_v44  ;;  %v8580_v59 = vadd.f32 %v6821_v13, %v1446_v0  ;;  %v1444_v25 = vadd.f32 %v1343_v4, %v8394_v56  ;;  %v4180_v11 = vrot.slane %v4179_v36, 4  ;;  %v6181_v63 = vld [vmem:[%s7368_s25 + $0x70] sm:$0xf] }
 0x125   : > { %v6300_v2 = vcombine.low %v8567_v14, %v8578_v43  ;;  %v4192_v49 = vrot.slane %v4190_v48, 5  ;;  %v4200_v39 = vshrl.u32 %v6178_v47, 16  ;;  %v4198_v60 = vrot.slane %v4196_v21, 5  ;;  %v6254_v21 = vld [vmem:[%s7368_s25 + $0x6c] sm:$0xe] }
 0x126   : > { %v8586_v5 = vadd.f32 %v1844_v10, %v1444_v25  ;;  %v4206_v52 = vshll.u32 %v6179_v40, 16  ;;  %v6269_v44 = vrot.slane %v6253_v3, 9  ;;  %v9161_v7 = vcombine.low %v8413_v32, %v8424_v53  ;;  %v6776_v3 = vpop.f32.mrf.mxu1  ;;  %v6824_v25 = vpop.f32.mrf.mxu0  ;;  %v6182_v10 = vld [vmem:[%s7368_s25 + $0x74] sm:$0x1] }
 0x127   : > { %v4185_v56 = vsel %vm7454_vm5, %v4180_v11, %v4184_v29  ;;  %v4193_v34 = vor.u32 %v4192_v49, %v4189_v35  ;;  %v4202_v13 = vrot.slane %v4200_v39, 4  ;;  %v4856_v62 = vrot.slane %v6178_v47, 5 }
 0x128   : > { %7099 = vmatmul.mubr.bf16.vlgmr.msra.gmra.mxu0 %v9161_v7  ;;  %v9162_v0 = vcombine.low %v8459_v33, %v8466_v9  ;;  %v6228_v36 = vcombine.low %v4175_v31, %v4185_v56  ;;  %v4208_v4 = vrot.slane %v4206_v52, 5  ;;  %v4859_v48 = vrot.slane %v6179_v40, 5  ;;  %v1356_v11 = vpop.f32.mrf.mxu1  ;;  %v1857_v49 = vpop.f32.mrf.mxu0 }
 0x129   : > { %v4211_v32 = vshrl.u32 %v6180_v50, 16  ;;  %7055 = vmatmul.mubr.bf16.gmra.mxu1 %v8506_v20  ;;  %v4194_v53 = vrot.slane %v4193_v34, 4  ;;  %v4203_v29 = vor.u32 %v4202_v13, %v4198_v60  ;;  %v8600_v35 = vsel %vm7435_vm4, %v6269_v44, %v4856_v62 }
 0x12a   : > { %7102 = vmatprep.mubr.bf16.mxu0 %v9162_v0  ;;  %v4858_v47 = vrot.slane %v4856_v62, 4  ;;  %7058 = vmatprep.mubr.bf16.mxu1 %v8552_v38  ;;  %v1449_v33 = vadd.f32 %v6776_v3, %v8405_v18  ;;  %v4214_v31 = vshll.u32 %v6180_v50, 16  ;;  %v4220_v40 = vshll.u32 %v6181_v63, 16  ;;  %v6777_v56 = vpop.f32.mrf.mxu1  ;;  %v6825_v34 = vpop.f32.mrf.mxu0 }
 0x12b   : > { %v4213_v9 = vrot.slane %v4211_v32, 4  ;;  %v4199_v20 = vsel %vm7454_vm5, %v4194_v53, %v4198_v60  ;;  %v4204_v39 = vrot.slane %v4203_v29, 4  ;;  %v4224_v44 = vshrl.u32 %v6181_v63, 16 }
 0x12c   : > { %v8610_v52 = vsel %vm7435_vm4, %v4858_v47, %v4859_v48  ;;  %v8614_v18 = vadd.f32 %v6824_v25, %v1449_v33  ;;  %v4216_v50 = vrot.slane %v4214_v31, 5  ;;  %v4222_v7 = vrot.slane %v4220_v40, 5  ;;  %v1359_v29 = vpop.f32.mrf.mxu1  ;;  %v6183_v47 = vld [vmem:[%s7368_s25 + $0x78] sm:$0xf] }
 0x12d   : > { %v6301_v38 = vcombine.low %v8600_v35, %v8610_v52  ;;  %v4209_v13 = vsel %vm7454_vm5, %v4204_v39, %v4208_v4  ;;  %v4226_v60 = vrot.slane %v4224_v44, 4  ;;  %v4230_v62 = vshll.u32 %v6182_v10, 16 }
 0x12e   : > { %v6270_v0 = vrot.slane %v6254_v21, 9  ;;  %v6229_v3 = vcombine.low %v4199_v20, %v4209_v13  ;;  %v4217_v48 = vor.u32 %v4216_v50, %v4213_v9  ;;  %v4863_v32 = vrot.slane %v6181_v63, 5  ;;  %v6184_v21 = vld [vmem:[%s7368_s25 + $0x7c] sm:$0xf] }
 0x12f   : > { %v4866_v53 = vrot.slane %v6182_v10, 5  ;;  %v9163_v25 = vcombine.low %v8499_v1, %v8511_v22  ;;  %v4227_v33 = vor.u32 %v4226_v60, %v4222_v7  ;;  %v4232_v31 = vrot.slane %v4230_v62, 5  ;;  %v1860_v22 = vpop.f32.mrf.mxu0  ;;  %v6780_v62 = vpop.f32.mrf.mxu1 }
 0x130   : > { %v1447_v40 = vadd.f32 %v1356_v11, %v8416_v41  ;;  %v1450_v4 = vadd.f32 %v6777_v56, %v8437_v28  ;;  %v4218_v9 = vrot.slane %v4217_v48, 4  ;;  %v8629_v63 = vsel %vm7435_vm4, %v6270_v0, %v4863_v32  ;;  %v6185_v11 = vld [vmem:[%s7368_s25 + $0x80] sm:$0x1] }
 0x131   : > { %7103 = vmatmul.mubr.bf16.gmra.mxu0 %v9163_v25  ;;  %v4865_v10 = vrot.slane %v4863_v32, 4  ;;  %v1448_v1 = vadd.f32 %v1359_v29, %v8447_v26  ;;  %7059 = vmatmul.mubr.bf16.gmra.mxu1 %v6228_v36  ;;  %v4228_v20 = vrot.slane %v4227_v33, 4  ;;  %v4235_v24 = vshrl.u32 %v6183_v47, 16  ;;  %v6255_v36 = vld [vmem:[%s7368_s25 + $0x78] sm:$0xe]  ;;  %v6828_v0 = vpop.f32.mrf.mxu0 }
 0x132   : > { %7106 = vmatprep.mubr.bf16.mxu0 %v6299_v19  ;;  %v8633_v41 = vadd.f32 %v1857_v49, %v1447_v40  ;;  %v8635_v28 = vadd.f32 %v6825_v34, %v1450_v4  ;;  %7062 = vmatprep.mubr.bf16.mxu1 %v6229_v3  ;;  %v4223_v45 = vsel %vm7454_vm5, %v4218_v9, %v4222_v7  ;;  %v4238_v39 = vshll.u32 %v6183_v47, 16  ;;  %v6186_v3 = vld [vmem:[%s7368_s25 + $0x84] sm:$0xf]  ;;  %v6187_v47 = vld [vmem:[%s7368_s25 + $0x88] sm:$0xf]  ;;  %v1372_v4 = vpop.f32.mrf.mxu1 }
 0x133   : > { %v8642_v19 = vsel %vm7435_vm4, %v4865_v10, %v4866_v53  ;;  %v8644_v26 = vadd.f32 %v1860_v22, %v1448_v1  ;;  %v4233_v49 = vsel %vm7454_vm5, %v4228_v20, %v4232_v31  ;;  %v4237_v50 = vrot.slane %v4235_v24, 4  ;;  %v1873_v9 = vpop.f32.mrf.mxu0 }
 0x134   : > { %v6302_v44 = vcombine.low %v8629_v63, %v8642_v19  ;;  %v4244_v56 = vshll.u32 %v6184_v21, 16  ;;  %v6230_v34 = vcombine.low %v4223_v45, %v4233_v49  ;;  %v4240_v13 = vrot.slane %v4238_v39, 5  ;;  %v6256_v39 = vld [vmem:[%s7368_s25 + $0x84] sm:$0xe]  ;;  %v6257_v63 = vld [vmem:[%s7368_s25 + $0x90] sm:$0xe] }
 0x135   : > { %v4248_v7 = vshrl.u32 %v6184_v21, 16  ;;  %v4254_v60 = vshll.u32 %v6185_v11, 16  ;;  %v6271_v32 = vrot.slane %v6255_v36, 9  ;;  %v4870_v53 = vrot.slane %v6184_v21, 5  ;;  %v6781_v36 = vpop.f32.mrf.mxu1  ;;  %v6829_v14 = vpop.f32.mrf.mxu0 }
 0x136   : > { %v4246_v48 = vrot.slane %v4244_v56, 5  ;;  %v4873_v29 = vrot.slane %v6185_v11, 5  ;;  %v4241_v25 = vor.u32 %v4240_v13, %v4237_v50  ;;  %v1453_v40 = vadd.f32 %v6780_v62, %v8183_v27  ;;  %v6188_v27 = vld [vmem:[%s7368_s25 + $0x8c] sm:$0x1] }
 0x137   : > { %v4250_v33 = vrot.slane %v4248_v7, 4  ;;  %v4256_v31 = vrot.slane %v4254_v60, 5  ;;  %v4871_v10 = vsel %vm7435_vm4, %v6271_v32, %v4870_v53  ;;  %v4872_v1 = vrot.slane %v4870_v53, 4  ;;  %v1375_v53 = vpop.f32.mrf.mxu1 }
 0x138   : > { %v4259_v22 = vshrl.u32 %v6186_v3, 16  ;;  %v4262_v21 = vshll.u32 %v6186_v3, 16  ;;  %v4242_v20 = vrot.slane %v4241_v25, 4  ;;  %v8662_v24 = vadd.f32 %v6828_v0, %v1453_v40  ;;  %v6189_v25 = vld [vmem:[%s7368_s25 + $0x90] sm:$0xf] }
 0x139   : > { %7107 = vmatmul.mubr.bf16.gmra.mxu0 %v6300_v2  ;;  %v4251_v11 = vor.u32 %v4250_v33, %v4246_v48  ;;  %v4268_v45 = vshll.u32 %v6187_v47, 16  ;;  %7063 = vmatmul.mubr.bf16.gmra.mxu1 %v6230_v34  ;;  %v4874_v43 = vsel %vm7435_vm4, %v4872_v1, %v4873_v29  ;;  %v4272_v50 = vshrl.u32 %v6187_v47, 16  ;;  %v1876_v29 = vpop.f32.mrf.mxu0  ;;  %v6190_v1 = vld [vmem:[%s7368_s25 + $0x94] sm:$0xf]  ;;  %v6784_v19 = vpop.f32.mrf.mxu1 }
 0x13a   : > { %7110 = vmatprep.mubr.bf16.mxu0 %v6301_v38  ;;  %v4261_v2 = vrot.slane %v4259_v22, 4  ;;  %v4264_v49 = vrot.slane %v4262_v21, 5  ;;  %v4247_v35 = vsel %vm7454_vm5, %v4242_v20, %v4246_v48  ;;  %v6303_v38 = vcombine.low %v4871_v10, %v4874_v43 }
 0x13b   : > { %v4252_v52 = vrot.slane %v4251_v11, 4  ;;  %v4270_v56 = vrot.slane %v4268_v45, 5  ;;  %v4274_v7 = vrot.slane %v4272_v50, 4  ;;  %v4278_v60 = vshll.u32 %v6188_v27, 16 }
 0x13c   : > { %v4265_v13 = vor.u32 %v4264_v49, %v4261_v2  ;;  %v6272_v62 = vrot.slane %v6256_v39, 9  ;;  %v4877_v0 = vrot.slane %v6187_v47, 5  ;;  %v4880_v3 = vrot.slane %v6188_v27, 5  ;;  %v6192_v49 = vld [vmem:[%s7368_s25 + $0x9c] sm:$0xf] }
 0x13d   : > { %v4257_v34 = vsel %vm7454_vm5, %v4252_v52, %v4256_v31  ;;  %v1451_v32 = vadd.f32 %v1372_v4, %v8205_v6  ;;  %v4275_v40 = vor.u32 %v4274_v7, %v4270_v56  ;;  %v4280_v10 = vrot.slane %v4278_v60, 5 }
 0x13e   : > { %v6231_v33 = vcombine.low %v4247_v35, %v4257_v34  ;;  %v4266_v48 = vrot.slane %v4265_v13, 4  ;;  %v4878_v22 = vsel %vm7435_vm4, %v6272_v62, %v4877_v0  ;;  %v4879_v21 = vrot.slane %v4877_v0, 4 }
 0x13f   : > { %v8677_v20 = vadd.f32 %v1873_v9, %v1451_v32  ;;  %v1454_v47 = vadd.f32 %v6781_v36, %v8223_v46  ;;  %v4276_v31 = vrot.slane %v4275_v40, 4  ;;  %v1452_v4 = vadd.f32 %v1375_v53, %v8248_v51  ;;  %v6191_v46 = vld [vmem:[%s7368_s25 + $0x98] sm:$0x1]  ;;  %v6193_v32 = vld [vmem:[%s7368_s25 + $0xa0] sm:$0xf] }
 0x140   : > { %7066 = vmatprep.mubr.bf16.mxu1 %v6231_v33  ;;  %v4271_v6 = vsel %vm7454_vm5, %v4266_v48, %v4270_v56  ;;  %v4283_v11 = vshrl.u32 %v6189_v25, 16  ;;  %v4881_v9 = vsel %vm7435_vm4, %v4879_v21, %v4880_v3  ;;  %v4286_v45 = vshll.u32 %v6189_v25, 16 }
 0x141   : > { %7111 = vmatmul.mubr.bf16.gmra.mxu0 %v6302_v44  ;;  %v8688_v27 = vadd.f32 %v6829_v14, %v1454_v47  ;;  %v4292_v39 = vshll.u32 %v6190_v1, 16  ;;  %v6832_v44 = vpop.f32.mrf.mxu0  ;;  %v4281_v36 = vsel %vm7454_vm5, %v4276_v31, %v4280_v10  ;;  %v6304_v43 = vcombine.low %v4878_v22, %v4881_v9  ;;  %v6194_v10 = vld [vmem:[%s7368_s25 + $0xa4] sm:$0x1]  ;;  %v6258_v31 = vld [vmem:[%s7368_s25 + $0x9c] sm:$0xe] }
 0x142   : > { %7114 = vmatprep.mubr.bf16.mxu0 %v6303_v38  ;;  %v8694_v2 = vadd.f32 %v1876_v29, %v1452_v4  ;;  %v4285_v51 = vrot.slane %v4283_v11, 4  ;;  %v6232_v50 = vcombine.low %v4271_v6, %v4281_v36  ;;  %v4288_v35 = vrot.slane %v4286_v45, 5  ;;  %v1388_v38 = vpop.f32.mrf.mxu1 }
 0x143   : > { %v4294_v52 = vrot.slane %v4292_v39, 5  ;;  %v4296_v14 = vshrl.u32 %v6190_v1, 16  ;;  %v1889_v56 = vpop.f32.mrf.mxu0  ;;  %v4302_v13 = vshll.u32 %v6191_v46, 16  ;;  %v6273_v7 = vrot.slane %v6257_v63, 9 }
 0x144   : > { %v4884_v60 = vrot.slane %v6190_v1, 5  ;;  %v4887_v62 = vrot.slane %v6191_v46, 5  ;;  %7067 = vmatmul.mubr.bf16.gmra.mxu1 %v6232_v50  ;;  %v4289_v34 = vor.u32 %v4288_v35, %v4285_v51  ;;  %v1457_v3 = vadd.f32 %v6784_v19, %v8269_v57  ;;  %v6785_v29 = vpop.f32.mrf.mxu1 }
 0x145   : > { %v4298_v0 = vrot.slane %v4296_v14, 4  ;;  %v4307_v53 = vshrl.u32 %v6192_v49, 16  ;;  %v6833_v25 = vpop.f32.mrf.mxu0  ;;  %v4304_v33 = vrot.slane %v4302_v13, 5  ;;  %v4310_v22 = vshll.u32 %v6192_v49, 16 }
 0x146   : > { %v4885_v48 = vsel %vm7435_vm4, %v6273_v7, %v4884_v60  ;;  %v4886_v40 = vrot.slane %v4884_v60, 4  ;;  %v4290_v21 = vrot.slane %v4289_v34, 4  ;;  %v8702_v47 = vadd.f32 %v6832_v44, %v1457_v3  ;;  %v1391_v19 = vpop.f32.mrf.mxu1  ;;  %v6195_v7 = vld [vmem:[%s7368_s25 + $0xa8] sm:$0xf] }
 0x147   : > { %v4299_v1 = vor.u32 %v4298_v0, %v4294_v52  ;;  %v4309_v6 = vrot.slane %v4307_v53, 4  ;;  %v4312_v4 = vrot.slane %v4310_v22, 5  ;;  %v4316_v11 = vshll.u32 %v6193_v32, 16  ;;  %v1892_v36 = vpop.f32.mrf.mxu0  ;;  %v9164_v53 = vld [vmem:[#allocation3_spill] sm:$0xff]  ;;  %v6196_v22 = vld [vmem:[%s7368_s25 + $0xac] sm:$0xf] }
 0x148   : > { %v4888_v57 = vsel %vm7435_vm4, %v4886_v40, %v4887_v62  ;;  %v4320_v9 = vshrl.u32 %v6193_v32, 16  ;;  %v4295_v46 = vsel %vm7454_vm5, %v4290_v21, %v4294_v52  ;;  %v4326_v63 = vshll.u32 %v6194_v10, 16  ;;  %v9165_v40 = vld [vmem:[#allocation4_spill] sm:$0xff]  ;;  %v6788_v21 = vpop.f32.mrf.mxu1 }
 0x149   : > { %7115 = vmatmul.mubr.bf16.gmra.mxu0 %v6304_v43  ;;  %v4300_v45 = vrot.slane %v4299_v1, 4  ;;  %v6305_v39 = vcombine.low %v4885_v48, %v4888_v57  ;;  %v4313_v44 = vor.u32 %v4312_v4, %v4309_v6  ;;  %v4318_v51 = vrot.slane %v4316_v11, 5  ;;  %v6259_v11 = vld [vmem:[%s7368_s25 + $0xa8] sm:$0xe] }
 0x14a   : > { %v4322_v49 = vrot.slane %v4320_v9, 4  ;;  %v6274_v43 = vrot.slane %v6258_v31, 9  ;;  %v4328_v35 = vrot.slane %v4326_v63, 5  ;;  %v4891_v14 = vrot.slane %v6193_v32, 5  ;;  %v6836_v32 = vpop.f32.mrf.mxu0  ;;  %v1404_v9 = vpop.f32.mrf.mxu1 }
 0x14b   : > { %v4305_v50 = vsel %vm7454_vm5, %v4300_v45, %v4304_v33  ;;  %7118 = vmatprep.mubr.bf16.mxu0 %v6305_v39  ;;  %v4894_v13 = vrot.slane %v6194_v10, 5  ;;  %v4314_v60 = vrot.slane %v4313_v44, 4  ;;  %v1455_v34 = vadd.f32 %v1388_v38, %v8292_v54  ;;  %v6197_v54 = vld [vmem:[%s7368_s25 + $0xb0] sm:$0x1] }
 0x14c   : > { %v6233_v52 = vcombine.low %v4295_v46, %v4305_v50  ;;  %v4323_v62 = vor.u32 %v4322_v49, %v4318_v51  ;;  %v4892_v0 = vsel %vm7435_vm4, %v6274_v43, %v4891_v14  ;;  %v4893_v3 = vrot.slane %v4891_v14, 4  ;;  %v1905_v46 = vpop.f32.mrf.mxu0  ;;  %v6198_v43 = vld [vmem:[%s7368_s25 + $0xb4] sm:$0xf] }
 0x14d   : > { %v1458_v48 = vadd.f32 %v6785_v29, %v9164_v53  ;;  %v1456_v33 = vadd.f32 %v1391_v19, %v9165_v40  ;;  %v4319_v10 = vsel %vm7454_vm5, %v4314_v60, %v4318_v51  ;;  %v8720_v6 = vadd.f32 %v1889_v56, %v1455_v34  ;;  %v9167_v34 = vld [vmem:[#allocation5_spill] sm:$0xff] }
 0x14e   : > { %7070 = vmatprep.mubr.bf16.mxu1 %v6233_v52  ;;  %v4324_v1 = vrot.slane %v4323_v62, 4  ;;  %v4331_v38 = vshrl.u32 %v6195_v7, 16  ;;  %v4895_v31 = vsel %vm7435_vm4, %v4893_v3, %v4894_v13  ;;  %v4334_v4 = vshll.u32 %v6195_v7, 16  ;;  %v6837_v50 = vpop.f32.mrf.mxu0  ;;  %v6199_v52 = vld [vmem:[%s7368_s25 + $0xb8] sm:$0xf] }
 0x14f   : > { %v8725_v57 = vadd.f32 %v6833_v25, %v1458_v48  ;;  %v8727_v29 = vadd.f32 %v1892_v36, %v1456_v33  ;;  %v6306_v56 = vcombine.low %v4892_v0, %v4895_v31  ;;  %v4340_v63 = vshll.u32 %v6196_v22, 16  ;;  %v6789_v25 = vpop.f32.mrf.mxu1 }
 0x150   : > { %v4329_v45 = vsel %vm7454_vm5, %v4324_v1, %v4328_v35  ;;  %v4333_v39 = vrot.slane %v4331_v38, 4  ;;  %v4336_v44 = vrot.slane %v4334_v4, 5  ;;  %v4344_v51 = vshrl.u32 %v6196_v22, 16  ;;  %v6260_v38 = vld [vmem:[%s7368_s25 + $0xb4] sm:$0xe]  ;;  %v1908_v4 = vpop.f32.mrf.mxu0 }
 0x151   : > { %9166 = vst [vmem:[#allocation3_spill] sm:$0xff] %v8727_v29  ;;  %v6234_v19 = vcombine.low %v4319_v10, %v4329_v45  ;;  %v4350_v49 = vshll.u32 %v6197_v54, 16  ;;  %7119 = vmatmul.mubr.bf16.gmra.mxu0 %v6306_v56  ;;  %v4342_v36 = vrot.slane %v4340_v63, 5  ;;  %v6275_v14 = vrot.slane %v6259_v11, 9  ;;  %v1407_v31 = vpop.f32.mrf.mxu1 }
 0x152   : > { %v4898_v13 = vrot.slane %v6196_v22, 5  ;;  %v4901_v7 = vrot.slane %v6197_v54, 5  ;;  %v4337_v35 = vor.u32 %v4336_v44, %v4333_v39  ;;  %v4346_v60 = vrot.slane %v4344_v51, 4  ;;  %v6200_v22 = vld [vmem:[%s7368_s25 + $0xbc] sm:$0x1] }
 0x153   : > { %7071 = vmatmul.mubr.bf16.gmra.mxu1 %v6234_v19  ;;  %v4352_v62 = vrot.slane %v4350_v49, 5  ;;  %v1461_v0 = vadd.f32 %v6788_v21, %v9167_v34  ;;  %v4355_v48 = vshrl.u32 %v6198_v43, 16  ;;  %v4358_v40 = vshll.u32 %v6198_v43, 16  ;;  %v6201_v34 = vld [vmem:[%s7368_s25 + $0xc0] sm:$0xf] }
 0x154   : > { %v4899_v3 = vsel %vm7435_vm4, %v6275_v14, %v4898_v13  ;;  %v4900_v53 = vrot.slane %v4898_v13, 4  ;;  %v4338_v33 = vrot.slane %v4337_v35, 4  ;;  %v4347_v10 = vor.u32 %v4346_v60, %v4342_v36  ;;  %v9169_v35 = vld [vmem:[#allocation6_spill] sm:$0xff] }
 0x155   : > { %v8737_v1 = vadd.f32 %v6836_v32, %v1461_v0  ;;  %v4364_v54 = vshll.u32 %v6199_v52, 16  ;;  %v4357_v45 = vrot.slane %v4355_v48, 4  ;;  %v4360_v21 = vrot.slane %v4358_v40, 5  ;;  %v6792_v0 = vpop.f32.mrf.mxu1 }
 0x156   : > { %v4902_v11 = vsel %vm7435_vm4, %v4900_v53, %v4901_v7  ;;  %v4368_v56 = vshrl.u32 %v6199_v52, 16  ;;  %v4343_v39 = vsel %vm7454_vm5, %v4338_v33, %v4342_v36  ;;  %v4348_v63 = vrot.slane %v4347_v10, 4  ;;  %v6840_v53 = vpop.f32.mrf.mxu0  ;;  %v6202_v33 = vld [vmem:[%s7368_s25 + $0xc4] sm:$0xf] }
 0x157   : > { %9168 = vst [vmem:[#allocation4_spill] sm:$0xff] %v8737_v1  ;;  %v6307_v19 = vcombine.low %v4899_v3, %v4902_v11  ;;  %v4366_v44 = vrot.slane %v4364_v54, 5  ;;  %v4361_v32 = vor.u32 %v4360_v21, %v4357_v45  ;;  %v4374_v49 = vshll.u32 %v6200_v22, 16  ;;  %v9172_v21 = vld [vmem:[#allocation8_spill] sm:$0xff] }
 0x158   : > { %v4370_v51 = vrot.slane %v4368_v56, 4  ;;  %v6276_v43 = vrot.slane %v6260_v38, 9  ;;  %v4353_v14 = vsel %vm7454_vm5, %v4348_v63, %v4352_v62  ;;  %v4905_v13 = vrot.slane %v6199_v52, 5  ;;  %v9171_v52 = vld [vmem:[#allocation7_spill] sm:$0xff]  ;;  %v8755_v38 = vpop.f32.mrf.mxu1 }
 0x159   : > { %7122 = vmatprep.mubr.bf16.mxu0 %v6307_v19  ;;  %v4908_v7 = vrot.slane %v6200_v22, 5  ;;  %v1459_v60 = vadd.f32 %v1404_v9, %v9169_v35  ;;  %v6235_v36 = vcombine.low %v4343_v39, %v4353_v14  ;;  %v4362_v48 = vrot.slane %v4361_v32, 4  ;;  %v8757_v9 = vpop.f32.mrf.mxu0  ;;  %v6203_v19 = vld [vmem:[%s7368_s25 + $0xc8] sm:$0x1]  ;;  %v6204_v35 = vld [vmem:[%s7368_s25 + $0xcc] sm:$0xf] }
 0x15a   : > { %v4371_v3 = vor.u32 %v4370_v51, %v4366_v44  ;;  %v4376_v40 = vrot.slane %v4374_v49, 5  ;;  %v4906_v10 = vsel %vm7435_vm4, %v6276_v43, %v4905_v13  ;;  %v4907_v54 = vrot.slane %v4905_v13, 4  ;;  %v6261_v51 = vld [vmem:[%s7368_s25 + $0xc0] sm:$0xe]  ;;  %v8768_v49 = vpop.f32.mrf.mxu1 }
 0x15b   : > { %v8752_v62 = vadd.f32 %v1905_v46, %v1459_v60  ;;  %v1462_v22 = vadd.f32 %v6789_v25, %v9171_v52  ;;  %7074 = vmatprep.mubr.bf16.mxu1 %v6235_v36  ;;  %v4367_v11 = vsel %vm7454_vm5, %v4362_v48, %v4366_v44  ;;  %v1460_v56 = vadd.f32 %v1407_v31, %v9172_v21  ;;  %v8770_v43 = vpop.f32.mrf.mxu0  ;;  %v6205_v21 = vld [vmem:[%s7368_s25 + $0xd0] sm:$0xf] }
 0x15c   : > { %v4372_v45 = vrot.slane %v4371_v3, 4  ;;  %v4379_v39 = vshrl.u32 %v6201_v34, 16  ;;  %v4909_v63 = vsel %vm7435_vm4, %v4907_v54, %v4908_v7  ;;  %v4382_v25 = vshll.u32 %v6201_v34, 16  ;;  %v1423_v34 = vpop.f32.mrf.mxu1 }
 0x15d   : > { %9170 = vst [vmem:[#allocation5_spill] sm:$0xff] %v8752_v62  ;;  %v8764_v46 = vadd.f32 %v6837_v50, %v1462_v22  ;;  %v4388_v32 = vshll.u32 %v6202_v33, 16  ;;  %v6308_v14 = vcombine.low %v4906_v10, %v4909_v63  ;;  %v8774_v13 = vadd.f32 %v1908_v4, %v1460_v56  ;;  %v1924_v22 = vpop.f32.mrf.mxu0  ;;  %v9175_v10 = vld [vmem:[#allocation9_spill] sm:$0xff] }
 0x15e   : > { %v4377_v44 = vsel %vm7454_vm5, %v4372_v45, %v4376_v40  ;;  %v4381_v31 = vrot.slane %v4379_v39, 4  ;;  %v4384_v50 = vrot.slane %v4382_v25, 5  ;;  %v4392_v36 = vshrl.u32 %v6202_v33, 16 }
 0x15f   : > { %9173 = vst [vmem:[#allocation6_spill] sm:$0xff] %v8764_v46  ;;  %9174 = vst [vmem:[#allocation7_spill] sm:$0xff] %v8774_v13  ;;  %v6236_v7 = vcombine.low %v4367_v11, %v4377_v44  ;;  %v4390_v60 = vrot.slane %v4388_v32, 5  ;;  %7123 = vmatmul.mubr.bf16.gmra.mxu0 %v6308_v14  ;;  %v4398_v48 = vshll.u32 %v6203_v19, 16  ;;  %v6277_v3 = vrot.slane %v6261_v51, 9  ;;  %v6860_v11 = vpop.f32.mrf.mxu1 }
 0x160   : > { %v4912_v54 = vrot.slane %v6202_v33, 5  ;;  %v4915_v52 = vrot.slane %v6203_v19, 5  ;;  %v4385_v40 = vor.u32 %v4384_v50, %v4381_v31  ;;  %v4394_v4 = vrot.slane %v4392_v36, 4  ;;  %v6206_v32 = vld [vmem:[%s7368_s25 + $0xd4] sm:$0x1] }
 0x161   : > { %7075 = vmatmul.mubr.bf16.gmra.mxu1 %v6236_v7  ;;  %v1465_v45 = vadd.f32 %v6792_v0, %v9175_v10  ;;  %v4403_v56 = vshrl.u32 %v6204_v35, 16  ;;  %v4400_v39 = vrot.slane %v4398_v48, 5  ;;  %v4406_v44 = vshll.u32 %v6204_v35, 16  ;;  %v6262_v7 = vld [vmem:[%s7368_s25 + $0xcc] sm:$0xe]  ;;  %v2196_v31 = vpop.f32.mrf.mxu1  ;;  %v6908_v48 = vpop.f32.mrf.mxu0 }
 0x162   : > { %v4913_v63 = vsel %vm7435_vm4, %v6277_v3, %v4912_v54  ;;  %v4914_v25 = vrot.slane %v4912_v54, 4  ;;  %v4386_v51 = vrot.slane %v4385_v40, 4  ;;  %v4395_v33 = vor.u32 %v4394_v4, %v4390_v60 }
 0x163   : > { %v8782_v19 = vadd.f32 %v6840_v53, %v1465_v45  ;;  %v4405_v14 = vrot.slane %v4403_v56, 4  ;;  %v4408_v50 = vrot.slane %v4406_v44, 5  ;;  %v4412_v36 = vshll.u32 %v6205_v21, 16  ;;  %v6861_v40 = vpop.f32.mrf.mxu1 }
 0x164   : > { %v4916_v0 = vsel %vm7435_vm4, %v4914_v25, %v4915_v52  ;;  %v4416_v10 = vshrl.u32 %v6205_v21, 16  ;;  %v4391_v3 = vsel %vm7454_vm5, %v4386_v51, %v4390_v60  ;;  %v4396_v54 = vrot.slane %v4395_v33, 4  ;;  %v9177_v51 = vld [vmem:[#allocation10_spill] sm:$0xff] }
 0x165   : > { %9176 = vst [vmem:[#allocation8_spill] sm:$0xff] %v8782_v19  ;;  %v6309_v13 = vcombine.low %v4913_v63, %v4916_v0  ;;  %v4422_v35 = vshll.u32 %v6206_v32, 16  ;;  %v4409_v4 = vor.u32 %v4408_v50, %v4405_v14  ;;  %v4414_v53 = vrot.slane %v4412_v36, 5  ;;  %v2950_v19 = vpop.f32.mrf.mxu0  ;;  %v2199_v62 = vpop.f32.mrf.mxu1  ;;  %v9178_v0 = vld [vmem:[#allocation11_spill] sm:$0xff] }
 0x166   : > { %v4418_v45 = vrot.slane %v4416_v10, 4  ;;  %v6278_v56 = vrot.slane %v6262_v7, 9  ;;  %v4401_v46 = vsel %vm7454_vm5, %v4396_v54, %v4400_v39  ;;  %v4919_v25 = vrot.slane %v6205_v21, 5  ;;  %v9179_v39 = vld [vmem:[#allocation12_spill] sm:$0xff] }
 0x167   : > { %7126 = vmatprep.mubr.bf16.mxu0 %v6309_v13  ;;  %v4424_v52 = vrot.slane %v4422_v35, 5  ;;  %v4922_v44 = vrot.slane %v6206_v32, 5  ;;  %v6237_v1 = vcombine.low %v4391_v3, %v4401_v46  ;;  %v4410_v29 = vrot.slane %v4409_v4, 4  ;;  %v6909_v33 = vpop.f32.mrf.mxu0  ;;  %v6864_v36 = vpop.f32.mrf.mxu1 }
 0x168   : > { %v4419_v60 = vor.u32 %v4418_v45, %v4414_v53  ;;  %v1463_v63 = vadd.f32 %v8755_v38, %v9177_v51  ;;  %v4920_v14 = vsel %vm7435_vm4, %v6278_v56, %v4919_v25  ;;  %v4921_v7 = vrot.slane %v4919_v25, 4 }
 0x169   : > { %v1466_v50 = vadd.f32 %v8768_v49, %v9178_v0  ;;  %v1464_v13 = vadd.f32 %v1423_v34, %v9179_v39  ;;  %7078 = vmatprep.mubr.bf16.mxu1 %v6237_v1  ;;  %v4415_v46 = vsel %vm7454_vm5, %v4410_v29, %v4414_v53  ;;  %v2325_v38 = vadd.f32 %v6860_v11, %v8475_v8  ;;  %v2953_v10 = vpop.f32.mrf.mxu0  ;;  %v2212_v34 = vpop.f32.mrf.mxu1 }
 0x16a   : > { %v4420_v21 = vrot.slane %v4419_v60, 4  ;;  %v8801_v32 = vadd.f32 %v8757_v9, %v1463_v63  ;;  %v4923_v3 = vsel %vm7435_vm4, %v4921_v7, %v4922_v44  ;;  %v2323_v1 = vadd.f32 %v2196_v31, %v8487_v12 }
 0x16b   : > { %v8807_v54 = vadd.f32 %v8770_v43, %v1466_v50  ;;  %v8809_v49 = vadd.f32 %v1924_v22, %v1464_v13  ;;  %v6310_v35 = vcombine.low %v4920_v14, %v4923_v3  ;;  %v8814_v9 = vadd.f32 %v6908_v48, %v2325_v38  ;;  %v6912_v11 = vpop.f32.mrf.mxu0  ;;  %v6865_v53 = vpop.f32.mrf.mxu1 }
 0x16c   : > { %v4425_v29 = vsel %vm7454_vm5, %v4420_v21, %v4424_v52  ;;  %v2326_v8 = vadd.f32 %v6861_v40, %v8503_v23  ;;  %v8817_v37 = vadd.f32 %v2950_v19, %v2323_v1  ;;  %v2324_v43 = vadd.f32 %v2199_v62, %v8513_v17 }
 0x16d   : > { %v6238_v4 = vcombine.low %v4415_v46, %v4425_v29  ;;  %v2329_v22 = vadd.f32 %v6864_v36, %v8519_v16  ;;  %7127 = vmatmul.mubr.bf16.gmra.mxu0 %v6310_v35  ;;  %v2327_v58 = vadd.f32 %v2212_v34, %v8527_v30  ;;  %v2966_v31 = vpop.f32.mrf.mxu0  ;;  %v2330_v48 = vadd.f32 %v6865_v53, %v8535_v42  ;;  %v2215_v19 = vpop.f32.mrf.mxu1 }
 0x16e   : > { %v8821_v12 = vadd.f32 %v6909_v33, %v2326_v8  ;;  %v8825_v45 = vadd.f32 %v2953_v10, %v2324_v43  ;;  %v2328_v16 = vadd.f32 %v2215_v19, %v8550_v61 }
 0x16f   : > { %7079 = vmatmul.mubr.bf16.gmra.mxu1 %v6238_v4  ;;  %v8827_v23 = vadd.f32 %v6912_v11, %v2329_v22  ;;  %v8829_v40 = vadd.f32 %v2966_v31, %v2327_v58  ;;  %v6913_v17 = vpop.f32.mrf.mxu0  ;;  %v6868_v56 = vpop.f32.mrf.mxu1 }
 0x170   : > { %v8832_v62 = vadd.f32 %v6913_v17, %v2330_v48  ;;  %v2333_v30 = vadd.f32 %v6868_v56, %v8559_v55 }
 0x171   : > { %v2969_v52 = vpop.f32.mrf.mxu0  ;;  %v2228_v42 = vpop.f32.mrf.mxu1 }
 0x172   : > { %v8835_v25 = vadd.f32 %v2969_v52, %v2328_v16  ;;  %v2331_v44 = vadd.f32 %v2228_v42, %v8569_v15 }
 0x173   : > { %v6869_v60 = vpop.f32.mrf.mxu1  ;;  %v6916_v51 = vpop.f32.mrf.mxu0 }
 0x174   : > { %v2334_v63 = vadd.f32 %v6869_v60, %v8580_v59  ;;  %v8839_v33 = vadd.f32 %v6916_v51, %v2333_v30 }
 0x175   : > { %v2231_v14 = vpop.f32.mrf.mxu1  ;;  %v2982_v7 = vpop.f32.mrf.mxu0 }
 0x176   : > { %v2332_v61 = vadd.f32 %v2231_v14, %v8586_v5  ;;  %v8842_v0 = vadd.f32 %v2982_v7, %v2331_v44  ;;  %v9180_v7 = vld [vmem:[#allocation3_spill] sm:$0xff] }
 0x177   : > { %v6872_v50 = vpop.f32.mrf.mxu1  ;;  %v6917_v39 = vpop.f32.mrf.mxu0 }
 0x178   : > { %v2337_v55 = vadd.f32 %v6872_v50, %v8614_v18  ;;  %v8845_v13 = vadd.f32 %v6917_v39, %v2334_v63 }
 0x179   : > { %v2244_v36 = vpop.f32.mrf.mxu1  ;;  %v2985_v15 = vpop.f32.mrf.mxu0 }
 0x17a   : > { %v2335_v46 = vadd.f32 %v2244_v36, %v8633_v41  ;;  %v8848_v21 = vadd.f32 %v2985_v15, %v2332_v61 }
 0x17b   : > { %v6873_v59 = vpop.f32.mrf.mxu1  ;;  %v6920_v38 = vpop.f32.mrf.mxu0 }
 0x17c   : > { %v2338_v10 = vadd.f32 %v6873_v59, %v8635_v28  ;;  %v8851_v3 = vadd.f32 %v6920_v38, %v2337_v55  ;;  %v9181_v55 = vld [vmem:[#allocation4_spill] sm:$0xff]  ;;  %v9182_v59 = vld [vmem:[#allocation5_spill] sm:$0xff] }
 0x17d   : > { %v2247_v5 = vpop.f32.mrf.mxu1  ;;  %v2998_v1 = vpop.f32.mrf.mxu0 }
 0x17e   : > { %v2336_v34 = vadd.f32 %v2247_v5, %v8644_v26  ;;  %v8854_v29 = vadd.f32 %v2998_v1, %v2335_v46  ;;  %v9183_v1 = vld [vmem:[#allocation6_spill] sm:$0xff] }
 0x17f   : > { %v6876_v18 = vpop.f32.mrf.mxu1  ;;  %v6921_v35 = vpop.f32.mrf.mxu0 }
 0x180   : > { %v2341_v8 = vadd.f32 %v6876_v18, %v8662_v24  ;;  %v8857_v11 = vadd.f32 %v6921_v35, %v2338_v10 }
 0x181   : > { %v2260_v41 = vpop.f32.mrf.mxu1  ;;  %v3001_v4 = vpop.f32.mrf.mxu0 }
 0x182   : > { %v2339_v43 = vadd.f32 %v2260_v41, %v8677_v20  ;;  %v8860_v22 = vadd.f32 %v3001_v4, %v2336_v34  ;;  %v9184_v41 = vld [vmem:[#allocation7_spill] sm:$0xff] }
 0x183   : > { %v6877_v28 = vpop.f32.mrf.mxu1  ;;  %v6924_v53 = vpop.f32.mrf.mxu0 }
 0x184   : > { %v2342_v58 = vadd.f32 %v6877_v28, %v8688_v27  ;;  %v8863_v31 = vadd.f32 %v6924_v53, %v2341_v8 }
 0x185   : > { %v2263_v26 = vpop.f32.mrf.mxu1  ;;  %v3014_v48 = vpop.f32.mrf.mxu0 }
 0x186   : > { %v2340_v19 = vadd.f32 %v2263_v26, %v8694_v2  ;;  %v8866_v17 = vadd.f32 %v3014_v48, %v2339_v43 }
 0x187   : > { %v6880_v24 = vpop.f32.mrf.mxu1  ;;  %v6925_v16 = vpop.f32.mrf.mxu0 }
 0x188   : > { %v2345_v56 = vadd.f32 %v6880_v24, %v8702_v47  ;;  %v8869_v52 = vadd.f32 %v6925_v16, %v2342_v58  ;;  %v9185_v58 = vld [vmem:[#allocation8_spill] sm:$0xff] }
 0x189   : > { %v2276_v20 = vpop.f32.mrf.mxu1  ;;  %v3017_v30 = vpop.f32.mrf.mxu0 }
 0x18a   : > { %v2343_v42 = vadd.f32 %v2276_v20, %v8720_v6  ;;  %v8872_v44 = vadd.f32 %v3017_v30, %v2340_v19 }
 0x18b   : > { %v6881_v27 = vpop.f32.mrf.mxu1  ;;  %v6928_v60 = vpop.f32.mrf.mxu0 }
 0x18c   : > { %v2346_v51 = vadd.f32 %v6881_v27, %v8725_v57  ;;  %v8875_v63 = vadd.f32 %v6928_v60, %v2345_v56 }
 0x18d   : > { %v2279_v2 = vpop.f32.mrf.mxu1  ;;  %v3030_v14 = vpop.f32.mrf.mxu0 }
 0x18e   : > { %v2344_v61 = vadd.f32 %v2279_v2, %v9180_v7  ;;  %v8878_v50 = vadd.f32 %v3030_v14, %v2343_v42 }
 0x18f   : > { %v6884_v47 = vpop.f32.mrf.mxu1  ;;  %v6929_v39 = vpop.f32.mrf.mxu0 }
 0x190   : > { %v2349_v36 = vadd.f32 %v6884_v47, %v9181_v55  ;;  %v8881_v15 = vadd.f32 %v6929_v39, %v2346_v51 }
 0x191   : > { %v2292_v6 = vpop.f32.mrf.mxu1  ;;  %v3033_v46 = vpop.f32.mrf.mxu0 }
 0x192   : > { %v2347_v38 = vadd.f32 %v2292_v6, %v9182_v59  ;;  %v8884_v10 = vadd.f32 %v3033_v46, %v2344_v61 }
 0x193   : > { %v6885_v57 = vpop.f32.mrf.mxu1  ;;  %v6932_v5 = vpop.f32.mrf.mxu0 }
 0x194   : > { %v2350_v34 = vadd.f32 %v6885_v57, %v9183_v1  ;;  %v8887_v18 = vadd.f32 %v6932_v5, %v2349_v36 }
 0x195   : > { %v2295_v35 = vpop.f32.mrf.mxu1  ;;  %v3046_v8 = vpop.f32.mrf.mxu0 }
 0x196   : > { %v2348_v4 = vadd.f32 %v2295_v35, %v9184_v41  ;;  %v8890_v43 = vadd.f32 %v3046_v8, %v2347_v38 }
 0x197   : > { %v6888_v28 = vpop.f32.mrf.mxu1  ;;  %v6933_v53 = vpop.f32.mrf.mxu0 }
 0x198   : > { %v2353_v26 = vadd.f32 %v6888_v28, %v9185_v58  ;;  %v8893_v48 = vadd.f32 %v6933_v53, %v2350_v34 }
 0x199   : > { %v2308_v19 = vpop.f32.mrf.mxu1  ;;  %v3049_v24 = vpop.f32.mrf.mxu0 }
 0x19a   : > { %v2351_v16 = vadd.f32 %v2308_v19, %v8801_v32  ;;  %v8896_v56 = vadd.f32 %v3049_v24, %v2348_v4 }
 0x19b   : > { %v6889_v20 = vpop.f32.mrf.mxu1  ;;  %v6936_v27 = vpop.f32.mrf.mxu0 }
 0x19c   : > { %v2354_v30 = vadd.f32 %v6889_v20, %v8807_v54  ;;  %v8900_v51 = vadd.f32 %v6936_v27, %v2353_v26 }
 0x19d   : > { %v2311_v42 = vpop.f32.mrf.mxu1  ;;  %v3062_v14 = vpop.f32.mrf.mxu0 }
 0x19e   : > { %v2352_v60 = vadd.f32 %v2311_v42, %v8809_v49  ;;  %v8903_v61 = vadd.f32 %v3062_v14, %v2351_v16 }
 0x19f   : > { %v6956_v2 = vpop.f32.mrf.mxu1  ;;  %v6937_v39 = vpop.f32.mrf.mxu0 }
 0x1a0   : > { %v3577_v7 = vadd.f32 %v6956_v2, %v8814_v9  ;;  %v8906_v55 = vadd.f32 %v6937_v39, %v2354_v30 }
 0x1a1   : > { %v3448_v47 = vpop.f32.mrf.mxu1  ;;  %v3065_v54 = vpop.f32.mrf.mxu0 }
 0x1a2   : > { %v3575_v32 = vadd.f32 %v3448_v47, %v8817_v37  ;;  %v8910_v6 = vadd.f32 %v3065_v54, %v2352_v60 }
 0x1a3   : > { %v8908_v36 = vpop.f32.mrf.mxu1  ;;  %v7004_v46 = vpop.f32.mrf.mxu0 }
 0x1a4   : > { %v8914_v59 = vadd.f32 %v7004_v46, %v3577_v7 }
 0x1a5   : > { %v8912_v49 = vpop.f32.mrf.mxu1  ;;  %v3835_v38 = vpop.f32.mrf.mxu0 }
 0x1a6   : > { %v8916_v57 = vadd.f32 %v3835_v38, %v3575_v32 }
 0x1a7   : > { %v6960_v9 = vpop.f32.mrf.mxu1  ;;  %v8919_v1 = vpop.f32.mrf.mxu0 }
 0x1a8   : > { %v3581_v5 = vadd.f32 %v6960_v9, %v8827_v23 }
 0x1a9   : > { %v3464_v37 = vpop.f32.mrf.mxu1  ;;  %v8922_v35 = vpop.f32.mrf.mxu0 }
 0x1aa   : > { %v3579_v34 = vadd.f32 %v3464_v37, %v8829_v40 }
 0x1ab   : > { %v8924_v8 = vpop.f32.mrf.mxu1  ;;  %v7008_v41 = vpop.f32.mrf.mxu0 }
 0x1ac   : > { %v8928_v28 = vadd.f32 %v7008_v41, %v3581_v5 }
 0x1ad   : > { %v8926_v4 = vpop.f32.mrf.mxu1  ;;  %v3851_v53 = vpop.f32.mrf.mxu0 }
 0x1ae   : > { %v8930_v26 = vadd.f32 %v3851_v53, %v3579_v34 }
 0x1af   : > { %v6964_v58 = vpop.f32.mrf.mxu1  ;;  %v8933_v19 = vpop.f32.mrf.mxu0 }
 0x1b0   : > { %v3585_v23 = vadd.f32 %v6964_v58, %v8839_v33 }
 0x1b1   : > { %v3480_v24 = vpop.f32.mrf.mxu1  ;;  %v8936_v16 = vpop.f32.mrf.mxu0 }
 0x1b2   : > { %v3583_v40 = vadd.f32 %v3480_v24, %v8842_v0 }
 0x1b3   : > { %v8938_v20 = vpop.f32.mrf.mxu1  ;;  %v7012_v30 = vpop.f32.mrf.mxu0 }
 0x1b4   : > { %v8942_v27 = vadd.f32 %v7012_v30, %v3585_v23 }
 0x1b5   : > { %v8940_v42 = vpop.f32.mrf.mxu1  ;;  %v3867_v60 = vpop.f32.mrf.mxu0 }
 0x1b6   : > { %v8944_v14 = vadd.f32 %v3867_v60, %v3583_v40 }
 0x1b7   : > { %v6968_v2 = vpop.f32.mrf.mxu1  ;;  %v8947_v7 = vpop.f32.mrf.mxu0 }
 0x1b8   : > { %v3589_v33 = vadd.f32 %v6968_v2, %v8851_v3 }
 0x1b9   : > { %v3496_v47 = vpop.f32.mrf.mxu1  ;;  %v8950_v39 = vpop.f32.mrf.mxu0 }
 0x1ba   : > { %v3587_v0 = vadd.f32 %v3496_v47, %v8854_v29 }
 0x1bb   : > { %v8952_v32 = vpop.f32.mrf.mxu1  ;;  %v7016_v54 = vpop.f32.mrf.mxu0 }
 0x1bc   : > { %v8956_v38 = vadd.f32 %v7016_v54, %v3589_v33 }
 0x1bd   : > { %v8954_v46 = vpop.f32.mrf.mxu1  ;;  %v3883_v9 = vpop.f32.mrf.mxu0 }
 0x1be   : > { %v8958_v37 = vadd.f32 %v3883_v9, %v3587_v0 }
 0x1bf   : > { %v6972_v5 = vpop.f32.mrf.mxu1  ;;  %v8961_v34 = vpop.f32.mrf.mxu0 }
 0x1c0   : > { %v3593_v3 = vadd.f32 %v6972_v5, %v8863_v31 }
 0x1c1   : > { %v3512_v41 = vpop.f32.mrf.mxu1  ;;  %v8964_v53 = vpop.f32.mrf.mxu0 }
 0x1c2   : > { %v3591_v29 = vadd.f32 %v3512_v41, %v8866_v17 }
 0x1c3   : > { %v8966_v58 = vpop.f32.mrf.mxu1  ;;  %v7020_v23 = vpop.f32.mrf.mxu0 }
 0x1c4   : > { %v8970_v40 = vadd.f32 %v7020_v23, %v3593_v3 }
 0x1c5   : > { %v8968_v24 = vpop.f32.mrf.mxu1  ;;  %v3899_v30 = vpop.f32.mrf.mxu0 }
 0x1c6   : > { %9186 = vst [vmem:[#allocation9_spill] sm:$0xff] %v8970_v40  ;;  %v8972_v2 = vadd.f32 %v3899_v30, %v3591_v29 }
 0x1c7   : > { %v6976_v60 = vpop.f32.mrf.mxu1  ;;  %v8975_v33 = vpop.f32.mrf.mxu0 }
 0x1c8   : > { %9187 = vst [vmem:[#allocation10_spill] sm:$0xff] %v8972_v2  ;;  %v3597_v31 = vadd.f32 %v6976_v60, %v8875_v63 }
 0x1c9   : > { %v3528_v47 = vpop.f32.mrf.mxu1  ;;  %v8978_v0 = vpop.f32.mrf.mxu0 }
 0x1ca   : > { %v3595_v17 = vadd.f32 %v3528_v47, %v8878_v50  ;;  %9188 = vst [vmem:[#allocation11_spill] sm:$0xff] %v8978_v0 }
 0x1cb   : > { %v6977_v54 = vpop.f32.mrf.mxu1  ;;  %v7024_v5 = vpop.f32.mrf.mxu0 }
 0x1cc   : > { %v3598_v9 = vadd.f32 %v6977_v54, %v8881_v15  ;;  %v8981_v3 = vadd.f32 %v7024_v5, %v3597_v31 }
 0x1cd   : > { %v3531_v41 = vpop.f32.mrf.mxu1  ;;  %v3915_v29 = vpop.f32.mrf.mxu0 }
 0x1ce   : > { %v3596_v23 = vadd.f32 %v3531_v41, %v8884_v10  ;;  %v8984_v2 = vadd.f32 %v3915_v29, %v3595_v17 }
 0x1cf   : > { %v6980_v30 = vpop.f32.mrf.mxu1  ;;  %v7025_v60 = vpop.f32.mrf.mxu0 }
 0x1d0   : > { %v3601_v63 = vadd.f32 %v6980_v30, %v8887_v18  ;;  %v8987_v50 = vadd.f32 %v7025_v60, %v3598_v9 }
 0x1d1   : > { %v3544_v40 = vpop.f32.mrf.mxu1  ;;  %v3918_v0 = vpop.f32.mrf.mxu0 }
 0x1d2   : > { %v3599_v47 = vadd.f32 %v3544_v40, %v8890_v43  ;;  %v8990_v54 = vadd.f32 %v3918_v0, %v3596_v23 }
 0x1d3   : > { %v6981_v15 = vpop.f32.mrf.mxu1  ;;  %v7028_v5 = vpop.f32.mrf.mxu0 }
 0x1d4   : > { %v3602_v31 = vadd.f32 %v6981_v15, %v8893_v48  ;;  %v8993_v41 = vadd.f32 %v7028_v5, %v3601_v63 }
 0x1d5   : > { %v3547_v10 = vpop.f32.mrf.mxu1  ;;  %v3931_v29 = vpop.f32.mrf.mxu0 }
 0x1d6   : > { %v3600_v17 = vadd.f32 %v3547_v10, %v8896_v56  ;;  %v8996_v30 = vadd.f32 %v3931_v29, %v3599_v47 }
 0x1d7   : > { %v7029_v60 = vpop.f32.mrf.mxu0 }
 0x1d8   : > { %v8999_v40 = vadd.f32 %v7029_v60, %v3602_v31  ;;  %v3578_v31 = vadd.f32 %v8908_v36, %v8821_v12  ;;  %v9024_v36 = vld [vmem:[%s9139_s2] ss:$0 sm:$0xff] }
 0x1d9   : > { %v6984_v18 = vpop.f32.mrf.mxu1  ;;  %v3934_v23 = vpop.f32.mrf.mxu0 }
 0x1da   : > { %v3605_v9 = vadd.f32 %v6984_v18, %v8900_v51  ;;  %v9002_v15 = vadd.f32 %v3934_v23, %v3600_v17 }
 0x1db   : > { %v3560_v43 = vpop.f32.mrf.mxu1  ;;  %v7032_v5 = vpop.f32.mrf.mxu0 }
 0x1dc   : > { %v3603_v0 = vadd.f32 %v3560_v43, %v8903_v61  ;;  %v9005_v10 = vadd.f32 %v7032_v5, %v3605_v9 }
 0x1dd   : > { %v6985_v48 = vpop.f32.mrf.mxu1  ;;  %v3947_v29 = vpop.f32.mrf.mxu0 }
 0x1de   : > { %v3606_v63 = vadd.f32 %v6985_v48, %v8906_v55  ;;  %v9010_v18 = vadd.f32 %v3947_v29, %v3603_v0  ;;  %v3576_v55 = vadd.f32 %v8912_v49, %v8825_v45  ;;  %v3582_v45 = vadd.f32 %v8924_v8, %v8832_v62 }
 0x1df   : > { %v3563_v56 = vpop.f32.mrf.mxu1  ;;  %v7033_v61 = vpop.f32.mrf.mxu0 }
 0x1e0   : > { %v3604_v47 = vadd.f32 %v3563_v56, %v8910_v6  ;;  %v9012_v43 = vadd.f32 %v7033_v61, %v3606_v63  ;;  %v3965_v6 = vadd.f32 %v8919_v1, %v3578_v31  ;;  %v3963_v56 = vadd.f32 %v8922_v35, %v3576_v55 }
 0x1e1   : > { %v7052_v51 = vpop.f32.mrf.mxu1  ;;  %v3950_v9 = vpop.f32.mrf.mxu0  ;;  %v3969_v62 = vadd.f32 %v8933_v19, %v3582_v45  ;;  %v3590_v45 = vadd.f32 %v8952_v32, %v8857_v11 }
 0x1e2   : > { %v4718_v17 = vadd.f32 %v7052_v51, %v8914_v59  ;;  %v9018_v48 = vadd.f32 %v3950_v9, %v3604_v47 }
 0x1e3   : > { %v4589_v60 = vpop.f32.mrf.mxu1 }
 0x1e4   : > { %v4716_v5 = vadd.f32 %v4589_v60, %v8916_v57  ;;  %v3580_v57 = vadd.f32 %v8926_v4, %v8835_v25 }
 0x1e5   : > { %v7053_v23 = vpop.f32.mrf.mxu1 }
 0x1e6   : > { %v4719_v59 = vadd.f32 %v7053_v23, %v3965_v6 }
 0x1e7   : > { %v4592_v0 = vpop.f32.mrf.mxu1 }
 0x1e8   : > { %v7100_v12 = vpop.f32.mrf.mxu0  ;;  %v4717_v31 = vadd.f32 %v4592_v0, %v3963_v56 }
 0x1e9   : > { %v5216_v63 = vadd.f32 %v7100_v12, %v4718_v17  ;;  %v7056_v1 = vpop.f32.mrf.mxu1  ;;  %v3584_v12 = vadd.f32 %v8940_v42, %v8848_v21 }
 0x1ea   : > { %v5087_v49 = vpop.f32.mrf.mxu0  ;;  %v4722_v61 = vadd.f32 %v7056_v1, %v8928_v28  ;;  %v3967_v28 = vadd.f32 %v8936_v16, %v3580_v57 }
 0x1eb   : > { %v5290_v47 = vadd.f32 %v9024_v36, %v5216_v63  ;;  %v5214_v29 = vadd.f32 %v5087_v49, %v4716_v5  ;;  %v4605_v60 = vpop.f32.mrf.mxu1  ;;  %v3586_v5 = vadd.f32 %v8938_v20, %v8845_v13 }
 0x1ec   : > { %v7101_v51 = vpop.f32.mrf.mxu0  ;;  %v4720_v9 = vadd.f32 %v4605_v60, %v8930_v26 }
 0x1ed   : > { %vm5322_vm6 = vcmp.ge.f32.partialorder %v5290_v47, 0.0  ;;  %v5354_v17 = vmul.f32 0.2, %v5290_v47  ;;  %v5288_v35 = vadd.f32 %v9024_v36, %v5214_v29  ;;  %v5217_v55 = vadd.f32 %v7101_v51, %v4719_v59  ;;  %v7057_v23 = vpop.f32.mrf.mxu1 }
 0x1ee   : > { %v5090_v8 = vpop.f32.mrf.mxu0  ;;  %v4723_v56 = vadd.f32 %v7057_v23, %v3969_v62 }
 0x1ef   : > { %v5386_v6 = vsel %vm5322_vm6, %v5290_v47, %v5354_v17  ;;  %vm5320_vm7 = vcmp.ge.f32.partialorder %v5288_v35, 0.0  ;;  %v5352_v25 = vmul.f32 0.2, %v5288_v35  ;;  %v5291_v4 = vadd.f32 %v9024_v36, %v5217_v55  ;;  %v4608_v63 = vpop.f32.mrf.mxu1 }
 0x1f0   : > { %v5215_v0 = vadd.f32 %v5090_v8, %v4717_v31  ;;  %v5418_v49 = vmul.f32 1.4142135, %v5386_v6  ;;  %v4721_v29 = vadd.f32 %v4608_v63, %v3967_v28  ;;  %v3971_v55 = vadd.f32 %v8950_v39, %v3584_v12 }
 0x1f1   : > { %v7104_v19 = vpop.f32.mrf.mxu0  ;;  %vm5323_vm8 = vcmp.ge.f32.partialorder %v5291_v4, 0.0  ;;  %v5355_v26 = vmul.f32 0.2, %v5291_v4  ;;  %v5384_v1 = vsel %vm5320_vm7, %v5288_v35, %v5352_v25  ;;  %v7060_v13 = vpop.f32.mrf.mxu1  ;;  %v3973_v35 = vadd.f32 %v8947_v7, %v3586_v5 }
 0x1f2   : > { %v5220_v59 = vadd.f32 %v7104_v19, %v4722_v61  ;;  %v5289_v16 = vadd.f32 %v9024_v36, %v5215_v0  ;;  %v4726_v61 = vadd.f32 %v7060_v13, %v8942_v27  ;;  %v5416_v23 = vmul.f32 1.4142135, %v5384_v1 }
 0x1f3   : > { %v5103_v47 = vpop.f32.mrf.mxu0  ;;  %v5387_v20 = vsel %vm5323_vm8, %v5291_v4, %v5355_v26  ;;  %v4621_v60 = vpop.f32.mrf.mxu1  ;;  %v3977_v39 = vadd.f32 %v8961_v34, %v3590_v45  ;;  %v3588_v5 = vadd.f32 %v8954_v46, %v8860_v22 }
 0x1f4   : > { %v5294_v21 = vadd.f32 %v9024_v36, %v5220_v59  ;;  %v5218_v42 = vadd.f32 %v5103_v47, %v4720_v9  ;;  %v5419_v57 = vmul.f32 1.4142135, %v5387_v20  ;;  %vm5321_vm9 = vcmp.ge.f32.partialorder %v5289_v16, 0.0 }
 0x1f5   : > { %v5353_v51 = vmul.f32 0.2, %v5289_v16  ;;  %v7105_v31 = vpop.f32.mrf.mxu0  ;;  %v7061_v27 = vpop.f32.mrf.mxu1  ;;  %v4724_v4 = vadd.f32 %v4621_v60, %v8944_v14 }
 0x1f6   : > { %vm5326_vm10 = vcmp.ge.f32.partialorder %v5294_v21, 0.0  ;;  %v5358_v11 = vmul.f32 0.2, %v5294_v21  ;;  %v5292_v32 = vadd.f32 %v9024_v36, %v5218_v42  ;;  %v5221_v17 = vadd.f32 %v7105_v31, %v4723_v56 }
 0x1f7   : > { %v6395_v62 = vpack.c.bf16 %v5419_v57, %v5418_v49  ;;  %v5385_v8 = vsel %vm5321_vm9, %v5289_v16, %v5353_v51  ;;  %v5106_v9 = vpop.f32.mrf.mxu0  ;;  %v4624_v7 = vpop.f32.mrf.mxu1  ;;  %v4727_v49 = vadd.f32 %v7061_v27, %v3973_v35  ;;  %v3975_v31 = vadd.f32 %v8964_v53, %v3588_v5 }
 0x1f8   : > { %v5417_v6 = vmul.f32 1.4142135, %v5385_v8  ;;  %v5356_v25 = vmul.f32 0.2, %v5292_v32  ;;  %v5390_v28 = vsel %vm5326_vm10, %v5294_v21, %v5358_v11  ;;  %vm5324_vm11 = vcmp.ge.f32.partialorder %v5292_v32, 0.0 }
 0x1f9   : > { %6467 = vst [vmem:[%s9051_s12 + $0x8] sm:$0xff] %v6395_v62   ;;  %v5295_v0 = vadd.f32 %v9024_v36, %v5221_v17  ;;  %v5219_v19 = vadd.f32 %v5106_v9, %v4721_v29  ;;  %v7108_v63 = vpop.f32.mrf.mxu0  ;;  %v7064_v1 = vpop.f32.mrf.mxu1  ;;  %v5422_v16 = vmul.f32 1.4142135, %v5390_v28  ;;  %v4725_v46 = vadd.f32 %v4624_v7, %v3971_v55 }
 0x1fa   : > { %v6390_v12 = vpack.c.bf16 %v5417_v6, %v5416_v23  ;;  %v5224_v26 = vadd.f32 %v7108_v63, %v4726_v61  ;;  %v5388_v47 = vsel %vm5324_vm11, %v5292_v32, %v5356_v25  ;;  %v4730_v51 = vadd.f32 %v7064_v1, %v8956_v38 }
 0x1fb   : > { %vm5327_vm12 = vcmp.ge.f32.partialorder %v5295_v0, 0.0  ;;  %v5359_v59 = vmul.f32 0.2, %v5295_v0  ;;  %v5293_v14 = vadd.f32 %v9024_v36, %v5219_v19  ;;  %v5119_v56 = vpop.f32.mrf.mxu0  ;;  %v4637_v21 = vpop.f32.mrf.mxu1  ;;  %v5420_v17 = vmul.f32 1.4142135, %v5388_v47 }
 0x1fc   : > { %6391 = vst [vmem:[%s9051_s12] sm:$0xff] %v6390_v12   ;;  %v5298_v13 = vadd.f32 %v9024_v36, %v5224_v26  ;;  %v5222_v20 = vadd.f32 %v5119_v56, %v4724_v4  ;;  %v4728_v55 = vadd.f32 %v4637_v21, %v8958_v37  ;;  %v3594_v8 = vadd.f32 %v8966_v58, %v8869_v52 }
 0x1fd   : > { %v5391_v34 = vsel %vm5327_vm12, %v5295_v0, %v5359_v59  ;;  %vm5325_vm13 = vcmp.ge.f32.partialorder %v5293_v14, 0.0  ;;  %v5357_v45 = vmul.f32 0.2, %v5293_v14  ;;  %v7109_v22 = vpop.f32.mrf.mxu0  ;;  %v7065_v32 = vpop.f32.mrf.mxu1  ;;  %v3592_v52 = vadd.f32 %v8968_v24, %v8872_v44 }
 0x1fe   : > { %v5423_v42 = vmul.f32 1.4142135, %v5391_v34  ;;  %v5362_v29 = vmul.f32 0.2, %v5298_v13  ;;  %v5296_v57 = vadd.f32 %v9024_v36, %v5222_v20  ;;  %vm5330_vm14 = vcmp.ge.f32.partialorder %v5298_v13, 0.0 }
 0x1ff   : > { %v5389_v61 = vsel %vm5325_vm13, %v5293_v14, %v5357_v45  ;;  %v5225_v60 = vadd.f32 %v7109_v22, %v4727_v49  ;;  %v5122_v11 = vpop.f32.mrf.mxu0  ;;  %v4640_v23 = vpop.f32.mrf.mxu1  ;;  %v4731_v19 = vadd.f32 %v7065_v32, %v3977_v39  ;;  %v3981_v14 = vadd.f32 %v8975_v33, %v3594_v8 }
 0x200   : > { %v6405_v35 = vpack.c.bf16 %v5423_v42, %v5422_v16  ;;  %v5421_v62 = vmul.f32 1.4142135, %v5389_v61  ;;  %v5360_v9 = vmul.f32 0.2, %v5296_v57  ;;  %v5223_v27 = vadd.f32 %v5122_v11, %v4725_v46 }
 0x201   : > { %v5299_v38 = vadd.f32 %v9024_v36, %v5225_v60  ;;  %v7112_v53 = vpop.f32.mrf.mxu0  ;;  %v5394_v25 = vsel %vm5330_vm14, %v5298_v13, %v5362_v29  ;;  %vm5328_vm15 = vcmp.ge.f32.partialorder %v5296_v57, 0.0  ;;  %v4729_v7 = vadd.f32 %v4640_v23, %v3975_v31  ;;  %v9189_v13 = vld [vmem:[#allocation9_spill] sm:$0xff]  ;;  %v9191_v60 = vld [vmem:[#allocation10_spill] sm:$0xff] }
 0x202   : > { %6469 = vst [vmem:[%s9051_s12 + $0x18] sm:$0xff] %v6405_v35   ;;  %v6400_v6 = vpack.c.bf16 %v5421_v62, %v5420_v17  ;;  %v5228_v4 = vadd.f32 %v7112_v53, %v4730_v51  ;;  %v5297_v37 = vadd.f32 %v9024_v36, %v5223_v27  ;;  %v5392_v5 = vsel %vm5328_vm15, %v5296_v57, %v5360_v9  ;;  %v9190_v57 = vld [vmem:[#allocation11_spill] sm:$0xff] }
 0x203   : > { %vm5331_vm0 = vcmp.ge.f32.partialorder %v5299_v38, 0.0  ;;  %v5363_v28 = vmul.f32 0.2, %v5299_v38  ;;  %v5135_v0 = vpop.f32.mrf.mxu0  ;;  %v5426_v56 = vmul.f32 1.4142135, %v5394_v25  ;;  %v3979_v51 = vadd.f32 %v9190_v57, %v3592_v52 }
 0x204   : > { %6468 = vst [vmem:[%s9051_s12 + $0x10] sm:$0xff] %v6400_v6   ;;  %v5302_v58 = vadd.f32 %v9024_v36, %v5228_v4  ;;  %v5226_v63 = vadd.f32 %v5135_v0, %v4728_v55  ;;  %vm5329_vm1 = vcmp.ge.f32.partialorder %v5297_v37, 0.0  ;;  %v5361_v26 = vmul.f32 0.2, %v5297_v37  ;;  %v7068_v39 = vpop.f32.mrf.mxu1 }
 0x205   : > { %v5395_v12 = vsel %vm5331_vm0, %v5299_v38, %v5363_v28  ;;  %v7113_v59 = vpop.f32.mrf.mxu0  ;;  %v4734_v20 = vadd.f32 %v7068_v39, %v9189_v13  ;;  %v5424_v34 = vmul.f32 1.4142135, %v5392_v5 }
 0x206   : > { %v5427_v49 = vmul.f32 1.4142135, %v5395_v12  ;;  %v5300_v1 = vadd.f32 %v9024_v36, %v5226_v63  ;;  %v5393_v16 = vsel %vm5329_vm1, %v5297_v37, %v5361_v26  ;;  %v5366_v44 = vmul.f32 0.2, %v5302_v58  ;;  %v4653_v46 = vpop.f32.mrf.mxu1 }
 0x207   : > { %v5229_v24 = vadd.f32 %v7113_v59, %v4731_v19  ;;  %v5138_v47 = vpop.f32.mrf.mxu0  ;;  %v5425_v22 = vmul.f32 1.4142135, %v5393_v16  ;;  %vm5334_vm2 = vcmp.ge.f32.partialorder %v5302_v58, 0.0  ;;  %v4732_v11 = vadd.f32 %v4653_v46, %v9191_v60 }
 0x208   : > { %v6415_v45 = vpack.c.bf16 %v5427_v49, %v5426_v56  ;;  %vm5332_vm3 = vcmp.ge.f32.partialorder %v5300_v1, 0.0  ;;  %v5364_v33 = vmul.f32 0.2, %v5300_v1  ;;  %v5227_v42 = vadd.f32 %v5138_v47, %v4729_v7  ;;  %v7069_v32 = vpop.f32.mrf.mxu1 }
 0x209   : > { %v5303_v21 = vadd.f32 %v9024_v36, %v5229_v24  ;;  %v7116_v29 = vpop.f32.mrf.mxu0  ;;  %v6410_v31 = vpack.c.bf16 %v5425_v22, %v5424_v34  ;;  %v5398_v17 = vsel %vm5334_vm2, %v5302_v58, %v5366_v44  ;;  %v4735_v27 = vadd.f32 %v7069_v32, %v3981_v14 }
 0x20a   : > { %6471 = vst [vmem:[%s9051_s12 + $0x28] sm:$0xff] %v6415_v45   ;;  %v5232_v61 = vadd.f32 %v7116_v29, %v4734_v20  ;;  %v5301_v62 = vadd.f32 %v9024_v36, %v5227_v42  ;;  %v5396_v8 = vsel %vm5332_vm3, %v5300_v1, %v5364_v33  ;;  %v4656_v53 = vpop.f32.mrf.mxu1  ;;  %v5430_v28 = vmul.f32 1.4142135, %v5398_v17 }
 0x20b   : > { %vm5335_vm4 = vcmp.ge.f32.partialorder %v5303_v21, 0.0  ;;  %v5367_v35 = vmul.f32 0.2, %v5303_v21  ;;  %v5151_v55 = vpop.f32.mrf.mxu0  ;;  %6470 = vst [vmem:[%s9051_s12 + $0x20] sm:$0xff] %v6410_v31   ;;  %v4733_v4 = vadd.f32 %v4656_v53, %v3979_v51  ;;  %v5428_v7 = vmul.f32 1.4142135, %v5396_v8 }
 0x20c   : > { %v5306_v9 = vadd.f32 %v9024_v36, %v5232_v61  ;;  %v5230_v38 = vadd.f32 %v5151_v55, %v4732_v11  ;;  %vm5333_vm5 = vcmp.ge.f32.partialorder %v5301_v62, 0.0  ;;  %v5365_v6 = vmul.f32 0.2, %v5301_v62 }
 0x20d   : > { %v5399_v23 = vsel %vm5335_vm4, %v5303_v21, %v5367_v35  ;;  %v7117_v25 = vpop.f32.mrf.mxu0 }
 0x20e   : > { %v5431_v37 = vmul.f32 1.4142135, %v5399_v23  ;;  %v5304_v0 = vadd.f32 %v9024_v36, %v5230_v38  ;;  %v5397_v19 = vsel %vm5333_vm5, %v5301_v62, %v5365_v6  ;;  %v5370_v52 = vmul.f32 0.2, %v5306_v9 }
 0x20f   : > { %v5233_v58 = vadd.f32 %v7117_v25, %v4735_v27  ;;  %v5154_v63 = vpop.f32.mrf.mxu0  ;;  %v5429_v12 = vmul.f32 1.4142135, %v5397_v19  ;;  %vm5338_vm6 = vcmp.ge.f32.partialorder %v5306_v9, 0.0 }
 0x210   : > { %v6425_v5 = vpack.c.bf16 %v5431_v37, %v5430_v28  ;;  %vm5336_vm7 = vcmp.ge.f32.partialorder %v5304_v0, 0.0  ;;  %v5368_v26 = vmul.f32 0.2, %v5304_v0  ;;  %v5231_v14 = vadd.f32 %v5154_v63, %v4733_v4 }
 0x211   : > { %v5307_v59 = vadd.f32 %v9024_v36, %v5233_v58  ;;  %v6420_v56 = vpack.c.bf16 %v5429_v12, %v5428_v7  ;;  %v5402_v49 = vsel %vm5338_vm6, %v5306_v9, %v5370_v52  ;;  %v7120_v16 = vpop.f32.mrf.mxu0 }
 0x212   : > { %6473 = vst [vmem:[%s9051_s12 + $0x38] sm:$0xff] %v6425_v5   ;;  %v5305_v39 = vadd.f32 %v9024_v36, %v5231_v14  ;;  %v5400_v44 = vsel %vm5336_vm7, %v5304_v0, %v5368_v26  ;;  %v5434_v45 = vmul.f32 1.4142135, %v5402_v49 }
 0x213   : > { %vm5339_vm8 = vcmp.ge.f32.partialorder %v5307_v59, 0.0  ;;  %v5371_v1 = vmul.f32 0.2, %v5307_v59  ;;  %6472 = vst [vmem:[%s9051_s12 + $0x30] sm:$0xff] %v6420_v56   ;;  %v7072_v24 = vpop.f32.mrf.mxu1  ;;  %v5167_v34 = vpop.f32.mrf.mxu0  ;;  %v5432_v29 = vmul.f32 1.4142135, %v5400_v44 }
 0x214   : > { %vm5337_vm9 = vcmp.ge.f32.partialorder %v5305_v39, 0.0  ;;  %v5369_v13 = vmul.f32 0.2, %v5305_v39  ;;  %v4738_v20 = vadd.f32 %v7072_v24, %v8981_v3 }
 0x215   : > { %v5403_v47 = vsel %vm5339_vm8, %v5307_v59, %v5371_v1  ;;  %v4669_v46 = vpop.f32.mrf.mxu1  ;;  %v7121_v3 = vpop.f32.mrf.mxu0 }
 0x216   : > { %v5435_v22 = vmul.f32 1.4142135, %v5403_v47  ;;  %v5401_v33 = vsel %vm5337_vm9, %v5305_v39, %v5369_v13  ;;  %v5236_v21 = vadd.f32 %v7120_v16, %v4738_v20  ;;  %v4736_v42 = vadd.f32 %v4669_v46, %v8984_v2 }
 0x217   : > { %v5433_v51 = vmul.f32 1.4142135, %v5401_v33  ;;  %v7073_v31 = vpop.f32.mrf.mxu1  ;;  %v5170_v9 = vpop.f32.mrf.mxu0 }
 0x218   : > { %v6435_v57 = vpack.c.bf16 %v5435_v22, %v5434_v45  ;;  %v5310_v61 = vadd.f32 %v9024_v36, %v5236_v21  ;;  %v5234_v60 = vadd.f32 %v5167_v34, %v4736_v42  ;;  %v4739_v11 = vadd.f32 %v7073_v31, %v8987_v50 }
 0x219   : > { %v6430_v32 = vpack.c.bf16 %v5433_v51, %v5432_v29  ;;  %v4672_v17 = vpop.f32.mrf.mxu1 }
 0x21a   : > { %6475 = vst [vmem:[%s9051_s12 + $0x48] sm:$0xff] %v6435_v57   ;;  %vm5342_vm10 = vcmp.ge.f32.partialorder %v5310_v61, 0.0  ;;  %v5374_v35 = vmul.f32 0.2, %v5310_v61  ;;  %v5308_v62 = vadd.f32 %v9024_v36, %v5234_v60  ;;  %v5237_v55 = vadd.f32 %v7121_v3, %v4739_v11 }
 0x21b   : > { %6474 = vst [vmem:[%s9051_s12 + $0x40] sm:$0xff] %v6430_v32   ;;  %v4737_v2 = vadd.f32 %v4672_v17, %v8990_v54 }
 0x21c   : > { %v5311_v8 = vadd.f32 %v9024_v36, %v5237_v55  ;;  %v5406_v38 = vsel %vm5342_vm10, %v5310_v61, %v5374_v35  ;;  %v5372_v27 = vmul.f32 0.2, %v5308_v62  ;;  %vm5340_vm11 = vcmp.ge.f32.partialorder %v5308_v62, 0.0 }
 0x21d   : > { %v5235_v53 = vadd.f32 %v5170_v9, %v4737_v2  ;;  %v5438_v6 = vmul.f32 1.4142135, %v5406_v38 }
 0x21e   : > { %vm5343_vm12 = vcmp.ge.f32.partialorder %v5311_v8, 0.0  ;;  %v5375_v50 = vmul.f32 0.2, %v5311_v8  ;;  %v5404_v28 = vsel %vm5340_vm11, %v5308_v62, %v5372_v27 }
 0x21f   : > { %v5309_v23 = vadd.f32 %v9024_v36, %v5235_v53  ;;  %v7124_v4 = vpop.f32.mrf.mxu0  ;;  %v5436_v5 = vmul.f32 1.4142135, %v5404_v28 }
 0x220   : > { %v5407_v25 = vsel %vm5343_vm12, %v5311_v8, %v5375_v50 }
 0x221   : > { %v5439_v37 = vmul.f32 1.4142135, %v5407_v25  ;;  %vm5341_vm13 = vcmp.ge.f32.partialorder %v5309_v23, 0.0  ;;  %v5373_v0 = vmul.f32 0.2, %v5309_v23  ;;  %v7076_v54 = vpop.f32.mrf.mxu1  ;;  %v5183_v52 = vpop.f32.mrf.mxu0 }
 0x222   : > { %v4742_v19 = vadd.f32 %v7076_v54, %v8993_v41 }
 0x223   : > { %v6445_v58 = vpack.c.bf16 %v5439_v37, %v5438_v6  ;;  %v5405_v63 = vsel %vm5341_vm13, %v5309_v23, %v5373_v0  ;;  %v4685_v7 = vpop.f32.mrf.mxu1  ;;  %v7125_v16 = vpop.f32.mrf.mxu0 }
 0x224   : > { %v5437_v12 = vmul.f32 1.4142135, %v5405_v63  ;;  %v5240_v26 = vadd.f32 %v7124_v4, %v4742_v19  ;;  %v4740_v59 = vadd.f32 %v4685_v7, %v8996_v30 }
 0x225   : > { %6477 = vst [vmem:[%s9051_s12 + $0x58] sm:$0xff] %v6445_v58   ;;  %v7077_v14 = vpop.f32.mrf.mxu1  ;;  %v5186_v20 = vpop.f32.mrf.mxu0 }
 0x226   : > { %v6440_v56 = vpack.c.bf16 %v5437_v12, %v5436_v5  ;;  %v5314_v49 = vadd.f32 %v9024_v36, %v5240_v26  ;;  %v5238_v1 = vadd.f32 %v5183_v52, %v4740_v59  ;;  %v4743_v39 = vadd.f32 %v7077_v14, %v8999_v40 }
 0x227   : > { %v4688_v41 = vpop.f32.mrf.mxu1 }
 0x228   : > { %6476 = vst [vmem:[%s9051_s12 + $0x50] sm:$0xff] %v6440_v56   ;;  %vm5346_vm14 = vcmp.ge.f32.partialorder %v5314_v49, 0.0  ;;  %v5378_v44 = vmul.f32 0.2, %v5314_v49  ;;  %v5312_v24 = vadd.f32 %v9024_v36, %v5238_v1  ;;  %v5241_v47 = vadd.f32 %v7125_v16, %v4743_v39 }
 0x229   : > { %v4741_v13 = vadd.f32 %v4688_v41, %v9002_v15 }
 0x22a   : > { %v5315_v30 = vadd.f32 %v9024_v36, %v5241_v47  ;;  %v5410_v34 = vsel %vm5346_vm14, %v5314_v49, %v5378_v44  ;;  %v5376_v45 = vmul.f32 0.2, %v5312_v24  ;;  %vm5344_vm15 = vcmp.ge.f32.partialorder %v5312_v24, 0.0 }
 0x22b   : > { %v5239_v22 = vadd.f32 %v5186_v20, %v4741_v13  ;;  %v5442_v33 = vmul.f32 1.4142135, %v5410_v34 }
 0x22c   : > { %vm5347_vm0 = vcmp.ge.f32.partialorder %v5315_v30, 0.0  ;;  %v5379_v46 = vmul.f32 0.2, %v5315_v30  ;;  %v5408_v29 = vsel %vm5344_vm15, %v5312_v24, %v5376_v45 }
 0x22d   : > { %v5313_v40 = vadd.f32 %v9024_v36, %v5239_v22  ;;  %v7128_v42 = vpop.f32.mrf.mxu0  ;;  %v5440_v32 = vmul.f32 1.4142135, %v5408_v29 }
 0x22e   : > { %v5411_v21 = vsel %vm5347_vm0, %v5315_v30, %v5379_v46 }
 0x22f   : > { %v5443_v57 = vmul.f32 1.4142135, %v5411_v21  ;;  %vm5345_vm1 = vcmp.ge.f32.partialorder %v5313_v40, 0.0  ;;  %v5377_v51 = vmul.f32 0.2, %v5313_v40  ;;  %v7080_v15 = vpop.f32.mrf.mxu1  ;;  %v5199_v61 = vpop.f32.mrf.mxu0 }
 0x230   : > { %v4746_v31 = vadd.f32 %v7080_v15, %v9005_v10 }
 0x231   : > { %v6455_v60 = vpack.c.bf16 %v5443_v57, %v5442_v33  ;;  %v5409_v11 = vsel %vm5345_vm1, %v5313_v40, %v5377_v51  ;;  %v4701_v3 = vpop.f32.mrf.mxu1  ;;  %v7129_v27 = vpop.f32.mrf.mxu0 }
 0x232   : > { %v5441_v17 = vmul.f32 1.4142135, %v5409_v11  ;;  %v5244_v35 = vadd.f32 %v7128_v42, %v4746_v31  ;;  %v4744_v62 = vadd.f32 %v4701_v3, %v9010_v18 }
 0x233   : > { %6479 = vst [vmem:[%s9051_s12 + $0x68] sm:$0xff] %v6455_v60   ;;  %v7081_v55 = vpop.f32.mrf.mxu1  ;;  %v5202_v25 = vpop.f32.mrf.mxu0 }
 0x234   : > { %v6450_v2 = vpack.c.bf16 %v5441_v17, %v5440_v32  ;;  %v5318_v8 = vadd.f32 %v9024_v36, %v5244_v35  ;;  %v5242_v9 = vadd.f32 %v5199_v61, %v4744_v62  ;;  %v4747_v38 = vadd.f32 %v7081_v55, %v9012_v43 }
 0x235   : > { %v4704_v10 = vpop.f32.mrf.mxu1 }
 0x236   : > { %6478 = vst [vmem:[%s9051_s12 + $0x60] sm:$0xff] %v6450_v2   ;;  %vm5350_vm2 = vcmp.ge.f32.partialorder %v5318_v8, 0.0  ;;  %v5382_v53 = vmul.f32 0.2, %v5318_v8  ;;  %v5316_v50 = vadd.f32 %v9024_v36, %v5242_v9  ;;  %v5245_v23 = vadd.f32 %v7129_v27, %v4747_v38 }
 0x237   : > { %v4745_v6 = vadd.f32 %v4704_v10, %v9018_v48 }
 0x238   : > { %v5319_v18 = vadd.f32 %v9024_v36, %v5245_v23  ;;  %v5414_v4 = vsel %vm5350_vm2, %v5318_v8, %v5382_v53  ;;  %v5380_v28 = vmul.f32 0.2, %v5316_v50  ;;  %vm5348_vm3 = vcmp.ge.f32.partialorder %v5316_v50, 0.0 }
 0x239   : > { %v5243_v37 = vadd.f32 %v5202_v25, %v4745_v6  ;;  %v5446_v54 = vmul.f32 1.4142135, %v5414_v4 }
 0x23a   : > { %vm5351_vm4 = vcmp.ge.f32.partialorder %v5319_v18, 0.0  ;;  %v5383_v43 = vmul.f32 0.2, %v5319_v18  ;;  %v5412_v52 = vsel %vm5348_vm3, %v5316_v50, %v5380_v28 }
 0x23b   : > { %v5317_v0 = vadd.f32 %v9024_v36, %v5243_v37  ;;  %v5444_v5 = vmul.f32 1.4142135, %v5412_v52 }
 0x23c   : > { %v5415_v19 = vsel %vm5351_vm4, %v5319_v18, %v5383_v43 }
 0x23d   : > { %v5447_v58 = vmul.f32 1.4142135, %v5415_v19  ;;  %vm5349_vm5 = vcmp.ge.f32.partialorder %v5317_v0, 0.0  ;;  %v5381_v63 = vmul.f32 0.2, %v5317_v0 }
 0x23f   : > { %v6465_v48 = vpack.c.bf16 %v5447_v58, %v5446_v54  ;;  %v5413_v7 = vsel %vm5349_vm5, %v5317_v0, %v5381_v63 }
 0x240   : > { %v5445_v12 = vmul.f32 1.4142135, %v5413_v7 }
 0x241   : > { %6481 = vst [vmem:[%s9051_s12 + $0x78] sm:$0xff] %v6465_v48  }
 0x242   : > { %v6460_v26 = vpack.c.bf16 %v5445_v12, %v5444_v5 }
 0x244   : > { %6480 = vst [vmem:[%s9051_s12 + $0x70] sm:$0xff] %v6460_v26  }
 0x245 PF: > { %s13_s14 = sadd.s32 1, %s7313_s14   ;;  %s9192_s12 = smov %s7309_s13 }
 0x246   : > { %p10_p5 = scmp.ge.s32.totalorder %s13_s14, 4   ;;  %s9193_s13 = smov %s9195_s15 }
 0x248   :  { %12 = sbr.rel (!%p10_p5) target bundleno = 2 (0x2), region = 86 }

</bundles_post_ra>
